<compile_context>
chip_gen: v5e
topology: v5e:2x2
jax: 0.10.0
libtpu: 0.0.40
codegen_flags: <defaults>
</compile_context>

<pallas_src>
import functools

import jax
import jax.numpy as jnp
from jax import lax
from jax.experimental import pallas as pl
from jax.experimental.pallas import tpu as pltpu


# ----------------------------------------------------------------------------
# Pallas kernels
# ----------------------------------------------------------------------------
def _encoder_kernel(x_ref, w1_ref, bias1_ref, w2_ref, bias2_ref,
                    prow_ref, rmat_ref, pool_ref, a1_ref,
                    *, D, H, W, Cin, C1, C2):
    """Fused encoder for one sample: conv1+ReLU -> conv2+ReLU -> (H,W) avg-pool.

    x_ref    : (D+2, H+2, (W+2)*Cin)        bf16  zero-padded input sample
    w1_ref   : (3, 3, (W+2)*Cin, (W+2)*C1)  bf16  banded conv1 weights (W-halo out)
    bias1_ref: (1, (W+2)*C1)                f32   conv1 bias (zero on W-halo lanes)
    w2_ref   : (3, 3, (W+2)*C1, W*C2)       bf16  banded conv2 weights
    bias2_ref: (1, W*C2)                    f32
    prow_ref : (D, D*H)                     f32   per-depth row-mean (1/H) matrix
    rmat_ref : (W*C2, C2)                   f32   per-channel W-mean (1/W) matrix
    pool_ref : (D, C2)                      f32   pooled output for this sample
    a1_ref   : (D+2, H+2, (W+2)*C1)         bf16  VMEM halo buffer for act1
    """
    M = D * H                  # depth-stacked matmul M dimension (128 here)
    Kp1 = (W + 2) * Cin        # conv1 contraction width
    Np1 = (W + 2) * C1         # conv1 output width (W halo included)
    Np2 = W * C2               # conv2 output width

    # ---------------- conv1: 3x3x3 'same' conv + bias + ReLU -----------------
    # kw taps + Cin contraction live inside the banded weight; kd/kh are a
    # fully unrolled in-body loop; the accumulator is a plain f32 value.
    acc1 = jnp.zeros((M, Np1), jnp.float32)
    for kd in range(3):
        for kh in range(3):
            lhs = x_ref[kd:kd + D, kh:kh + H, :].reshape(M, Kp1)
            acc1 = acc1 + jnp.dot(lhs, w1_ref[kd, kh],
                                  preferred_element_type=jnp.float32)
    act1 = jnp.maximum(acc1 + bias1_ref[...], 0.0).astype(a1_ref.dtype)

    # Stage act1 into the zero-padded VMEM halo buffer (never touches HBM).
    # The W halo lanes of act1 are already exact zeros (zero band columns,
    # zero bias, ReLU(0)=0); only depth/H borders need explicit zeroing.
    a1_ref[...] = jnp.zeros_like(a1_ref)
    for d in range(D):
        a1_ref[d + 1, 1:H + 1, :] = act1[d * H:(d + 1) * H, :]

    # ---------------- conv2: 3x3x3 'same' conv + bias + ReLU -----------------
    acc2 = jnp.zeros((M, Np2), jnp.float32)
    for kd in range(3):
        for kh in range(3):
            lhs = a1_ref[kd:kd + D, kh:kh + H, :].reshape(M, Np1)
            acc2 = acc2 + jnp.dot(lhs, w2_ref[kd, kh],
                                  preferred_element_type=jnp.float32)
    act2 = jnp.maximum(acc2 + bias2_ref[...], 0.0)          # (D*H, W*C2) f32

    # -------- fused AdaptiveAvgPool3d((None,1,1)): mean over (H, W) ----------
    per_d = jnp.dot(prow_ref[...], act2, preferred_element_type=jnp.float32)
    pool_ref[...] = jnp.dot(per_d, rmat_ref[...],
                            preferred_element_type=jnp.float32)


def _fc_kernel(x_ref, w1_ref, b1_ref, w2_ref, b2_ref, o_ref):
    """FullyConnected head: Linear -> ReLU -> Linear, whole batch in one block."""
    h = jnp.dot(x_ref[...], w1_ref[...], preferred_element_type=jnp.float32)
    h = jnp.maximum(h + b1_ref[...], 0.0)
    o = jnp.dot(h, w2_ref[...], preferred_element_type=jnp.float32) + b2_ref[...]
    o_ref[...] = o.astype(o_ref.dtype)


# ----------------------------------------------------------------------------
# Weight preprocessing (tiny, done in plain JAX at trace time)
# ----------------------------------------------------------------------------
def _band_weights(w, W, pad_out=False):
    """PyTorch OIDHW (Cout,Cin,3,3,3) -> (3, 3, (W+2)*Cin, [W or W+2]*Cout) band.

    band[kd, kh, wi*Cin+ci, wo*Cout+co] = w[co, ci, kd, kh, wi-wo] (0 elsewhere),
    so  x_pad[kd:kd+D, kh:kh+H] @ band[kd, kh]  performs all three kw taps and
    the Cin contraction of one (kd, kh) plane in a single lane-dense MXU matmul.
    With pad_out=True the output columns carry the W halo (zeros at w=0, W+1),
    i.e. the result is already 'same'-padded along W for the next conv.
    """
    Wp = W + 2
    Cin, Cout = w.shape[1], w.shape[0]
    wt = jnp.transpose(w, (2, 3, 4, 1, 0))                        # (kd,kh,kw,Cin,Cout)
    sel = (jnp.arange(Wp)[None, :, None] ==
           (jnp.arange(W)[None, None, :] + jnp.arange(3)[:, None, None]))
    sel = sel.astype(w.dtype)                                     # (kw, wi, wo)
    band = jnp.einsum("kpq,dhkio->dhpiqo", sel, wt)               # exact copies of w
    band = band.reshape(3, 3, Wp * Cin, W * Cout)
    if pad_out:
        band = jnp.pad(band, ((0, 0), (0, 0), (0, 0), (Cout, Cout)))
    return band


# ----------------------------------------------------------------------------
# Wrappers
# ----------------------------------------------------------------------------
def encoder_pool(x_cl, w1, b1, w2, b2):
    """Fused 2-block 3x3x3 conv+ReLU encoder with fused (H, W) average pool.

    x_cl: (N, D, H, W, Cin) channels-last; w*: PyTorch OIDHW; b*: (C*,)
    returns pooled (N, D, C2) f32 == mean over (H, W) of the conv2 activation.
    """
    N, D, H, W, Cin = x_cl.shape
    C1, C2 = w1.shape[0], w2.shape[0]
    Wp = W + 2

    # single cheap zero-pad pass for the halo, then merge (W, Cin) into lanes
    xp = jnp.pad(x_cl.astype(jnp.bfloat16),
                 ((0, 0), (1, 1), (1, 1), (1, 1), (0, 0)))
    xp = xp.reshape(N, D + 2, H + 2, Wp * Cin)

    band1 = _band_weights(w1, W, pad_out=True).astype(jnp.bfloat16)   # (3,3,Wp*Cin,Wp*C1)
    band2 = _band_weights(w2, W).astype(jnp.bfloat16)                 # (3,3,Wp*C1,W*C2)
    bias1 = jnp.pad(jnp.tile(b1.astype(jnp.float32), (W,)),
                    (C1, C1)).reshape(1, Wp * C1)
    bias2 = jnp.tile(b2.astype(jnp.float32), (W,)).reshape(1, W * C2)
    prow = jnp.kron(jnp.eye(D, dtype=jnp.float32),
                    jnp.ones((1, H), jnp.float32)) / float(H)         # (D, D*H)
    rmat = jnp.tile(jnp.eye(C2, dtype=jnp.float32), (W, 1)) / float(W)  # (W*C2, C2)

    # VMEM budget derived from actual resident tiles (+ headroom for the f32
    # accumulators / temporaries), clamped to the default scoped limit.
    blk_in_bytes = ((D + 2) * (H + 2) * (Wp * Cin) * 2
                    + band1.size * 2 + band2.size * 2
                    + bias1.size * 4 + bias2.size * 4
                    + prow.size * 4 + rmat.size * 4)
    blk_out_bytes = D * C2 * 4
    scratch_bytes = (D + 2) * (H + 2) * (Wp * C1) * 2
    vmem_limit = int(min(32 * 1024 * 1024,
                         2 * (blk_in_bytes + blk_out_bytes) + scratch_bytes
                         + 8 * 1024 * 1024))

    kernel = functools.partial(_encoder_kernel,
                               D=D, H=H, W=W, Cin=Cin, C1=C1, C2=C2)
    pooled = pl.pallas_call(
        kernel,
        out_shape=jax.ShapeDtypeStruct((N, D, C2), jnp.float32),
        grid=(N,),
        in_specs=[
            pl.BlockSpec((None, D + 2, H + 2, Wp * Cin),
                         lambda n: (n, 0, 0, 0)),
            pl.BlockSpec((3, 3, Wp * Cin, Wp * C1), lambda n: (0, 0, 0, 0)),
            pl.BlockSpec((1, Wp * C1), lambda n: (0, 0)),
            pl.BlockSpec((3, 3, Wp * C1, W * C2), lambda n: (0, 0, 0, 0)),
            pl.BlockSpec((1, W * C2), lambda n: (0, 0)),
            pl.BlockSpec((D, D * H), lambda n: (0, 0)),
            pl.BlockSpec((W * C2, C2), lambda n: (0, 0)),
        ],
        out_specs=pl.BlockSpec((None, D, C2), lambda n: (n, 0, 0)),
        scratch_shapes=[pltpu.VMEM((D + 2, H + 2, Wp * C1), jnp.bfloat16)],
        compiler_params=pltpu.CompilerParams(
            dimension_semantics=("parallel",),
            vmem_limit_bytes=vmem_limit),
    )(xp, band1, bias1, band2, bias2, prow, rmat)
    return pooled


def fully_connected(feat, w1, b1, w2, b2):
    """Fused Linear-ReLU-Linear head; whole batch as one block (no grid)."""
    N, _ = feat.shape
    Hd = w1.shape[1]
    O = w2.shape[1]
    return pl.pallas_call(
        _fc_kernel,
        out_shape=jax.ShapeDtypeStruct((N, O), jnp.float32),
    )(feat, w1, b1.reshape(1, Hd), w2, b2.reshape(1, O))


# ----------------------------------------------------------------------------
# MatchingModel forward
# ----------------------------------------------------------------------------
def matching_model_forward(x, params, batch_size):
    # one-time layout conversion: PyTorch NCDHW -> channels-last NDHWC
    x_cl = jnp.transpose(x, (0, 2, 3, 4, 1))
    # encoder (UNet3D-style: two 3x3x3 conv + ReLU blocks) fused with
    # AdaptiveAvgPool3d((None,1,1)); activations never round-trip HBM.
    pooled = encoder_pool(x_cl, params["enc_w1"], params["enc_b1"],
                          params["enc_w2"], params["enc_b2"])     # (N, D, C2) f32

    N, D, C2 = pooled.shape
    feat = pooled.reshape(N, D * C2)                  # free reshape, (d, c) order
    Hd = params["fc_w1"].shape[1]
    # permute FC1 rows from PyTorch flatten order (c*D + d) to kernel (d*C2 + c)
    w1p = (params["fc_w1"].reshape(C2, D, Hd)
           .transpose(1, 0, 2).reshape(D * C2, Hd))
    out = fully_connected(feat, w1p, params["fc_b1"],
                          params["fc_w2"], params["fc_b2"])
    # out.view(batch_size, 3, -1)
    return out.reshape(batch_size, 3, -1)


def _reference_forward(x, p, batch_size):
    """Plain-XLA reference mirroring the kernel's bf16/f32 precision choices."""
    dn = ("NCDHW", "OIDHW", "NCDHW")
    h = lax.conv_general_dilated(
        x.astype(jnp.bfloat16), p["enc_w1"].astype(jnp.bfloat16),
        (1, 1, 1), [(1, 1)] * 3, dimension_numbers=dn,
        preferred_element_type=jnp.float32)
    h = jnp.maximum(h + p["enc_b1"][None, :, None, None, None], 0.0)
    h = lax.conv_general_dilated(
        h.astype(jnp.bfloat16), p["enc_w2"].astype(jnp.bfloat16),
        (1, 1, 1), [(1, 1)] * 3, dimension_numbers=dn,
        preferred_element_type=jnp.float32)
    h = jnp.maximum(h + p["enc_b2"][None, :, None, None, None], 0.0)
    h = jnp.mean(h, axis=(3, 4)).reshape(h.shape[0], -1)    # (N, C*D), c-major
    h = jnp.maximum(h @ p["fc_w1"] + p["fc_b1"], 0.0)
    h = h @ p["fc_w2"] + p["fc_b2"]
    return h.reshape(batch_size, 3, -1)


if __name__ == "__main__":
    # small, forward-consistent shapes
    N, Cin, D, H, W = 2, 1, 8, 16, 16        # input volume (NCDHW)
    C1, C2 = 8, 16                            # encoder channels
    input_size = C2 * D                       # = 128 (after pool over H,W + flatten)
    hidden_size = 32
    out_size = 3                              # include_top head -> view(batch, 3, -1)

    key = jax.random.PRNGKey(0)
    ks = jax.random.split(key, 9)
    params = {
        "enc_w1": 0.1 * jax.random.normal(ks[0], (C1, Cin, 3, 3, 3), jnp.float32),
        "enc_b1": 0.1 * jax.random.normal(ks[1], (C1,), jnp.float32),
        "enc_w2": 0.1 * jax.random.normal(ks[2], (C2, C1, 3, 3, 3), jnp.float32),
        "enc_b2": 0.1 * jax.random.normal(ks[3], (C2,), jnp.float32),
        "fc_w1": 0.1 * jax.random.normal(ks[4], (input_size, hidden_size), jnp.float32),
        "fc_b1": 0.1 * jax.random.normal(ks[5], (hidden_size,), jnp.float32),
        "fc_w2": 0.1 * jax.random.normal(ks[6], (hidden_size, out_size), jnp.float32),
        "fc_b2": 0.1 * jax.random.normal(ks[7], (out_size,), jnp.float32),
    }
    x = jax.random.normal(ks[8], (N, Cin, D, H, W), jnp.float32)

    fwd = jax.jit(lambda xx: matching_model_forward(xx, params, N))
    out = jax.block_until_ready(fwd(x))
    assert out.shape == (N, 3, 1), out.shape

    ref = _reference_forward(x, params, N)
    assert jnp.allclose(out, ref, atol=1e-2, rtol=1e-2), (out, ref)

    print("KERNEL_OK")
</pallas_src>

<mosaic_0001>
module attributes {stable_mosaic.version = 11 : i64} {
  func.func @_encoder_kernel(%arg0: i32, %arg1: memref<1x10x18x18xbf16, #tpu.memory_space<vmem>>, %arg2: memref<3x3x18x144xbf16, #tpu.memory_space<vmem>>, %arg3: memref<1x144xf32, #tpu.memory_space<vmem>>, %arg4: memref<3x3x144x256xbf16, #tpu.memory_space<vmem>>, %arg5: memref<1x256xf32, #tpu.memory_space<vmem>>, %arg6: memref<8x128xf32, #tpu.memory_space<vmem>>, %arg7: memref<256x16xf32, #tpu.memory_space<vmem>>, %arg8: memref<1x8x16xf32, #tpu.memory_space<vmem>>, %arg9: memref<10x18x144xbf16, #tpu.memory_space<vmem>>) attributes {dimension_semantics = [#tpu.dimension_semantics<parallel>], iteration_bounds = array<i64: 2>, scalar_prefetch = 0 : i64, scratch_operands = 1 : i64, tpu.core_type = #tpu.core_type<tc>, window_params = [{transform_indices = @transform_0, window_bounds = array<i64: 1, 10, 18, 18>}, {pipeline_mode = #tpu.pipeline_mode<synchronous>, transform_indices = @transform_1, window_bounds = array<i64: 3, 3, 18, 144>}, {pipeline_mode = #tpu.pipeline_mode<synchronous>, transform_indices = @transform_2, window_bounds = array<i64: 1, 144>}, {pipeline_mode = #tpu.pipeline_mode<synchronous>, transform_indices = @transform_3, window_bounds = array<i64: 3, 3, 144, 256>}, {pipeline_mode = #tpu.pipeline_mode<synchronous>, transform_indices = @transform_4, window_bounds = array<i64: 1, 256>}, {pipeline_mode = #tpu.pipeline_mode<synchronous>, transform_indices = @transform_5, window_bounds = array<i64: 8, 128>}, {pipeline_mode = #tpu.pipeline_mode<synchronous>, transform_indices = @transform_6, window_bounds = array<i64: 256, 16>}, {transform_indices = @transform_7, window_bounds = array<i64: 1, 8, 16>}]} {
    %cst = arith.constant 0.000000e+00 : f32
    %0 = vector.broadcast %cst : f32 to vector<128x144xf32>
    %c0 = arith.constant 0 : index
    %c0_0 = arith.constant 0 : index
    %c0_1 = arith.constant 0 : index
    %c0_2 = arith.constant 0 : index
    %1 = vector.load %arg1[%c0, %c0_0, %c0_1, %c0_2] : memref<1x10x18x18xbf16, #tpu.memory_space<vmem>>, vector<1x8x16x18xbf16>
    %2 = vector.shape_cast %1 : vector<1x8x16x18xbf16> to vector<8x16x18xbf16>
    %3 = vector.shape_cast %2 : vector<8x16x18xbf16> to vector<128x18xbf16>
    %c0_3 = arith.constant 0 : index
    %c0_4 = arith.constant 0 : index
    %c0_5 = arith.constant 0 : index
    %c0_6 = arith.constant 0 : index
    %4 = vector.load %arg2[%c0_3, %c0_4, %c0_5, %c0_6] : memref<3x3x18x144xbf16, #tpu.memory_space<vmem>>, vector<1x1x18x144xbf16>
    %5 = vector.shape_cast %4 : vector<1x1x18x144xbf16> to vector<18x144xbf16>
    %cst_7 = arith.constant dense<0.000000e+00> : vector<128x144xf32>
    %6 = tpu.matmul %3, %5, %cst_7 {dimension_numbers = #tpu.dot_dimension_numbers<[1], [0], [0], [1], [0, 0, 1, 1], [], []>} : vector<128x18xbf16>, vector<18x144xbf16>, vector<128x144xf32> -> vector<128x144xf32>
    %7 = arith.addf %0, %6 : vector<128x144xf32>
    %c0_8 = arith.constant 0 : index
    %c0_9 = arith.constant 0 : index
    %c1 = arith.constant 1 : index
    %c0_10 = arith.constant 0 : index
    %8 = vector.load %arg1[%c0_8, %c0_9, %c1, %c0_10] : memref<1x10x18x18xbf16, #tpu.memory_space<vmem>>, vector<1x8x16x18xbf16>
    %9 = vector.shape_cast %8 : vector<1x8x16x18xbf16> to vector<8x16x18xbf16>
    %10 = vector.shape_cast %9 : vector<8x16x18xbf16> to vector<128x18xbf16>
    %c0_11 = arith.constant 0 : index
    %c1_12 = arith.constant 1 : index
    %c0_13 = arith.constant 0 : index
    %c0_14 = arith.constant 0 : index
    %11 = vector.load %arg2[%c0_11, %c1_12, %c0_13, %c0_14] : memref<3x3x18x144xbf16, #tpu.memory_space<vmem>>, vector<1x1x18x144xbf16>
    %12 = vector.shape_cast %11 : vector<1x1x18x144xbf16> to vector<18x144xbf16>
    %cst_15 = arith.constant dense<0.000000e+00> : vector<128x144xf32>
    %13 = tpu.matmul %10, %12, %cst_15 {dimension_numbers = #tpu.dot_dimension_numbers<[1], [0], [0], [1], [0, 0, 1, 1], [], []>} : vector<128x18xbf16>, vector<18x144xbf16>, vector<128x144xf32> -> vector<128x144xf32>
    %14 = arith.addf %7, %13 : vector<128x144xf32>
    %c0_16 = arith.constant 0 : index
    %c0_17 = arith.constant 0 : index
    %c2 = arith.constant 2 : index
    %c0_18 = arith.constant 0 : index
    %15 = vector.load %arg1[%c0_16, %c0_17, %c2, %c0_18] : memref<1x10x18x18xbf16, #tpu.memory_space<vmem>>, vector<1x8x16x18xbf16>
    %16 = vector.shape_cast %15 : vector<1x8x16x18xbf16> to vector<8x16x18xbf16>
    %17 = vector.shape_cast %16 : vector<8x16x18xbf16> to vector<128x18xbf16>
    %c0_19 = arith.constant 0 : index
    %c2_20 = arith.constant 2 : index
    %c0_21 = arith.constant 0 : index
    %c0_22 = arith.constant 0 : index
    %18 = vector.load %arg2[%c0_19, %c2_20, %c0_21, %c0_22] : memref<3x3x18x144xbf16, #tpu.memory_space<vmem>>, vector<1x1x18x144xbf16>
    %19 = vector.shape_cast %18 : vector<1x1x18x144xbf16> to vector<18x144xbf16>
    %cst_23 = arith.constant dense<0.000000e+00> : vector<128x144xf32>
    %20 = tpu.matmul %17, %19, %cst_23 {dimension_numbers = #tpu.dot_dimension_numbers<[1], [0], [0], [1], [0, 0, 1, 1], [], []>} : vector<128x18xbf16>, vector<18x144xbf16>, vector<128x144xf32> -> vector<128x144xf32>
    %21 = arith.addf %14, %20 : vector<128x144xf32>
    %c0_24 = arith.constant 0 : index
    %c1_25 = arith.constant 1 : index
    %c0_26 = arith.constant 0 : index
    %c0_27 = arith.constant 0 : index
    %22 = vector.load %arg1[%c0_24, %c1_25, %c0_26, %c0_27] : memref<1x10x18x18xbf16, #tpu.memory_space<vmem>>, vector<1x8x16x18xbf16>
    %23 = vector.shape_cast %22 : vector<1x8x16x18xbf16> to vector<8x16x18xbf16>
    %24 = vector.shape_cast %23 : vector<8x16x18xbf16> to vector<128x18xbf16>
    %c1_28 = arith.constant 1 : index
    %c0_29 = arith.constant 0 : index
    %c0_30 = arith.constant 0 : index
    %c0_31 = arith.constant 0 : index
    %25 = vector.load %arg2[%c1_28, %c0_29, %c0_30, %c0_31] : memref<3x3x18x144xbf16, #tpu.memory_space<vmem>>, vector<1x1x18x144xbf16>
    %26 = vector.shape_cast %25 : vector<1x1x18x144xbf16> to vector<18x144xbf16>
    %cst_32 = arith.constant dense<0.000000e+00> : vector<128x144xf32>
    %27 = tpu.matmul %24, %26, %cst_32 {dimension_numbers = #tpu.dot_dimension_numbers<[1], [0], [0], [1], [0, 0, 1, 1], [], []>} : vector<128x18xbf16>, vector<18x144xbf16>, vector<128x144xf32> -> vector<128x144xf32>
    %28 = arith.addf %21, %27 : vector<128x144xf32>
    %c0_33 = arith.constant 0 : index
    %c1_34 = arith.constant 1 : index
    %c1_35 = arith.constant 1 : index
    %c0_36 = arith.constant 0 : index
    %29 = vector.load %arg1[%c0_33, %c1_34, %c1_35, %c0_36] : memref<1x10x18x18xbf16, #tpu.memory_space<vmem>>, vector<1x8x16x18xbf16>
    %30 = vector.shape_cast %29 : vector<1x8x16x18xbf16> to vector<8x16x18xbf16>
    %31 = vector.shape_cast %30 : vector<8x16x18xbf16> to vector<128x18xbf16>
    %c1_37 = arith.constant 1 : index
    %c1_38 = arith.constant 1 : index
    %c0_39 = arith.constant 0 : index
    %c0_40 = arith.constant 0 : index
    %32 = vector.load %arg2[%c1_37, %c1_38, %c0_39, %c0_40] : memref<3x3x18x144xbf16, #tpu.memory_space<vmem>>, vector<1x1x18x144xbf16>
    %33 = vector.shape_cast %32 : vector<1x1x18x144xbf16> to vector<18x144xbf16>
    %cst_41 = arith.constant dense<0.000000e+00> : vector<128x144xf32>
    %34 = tpu.matmul %31, %33, %cst_41 {dimension_numbers = #tpu.dot_dimension_numbers<[1], [0], [0], [1], [0, 0, 1, 1], [], []>} : vector<128x18xbf16>, vector<18x144xbf16>, vector<128x144xf32> -> vector<128x144xf32>
    %35 = arith.addf %28, %34 : vector<128x144xf32>
    %c0_42 = arith.constant 0 : index
    %c1_43 = arith.constant 1 : index
    %c2_44 = arith.constant 2 : index
    %c0_45 = arith.constant 0 : index
    %36 = vector.load %arg1[%c0_42, %c1_43, %c2_44, %c0_45] : memref<1x10x18x18xbf16, #tpu.memory_space<vmem>>, vector<1x8x16x18xbf16>
    %37 = vector.shape_cast %36 : vector<1x8x16x18xbf16> to vector<8x16x18xbf16>
    %38 = vector.shape_cast %37 : vector<8x16x18xbf16> to vector<128x18xbf16>
    %c1_46 = arith.constant 1 : index
    %c2_47 = arith.constant 2 : index
    %c0_48 = arith.constant 0 : index
    %c0_49 = arith.constant 0 : index
    %39 = vector.load %arg2[%c1_46, %c2_47, %c0_48, %c0_49] : memref<3x3x18x144xbf16, #tpu.memory_space<vmem>>, vector<1x1x18x144xbf16>
    %40 = vector.shape_cast %39 : vector<1x1x18x144xbf16> to vector<18x144xbf16>
    %cst_50 = arith.constant dense<0.000000e+00> : vector<128x144xf32>
    %41 = tpu.matmul %38, %40, %cst_50 {dimension_numbers = #tpu.dot_dimension_numbers<[1], [0], [0], [1], [0, 0, 1, 1], [], []>} : vector<128x18xbf16>, vector<18x144xbf16>, vector<128x144xf32> -> vector<128x144xf32>
    %42 = arith.addf %35, %41 : vector<128x144xf32>
    %c0_51 = arith.constant 0 : index
    %c2_52 = arith.constant 2 : index
    %c0_53 = arith.constant 0 : index
    %c0_54 = arith.constant 0 : index
    %43 = vector.load %arg1[%c0_51, %c2_52, %c0_53, %c0_54] : memref<1x10x18x18xbf16, #tpu.memory_space<vmem>>, vector<1x8x16x18xbf16>
    %44 = vector.shape_cast %43 : vector<1x8x16x18xbf16> to vector<8x16x18xbf16>
    %45 = vector.shape_cast %44 : vector<8x16x18xbf16> to vector<128x18xbf16>
    %c2_55 = arith.constant 2 : index
    %c0_56 = arith.constant 0 : index
    %c0_57 = arith.constant 0 : index
    %c0_58 = arith.constant 0 : index
    %46 = vector.load %arg2[%c2_55, %c0_56, %c0_57, %c0_58] : memref<3x3x18x144xbf16, #tpu.memory_space<vmem>>, vector<1x1x18x144xbf16>
    %47 = vector.shape_cast %46 : vector<1x1x18x144xbf16> to vector<18x144xbf16>
    %cst_59 = arith.constant dense<0.000000e+00> : vector<128x144xf32>
    %48 = tpu.matmul %45, %47, %cst_59 {dimension_numbers = #tpu.dot_dimension_numbers<[1], [0], [0], [1], [0, 0, 1, 1], [], []>} : vector<128x18xbf16>, vector<18x144xbf16>, vector<128x144xf32> -> vector<128x144xf32>
    %49 = arith.addf %42, %48 : vector<128x144xf32>
    %c0_60 = arith.constant 0 : index
    %c2_61 = arith.constant 2 : index
    %c1_62 = arith.constant 1 : index
    %c0_63 = arith.constant 0 : index
    %50 = vector.load %arg1[%c0_60, %c2_61, %c1_62, %c0_63] : memref<1x10x18x18xbf16, #tpu.memory_space<vmem>>, vector<1x8x16x18xbf16>
    %51 = vector.shape_cast %50 : vector<1x8x16x18xbf16> to vector<8x16x18xbf16>
    %52 = vector.shape_cast %51 : vector<8x16x18xbf16> to vector<128x18xbf16>
    %c2_64 = arith.constant 2 : index
    %c1_65 = arith.constant 1 : index
    %c0_66 = arith.constant 0 : index
    %c0_67 = arith.constant 0 : index
    %53 = vector.load %arg2[%c2_64, %c1_65, %c0_66, %c0_67] : memref<3x3x18x144xbf16, #tpu.memory_space<vmem>>, vector<1x1x18x144xbf16>
    %54 = vector.shape_cast %53 : vector<1x1x18x144xbf16> to vector<18x144xbf16>
    %cst_68 = arith.constant dense<0.000000e+00> : vector<128x144xf32>
    %55 = tpu.matmul %52, %54, %cst_68 {dimension_numbers = #tpu.dot_dimension_numbers<[1], [0], [0], [1], [0, 0, 1, 1], [], []>} : vector<128x18xbf16>, vector<18x144xbf16>, vector<128x144xf32> -> vector<128x144xf32>
    %56 = arith.addf %49, %55 : vector<128x144xf32>
    %c0_69 = arith.constant 0 : index
    %c2_70 = arith.constant 2 : index
    %c2_71 = arith.constant 2 : index
    %c0_72 = arith.constant 0 : index
    %57 = vector.load %arg1[%c0_69, %c2_70, %c2_71, %c0_72] : memref<1x10x18x18xbf16, #tpu.memory_space<vmem>>, vector<1x8x16x18xbf16>
    %58 = vector.shape_cast %57 : vector<1x8x16x18xbf16> to vector<8x16x18xbf16>
    %59 = vector.shape_cast %58 : vector<8x16x18xbf16> to vector<128x18xbf16>
    %c2_73 = arith.constant 2 : index
    %c2_74 = arith.constant 2 : index
    %c0_75 = arith.constant 0 : index
    %c0_76 = arith.constant 0 : index
    %60 = vector.load %arg2[%c2_73, %c2_74, %c0_75, %c0_76] : memref<3x3x18x144xbf16, #tpu.memory_space<vmem>>, vector<1x1x18x144xbf16>
    %61 = vector.shape_cast %60 : vector<1x1x18x144xbf16> to vector<18x144xbf16>
    %cst_77 = arith.constant dense<0.000000e+00> : vector<128x144xf32>
    %62 = tpu.matmul %59, %61, %cst_77 {dimension_numbers = #tpu.dot_dimension_numbers<[1], [0], [0], [1], [0, 0, 1, 1], [], []>} : vector<128x18xbf16>, vector<18x144xbf16>, vector<128x144xf32> -> vector<128x144xf32>
    %63 = arith.addf %56, %62 : vector<128x144xf32>
    %c0_78 = arith.constant 0 : index
    %c0_79 = arith.constant 0 : index
    %64 = vector.load %arg3[%c0_78, %c0_79] : memref<1x144xf32, #tpu.memory_space<vmem>>, vector<1x144xf32>
    %65 = vector.broadcast %64 : vector<1x144xf32> to vector<128x144xf32>
    %66 = arith.addf %63, %65 : vector<128x144xf32>
    %cst_80 = arith.constant 0.000000e+00 : f32
    %67 = vector.broadcast %cst_80 : f32 to vector<128x144xf32>
    %68 = arith.maximumf %66, %67 : vector<128x144xf32>
    %69 = arith.truncf %68 : vector<128x144xf32> to vector<128x144xbf16>
    %cst_81 = arith.constant 0.000000e+00 : bf16
    %70 = vector.broadcast %cst_81 : bf16 to vector<10x18x144xbf16>
    %c0_82 = arith.constant 0 : index
    %c0_83 = arith.constant 0 : index
    %c0_84 = arith.constant 0 : index
    %71 = vector.load %arg9[%c0_82, %c0_83, %c0_84] : memref<10x18x144xbf16, #tpu.memory_space<vmem>>, vector<10x18x144xbf16>
    tpu.vector_store %arg9[%c0_82, %c0_83, %c0_84], %70 {strides = array<i32>} : memref<10x18x144xbf16, #tpu.memory_space<vmem>>, vector<10x18x144xbf16>,
    %72 = vector.extract_strided_slice %69 {offsets = [0, 0], sizes = [16, 144], strides = [1, 1]} : vector<128x144xbf16> to vector<16x144xbf16>
    %c1_85 = arith.constant 1 : index
    %c1_86 = arith.constant 1 : index
    %c0_87 = arith.constant 0 : index
    %73 = vector.load %arg9[%c1_85, %c1_86, %c0_87] : memref<10x18x144xbf16, #tpu.memory_space<vmem>>, vector<1x16x144xbf16>
    %74 = vector.shape_cast %73 : vector<1x16x144xbf16> to vector<16x144xbf16>
    %75 = vector.shape_cast %72 : vector<16x144xbf16> to vector<1x16x144xbf16>
    tpu.vector_store %arg9[%c1_85, %c1_86, %c0_87], %75 {strides = array<i32>} : memref<10x18x144xbf16, #tpu.memory_space<vmem>>, vector<1x16x144xbf16>,
    %76 = vector.extract_strided_slice %69 {offsets = [16, 0], sizes = [16, 144], strides = [1, 1]} : vector<128x144xbf16> to vector<16x144xbf16>
    %c2_88 = arith.constant 2 : index
    %c1_89 = arith.constant 1 : index
    %c0_90 = arith.constant 0 : index
    %77 = vector.load %arg9[%c2_88, %c1_89, %c0_90] : memref<10x18x144xbf16, #tpu.memory_space<vmem>>, vector<1x16x144xbf16>
    %78 = vector.shape_cast %77 : vector<1x16x144xbf16> to vector<16x144xbf16>
    %79 = vector.shape_cast %76 : vector<16x144xbf16> to vector<1x16x144xbf16>
    tpu.vector_store %arg9[%c2_88, %c1_89, %c0_90], %79 {strides = array<i32>} : memref<10x18x144xbf16, #tpu.memory_space<vmem>>, vector<1x16x144xbf16>,
    %80 = vector.extract_strided_slice %69 {offsets = [32, 0], sizes = [16, 144], strides = [1, 1]} : vector<128x144xbf16> to vector<16x144xbf16>
    %c3 = arith.constant 3 : index
    %c1_91 = arith.constant 1 : index
    %c0_92 = arith.constant 0 : index
    %81 = vector.load %arg9[%c3, %c1_91, %c0_92] : memref<10x18x144xbf16, #tpu.memory_space<vmem>>, vector<1x16x144xbf16>
    %82 = vector.shape_cast %81 : vector<1x16x144xbf16> to vector<16x144xbf16>
    %83 = vector.shape_cast %80 : vector<16x144xbf16> to vector<1x16x144xbf16>
    tpu.vector_store %arg9[%c3, %c1_91, %c0_92], %83 {strides = array<i32>} : memref<10x18x144xbf16, #tpu.memory_space<vmem>>, vector<1x16x144xbf16>,
    %84 = vector.extract_strided_slice %69 {offsets = [48, 0], sizes = [16, 144], strides = [1, 1]} : vector<128x144xbf16> to vector<16x144xbf16>
    %c4 = arith.constant 4 : index
    %c1_93 = arith.constant 1 : index
    %c0_94 = arith.constant 0 : index
    %85 = vector.load %arg9[%c4, %c1_93, %c0_94] : memref<10x18x144xbf16, #tpu.memory_space<vmem>>, vector<1x16x144xbf16>
    %86 = vector.shape_cast %85 : vector<1x16x144xbf16> to vector<16x144xbf16>
    %87 = vector.shape_cast %84 : vector<16x144xbf16> to vector<1x16x144xbf16>
    tpu.vector_store %arg9[%c4, %c1_93, %c0_94], %87 {strides = array<i32>} : memref<10x18x144xbf16, #tpu.memory_space<vmem>>, vector<1x16x144xbf16>,
    %88 = vector.extract_strided_slice %69 {offsets = [64, 0], sizes = [16, 144], strides = [1, 1]} : vector<128x144xbf16> to vector<16x144xbf16>
    %c5 = arith.constant 5 : index
    %c1_95 = arith.constant 1 : index
    %c0_96 = arith.constant 0 : index
    %89 = vector.load %arg9[%c5, %c1_95, %c0_96] : memref<10x18x144xbf16, #tpu.memory_space<vmem>>, vector<1x16x144xbf16>
    %90 = vector.shape_cast %89 : vector<1x16x144xbf16> to vector<16x144xbf16>
    %91 = vector.shape_cast %88 : vector<16x144xbf16> to vector<1x16x144xbf16>
    tpu.vector_store %arg9[%c5, %c1_95, %c0_96], %91 {strides = array<i32>} : memref<10x18x144xbf16, #tpu.memory_space<vmem>>, vector<1x16x144xbf16>,
    %92 = vector.extract_strided_slice %69 {offsets = [80, 0], sizes = [16, 144], strides = [1, 1]} : vector<128x144xbf16> to vector<16x144xbf16>
    %c6 = arith.constant 6 : index
    %c1_97 = arith.constant 1 : index
    %c0_98 = arith.constant 0 : index
    %93 = vector.load %arg9[%c6, %c1_97, %c0_98] : memref<10x18x144xbf16, #tpu.memory_space<vmem>>, vector<1x16x144xbf16>
    %94 = vector.shape_cast %93 : vector<1x16x144xbf16> to vector<16x144xbf16>
    %95 = vector.shape_cast %92 : vector<16x144xbf16> to vector<1x16x144xbf16>
    tpu.vector_store %arg9[%c6, %c1_97, %c0_98], %95 {strides = array<i32>} : memref<10x18x144xbf16, #tpu.memory_space<vmem>>, vector<1x16x144xbf16>,
    %96 = vector.extract_strided_slice %69 {offsets = [96, 0], sizes = [16, 144], strides = [1, 1]} : vector<128x144xbf16> to vector<16x144xbf16>
    %c7 = arith.constant 7 : index
    %c1_99 = arith.constant 1 : index
    %c0_100 = arith.constant 0 : index
    %97 = vector.load %arg9[%c7, %c1_99, %c0_100] : memref<10x18x144xbf16, #tpu.memory_space<vmem>>, vector<1x16x144xbf16>
    %98 = vector.shape_cast %97 : vector<1x16x144xbf16> to vector<16x144xbf16>
    %99 = vector.shape_cast %96 : vector<16x144xbf16> to vector<1x16x144xbf16>
    tpu.vector_store %arg9[%c7, %c1_99, %c0_100], %99 {strides = array<i32>} : memref<10x18x144xbf16, #tpu.memory_space<vmem>>, vector<1x16x144xbf16>,
    %100 = vector.extract_strided_slice %69 {offsets = [112, 0], sizes = [16, 144], strides = [1, 1]} : vector<128x144xbf16> to vector<16x144xbf16>
    %c8 = arith.constant 8 : index
    %c1_101 = arith.constant 1 : index
    %c0_102 = arith.constant 0 : index
    %101 = vector.load %arg9[%c8, %c1_101, %c0_102] : memref<10x18x144xbf16, #tpu.memory_space<vmem>>, vector<1x16x144xbf16>
    %102 = vector.shape_cast %101 : vector<1x16x144xbf16> to vector<16x144xbf16>
    %103 = vector.shape_cast %100 : vector<16x144xbf16> to vector<1x16x144xbf16>
    tpu.vector_store %arg9[%c8, %c1_101, %c0_102], %103 {strides = array<i32>} : memref<10x18x144xbf16, #tpu.memory_space<vmem>>, vector<1x16x144xbf16>,
    %cst_103 = arith.constant 0.000000e+00 : f32
    %104 = vector.broadcast %cst_103 : f32 to vector<128x256xf32>
    %c0_104 = arith.constant 0 : index
    %c0_105 = arith.constant 0 : index
    %c0_106 = arith.constant 0 : index
    %105 = vector.load %arg9[%c0_104, %c0_105, %c0_106] : memref<10x18x144xbf16, #tpu.memory_space<vmem>>, vector<8x16x144xbf16>
    %106 = vector.shape_cast %105 : vector<8x16x144xbf16> to vector<128x144xbf16>
    %c0_107 = arith.constant 0 : index
    %c0_108 = arith.constant 0 : index
    %c0_109 = arith.constant 0 : index
    %c0_110 = arith.constant 0 : index
    %107 = vector.load %arg4[%c0_107, %c0_108, %c0_109, %c0_110] : memref<3x3x144x256xbf16, #tpu.memory_space<vmem>>, vector<1x1x144x256xbf16>
    %108 = vector.shape_cast %107 : vector<1x1x144x256xbf16> to vector<144x256xbf16>
    %cst_111 = arith.constant dense<0.000000e+00> : vector<128x256xf32>
    %109 = tpu.matmul %106, %108, %cst_111 {dimension_numbers = #tpu.dot_dimension_numbers<[1], [0], [0], [1], [0, 0, 1, 1], [], []>} : vector<128x144xbf16>, vector<144x256xbf16>, vector<128x256xf32> -> vector<128x256xf32>
    %110 = arith.addf %104, %109 : vector<128x256xf32>
    %c0_112 = arith.constant 0 : index
    %c1_113 = arith.constant 1 : index
    %c0_114 = arith.constant 0 : index
    %111 = vector.load %arg9[%c0_112, %c1_113, %c0_114] : memref<10x18x144xbf16, #tpu.memory_space<vmem>>, vector<8x16x144xbf16>
    %112 = vector.shape_cast %111 : vector<8x16x144xbf16> to vector<128x144xbf16>
    %c0_115 = arith.constant 0 : index
    %c1_116 = arith.constant 1 : index
    %c0_117 = arith.constant 0 : index
    %c0_118 = arith.constant 0 : index
    %113 = vector.load %arg4[%c0_115, %c1_116, %c0_117, %c0_118] : memref<3x3x144x256xbf16, #tpu.memory_space<vmem>>, vector<1x1x144x256xbf16>
    %114 = vector.shape_cast %113 : vector<1x1x144x256xbf16> to vector<144x256xbf16>
    %cst_119 = arith.constant dense<0.000000e+00> : vector<128x256xf32>
    %115 = tpu.matmul %112, %114, %cst_119 {dimension_numbers = #tpu.dot_dimension_numbers<[1], [0], [0], [1], [0, 0, 1, 1], [], []>} : vector<128x144xbf16>, vector<144x256xbf16>, vector<128x256xf32> -> vector<128x256xf32>
    %116 = arith.addf %110, %115 : vector<128x256xf32>
    %c0_120 = arith.constant 0 : index
    %c2_121 = arith.constant 2 : index
    %c0_122 = arith.constant 0 : index
    %117 = vector.load %arg9[%c0_120, %c2_121, %c0_122] : memref<10x18x144xbf16, #tpu.memory_space<vmem>>, vector<8x16x144xbf16>
    %118 = vector.shape_cast %117 : vector<8x16x144xbf16> to vector<128x144xbf16>
    %c0_123 = arith.constant 0 : index
    %c2_124 = arith.constant 2 : index
    %c0_125 = arith.constant 0 : index
    %c0_126 = arith.constant 0 : index
    %119 = vector.load %arg4[%c0_123, %c2_124, %c0_125, %c0_126] : memref<3x3x144x256xbf16, #tpu.memory_space<vmem>>, vector<1x1x144x256xbf16>
    %120 = vector.shape_cast %119 : vector<1x1x144x256xbf16> to vector<144x256xbf16>
    %cst_127 = arith.constant dense<0.000000e+00> : vector<128x256xf32>
    %121 = tpu.matmul %118, %120, %cst_127 {dimension_numbers = #tpu.dot_dimension_numbers<[1], [0], [0], [1], [0, 0, 1, 1], [], []>} : vector<128x144xbf16>, vector<144x256xbf16>, vector<128x256xf32> -> vector<128x256xf32>
    %122 = arith.addf %116, %121 : vector<128x256xf32>
    %c1_128 = arith.constant 1 : index
    %c0_129 = arith.constant 0 : index
    %c0_130 = arith.constant 0 : index
    %123 = vector.load %arg9[%c1_128, %c0_129, %c0_130] : memref<10x18x144xbf16, #tpu.memory_space<vmem>>, vector<8x16x144xbf16>
    %124 = vector.shape_cast %123 : vector<8x16x144xbf16> to vector<128x144xbf16>
    %c1_131 = arith.constant 1 : index
    %c0_132 = arith.constant 0 : index
    %c0_133 = arith.constant 0 : index
    %c0_134 = arith.constant 0 : index
    %125 = vector.load %arg4[%c1_131, %c0_132, %c0_133, %c0_134] : memref<3x3x144x256xbf16, #tpu.memory_space<vmem>>, vector<1x1x144x256xbf16>
    %126 = vector.shape_cast %125 : vector<1x1x144x256xbf16> to vector<144x256xbf16>
    %cst_135 = arith.constant dense<0.000000e+00> : vector<128x256xf32>
    %127 = tpu.matmul %124, %126, %cst_135 {dimension_numbers = #tpu.dot_dimension_numbers<[1], [0], [0], [1], [0, 0, 1, 1], [], []>} : vector<128x144xbf16>, vector<144x256xbf16>, vector<128x256xf32> -> vector<128x256xf32>
    %128 = arith.addf %122, %127 : vector<128x256xf32>
    %c1_136 = arith.constant 1 : index
    %c1_137 = arith.constant 1 : index
    %c0_138 = arith.constant 0 : index
    %129 = vector.load %arg9[%c1_136, %c1_137, %c0_138] : memref<10x18x144xbf16, #tpu.memory_space<vmem>>, vector<8x16x144xbf16>
    %130 = vector.shape_cast %129 : vector<8x16x144xbf16> to vector<128x144xbf16>
    %c1_139 = arith.constant 1 : index
    %c1_140 = arith.constant 1 : index
    %c0_141 = arith.constant 0 : index
    %c0_142 = arith.constant 0 : index
    %131 = vector.load %arg4[%c1_139, %c1_140, %c0_141, %c0_142] : memref<3x3x144x256xbf16, #tpu.memory_space<vmem>>, vector<1x1x144x256xbf16>
    %132 = vector.shape_cast %131 : vector<1x1x144x256xbf16> to vector<144x256xbf16>
    %cst_143 = arith.constant dense<0.000000e+00> : vector<128x256xf32>
    %133 = tpu.matmul %130, %132, %cst_143 {dimension_numbers = #tpu.dot_dimension_numbers<[1], [0], [0], [1], [0, 0, 1, 1], [], []>} : vector<128x144xbf16>, vector<144x256xbf16>, vector<128x256xf32> -> vector<128x256xf32>
    %134 = arith.addf %128, %133 : vector<128x256xf32>
    %c1_144 = arith.constant 1 : index
    %c2_145 = arith.constant 2 : index
    %c0_146 = arith.constant 0 : index
    %135 = vector.load %arg9[%c1_144, %c2_145, %c0_146] : memref<10x18x144xbf16, #tpu.memory_space<vmem>>, vector<8x16x144xbf16>
    %136 = vector.shape_cast %135 : vector<8x16x144xbf16> to vector<128x144xbf16>
    %c1_147 = arith.constant 1 : index
    %c2_148 = arith.constant 2 : index
    %c0_149 = arith.constant 0 : index
    %c0_150 = arith.constant 0 : index
    %137 = vector.load %arg4[%c1_147, %c2_148, %c0_149, %c0_150] : memref<3x3x144x256xbf16, #tpu.memory_space<vmem>>, vector<1x1x144x256xbf16>
    %138 = vector.shape_cast %137 : vector<1x1x144x256xbf16> to vector<144x256xbf16>
    %cst_151 = arith.constant dense<0.000000e+00> : vector<128x256xf32>
    %139 = tpu.matmul %136, %138, %cst_151 {dimension_numbers = #tpu.dot_dimension_numbers<[1], [0], [0], [1], [0, 0, 1, 1], [], []>} : vector<128x144xbf16>, vector<144x256xbf16>, vector<128x256xf32> -> vector<128x256xf32>
    %140 = arith.addf %134, %139 : vector<128x256xf32>
    %c2_152 = arith.constant 2 : index
    %c0_153 = arith.constant 0 : index
    %c0_154 = arith.constant 0 : index
    %141 = vector.load %arg9[%c2_152, %c0_153, %c0_154] : memref<10x18x144xbf16, #tpu.memory_space<vmem>>, vector<8x16x144xbf16>
    %142 = vector.shape_cast %141 : vector<8x16x144xbf16> to vector<128x144xbf16>
    %c2_155 = arith.constant 2 : index
    %c0_156 = arith.constant 0 : index
    %c0_157 = arith.constant 0 : index
    %c0_158 = arith.constant 0 : index
    %143 = vector.load %arg4[%c2_155, %c0_156, %c0_157, %c0_158] : memref<3x3x144x256xbf16, #tpu.memory_space<vmem>>, vector<1x1x144x256xbf16>
    %144 = vector.shape_cast %143 : vector<1x1x144x256xbf16> to vector<144x256xbf16>
    %cst_159 = arith.constant dense<0.000000e+00> : vector<128x256xf32>
    %145 = tpu.matmul %142, %144, %cst_159 {dimension_numbers = #tpu.dot_dimension_numbers<[1], [0], [0], [1], [0, 0, 1, 1], [], []>} : vector<128x144xbf16>, vector<144x256xbf16>, vector<128x256xf32> -> vector<128x256xf32>
    %146 = arith.addf %140, %145 : vector<128x256xf32>
    %c2_160 = arith.constant 2 : index
    %c1_161 = arith.constant 1 : index
    %c0_162 = arith.constant 0 : index
    %147 = vector.load %arg9[%c2_160, %c1_161, %c0_162] : memref<10x18x144xbf16, #tpu.memory_space<vmem>>, vector<8x16x144xbf16>
    %148 = vector.shape_cast %147 : vector<8x16x144xbf16> to vector<128x144xbf16>
    %c2_163 = arith.constant 2 : index
    %c1_164 = arith.constant 1 : index
    %c0_165 = arith.constant 0 : index
    %c0_166 = arith.constant 0 : index
    %149 = vector.load %arg4[%c2_163, %c1_164, %c0_165, %c0_166] : memref<3x3x144x256xbf16, #tpu.memory_space<vmem>>, vector<1x1x144x256xbf16>
    %150 = vector.shape_cast %149 : vector<1x1x144x256xbf16> to vector<144x256xbf16>
    %cst_167 = arith.constant dense<0.000000e+00> : vector<128x256xf32>
    %151 = tpu.matmul %148, %150, %cst_167 {dimension_numbers = #tpu.dot_dimension_numbers<[1], [0], [0], [1], [0, 0, 1, 1], [], []>} : vector<128x144xbf16>, vector<144x256xbf16>, vector<128x256xf32> -> vector<128x256xf32>
    %152 = arith.addf %146, %151 : vector<128x256xf32>
    %c2_168 = arith.constant 2 : index
    %c2_169 = arith.constant 2 : index
    %c0_170 = arith.constant 0 : index
    %153 = vector.load %arg9[%c2_168, %c2_169, %c0_170] : memref<10x18x144xbf16, #tpu.memory_space<vmem>>, vector<8x16x144xbf16>
    %154 = vector.shape_cast %153 : vector<8x16x144xbf16> to vector<128x144xbf16>
    %c2_171 = arith.constant 2 : index
    %c2_172 = arith.constant 2 : index
    %c0_173 = arith.constant 0 : index
    %c0_174 = arith.constant 0 : index
    %155 = vector.load %arg4[%c2_171, %c2_172, %c0_173, %c0_174] : memref<3x3x144x256xbf16, #tpu.memory_space<vmem>>, vector<1x1x144x256xbf16>
    %156 = vector.shape_cast %155 : vector<1x1x144x256xbf16> to vector<144x256xbf16>
    %cst_175 = arith.constant dense<0.000000e+00> : vector<128x256xf32>
    %157 = tpu.matmul %154, %156, %cst_175 {dimension_numbers = #tpu.dot_dimension_numbers<[1], [0], [0], [1], [0, 0, 1, 1], [], []>} : vector<128x144xbf16>, vector<144x256xbf16>, vector<128x256xf32> -> vector<128x256xf32>
    %158 = arith.addf %152, %157 : vector<128x256xf32>
    %c0_176 = arith.constant 0 : index
    %c0_177 = arith.constant 0 : index
    %159 = vector.load %arg5[%c0_176, %c0_177] : memref<1x256xf32, #tpu.memory_space<vmem>>, vector<1x256xf32>
    %160 = vector.broadcast %159 : vector<1x256xf32> to vector<128x256xf32>
    %161 = arith.addf %158, %160 : vector<128x256xf32>
    %cst_178 = arith.constant 0.000000e+00 : f32
    %162 = vector.broadcast %cst_178 : f32 to vector<128x256xf32>
    %163 = arith.maximumf %161, %162 : vector<128x256xf32>
    %c0_179 = arith.constant 0 : index
    %c0_180 = arith.constant 0 : index
    %164 = vector.load %arg6[%c0_179, %c0_180] : memref<8x128xf32, #tpu.memory_space<vmem>>, vector<8x128xf32>
    %cst_181 = arith.constant dense<0.000000e+00> : vector<8x256xf32>
    %165 = tpu.matmul %164, %163, %cst_181 {dimension_numbers = #tpu.dot_dimension_numbers<[1], [0], [0], [1], [0, 0, 1, 1], [], []>} : vector<8x128xf32>, vector<128x256xf32>, vector<8x256xf32> -> vector<8x256xf32>
    %c0_182 = arith.constant 0 : index
    %c0_183 = arith.constant 0 : index
    %166 = vector.load %arg7[%c0_182, %c0_183] : memref<256x16xf32, #tpu.memory_space<vmem>>, vector<256x16xf32>
    %cst_184 = arith.constant dense<0.000000e+00> : vector<8x16xf32>
    %167 = tpu.matmul %165, %166, %cst_184 {dimension_numbers = #tpu.dot_dimension_numbers<[1], [0], [0], [1], [0, 0, 1, 1], [], []>} : vector<8x256xf32>, vector<256x16xf32>, vector<8x16xf32> -> vector<8x16xf32>
    %c0_185 = arith.constant 0 : index
    %c0_186 = arith.constant 0 : index
    %c0_187 = arith.constant 0 : index
    %168 = vector.load %arg8[%c0_185, %c0_186, %c0_187] : memref<1x8x16xf32, #tpu.memory_space<vmem>>, vector<1x8x16xf32>
    %169 = vector.shape_cast %168 : vector<1x8x16xf32> to vector<8x16xf32>
    %170 = vector.shape_cast %167 : vector<8x16xf32> to vector<1x8x16xf32>
    tpu.vector_store %arg8[%c0_185, %c0_186, %c0_187], %170 {strides = array<i32>} : memref<1x8x16xf32, #tpu.memory_space<vmem>>, vector<1x8x16xf32>,
    return
  }
  func.func @transform_0(%arg0: i32) -> (i32, i32, i32, i32) {
    %c0_i32 = arith.constant 0 : i32
    %c0_i32_0 = arith.constant 0 : i32
    %c0_i32_1 = arith.constant 0 : i32
    %c0_i32_2 = arith.constant 0 : i32
    return %arg0, %c0_i32, %c0_i32_0, %c0_i32_1 : i32, i32, i32, i32
  }
  func.func @transform_1(%arg0: i32) -> (i32, i32, i32, i32) {
    %c0_i32 = arith.constant 0 : i32
    %c0_i32_0 = arith.constant 0 : i32
    %c0_i32_1 = arith.constant 0 : i32
    %c0_i32_2 = arith.constant 0 : i32
    %c0_i32_3 = arith.constant 0 : i32
    return %c0_i32, %c0_i32_0, %c0_i32_1, %c0_i32_2 : i32, i32, i32, i32
  }
  func.func @transform_2(%arg0: i32) -> (i32, i32) {
    %c0_i32 = arith.constant 0 : i32
    %c0_i32_0 = arith.constant 0 : i32
    %c0_i32_1 = arith.constant 0 : i32
    return %c0_i32, %c0_i32_0 : i32, i32
  }
  func.func @transform_3(%arg0: i32) -> (i32, i32, i32, i32) {
    %c0_i32 = arith.constant 0 : i32
    %c0_i32_0 = arith.constant 0 : i32
    %c0_i32_1 = arith.constant 0 : i32
    %c0_i32_2 = arith.constant 0 : i32
    %c0_i32_3 = arith.constant 0 : i32
    return %c0_i32, %c0_i32_0, %c0_i32_1, %c0_i32_2 : i32, i32, i32, i32
  }
  func.func @transform_4(%arg0: i32) -> (i32, i32) {
    %c0_i32 = arith.constant 0 : i32
    %c0_i32_0 = arith.constant 0 : i32
    %c0_i32_1 = arith.constant 0 : i32
    return %c0_i32, %c0_i32_0 : i32, i32
  }
  func.func @transform_5(%arg0: i32) -> (i32, i32) {
    %c0_i32 = arith.constant 0 : i32
    %c0_i32_0 = arith.constant 0 : i32
    %c0_i32_1 = arith.constant 0 : i32
    return %c0_i32, %c0_i32_0 : i32, i32
  }
  func.func @transform_6(%arg0: i32) -> (i32, i32) {
    %c0_i32 = arith.constant 0 : i32
    %c0_i32_0 = arith.constant 0 : i32
    %c0_i32_1 = arith.constant 0 : i32
    return %c0_i32, %c0_i32_0 : i32, i32
  }
  func.func @transform_7(%arg0: i32) -> (i32, i32, i32) {
    %c0_i32 = arith.constant 0 : i32
    %c0_i32_0 = arith.constant 0 : i32
    %c0_i32_1 = arith.constant 0 : i32
    return %arg0, %c0_i32, %c0_i32_0 : i32, i32, i32
  }
}

module attributes {stable_mosaic.version = 11 : i64} {
  func.func @_fc_kernel(%arg0: memref<2x128xf32, #tpu.memory_space<vmem>>, %arg1: memref<128x32xf32, #tpu.memory_space<vmem>>, %arg2: memref<1x32xf32, #tpu.memory_space<vmem>>, %arg3: memref<32x3xf32, #tpu.memory_space<vmem>>, %arg4: memref<1x3xf32, #tpu.memory_space<vmem>>, %arg5: memref<2x3xf32, #tpu.memory_space<vmem>>) attributes {dimension_semantics = [], scalar_prefetch = 0 : i64, scratch_operands = 0 : i64, tpu.core_type = #tpu.core_type<tc>} {
    %c0 = arith.constant 0 : index
    %c0_0 = arith.constant 0 : index
    %0 = vector.load %arg0[%c0, %c0_0] : memref<2x128xf32, #tpu.memory_space<vmem>>, vector<2x128xf32>
    %c0_1 = arith.constant 0 : index
    %c0_2 = arith.constant 0 : index
    %1 = vector.load %arg1[%c0_1, %c0_2] : memref<128x32xf32, #tpu.memory_space<vmem>>, vector<128x32xf32>
    %cst = arith.constant dense<0.000000e+00> : vector<2x32xf32>
    %2 = tpu.matmul %0, %1, %cst {dimension_numbers = #tpu.dot_dimension_numbers<[1], [0], [0], [1], [0, 0, 1, 1], [], []>} : vector<2x128xf32>, vector<128x32xf32>, vector<2x32xf32> -> vector<2x32xf32>
    %c0_3 = arith.constant 0 : index
    %c0_4 = arith.constant 0 : index
    %3 = vector.load %arg2[%c0_3, %c0_4] : memref<1x32xf32, #tpu.memory_space<vmem>>, vector<1x32xf32>
    %4 = vector.broadcast %3 : vector<1x32xf32> to vector<2x32xf32>
    %5 = arith.addf %2, %4 : vector<2x32xf32>
    %cst_5 = arith.constant 0.000000e+00 : f32
    %6 = vector.broadcast %cst_5 : f32 to vector<2x32xf32>
    %7 = arith.maximumf %5, %6 : vector<2x32xf32>
    %c0_6 = arith.constant 0 : index
    %c0_7 = arith.constant 0 : index
    %8 = vector.load %arg3[%c0_6, %c0_7] : memref<32x3xf32, #tpu.memory_space<vmem>>, vector<32x3xf32>
    %cst_8 = arith.constant dense<0.000000e+00> : vector<2x3xf32>
    %9 = tpu.matmul %7, %8, %cst_8 {dimension_numbers = #tpu.dot_dimension_numbers<[1], [0], [0], [1], [0, 0, 1, 1], [], []>} : vector<2x32xf32>, vector<32x3xf32>, vector<2x3xf32> -> vector<2x3xf32>
    %c0_9 = arith.constant 0 : index
    %c0_10 = arith.constant 0 : index
    %10 = vector.load %arg4[%c0_9, %c0_10] : memref<1x3xf32, #tpu.memory_space<vmem>>, vector<1x3xf32>
    %11 = vector.broadcast %10 : vector<1x3xf32> to vector<2x3xf32>
    %12 = arith.addf %9, %11 : vector<2x3xf32>
    %c0_11 = arith.constant 0 : index
    %c0_12 = arith.constant 0 : index
    %13 = vector.load %arg5[%c0_11, %c0_12] : memref<2x3xf32, #tpu.memory_space<vmem>>, vector<2x3xf32>
    tpu.vector_store %arg5[%c0_11, %c0_12], %12 {strides = array<i32>} : memref<2x3xf32, #tpu.memory_space<vmem>>, vector<2x3xf32>,
    return
  }
}

</mosaic_0001>

<bundles_post_ra>
// kernel: tile.15
= control target key start
LH: loop header
LB: loop body
LE: loop exit
PB: predicated region body
PF: predicated region fallthrough
CT: control target
= control target key end

     0   :  { %s28_s0 = inlined_call_operand.vmem [shape: f32[8], index: 0, kind: input, shape index: {}]   ;;  %s29_s1 = inlined_call_operand.vmem [shape: f32[16,8], index: 1, kind: output, shape index: {}]  }
   0x1   :  { %v4_v0 = vld [vmem:[%s28_s0] ss:$0 sm:$0xff] }
   0x2   :  { %5 = vst [vmem:[%s29_s1] sm:$0xff] %v4_v0 }
   0x3   :  { %8 = vst [vmem:[%s29_s1 + $0x8] sm:$0xff] %v4_v0 }

// kernel: tile.16
= control target key start
LH: loop header
LB: loop body
LE: loop exit
PB: predicated region body
PF: predicated region fallthrough
CT: control target
= control target key end

     0   :  { %s131_s10 = smov 120   ;;  %s132_s11 = smov 104   ;;  %vm3_vm0 = vcmask 64512   ;;  %vm9_vm1 = vcmask 1048512   ;;  %vm15_vm2 = vcmask 982912   ;;  %vm21_vm3 = vcmask 917312   ;;  %s207_s0 = inlined_call_operand.vmem [shape: f32[16,8], index: 0, kind: input, shape index: {}]   ;;  %s208_s1 = inlined_call_operand.vmem [shape: f32[128], index: 1, kind: output, shape index: {}]  }
   0x1   :  { %v101_v0 = vld [vmem:[%s207_s0 + $0xf] sm:$0x1]   ;;  %v103_v1 = vld [vmem:[%s207_s0 + $0xd] sm:$0x1]   ;;  %v105_v2 = vld [vmem:[%s207_s0 + $0xb] sm:$0x1]  }
   0x2   :  { %7 = vrot.lane.b32.xlu0 %v101_v0, %s131_s10  ;;  %19 = vrot.lane.b32.xlu1 %v103_v1, %s132_s11  ;;  %s133_s14 = smov 88   ;;  %v102_v3 = vld [vmem:[%s207_s0 + $0xe] sm:$0x1]   ;;  %v104_v4 = vld [vmem:[%s207_s0 + $0xc] sm:$0x1]   ;;  %s134_s19 = smov 112  }
   0x3   :  { %31 = vrot.lane.b32.xlu2 %v105_v2, %s133_s14  ;;  %s135_s20 = smov 96   ;;  %v106_v5 = vld [vmem:[%s207_s0 + $0xa] sm:$0x1]   ;;  %s136_s23 = smov 80   ;;  %v107_v6 = vld [vmem:[%s207_s0 + $0x9] sm:$0x1]  }
   0x4   :  { %v108_v7 = vld [vmem:[%s207_s0 + $0x8] sm:$0x1]   ;;  %s137_s28 = smov 72   ;;  %s138_s29 = smov 64   ;;  %v109_v8 = vld [vmem:[%s207_s0 + $0x7] sm:$0x1]  }
   0x5   :  { %s139_s3 = smov 56   ;;  %v110_v9 = vld [vmem:[%s207_s0 + $0x6] sm:$0x1]   ;;  %v111_v10 = vld [vmem:[%s207_s0 + $0x5] sm:$0x1]   ;;  %s140_s8 = smov 48  }
   0x6   :  { %s141_s9 = smov 40   ;;  %v112_v11 = vld [vmem:[%s207_s0 + $0x4] sm:$0x1]   ;;  %s142_s12 = smov 32   ;;  %v113_v12 = vld [vmem:[%s207_s0 + $0x3] sm:$0x1]  }
   0x7   :  { %v114_v13 = vld [vmem:[%s207_s0 + $0x2] sm:$0x1]   ;;  %s143_s17 = smov 24   ;;  %s144_s18 = smov 16   ;;  %v115_v14 = vld [vmem:[%s207_s0 + $0x1] sm:$0x1]  }
   0x8   :  { %s145_s21 = smov 8   ;;  %v2_v15 = vld [vmem:[%s207_s0] sm:$0x1]   ;;  %vm27_vm4 = vcmask 851712   ;;  %vm33_vm5 = vcmask 786112   ;;  %vm39_vm6 = vcmask 720512  }
   0x9   :  { %4 = vst.msk [vmem:[#allocation0] sm:$0x1] %vm3_vm0, %v2_v15   ;;  %vm45_vm7 = vcmask 654912   ;;  %vm51_vm8 = vcmask 589312   ;;  %vm57_vm9 = vcmask 523712   ;;  %vm63_vm10 = vcmask 458112  }
   0xa   :  { %13 = vrot.lane.b32.xlu0 %v102_v3, %s134_s19  ;;  %25 = vrot.lane.b32.xlu1 %v104_v4, %s135_s20  ;;  %vm69_vm11 = vcmask 392512   ;;  %vm75_vm12 = vcmask 326912   ;;  %vm81_vm13 = vcmask 261312   ;;  %vm87_vm14 = vcmask 195712  }
   0xb   :  { %37 = vrot.lane.b32.xlu2 %v106_v5, %s136_s23  ;;  %vm93_vm15 = vcmask 130112  }
  0x12   :  { %43 = vrot.lane.b32.xlu0 %v107_v6, %s137_s28  ;;  %49 = vrot.lane.b32.xlu1 %v108_v7, %s138_s29 }
  0x13   :  { %55 = vrot.lane.b32.xlu2 %v109_v8, %s139_s3 }
  0x1a   :  { %61 = vrot.lane.b32.xlu0 %v110_v9, %s140_s8  ;;  %67 = vrot.lane.b32.xlu1 %v111_v10, %s141_s9 }
  0x1b   :  { %73 = vrot.lane.b32.xlu2 %v112_v11, %s142_s12 }
  0x22   :  { %79 = vrot.lane.b32.xlu0 %v113_v12, %s143_s17  ;;  %85 = vrot.lane.b32.xlu1 %v114_v13, %s144_s18 }
  0x23   :  { %91 = vrot.lane.b32.xlu2 %v115_v14, %s145_s21 }
  0x5d   :  { %v32_v16 = vpop.permute.xlu2 %31  }
  0x65   :  { %v38_v17 = vpop.permute.xlu2 %37  }
  0x6d   :  { %v56_v18 = vpop.permute.xlu2 %55  }
  0x74   :  { %v8_v19 = vpop.permute.xlu0 %7   ;;  %v20_v20 = vpop.permute.xlu1 %19  }
  0x75   :  { %10 = vst.msk [vmem:[#allocation0] sm:$0x1] %vm9_vm1, %v8_v19   ;;  %v74_v21 = vpop.permute.xlu2 %73  }
  0x7c   :  { %v14_v22 = vpop.permute.xlu0 %13   ;;  %v26_v23 = vpop.permute.xlu1 %25  }
  0x7d   :  { %16 = vst.msk [vmem:[#allocation0] sm:$0x1] %vm15_vm2, %v14_v22   ;;  %v92_v24 = vpop.permute.xlu2 %91  }
  0x7e   :  { %22 = vst.msk [vmem:[#allocation0] sm:$0x1] %vm21_vm3, %v20_v20  }
  0x7f   :  { %28 = vst.msk [vmem:[#allocation0] sm:$0x1] %vm27_vm4, %v26_v23  }
  0x80   :  { %34 = vst.msk [vmem:[#allocation0] sm:$0x1] %vm33_vm5, %v32_v16  }
  0x81   :  { %40 = vst.msk [vmem:[#allocation0] sm:$0x1] %vm39_vm6, %v38_v17  }
  0x84   :  { %v44_v25 = vpop.permute.xlu0 %43   ;;  %v50_v26 = vpop.permute.xlu1 %49  }
  0x85   :  { %46 = vst.msk [vmem:[#allocation0] sm:$0x1] %vm45_vm7, %v44_v25  }
  0x86   :  { %52 = vst.msk [vmem:[#allocation0] sm:$0x1] %vm51_vm8, %v50_v26  }
  0x87   :  { %58 = vst.msk [vmem:[#allocation0] sm:$0x1] %vm57_vm9, %v56_v18  }
  0x8c   :  { %v62_v27 = vpop.permute.xlu0 %61   ;;  %v68_v28 = vpop.permute.xlu1 %67  }
  0x8d   :  { %64 = vst.msk [vmem:[#allocation0] sm:$0x1] %vm63_vm10, %v62_v27  }
  0x8e   :  { %70 = vst.msk [vmem:[#allocation0] sm:$0x1] %vm69_vm11, %v68_v28  }
  0x8f   :  { %76 = vst.msk [vmem:[#allocation0] sm:$0x1] %vm75_vm12, %v74_v21  }
  0x94   :  { %v80_v29 = vpop.permute.xlu0 %79   ;;  %v86_v30 = vpop.permute.xlu1 %85  }
  0x95   :  { %82 = vst.msk [vmem:[#allocation0] sm:$0x1] %vm81_vm13, %v80_v29  }
  0x96   :  { %88 = vst.msk [vmem:[#allocation0] sm:$0x1] %vm87_vm14, %v86_v30  }
  0x97   :  { %94 = vst.msk [vmem:[#allocation0] sm:$0x1] %vm93_vm15, %v92_v24  }
  0x9e   :  { %v97_v31 = vld [vmem:[#allocation0] sm:$0x1] }
  0x9f   :  { %100 = vst [vmem:[%s208_s1] sm:$0x1] %v97_v31 }

// kernel: tile.19
= control target key start
LH: loop header
LB: loop body
LE: loop exit
PB: predicated region body
PF: predicated region fallthrough
CT: control target
= control target key end

     0   :  { %s28_s0 = inlined_call_operand.vmem [shape: f32[16], index: 0, kind: input, shape index: {}]   ;;  %s29_s1 = inlined_call_operand.vmem [shape: f32[16,16], index: 1, kind: output, shape index: {}]  }
   0x1   :  { %v4_v0 = vld [vmem:[%s28_s0] ss:$0 sm:$0xff] }
   0x2   :  { %5 = vst [vmem:[%s29_s1] sm:$0xff] %v4_v0 }
   0x3   :  { %8 = vst [vmem:[%s29_s1 + $0x8] sm:$0xff] %v4_v0 }

// kernel: tile.20
= control target key start
LH: loop header
LB: loop body
LE: loop exit
PB: predicated region body
PF: predicated region fallthrough
CT: control target
= control target key end

     0   :  { %s7_s6 = smov 3  ;;  %s21_s9 = smov 3  ;;  %vm4_vm0 = vcmask 130048   ;;  %vm11_vm1 = vcmask 1048448   ;;  %vm18_vm2 = vcmask 917248   ;;  %vm25_vm3 = vcmask 786048   ;;  %s129_s0 = inlined_call_operand.vmem [shape: f32[16,16], index: 0, kind: input, shape index: {}]   ;;  %s130_s1 = inlined_call_operand.vmem [shape: f32[1,256], index: 1, kind: output, shape index: {}]  }
   0x1   :  { %v67_v0 = vld [vmem:[%s129_s0 + $0x7] ss:$8 sm:%s7_s6]   ;;  %s82_s10 = smov 112   ;;  %v69_v1 = vld [vmem:[%s129_s0 + $0x5] ss:$8 sm:%s21_s9]   ;;  %s83_s13 = smov 80  }
   0x2   :  { %9 = vrot.lane.b32.xlu0 %v67_v0, %s82_s10  ;;  %23 = vrot.lane.b32.xlu1 %v69_v1, %s83_s13  ;;  %s14_s14 = smov 3  ;;  %s28_s15 = smov 3  ;;  %vm32_vm4 = vcmask 654848   ;;  %vm39_vm5 = vcmask 523648   ;;  %vm46_vm6 = vcmask 392448   ;;  %vm53_vm7 = vcmask 261248  }
   0x3   :  { %s35_s16 = smov 3  ;;  %v68_v3 = vld [vmem:[%s129_s0 + $0x6] ss:$8 sm:%s14_s14]   ;;  %s84_s21 = smov 48   ;;  %v70_v4 = vld [vmem:[%s129_s0 + $0x4] ss:$8 sm:%s28_s15]  }
   0x4   :  { %v71_v2 = vld [vmem:[%s129_s0 + $0x3] ss:$8 sm:%s35_s16]   ;;  %s42_s24 = smov 3  ;;  %s85_s25 = smov 96  }
   0x5   :  { %37 = vrot.lane.b32.xlu2 %v71_v2, %s84_s21  ;;  %s86_s26 = smov 64   ;;  %s49_s27 = smov 3  ;;  %v72_v5 = vld [vmem:[%s129_s0 + $0x2] ss:$8 sm:%s42_s24]  }
   0x6   :  { %v73_v6 = vld [vmem:[%s129_s0 + $0x1] ss:$8 sm:%s49_s27]   ;;  %s87_s3 = smov 32   ;;  %s88_s4 = smov 16  }
   0x7   :  { %s2_s5 = smov 3 }
   0x8   :  { %v3_v7 = vld [vmem:[%s129_s0] ss:$8 sm:%s2_s5]  }
   0x9   :  { %5 = vst.msk [vmem:[#allocation0] ss:$8 sm:$0x3] %vm4_vm0, %v3_v7  }
   0xa   :  { %16 = vrot.lane.b32.xlu0 %v68_v3, %s85_s25  ;;  %30 = vrot.lane.b32.xlu1 %v70_v4, %s86_s26 }
   0xd   :  { %44 = vrot.lane.b32.xlu2 %v72_v5, %s87_s3 }
  0x12   :  { %51 = vrot.lane.b32.xlu0 %v73_v6, %s88_s4 }
  0x5f   :  { %v38_v8 = vpop.permute.xlu2 %37  }
  0x67   :  { %v45_v9 = vpop.permute.xlu2 %44  }
  0x74   :  { %v10_v10 = vpop.permute.xlu0 %9   ;;  %v24_v11 = vpop.permute.xlu1 %23  }
  0x75   :  { %12 = vst.msk [vmem:[#allocation0] ss:$8 sm:$0x3] %vm11_vm1, %v10_v10  }
  0x7c   :  { %v17_v12 = vpop.permute.xlu0 %16   ;;  %v31_v13 = vpop.permute.xlu1 %30  }
  0x7d   :  { %19 = vst.msk [vmem:[#allocation0] ss:$8 sm:$0x3] %vm18_vm2, %v17_v12  }
  0x7e   :  { %26 = vst.msk [vmem:[#allocation0] ss:$8 sm:$0x3] %vm25_vm3, %v24_v11  }
  0x7f   :  { %33 = vst.msk [vmem:[#allocation0] ss:$8 sm:$0x3] %vm32_vm4, %v31_v13  }
  0x80   :  { %40 = vst.msk [vmem:[#allocation0] ss:$8 sm:$0x3] %vm39_vm5, %v38_v8  }
  0x81   :  { %47 = vst.msk [vmem:[#allocation0] ss:$8 sm:$0x3] %vm46_vm6, %v45_v9  }
  0x84   :  { %v52_v14 = vpop.permute.xlu0 %51  }
  0x85   :  { %54 = vst.msk [vmem:[#allocation0] ss:$8 sm:$0x3] %vm53_vm7, %v52_v14  }
  0x8c   :  { %v57_v15 = vld [vmem:[#allocation0] sm:$0x1]  ;;  %v62_v16 = vld [vmem:[#allocation0 + $0x8] sm:$0x1] }
  0x8d   :  { %60 = vst [vmem:[%s130_s1] sm:$0x1] %v57_v15 }
  0x8e   :  { %74 = vst [vmem:[%s130_s1 + $0x1] sm:$0x1] %v62_v16 }

// kernel: _lambda_.3
= control target key start
LH: loop header
LB: loop body
LE: loop exit
PB: predicated region body
PF: predicated region fallthrough
CT: control target
= control target key end

     0   :  { %s246_s0 = inlined_call_operand.vmem [shape: f32[2,128], index: 0, kind: input, shape index: {}]   ;;  %s247_s1 = inlined_call_operand.vmem [shape: f32[128,32], index: 1, kind: input, shape index: {}]   ;;  %s248_s2 = inlined_call_operand.vmem [shape: f32[1,32], index: 2, kind: input, shape index: {}]   ;;  %s249_s3 = inlined_call_operand.vmem [shape: f32[32,3], index: 3, kind: input, shape index: {}]   ;;  %s250_s4 = inlined_call_operand.vmem [shape: f32[1,3], index: 4, kind: input, shape index: {}]   ;;  %s251_s5 = inlined_call_operand.hbm [shape: f32[2,3], index: 5, kind: output, shape index: {}]  }
   0x1   :  { %v37_v0 = vld [vmem:[%s247_s1 + $0x78] sm:$0xff]  ;;  %v36_v1 = vld [vmem:[%s247_s1 + $0x70] sm:$0xff]  ;;  %v35_v2 = vld [vmem:[%s247_s1 + $0x68] sm:$0xff] }
   0x2   :  { %42 = vmatpush.msra.mxu0 %v37_v0  ;;  %v34_v3 = vld [vmem:[%s247_s1 + $0x60] sm:$0xff]  ;;  %v66_v4 = vld [vmem:[%s249_s3 + $0x18] sm:$0xff] }
   0x3   :  { %v33_v5 = vld [vmem:[%s247_s1 + $0x58] sm:$0xff]  ;;  %87 = vmatpush.msra.mxu1 %v66_v4 }
   0x4   :  { %43 = vmatpush.msra.mxu0 %v36_v1 }
   0x6   :  { %44 = vmatpush.msra.mxu0 %v35_v2 }
   0x8   :  { %45 = vmatpush.msra.mxu0 %v34_v3 }
   0x9   :  { %10 = vsyncpa [#allocation3], 0  ;;  %v32_v6 = vld [vmem:[%s247_s1 + $0x50] sm:$0xff]  ;;  %v31_v7 = vld [vmem:[%s247_s1 + $0x48] sm:$0xff]  ;;  %vm71_vm0 = vcmask 261120   ;;  %s143_s12 = smov [#allocation2]  }
   0xa   :  { %46 = vmatpush.msra.mxu0 %v33_v5  ;;  %v30_v8 = vld [vmem:[%s247_s1 + $0x40] sm:$0xff]  ;;  %v29_v9 = vld [vmem:[%s247_s1 + $0x38] sm:$0xff]  ;;  %v28_v10 = vld [vmem:[%s247_s1 + $0x30] sm:$0xff]  ;;  %s102_s13 = sshll.u32 %s143_s12, 4  ;;  %vm95_vm1 = vcmask 17408   ;;  %s103_s13 = int_to_ptr.vmem [resolvable:$true] %s102_s13 }
   0xb   :  { %v27_v11 = vld [vmem:[%s247_s1 + $0x28] sm:$0xff]  ;;  %v26_v12 = vld [vmem:[%s247_s1 + $0x20] sm:$0xff]  ;;  %v25_v13 = vld [vmem:[%s247_s1 + $0x18] sm:$0xff] }
   0xc   :  { %47 = vmatpush.msra.mxu0 %v32_v6  ;;  %v24_v14 = vld [vmem:[%s247_s1 + $0x10] sm:$0xff]  ;;  %v23_v15 = vld [vmem:[%s247_s1 + $0x8] sm:$0xff]  ;;  %v22_v16 = vld [vmem:[%s247_s1] sm:$0xff] }
   0xd   :  { %v21_v17 = vld [vmem:[%s246_s0] sm:$0x3]  ;;  %v65_v18 = vld [vmem:[%s249_s3 + $0x10] sm:$0xff]  ;;  %v64_v19 = vld [vmem:[%s249_s3 + $0x8] sm:$0xff] }
   0xe   :  { %48 = vmatpush.msra.mxu0 %v31_v7  ;;  %88 = vmatpush.msra.mxu1 %v65_v18  ;;  %v63_v20 = vld [vmem:[%s249_s3] sm:$0xff]  ;;  %s104_s3 = sshll.u32 %s251_s5, 4  ;;  %s105_s3 = int_to_ptr.hbm [resolvable:$true] %s104_s3 }
   0xf   :  { %v115_v21 = vld [vmem:[%s248_s2] ss:$0 sm:$0xff] }
  0x10   :  { %49 = vmatpush.msra.mxu0 %v30_v8  ;;  %89 = vmatpush.msra.mxu1 %v64_v19  ;;  %v116_v25 = vld [vmem:[%s250_s4] ss:$0 sm:$0xff] }
  0x12   :  { %50 = vmatpush.msra.mxu0 %v29_v9  ;;  %90 = vmatpush.msra.mxu1 %v63_v20 }
  0x14   :  { %51 = vmatpush.msra.mxu0 %v28_v10 }
  0x16   :  { %52 = vmatpush.msra.mxu0 %v27_v11 }
  0x18   :  { %53 = vmatpush.msra.mxu0 %v26_v12 }
  0x1a   :  { %54 = vmatpush.msra.mxu0 %v25_v13 }
  0x1c   :  { %55 = vmatpush.msra.mxu0 %v24_v14 }
  0x1e   :  { %56 = vmatpush.msra.mxu0 %v23_v15 }
  0x20   :  { %57 = vmatpush.msra.mxu0 %v22_v16 }
  0x21   :  { %58 = vmatmul.f32.vlgmr.msra.gmra.mxu0 %v21_v17 }
  0x9e   :  { %v59_v22 = vpop.f32.mrf.mxu0 }
  0x9f   :  { %v60_v23 = vadd.f32 %v115_v21, %v59_v22 }
  0xa1   :  { %v62_v24 = vmax.f32 %v60_v23, 0.0 }
  0xa3   :  { %113 = vmatmul.msk.f32.vlgmr.msra.gmra.mxu1 %vm71_vm0, %v62_v24 }
 0x120   :  { %v92_v26 = vpop.f32.mrf.mxu1 }
 0x121   :  { %v93_v27 = vadd.f32 %v116_v25, %v92_v26 }
 0x123   :  { %96 = vst.msk [vmem:[#allocation2] sm:$0x3] %vm95_vm1, %v93_v27 }
 0x124   :  { %107 = dma.vmem_to_hbm [thread:$0]  %s103_s13, 32, %s105_s3, [#allocation3]  }
 0x125   :  { %141 = dma.done.wait [#allocation3], 32  }
 0x126   :  { %142 = vsyncadd [#allocation3], 4294967264 }
 0x127   :  { %112 = vsyncpa [#allocation3], 1 }

// kernel: _lambda_.2
= control target key start
LH: loop header
LB: loop body
LE: loop exit
PB: predicated region body
PF: predicated region fallthrough
CT: control target
= control target key end

     0   :  { %s10257_s24 = smov 0   ;;  %s14754_s0 = inlined_call_operand.vmem [shape: bf16[2,10,18,18], index: 0, kind: input, shape index: {}]   ;;  %s14755_s1 = inlined_call_operand.vmem [shape: bf16[3,3,18,144], index: 1, kind: input, shape index: {}]   ;;  %s14756_s2 = inlined_call_operand.vmem [shape: f32[1,144], index: 2, kind: input, shape index: {}]   ;;  %s14757_s3 = inlined_call_operand.vmem [shape: bf16[3,3,144,256], index: 3, kind: input, shape index: {}]   ;;  %s14758_s4 = inlined_call_operand.vmem [shape: f32[1,256], index: 4, kind: input, shape index: {}]   ;;  %s14759_s5 = inlined_call_operand.vmem [shape: f32[8,128], index: 5, kind: input, shape index: {}]   ;;  %s14760_s6 = inlined_call_operand.vmem [shape: f32[256,16], index: 6, kind: input, shape index: {}]   ;;  %s14761_s7 = inlined_call_operand.vmem [shape: f32[2,8,16], index: 7, kind: output, shape index: {}]  }
   0x1 LB: > { %s8305_s25 = sadd.s32 4294967295, %s10214_s24   ;;  %p8309_p0 = scmp.ge.s32.totalorder %s10214_s24, 1  ;;  %s10214_s24 = sphi %s10257_s24, %s17_s24  }
   0x2   : > { %p237_p1 = scmp.lt.s32.totalorder %s10214_s24, 3 }
   0x4   : > { %p238_p2 = pnand %p8309_p0, %p237_p1 }
   0x6   : > { %241 = sbr.rel (%p238_p2) target bundleno = 2250 (0x8ca), region = 48 }
   0xb   : > { %v8314_v0 = vld [vmem:[%s14755_s1 + $0x28] sm:$0x11]  ;;  %p268_p3 = scmp.lt.s32.totalorder %s8305_s25, 1  ;;  %vm568_vm0 = vcmask 1040384   ;;  %v8317_v5 = vld [vmem:[%s14755_s1 + $0x18] sm:$0xf] }
   0xc   : > { %v535_v1 = vunpack.c.l.b16 %v8314_v0  ;;  %v536_v2 = vunpack.c.h.b16 %v8314_v0  ;;  %v9933_v6 = vld [vmem:[%s14755_s1 + $0x1c] sm:$0xf0]  ;;  %v9932_v7 = vld [vmem:[%s14755_s1 + $0x1c] sm:$0xf]  ;;  %v8319_v8 = vld [vmem:[%s14755_s1 + $0x20] sm:$0xf0] }
   0xd   : > { %s14953_s25 = smov (!%p268_p3, %s8305_s25), 1  ;;  %v8318_v11 = vor.u32 %v9933_v6, %v8317_v5  ;;  %vm305_vm1 = vsmask.f32 3328  ;;  %vm306_vm2 = vsmask.f32 7440  ;;  %v8322_v12 = vor.u32 %v9932_v7, %v8319_v8 }
   0xe   : > { %v539_v3 = vpack.c.b16 %v535_v1, %v535_v1  ;;  %v540_v4 = vpack.c.b16 %v536_v2, %v536_v2  ;;  %s10178_s13 = smul.u32 120, %s14953_s25  ;;  %vm10316_vm3 = vmor %vm305_vm1, %vm306_vm2  ;;  %v14797_v38 = vmov 0  ;;  %vm543_vm4 = vcmask 146432   ;;  %s8311_s21 = sshll.u32 %s14953_s25, 3 }
   0xf   : > { %v14798_v38 = vsel %vm10316_vm3, 4294967295, %v14797_v38  ;;  %vm880_vm5 = vcmask 1042432   ;;  %vm881_vm6 = vcmask 1046532   ;;  %vm3120_vm8 = vcmask 1043456   ;;  %s276_s26 = scalar_lea.vmem %s14761_s7, %s8311_s21 }
  0x10   : > { %v570_v9 = vsel %vm568_vm0, %v539_v3, 0  ;;  %v573_v10 = vsel %vm568_vm0, %v540_v4, 0  ;;  %s10288_s16 = scalar_lea.vmem %s14754_s0, %s10178_s13  ;;  %14799 = vst [vmem:[#allocation3_spill] sm:$0xff] %v14798_v38  ;;  %vm10471_vm7 = vmor %vm880_vm5, %vm881_vm6  ;;  %vm3121_vm9 = vcmask 130052   ;;  %vm3125_vm11 = vcmask 126980  }
  0x11   : > { %581 = vmatpush.bf16.msra.mxu0 %v570_v9  ;;  %10174 = vmatpush.bf16.msra.mxu2 %v570_v9  ;;  %v278_v13 = vld [vmem:[%s10288_s16] sm:$0xf]  ;;  %v10292_v14 = vld [vmem:[%s10288_s16 + $0x4] sm:$0xf]  ;;  %v10295_v15 = vld [vmem:[%s10288_s16 + $0x8] sm:$0x1] }
  0x12   : > { %630 = vmatpush.bf16.msra.mxu1 %v573_v10  ;;  %10176 = vmatpush.bf16.msra.mxu3 %v573_v10  ;;  %v309_v16 = vshrl.u32 %v278_v13, 16  ;;  %v312_v17 = vshll.u32 %v278_v13, 16  ;;  %v318_v18 = vshll.u32 %v10292_v14, 16  ;;  %v322_v19 = vshrl.u32 %v10292_v14, 16  ;;  %v290_v20 = vld [vmem:[%s10288_s16 + $0x48] sm:$0xf]  ;;  %vm11762_vm10 = vmor %vm3121_vm9, %vm3120_vm8 }
  0x13   : > { %v328_v21 = vshll.u32 %v10295_v15, 16  ;;  %v10302_v22 = vld [vmem:[%s10288_s16 + $0x4c] sm:$0xf]  ;;  %v10305_v23 = vld [vmem:[%s10288_s16 + $0x50] sm:$0x1]  ;;  %v453_v29 = vshrl.u32 %v290_v20, 16  ;;  %vm11915_vm12 = vmor %vm3125_vm11, %vm568_vm0 }
  0x14   : > { %v311_v24 = vrot.slane %v309_v16, 4  ;;  %v314_v25 = vrot.slane %v312_v17, 5  ;;  %v320_v26 = vrot.slane %v318_v18, 5  ;;  %v324_v27 = vrot.slane %v322_v19, 4  ;;  %v280_v36 = vld [vmem:[%s10288_s16 + $0xc] sm:$0xf] }
  0x15   : > { %582 = vmatpush.bf16.msra.mxu0 %v8318_v11  ;;  %10175 = vmatpush.bf16.msra.mxu2 %v8318_v11  ;;  %v330_v28 = vrot.slane %v328_v21, 5  ;;  %v456_v30 = vshll.u32 %v290_v20, 16  ;;  %v462_v31 = vshll.u32 %v10302_v22, 16  ;;  %v466_v34 = vshrl.u32 %v10302_v22, 16  ;;  %v10312_v37 = vld [vmem:[%s10288_s16 + $0x10] sm:$0xf] }
  0x16   : > { %631 = vmatpush.bf16.msra.mxu1 %v8322_v12  ;;  %10177 = vmatpush.bf16.msra.mxu3 %v8322_v12  ;;  %v315_v32 = vor.u32 %v314_v25, %v311_v24  ;;  %v325_v33 = vor.u32 %v324_v27, %v320_v26  ;;  %v472_v35 = vshll.u32 %v10305_v23, 16  ;;  %v455_v39 = vrot.slane %v453_v29, 4  ;;  %v10326_v53 = vld [vmem:[%s10288_s16 + $0x14] sm:$0x1]  ;;  %v10334_v3 = vld [vmem:[%s10288_s16 + $0x58] sm:$0xf] }
  0x17   : > { %v458_v40 = vrot.slane %v456_v30, 5  ;;  %v464_v41 = vrot.slane %v462_v31, 5  ;;  %v468_v44 = vrot.slane %v466_v34, 4  ;;  %v333_v47 = vshrl.u32 %v280_v36, 16  ;;  %v292_v55 = vld [vmem:[%s10288_s16 + $0x54] sm:$0xf] }
  0x18   : > { %v316_v42 = vrot.slane %v315_v32, 4  ;;  %v326_v43 = vrot.slane %v325_v33, 4  ;;  %v474_v45 = vrot.slane %v472_v35, 5  ;;  %v336_v48 = vshll.u32 %v280_v36, 16  ;;  %v10339_v9 = vld [vmem:[%s10288_s16 + $0x5c] sm:$0x1] }
  0x19   : > { %v459_v46 = vor.u32 %v458_v40, %v455_v39  ;;  %v342_v49 = vshll.u32 %v10312_v37, 16  ;;  %v469_v52 = vor.u32 %v468_v44, %v464_v41  ;;  %v346_v54 = vshrl.u32 %v10312_v37, 16  ;;  %v296_v25 = vld [vmem:[%s14755_s1 + $0x10] sm:$0x11]  ;;  %v282_v30 = vld [vmem:[%s10288_s16 + $0x18] sm:$0xf] }
  0x1a   : > { %v321_v50 = vsel %vm10316_vm3, %v316_v42, %v320_v26  ;;  %v331_v51 = vsel %vm10316_vm3, %v326_v43, %v330_v28  ;;  %v335_v59 = vrot.slane %v333_v47, 4  ;;  %v338_v61 = vrot.slane %v336_v48, 5  ;;  %v8373_v32 = vld [vmem:[%s14755_s1] sm:$0xf]  ;;  %v9931_v39 = vld [vmem:[%s14755_s1 + $0x4] sm:$0xf0] }
  0x1b   : > { %v504_v56 = vunpack.c.l.b16 %v321_v50  ;;  %v505_v57 = vunpack.c.l.b16 %v331_v51  ;;  %v460_v58 = vrot.slane %v459_v46, 4  ;;  %v470_v60 = vrot.slane %v469_v52, 4  ;;  %v10363_v40 = vld [vmem:[%s10288_s16 + $0x1c] sm:$0xf]  ;;  %v9930_v48 = vld [vmem:[%s14755_s1 + $0x4] sm:$0xf] }
  0x1c   : > { %v344_v62 = vrot.slane %v342_v49, 5  ;;  %v348_v63 = vrot.slane %v346_v54, 4  ;;  %v352_v2 = vshll.u32 %v10326_v53, 16  ;;  %v477_v4 = vshrl.u32 %v292_v55, 16  ;;  %v8375_v49 = vld [vmem:[%s14755_s1 + $0x8] sm:$0xf0] }
  0x1d   : > { %v520_v0 = vpack.c.b16 %v505_v57, %v504_v56  ;;  %v465_v1 = vsel %vm10316_vm3, %v460_v58, %v464_v41  ;;  %v475_v5 = vsel %vm10316_vm3, %v470_v60, %v474_v45  ;;  %v339_v7 = vor.u32 %v338_v61, %v335_v59  ;;  %v10380_v61 = vld [vmem:[%s10288_s16 + $0x20] sm:$0x1] }
  0x1e   : > { %v516_v6 = vunpack.c.l.b16 %v465_v1  ;;  %v349_v8 = vor.u32 %v348_v63, %v344_v62  ;;  %v517_v10 = vunpack.c.l.b16 %v475_v5  ;;  %v354_v11 = vrot.slane %v352_v2, 5 }
  0x1f   : > { %8323 = vmatmul.msk.bf16.vlgmr.msra.gmra.mxu0 %vm543_vm4, %v520_v0  ;;  %8331 = vmatmul.msk.bf16.vlgmr.msra.gmra.mxu1 %vm543_vm4, %v520_v0  ;;  %v479_v12 = vrot.slane %v477_v4, 4  ;;  %v480_v13 = vshll.u32 %v292_v55, 16  ;;  %v340_v16 = vrot.slane %v339_v7, 4  ;;  %v486_v18 = vshll.u32 %v10334_v3, 16 }
  0x20   : > { %v350_v17 = vrot.slane %v349_v8, 4  ;;  %v490_v19 = vshrl.u32 %v10334_v3, 16  ;;  %v526_v20 = vpack.c.b16 %v517_v10, %v516_v6  ;;  %v496_v24 = vshll.u32 %v10339_v9, 16  ;;  %v284_v10 = vld [vmem:[%s10288_s16 + $0x24] sm:$0xf] }
  0x21   : > { %v482_v21 = vrot.slane %v480_v13, 5  ;;  %v345_v26 = vsel %vm10316_vm3, %v340_v16, %v344_v62  ;;  %v488_v28 = vrot.slane %v486_v18, 5  ;;  %v720_v35 = vunpack.c.l.b16 %v296_v25 }
  0x22   : > { %v355_v27 = vsel %vm10316_vm3, %v350_v17, %v354_v11  ;;  %v492_v29 = vrot.slane %v490_v19, 4  ;;  %8329 = vmatmul.msk.bf16.vlgmr.msra.gmra.mxu2 %vm543_vm4, %v526_v20  ;;  %8337 = vmatmul.msk.bf16.vlgmr.msra.gmra.mxu3 %vm543_vm4, %v526_v20  ;;  %v498_v34 = vrot.slane %v496_v24, 5  ;;  %v721_v36 = vunpack.c.h.b16 %v296_v25  ;;  %v10387_v11 = vld [vmem:[%s10288_s16 + $0x28] sm:$0xf] }
  0x23   : > { %v483_v31 = vor.u32 %v482_v21, %v479_v12  ;;  %v506_v41 = vunpack.c.l.b16 %v345_v26  ;;  %v507_v42 = vunpack.c.l.b16 %v355_v27  ;;  %v357_v44 = vshrl.u32 %v282_v30, 16 }
  0x24   : > { %v493_v33 = vor.u32 %v492_v29, %v488_v28  ;;  %v724_v46 = vpack.c.b16 %v720_v35, %v720_v35  ;;  %v725_v47 = vpack.c.b16 %v721_v36, %v721_v36  ;;  %v360_v50 = vshll.u32 %v282_v30, 16 }
  0x25   : > { %v484_v43 = vrot.slane %v483_v31, 4  ;;  %v8374_v52 = vor.u32 %v9931_v39, %v8373_v32  ;;  %v366_v54 = vshll.u32 %v10363_v40, 16  ;;  %v370_v55 = vshrl.u32 %v10363_v40, 16  ;;  %v10398_v31 = vld [vmem:[%s10288_s16 + $0x2c] sm:$0x1] }
  0x26   : > { %v494_v45 = vrot.slane %v493_v33, 4  ;;  %v753_v57 = vsel %vm568_vm0, %v724_v46, 0  ;;  %v756_v58 = vsel %vm568_vm0, %v725_v47, 0  ;;  %v359_v59 = vrot.slane %v357_v44, 4  ;;  %v10406_v44 = vld [vmem:[%s10288_s16 + $0x34] sm:$0xf] }
  0x27   : > { %v489_v51 = vsel %vm10316_vm3, %v484_v43, %v488_v28  ;;  %764 = vmatpush.bf16.msrb.mxu2 %v753_v57  ;;  %813 = vmatpush.bf16.msrb.mxu3 %v756_v58  ;;  %v8378_v60 = vor.u32 %v9930_v48, %v8375_v49  ;;  %v362_v62 = vrot.slane %v360_v50, 5  ;;  %v368_v63 = vrot.slane %v366_v54, 5  ;;  %v286_v43 = vld [vmem:[%s10288_s16 + $0x30] sm:$0xf]  ;;  %v10417_v58 = vld [vmem:[%s10288_s16 + $0x38] sm:$0x1] }
  0x28   : > { %v499_v56 = vsel %vm10316_vm3, %v494_v45, %v498_v34  ;;  %v372_v0 = vrot.slane %v370_v55, 4  ;;  %v521_v1 = vpack.c.b16 %v507_v42, %v506_v41  ;;  %v518_v2 = vunpack.c.l.b16 %v489_v51  ;;  %v9922_v42 = vld [vmem:[%s10288_s16] sm:$0xff] }
  0x29   : > { %v519_v4 = vunpack.c.l.b16 %v499_v56  ;;  %v363_v5 = vor.u32 %v362_v62, %v359_v59  ;;  %v376_v7 = vshll.u32 %v10380_v61, 16  ;;  %v381_v17 = vshrl.u32 %v284_v10, 16 }
  0x2a   : > { %v373_v6 = vor.u32 %v372_v0, %v368_v63  ;;  %v384_v18 = vshll.u32 %v284_v10, 16  ;;  %v390_v19 = vshll.u32 %v10387_v11, 16  ;;  %v394_v20 = vshrl.u32 %v10387_v11, 16  ;;  %v9923_v0 = vld [vmem:[%s10288_s16 + $0xc] sm:$0xff] }
  0x2b   : > { %765 = vmatpush.bf16.msrb.mxu2 %v8374_v52  ;;  %814 = vmatpush.bf16.msrb.mxu3 %v8378_v60  ;;  %v527_v8 = vpack.c.b16 %v519_v4, %v518_v2  ;;  %v364_v12 = vrot.slane %v363_v5, 4  ;;  %v378_v16 = vrot.slane %v376_v7, 5  ;;  %v383_v25 = vrot.slane %v381_v17, 4  ;;  %v288_v5 = vld [vmem:[%s10288_s16 + $0x3c] sm:$0xf] }
  0x2c   : > { %v374_v13 = vrot.slane %v373_v6, 4  ;;  %v386_v26 = vrot.slane %v384_v18, 5  ;;  %v392_v27 = vrot.slane %v390_v19, 5  ;;  %v396_v28 = vrot.slane %v394_v20, 4  ;;  %v10425_v6 = vld [vmem:[%s10288_s16 + $0x40] sm:$0xf] }
  0x2d   : > { %v369_v21 = vsel %vm10316_vm3, %v364_v12, %v368_v63  ;;  %v400_v34 = vshll.u32 %v10398_v31, 16  ;;  %v405_v47 = vshrl.u32 %v286_v43, 16  ;;  %v408_v48 = vshll.u32 %v286_v43, 16  ;;  %v8408_v20 = vld [vmem:[%s14755_s1 + $0x30] sm:$0xf] }
  0x2e   : > { %v379_v24 = vsel %vm10316_vm3, %v374_v13, %v378_v16  ;;  %v508_v29 = vunpack.c.l.b16 %v369_v21  ;;  %v387_v32 = vor.u32 %v386_v26, %v383_v25  ;;  %v397_v33 = vor.u32 %v396_v28, %v392_v27  ;;  %v8405_v13 = vld [vmem:[%s14755_s1 + $0x40] sm:$0x11]  ;;  %v9935_v25 = vld [vmem:[%s14755_s1 + $0x34] sm:$0xf0]  ;;  %v9934_v26 = vld [vmem:[%s14755_s1 + $0x34] sm:$0xf] }
  0x2f   : > { %8324 = vmatmul.msk.bf16.gmra.mxu0 %vm543_vm4, %v521_v1  ;;  %8332 = vmatmul.msk.bf16.gmra.mxu1 %vm543_vm4, %v521_v1  ;;  %v509_v30 = vunpack.c.l.b16 %v379_v24  ;;  %v402_v41 = vrot.slane %v400_v34, 5  ;;  %v414_v49 = vshll.u32 %v10406_v44, 16  ;;  %v418_v50 = vshrl.u32 %v10406_v44, 16 }
  0x30   : > { %v388_v36 = vrot.slane %v387_v32, 4  ;;  %v398_v39 = vrot.slane %v397_v33, 4  ;;  %v407_v54 = vrot.slane %v405_v47, 4  ;;  %v410_v55 = vrot.slane %v408_v48, 5  ;;  %v9924_v48 = vld [vmem:[%s10288_s16 + $0x18] sm:$0xff] }
  0x31   : > { %v522_v35 = vpack.c.b16 %v509_v30, %v508_v29  ;;  %v416_v56 = vrot.slane %v414_v49, 5  ;;  %v420_v57 = vrot.slane %v418_v50, 4  ;;  %v424_v63 = vshll.u32 %v10417_v58, 16 }
  0x32   : > { %8330 = vmatmul.msk.bf16.gmra.mxu2 %vm543_vm4, %v527_v8  ;;  %8338 = vmatmul.msk.bf16.gmra.mxu3 %vm543_vm4, %v527_v8  ;;  %v393_v45 = vsel %vm10316_vm3, %v388_v36, %v392_v27  ;;  %v403_v46 = vsel %vm10316_vm3, %v398_v39, %v402_v41  ;;  %v411_v60 = vor.u32 %v410_v55, %v407_v54  ;;  %v429_v10 = vshrl.u32 %v288_v5, 16  ;;  %v8410_v27 = vld [vmem:[%s14755_s1 + $0x38] sm:$0xf0]  ;;  %v10453_v39 = vld [vmem:[%s10288_s16 + $0x44] sm:$0x1] }
  0x33   : > { %v510_v51 = vunpack.c.l.b16 %v393_v45  ;;  %v511_v52 = vunpack.c.l.b16 %v403_v46  ;;  %v421_v62 = vor.u32 %v420_v57, %v416_v56  ;;  %v426_v4 = vrot.slane %v424_v63, 5 }
  0x34   : > { %v412_v1 = vrot.slane %v411_v60, 4  ;;  %v432_v12 = vshll.u32 %v288_v5, 16  ;;  %v438_v16 = vshll.u32 %v10425_v6, 16  ;;  %v442_v17 = vshrl.u32 %v10425_v6, 16  ;;  %v856_v60 = vld [vmem:[%s10288_s16] sm:$0xe] }
  0x35   : > { %v523_v59 = vpack.c.b16 %v511_v52, %v510_v51  ;;  %v422_v2 = vrot.slane %v421_v62, 4  ;;  %v974_v18 = vunpack.c.l.b16 %v8405_v13  ;;  %v975_v19 = vunpack.c.h.b16 %v8405_v13  ;;  %v9925_v62 = vld [vmem:[%s10288_s16 + $0x24] sm:$0xff] }
  0x36   : > { %v417_v7 = vsel %vm10316_vm3, %v412_v1, %v416_v56  ;;  %v431_v30 = vrot.slane %v429_v10, 4  ;;  %v434_v32 = vrot.slane %v432_v12, 5  ;;  %v440_v33 = vrot.slane %v438_v16, 5  ;;  %v857_v10 = vld [vmem:[%s10288_s16 + $0xc] sm:$0xe]  ;;  %v9926_v12 = vld [vmem:[%s10288_s16 + $0x30] sm:$0xff] }
  0x37   : > { %v427_v8 = vsel %vm10316_vm3, %v422_v2, %v426_v4  ;;  %v978_v21 = vpack.c.b16 %v974_v18, %v974_v18  ;;  %v979_v24 = vpack.c.b16 %v975_v19, %v975_v19  ;;  %v512_v28 = vunpack.c.l.b16 %v417_v7 }
  0x38   : > { %v513_v29 = vunpack.c.l.b16 %v427_v8  ;;  %v444_v34 = vrot.slane %v442_v17, 4  ;;  %v8409_v41 = vor.u32 %v9935_v25, %v8408_v20  ;;  %v435_v45 = vor.u32 %v434_v32, %v431_v30  ;;  %v858_v25 = vld [vmem:[%s10288_s16 + $0x18] sm:$0xe]  ;;  %v8448_v30 = vld [vmem:[%s14755_s1 + $0x58] sm:$0x11] }
  0x39   : > { %v1010_v36 = vsel %vm568_vm0, %v979_v24, 0  ;;  %v448_v47 = vshll.u32 %v10453_v39, 16  ;;  %v888_v63 = vrot.slane %v10295_v15, 5  ;;  %v14800_v2 = vmov 0 }
  0x3a   : > { %1067 = vmatpush.bf16.msrb.mxu1 %v1010_v36  ;;  %v524_v43 = vpack.c.b16 %v513_v29, %v512_v28  ;;  %v445_v46 = vor.u32 %v444_v34, %v440_v33  ;;  %v436_v49 = vrot.slane %v435_v45, 4  ;;  %v14801_v2 = vsel %vm10471_vm7, 4294967295, %v14800_v2 }
  0x3b   : > { %v450_v51 = vrot.slane %v448_v47, 5  ;;  %14802 = vst [vmem:[#allocation4_spill] sm:$0xff] %v14801_v2  ;;  %v892_v15 = vrot.slane %v10312_v37, 5  ;;  %v8396_v13 = vrot.slane %v857_v10, 9  ;;  %v895_v17 = vrot.slane %v10326_v53, 5 }
  0x3c   : > { %v446_v50 = vrot.slane %v445_v46, 4  ;;  %v441_v52 = vsel %vm10316_vm3, %v436_v49, %v440_v33  ;;  %v899_v24 = vrot.slane %v10363_v40, 5  ;;  %v8397_v53 = vrot.slane %v858_v25, 9  ;;  %v859_v47 = vld [vmem:[%s10288_s16 + $0x24] sm:$0xe] }
  0x3d   : > { %v514_v55 = vunpack.c.l.b16 %v441_v52  ;;  %v894_v16 = vrot.slane %v892_v15, 4  ;;  %v893_v18 = vsel %vm10471_vm7, %v8396_v13, %v892_v15  ;;  %v902_v28 = vrot.slane %v10380_v61, 5  ;;  %v8483_v49 = vld [vmem:[%s14755_s1 + $0x48] sm:$0xf]  ;;  %v860_v10 = vld [vmem:[%s10288_s16 + $0x30] sm:$0xe] }
  0x3e   : > { %v451_v54 = vsel %vm10316_vm3, %v446_v50, %v450_v51  ;;  %v945_v19 = vunpack.c.l.b16 %v893_v18  ;;  %v900_v29 = vsel %vm10471_vm7, %v8397_v53, %v899_v24  ;;  %v1210_v34 = vunpack.c.l.b16 %v8448_v30  ;;  %v9945_v50 = vld [vmem:[%s14755_s1 + $0x4c] sm:$0xf0]  ;;  %v9944_v51 = vld [vmem:[%s14755_s1 + $0x4c] sm:$0xf] }
  0x3f   : > { %8325 = vmatmul.msk.bf16.gmra.mxu0 %vm543_vm4, %v522_v35  ;;  %8333 = vmatmul.msk.bf16.gmra.mxu1 %vm543_vm4, %v522_v35  ;;  %v1007_v35 = vsel %vm568_vm0, %v978_v21, 0  ;;  %v515_v56 = vunpack.c.l.b16 %v451_v54  ;;  %v896_v37 = vsel %vm10471_vm7, %v894_v16, %v895_v17  ;;  %v947_v32 = vunpack.c.l.b16 %v900_v29  ;;  %v8485_v54 = vld [vmem:[%s14755_s1 + $0x50] sm:$0xf0] }
  0x40   : > { %1018 = vmatpush.bf16.msrb.mxu0 %v1007_v35  ;;  %v946_v20 = vunpack.c.l.b16 %v896_v37  ;;  %v1211_v35 = vunpack.c.h.b16 %v8448_v30  ;;  %v1214_v61 = vpack.c.b16 %v1210_v34, %v1210_v34  ;;  %v8484_v52 = vor.u32 %v9945_v50, %v8483_v49  ;;  %v9929_v16 = vld [vmem:[%s10288_s16 + $0x54] sm:$0xff] }
  0x41   : > { %v525_v57 = vpack.c.b16 %v515_v56, %v514_v55  ;;  %v8488_v55 = vor.u32 %v9944_v51, %v8485_v54  ;;  %v8398_v56 = vrot.slane %v859_v47, 9  ;;  %v913_v15 = vrot.slane %v10406_v44, 5 }
  0x42   : > { %8379 = vmatmul.msk.bf16.vlgmr.msrb.gmra.mxu2 %vm543_vm4, %v9922_v42  ;;  %8387 = vmatmul.msk.bf16.vlgmr.msrb.gmra.mxu3 %vm543_vm4, %v9922_v42  ;;  %v8413_v42 = vor.u32 %v9934_v26, %v8410_v27  ;;  %v960_v21 = vpack.c.b16 %v946_v20, %v945_v19  ;;  %v9927_v26 = vld [vmem:[%s10288_s16 + $0x3c] sm:$0xff]  ;;  %v901_v27 = vrot.slane %v899_v24, 4  ;;  %v1215_v36 = vpack.c.b16 %v1211_v35, %v1211_v35 }
  0x43   : > { %v8399_v17 = vrot.slane %v860_v10, 9  ;;  %v915_v18 = vrot.slane %v913_v15, 4  ;;  %v916_v37 = vrot.slane %v10417_v58, 5  ;;  %v920_v29 = vrot.slane %v10425_v6, 5  ;;  %v8531_v6 = vld [vmem:[%s14755_s1 + $0x70] sm:$0x11] }
  0x44   : > { %1019 = vmatpush.bf16.msrb.mxu0 %v8409_v41  ;;  %1068 = vmatpush.bf16.msrb.mxu1 %v8413_v42  ;;  %v903_v40 = vsel %vm10471_vm7, %v901_v27, %v902_v28  ;;  %v1243_v42 = vsel %vm568_vm0, %v1214_v61, 0  ;;  %v923_v61 = vrot.slane %v10453_v39, 5  ;;  %v1629_v47 = vunpack.c.l.b16 %v8531_v6  ;;  %v9937_v10 = vld [vmem:[%s10288_s16 + $0x18] sm:$0xff] }
  0x45   : > { %v948_v33 = vunpack.c.l.b16 %v903_v40  ;;  %1254 = vmatpush.bf16.msra.mxu2 %v1243_v42  ;;  %v914_v20 = vsel %vm10471_vm7, %v8399_v17, %v913_v15  ;;  %v861_v40 = vld [vmem:[%s10288_s16 + $0x3c] sm:$0xe]  ;;  %v922_v35 = vrot.slane %v920_v29, 4  ;;  %v1630_v39 = vunpack.c.h.b16 %v8531_v6 }
  0x46   : > { %v951_v58 = vunpack.c.l.b16 %v914_v20  ;;  %v8400_v34 = vrot.slane %v861_v40, 9  ;;  %v1633_v50 = vpack.c.b16 %v1629_v47, %v1629_v47  ;;  %v863_v40 = vld [vmem:[%s10288_s16 + $0x54] sm:$0xe]  ;;  %vm3180_vm13 = vsmask.f32 7938 }
  0x47   : > { %v961_v41 = vpack.c.b16 %v948_v33, %v947_v32  ;;  %v9936_v33 = vld [vmem:[%s10288_s16 + $0xc] sm:$0xff]  ;;  %v1634_v51 = vpack.c.b16 %v1630_v39, %v1630_v39  ;;  %vm3183_vm14 = vsmask.f32 7954  ;;  %vm11988_vm15 = vmand %vm3120_vm8, %vm3180_vm13  ;;  %vm3794_vm2 = vcmask 130048  }
  0x48   : > { %v921_v42 = vsel %vm10471_vm7, %v8400_v34, %v920_v29  ;;  %v8536_v39 = vld [vmem:[%s14755_s1 + $0x68] sm:$0xf0]  ;;  %vm3184_vm1 = vmand %vm3121_vm9, %vm3183_vm14  ;;  %vm3155_vm5 = vsmask.f32 256  ;;  %vm3193_vm6 = vsmask.f32 4352 }
  0x49   : > { %1255 = vmatpush.bf16.msra.mxu2 %v8484_v52  ;;  %vm3156_vm8 = vsmask.f32 4368  ;;  %vm3191_vm9 = vmand %vm568_vm0, %vm3155_vm5 }
  0x4a   : > { %vm12023_vm13 = vmor %vm3155_vm5, %vm3156_vm8 }
  0x4f   : > { %8326 = vmatmul.msk.bf16.gmra.mxu0 %vm543_vm4, %v523_v59  ;;  %8334 = vmatmul.msk.bf16.gmra.mxu1 %vm543_vm4, %v523_v59  ;;  %v885_v59 = vrot.slane %v10292_v14, 5 }
  0x51   : > { %v887_v1 = vrot.slane %v885_v59, 4 }
  0x52   : > { %8380 = vmatmul.msk.bf16.gmra.mxu2 %vm543_vm4, %v9923_v0  ;;  %8388 = vmatmul.msk.bf16.gmra.mxu3 %vm543_vm4, %v9923_v0  ;;  %v8395_v0 = vrot.slane %v856_v60, 9 }
  0x53   : > { %v889_v4 = vsel %vm10471_vm7, %v887_v1, %v888_v63 }
  0x54   : > { %v886_v14 = vsel %vm10471_vm7, %v8395_v0, %v885_v59  ;;  %v944_v7 = vunpack.c.l.b16 %v889_v4  ;;  %v909_v59 = vrot.slane %v10398_v31, 5 }
  0x55   : > { %v943_v5 = vunpack.c.l.b16 %v886_v14 }
  0x57   : > { %v959_v8 = vpack.c.b16 %v944_v7, %v943_v5 }
  0x5f   : > { %8327 = vmatmul.msk.bf16.gmra.mxu0 %vm543_vm4, %v524_v43  ;;  %8335 = vmatmul.msk.bf16.gmra.mxu1 %vm543_vm4, %v524_v43  ;;  %v1246_v43 = vsel %vm568_vm0, %v1215_v36, 0 }
  0x60   : > { %1303 = vmatpush.bf16.msra.mxu3 %v1246_v43  ;;  %v924_v43 = vsel %vm10471_vm7, %v922_v35, %v923_v61  ;;  %v8534_v61 = vld [vmem:[%s14755_s1 + $0x60] sm:$0xf] }
  0x62   : > { %8381 = vmatmul.msk.bf16.gmra.mxu2 %vm543_vm4, %v9924_v48  ;;  %8389 = vmatmul.msk.bf16.gmra.mxu3 %vm543_vm4, %v9924_v48  ;;  %v906_v48 = vrot.slane %v10387_v11, 5  ;;  %v9928_v11 = vld [vmem:[%s10288_s16 + $0x48] sm:$0xff] }
  0x64   : > { %1304 = vmatpush.bf16.msra.mxu3 %v8488_v55  ;;  %v907_v63 = vsel %vm10471_vm7, %v8398_v56, %v906_v48  ;;  %v954_v55 = vunpack.c.l.b16 %v924_v43  ;;  %v1662_v56 = vsel %vm568_vm0, %v1633_v50, 0  ;;  %v8402_v43 = vrot.slane %v863_v40, 9  ;;  %v9938_v50 = vld [vmem:[%s10288_s16 + $0x24] sm:$0xff] }
  0x65   : > { %v949_v14 = vunpack.c.l.b16 %v907_v63  ;;  %1673 = vmatpush.bf16.msra.mxu0 %v1662_v56 }
  0x6f   : > { %8328 = vmatmul.msk.bf16.gmra.mxu0 %vm543_vm4, %v525_v57  ;;  %8336 = vmatmul.msk.bf16.gmra.mxu1 %vm543_vm4, %v525_v57  ;;  %v908_v57 = vrot.slane %v906_v48, 4 }
  0x71   : > { %v910_v0 = vsel %vm10471_vm7, %v908_v57, %v909_v59  ;;  %v1665_v57 = vsel %vm568_vm0, %v1634_v51, 0 }
  0x72   : > { %8382 = vmatmul.msk.bf16.gmra.mxu2 %vm543_vm4, %v9925_v62  ;;  %8390 = vmatmul.msk.bf16.gmra.mxu3 %vm543_vm4, %v9925_v62  ;;  %v950_v4 = vunpack.c.l.b16 %v910_v0 }
  0x73   : > { %1722 = vmatpush.bf16.msra.mxu1 %v1665_v57 }
  0x74   : > { %v962_v5 = vpack.c.b16 %v950_v4, %v949_v14  ;;  %v862_v14 = vld [vmem:[%s10288_s16 + $0x48] sm:$0xe] }
  0x75   : > { %v8401_v17 = vrot.slane %v862_v14, 9 }
  0x7f   : > { %8414 = vmatmul.msk.bf16.vlgmr.msrb.gmra.mxu0 %vm543_vm4, %v959_v8  ;;  %8422 = vmatmul.msk.bf16.vlgmr.msrb.gmra.mxu1 %vm543_vm4, %v959_v8 }
  0x82   : > { %8383 = vmatmul.msk.bf16.gmra.mxu2 %vm543_vm4, %v9926_v12  ;;  %8391 = vmatmul.msk.bf16.gmra.mxu3 %vm543_vm4, %v9926_v12 }
  0x8f   : > { %8415 = vmatmul.msk.bf16.gmra.mxu0 %vm543_vm4, %v960_v21  ;;  %8423 = vmatmul.msk.bf16.gmra.mxu1 %vm543_vm4, %v960_v21  ;;  %v917_v21 = vsel %vm10471_vm7, %v915_v18, %v916_v37 }
  0x92   : > { %8384 = vmatmul.msk.bf16.gmra.mxu2 %vm543_vm4, %v9927_v26  ;;  %8392 = vmatmul.msk.bf16.gmra.mxu3 %vm543_vm4, %v9927_v26  ;;  %v952_v26 = vunpack.c.l.b16 %v917_v21 }
  0x94   : > { %v963_v53 = vpack.c.b16 %v952_v26, %v951_v58 }
  0x9c   : > { %v10510_v45 = vpop.f32.mrf.mxu0  ;;  %v10512_v46 = vpop.f32.mrf.mxu1 }
  0x9f   : > { %8416 = vmatmul.msk.bf16.gmra.mxu0 %vm543_vm4, %v961_v41  ;;  %8424 = vmatmul.msk.bf16.gmra.mxu1 %vm543_vm4, %v961_v41 }
  0xa2   : > { %8385 = vmatmul.msk.bf16.gmra.mxu2 %vm543_vm4, %v9928_v11  ;;  %8393 = vmatmul.msk.bf16.gmra.mxu3 %vm543_vm4, %v9928_v11  ;;  %v953_v11 = vunpack.c.l.b16 %v921_v42 }
  0xa4   : > { %v10534_v60 = vpop.f32.mrf.mxu0  ;;  %v10536_v62 = vpop.f32.mrf.mxu1  ;;  %v964_v59 = vpack.c.b16 %v954_v55, %v953_v11  ;;  %v8505_v11 = vld [vmem:[%s10288_s16 + $0xc] sm:$0xf]  ;;  %v10671_v55 = vld [vmem:[%s10288_s16 + $0x10] sm:$0xf] }
  0xa5   : > { %v10542_v1 = vpop.f32.mrf.mxu2  ;;  %v10544_v31 = vpop.f32.mrf.mxu3  ;;  %v1403_v56 = vshrl.u32 %v8505_v11, 16  ;;  %v1406_v57 = vshll.u32 %v8505_v11, 16 }
  0xac   : > { %v10546_v7 = vpop.f32.mrf.mxu0  ;;  %v10548_v8 = vpop.f32.mrf.mxu1 }
  0xad   : > { %v10552_v12 = vpop.f32.mrf.mxu2  ;;  %v10554_v13 = vpop.f32.mrf.mxu3 }
  0xaf   : > { %8417 = vmatmul.msk.bf16.gmra.mxu0 %vm543_vm4, %v962_v5  ;;  %8425 = vmatmul.msk.bf16.gmra.mxu1 %vm543_vm4, %v962_v5 }
  0xb2   : > { %8386 = vmatmul.msk.bf16.gmra.mxu2 %vm543_vm4, %v9929_v16  ;;  %8394 = vmatmul.msk.bf16.gmra.mxu3 %vm543_vm4, %v9929_v16  ;;  %v930_v16 = vrot.slane %v10305_v23, 5 }
  0xb4   : > { %v10562_v44 = vpop.f32.mrf.mxu0  ;;  %v10564_v19 = vpop.f32.mrf.mxu1 }
  0xb5   : > { %v10570_v24 = vpop.f32.mrf.mxu2  ;;  %v10572_v25 = vpop.f32.mrf.mxu3 }
  0xbc   : > { %v10574_v27 = vpop.f32.mrf.mxu0  ;;  %v10576_v28 = vpop.f32.mrf.mxu1 }
  0xbd   : > { %v10580_v30 = vpop.f32.mrf.mxu2  ;;  %v10582_v32 = vpop.f32.mrf.mxu3 }
  0xbe   : > { %14803 = vst [vmem:[#allocation5_spill] sm:$0xff] %v10580_v30 }
  0xbf   : > { %14804 = vst [vmem:[#allocation6_spill] sm:$0xff] %v10582_v32  ;;  %8418 = vmatmul.msk.bf16.gmra.mxu0 %vm543_vm4, %v963_v53  ;;  %8426 = vmatmul.msk.bf16.gmra.mxu1 %vm543_vm4, %v963_v53 }
  0xc2   : > { %8489 = vmatmul.msk.bf16.vlgmr.msra.gmra.mxu2 %vm543_vm4, %v9936_v33  ;;  %8497 = vmatmul.msk.bf16.vlgmr.msra.gmra.mxu3 %vm543_vm4, %v9936_v33  ;;  %v934_v33 = vrot.slane %v10334_v3, 5  ;;  %v937_v3 = vrot.slane %v10339_v9, 5 }
  0xc4   : > { %v10593_v36 = vpop.f32.mrf.mxu0  ;;  %v10595_v41 = vpop.f32.mrf.mxu1  ;;  %v936_v9 = vrot.slane %v934_v33, 4 }
  0xc5   : > { %v767_v48 = vpop.f32.mrf.mxu2  ;;  %v816_v49 = vpop.f32.mrf.mxu3 }
  0xc6   : > { %v10602_v52 = vadd.f32 %v767_v48, %v10510_v45  ;;  %v10605_v54 = vadd.f32 %v816_v49, %v10512_v46  ;;  %v927_v45 = vrot.slane %v10302_v22, 5 }
  0xc8   : > { %v929_v18 = vrot.slane %v927_v45, 4 }
  0xca   : > { %v931_v37 = vsel %vm10471_vm7, %v929_v18, %v930_v16  ;;  %v1405_v18 = vrot.slane %v1403_v56, 4 }
  0xcb   : > { %v956_v53 = vunpack.c.l.b16 %v931_v37 }
  0xcc   : > { %v10609_v63 = vpop.f32.mrf.mxu0  ;;  %v10611_v0 = vpop.f32.mrf.mxu1 }
  0xcd   : > { %v769_v4 = vpop.f32.mrf.mxu2  ;;  %v818_v46 = vpop.f32.mrf.mxu3 }
  0xce   : > { %v10616_v5 = vadd.f32 %v769_v4, %v10534_v60  ;;  %v10619_v15 = vadd.f32 %v818_v46, %v10536_v62  ;;  %v928_v62 = vsel %vm10471_vm7, %v8401_v17, %v927_v45  ;;  %v1416_v45 = vshrl.u32 %v10671_v55, 16 }
  0xcf   : > { %8419 = vmatmul.msk.bf16.gmra.mxu0 %vm543_vm4, %v964_v59  ;;  %8427 = vmatmul.msk.bf16.gmra.mxu1 %vm543_vm4, %v964_v59  ;;  %v955_v26 = vunpack.c.l.b16 %v928_v62  ;;  %v1412_v59 = vshll.u32 %v10671_v55, 16  ;;  %v1408_v62 = vrot.slane %v1406_v57, 5 }
  0xd1   : > { %v965_v29 = vpack.c.b16 %v956_v53, %v955_v26  ;;  %v1418_v26 = vrot.slane %v1416_v45, 4  ;;  %v10692_v53 = vld [vmem:[%s10288_s16 + $0x14] sm:$0x1] }
  0xd2   : > { %8490 = vmatmul.msk.bf16.gmra.mxu2 %vm543_vm4, %v9937_v10  ;;  %8498 = vmatmul.msk.bf16.gmra.mxu3 %vm543_vm4, %v9937_v10 }
  0xd4   : > { %v10627_v22 = vpop.f32.mrf.mxu0  ;;  %v10629_v60 = vpop.f32.mrf.mxu1 }
  0xd5   : > { %v772_v20 = vpop.f32.mrf.mxu2  ;;  %v821_v21 = vpop.f32.mrf.mxu3 }
  0xd6   : > { %v10636_v23 = vadd.f32 %v772_v20, %v10546_v7  ;;  %v10639_v58 = vadd.f32 %v821_v21, %v10548_v8  ;;  %v9947_v7 = vld [vmem:[%s14755_s1 + $0x64] sm:$0xf0]  ;;  %v9946_v8 = vld [vmem:[%s14755_s1 + $0x64] sm:$0xf]  ;;  %v1414_v21 = vrot.slane %v1412_v59, 5 }
  0xd7   : > { %v8535_v47 = vor.u32 %v9947_v7, %v8534_v61  ;;  %v8539_v51 = vor.u32 %v9946_v8, %v8536_v39  ;;  %v1422_v61 = vshll.u32 %v10692_v53, 16 }
  0xd9   : > { %1674 = vmatpush.bf16.msra.mxu0 %v8535_v47  ;;  %1723 = vmatpush.bf16.msra.mxu1 %v8539_v51  ;;  %v1424_v39 = vrot.slane %v1422_v61, 5 }
  0xdc   : > { %v10643_v34 = vpop.f32.mrf.mxu0  ;;  %v10645_v35 = vpop.f32.mrf.mxu1 }
  0xdd   : > { %v774_v6 = vpop.f32.mrf.mxu2  ;;  %v823_v42 = vpop.f32.mrf.mxu3 }
  0xde   : > { %v10661_v48 = vadd.f32 %v774_v6, %v10562_v44  ;;  %v10664_v49 = vadd.f32 %v823_v42, %v10564_v19  ;;  %v935_v44 = vsel %vm10471_vm7, %v8402_v43, %v934_v33  ;;  %v938_v19 = vsel %vm10471_vm7, %v936_v9, %v937_v3  ;;  %v9939_v43 = vld [vmem:[%s10288_s16 + $0x30] sm:$0xff]  ;;  %v10710_v9 = vld [vmem:[%s10288_s16 + $0x1c] sm:$0xf] }
  0xdf   : > { %8420 = vmatmul.msk.bf16.gmra.mxu0 %vm543_vm4, %v965_v29  ;;  %8428 = vmatmul.msk.bf16.gmra.mxu1 %vm543_vm4, %v965_v29  ;;  %v957_v16 = vunpack.c.l.b16 %v935_v44  ;;  %v958_v17 = vunpack.c.l.b16 %v938_v19  ;;  %v1409_v29 = vor.u32 %v1408_v62, %v1405_v18  ;;  %v1419_v33 = vor.u32 %v1418_v26, %v1414_v21 }
  0xe0   : > { %v1436_v44 = vshll.u32 %v10710_v9, 16  ;;  %v1440_v19 = vshrl.u32 %v10710_v9, 16 }
  0xe1   : > { %v966_v40 = vpack.c.b16 %v958_v17, %v957_v16  ;;  %v1420_v47 = vrot.slane %v1419_v33, 4 }
  0xe2   : > { %8491 = vmatmul.msk.bf16.gmra.mxu2 %vm543_vm4, %v9938_v50  ;;  %8499 = vmatmul.msk.bf16.gmra.mxu3 %vm543_vm4, %v9938_v50  ;;  %v8508_v50 = vld [vmem:[%s10288_s16 + $0x18] sm:$0xf]  ;;  %v1442_v26 = vrot.slane %v1440_v19, 4 }
  0xe3   : > { %v1427_v51 = vshrl.u32 %v8508_v50, 16  ;;  %v1430_v11 = vshll.u32 %v8508_v50, 16  ;;  %v10742_v50 = vld [vmem:[%s10288_s16 + $0x28] sm:$0xf] }
  0xe4   : > { %v10681_v14 = vpop.f32.mrf.mxu0  ;;  %v10683_v4 = vpop.f32.mrf.mxu1 }
  0xe5   : > { %v777_v46 = vpop.f32.mrf.mxu2  ;;  %v826_v10 = vpop.f32.mrf.mxu3  ;;  %v1429_v18 = vrot.slane %v1427_v51, 4  ;;  %v1432_v62 = vrot.slane %v1430_v11, 5  ;;  %v9940_v51 = vld [vmem:[%s10288_s16 + $0x3c] sm:$0xff] }
  0xe6   : > { %v10686_v37 = vadd.f32 %v777_v46, %v10574_v27  ;;  %v10689_v20 = vadd.f32 %v826_v10, %v10576_v28  ;;  %v1410_v28 = vrot.slane %v1409_v29, 4  ;;  %v10731_v29 = vld [vmem:[%s10288_s16 + $0x20] sm:$0x1] }
  0xe7   : > { %v1433_v33 = vor.u32 %v1432_v62, %v1429_v18 }
  0xec   : > { %v10695_v7 = vpop.f32.mrf.mxu0  ;;  %v10697_v8 = vpop.f32.mrf.mxu1 }
  0xed   : > { %v779_v27 = vpop.f32.mrf.mxu2  ;;  %v828_v3 = vpop.f32.mrf.mxu3 }
  0xee   : > { %v10700_v6 = vadd.f32 %v779_v27, %v10593_v36  ;;  %v10703_v42 = vadd.f32 %v828_v3, %v10595_v41  ;;  %v1415_v36 = vsel %vm10316_vm3, %v1410_v28, %v1414_v21  ;;  %v1425_v41 = vsel %vm10316_vm3, %v1420_v47, %v1424_v39 }
  0xef   : > { %8421 = vmatmul.msk.bf16.gmra.mxu0 %vm543_vm4, %v966_v40  ;;  %8429 = vmatmul.msk.bf16.gmra.mxu1 %vm543_vm4, %v966_v40  ;;  %v1598_v46 = vunpack.c.l.b16 %v1415_v36  ;;  %v1599_v10 = vunpack.c.l.b16 %v1425_v41  ;;  %v1438_v21 = vrot.slane %v1436_v44, 5  ;;  %v1446_v28 = vshll.u32 %v10731_v29, 16 }
  0xf1   : > { %v1614_v40 = vpack.c.b16 %v1599_v10, %v1598_v46  ;;  %v1443_v3 = vor.u32 %v1442_v26, %v1438_v21 }
  0xf2   : > { %8492 = vmatmul.msk.bf16.gmra.mxu2 %vm543_vm4, %v9939_v43  ;;  %8500 = vmatmul.msk.bf16.gmra.mxu3 %vm543_vm4, %v9939_v43  ;;  %v8511_v43 = vld [vmem:[%s10288_s16 + $0x24] sm:$0xf] }
  0xf3   : > { %v1444_v11 = vrot.slane %v1443_v3, 4  ;;  %v1451_v44 = vshrl.u32 %v8511_v43, 16  ;;  %v1454_v19 = vshll.u32 %v8511_v43, 16 }
  0xf4   : > { %v10718_v56 = vpop.f32.mrf.mxu0  ;;  %v10720_v57 = vpop.f32.mrf.mxu1 }
  0xf5   : > { %v782_v59 = vpop.f32.mrf.mxu2  ;;  %v831_v45 = vpop.f32.mrf.mxu3  ;;  %v1453_v18 = vrot.slane %v1451_v44, 4  ;;  %v1456_v62 = vrot.slane %v1454_v19, 5 }
  0xf6   : > { %v10725_v16 = vadd.f32 %v782_v59, %v10609_v63  ;;  %v10728_v17 = vadd.f32 %v831_v45, %v10611_v0  ;;  %v1460_v59 = vshll.u32 %v10742_v50, 16  ;;  %v1464_v45 = vshrl.u32 %v10742_v50, 16 }
  0xfc   : > { %v1021_v61 = vpop.f32.mrf.mxu0  ;;  %v1070_v27 = vpop.f32.mrf.mxu1 }
  0xfd   : > { %v10735_v63 = vadd.f32 %v1021_v61, %v10602_v52  ;;  %v10738_v0 = vadd.f32 %v1070_v27, %v10605_v54  ;;  %v784_v47 = vpop.f32.mrf.mxu2  ;;  %v833_v39 = vpop.f32.mrf.mxu3  ;;  %v1434_v52 = vrot.slane %v1433_v33, 4  ;;  %v1448_v54 = vrot.slane %v1446_v28, 5  ;;  %v10768_v28 = vld [vmem:[%s10288_s16 + $0x2c] sm:$0x1] }
  0xfe   : > { %v10745_v36 = vadd.f32 %v784_v47, %v10627_v22  ;;  %v10748_v41 = vadd.f32 %v833_v39, %v10629_v60  ;;  %v1462_v33 = vrot.slane %v1460_v59, 5  ;;  %v1466_v61 = vrot.slane %v1464_v45, 4 }
  0xff   : > { %8540 = vmatmul.msk.bf16.vlgmr.msra.gmra.mxu0 %vm543_vm4, %v1614_v40  ;;  %8548 = vmatmul.msk.bf16.vlgmr.msra.gmra.mxu1 %vm543_vm4, %v1614_v40  ;;  %v1439_v46 = vsel %vm10316_vm3, %v1434_v52, %v1438_v21  ;;  %v1449_v10 = vsel %vm10316_vm3, %v1444_v11, %v1448_v54 }
 0x100   : > { %v1600_v47 = vunpack.c.l.b16 %v1439_v46  ;;  %v1601_v39 = vunpack.c.l.b16 %v1449_v10  ;;  %v9941_v10 = vld [vmem:[%s10288_s16 + $0x48] sm:$0xff] }
 0x102   : > { %8493 = vmatmul.msk.bf16.gmra.mxu2 %vm543_vm4, %v9940_v51  ;;  %8501 = vmatmul.msk.bf16.gmra.mxu3 %vm543_vm4, %v9940_v51  ;;  %v1467_v51 = vor.u32 %v1466_v61, %v1462_v33  ;;  %v1615_v52 = vpack.c.b16 %v1601_v39, %v1600_v47 }
 0x104   : > { %v1023_v22 = vpop.f32.mrf.mxu0  ;;  %v1072_v60 = vpop.f32.mrf.mxu1 }
 0x105   : > { %v10762_v26 = vadd.f32 %v1023_v22, %v10616_v5  ;;  %v10765_v40 = vadd.f32 %v1072_v60, %v10619_v15  ;;  %v787_v27 = vpop.f32.mrf.mxu2  ;;  %v836_v3 = vpop.f32.mrf.mxu3  ;;  %v1457_v5 = vor.u32 %v1456_v62, %v1453_v18  ;;  %v1470_v15 = vshll.u32 %v10768_v28, 16  ;;  %v10794_v18 = vld [vmem:[%s10288_s16 + $0x34] sm:$0xf] }
 0x106   : > { %v10771_v43 = vadd.f32 %v787_v27, %v10643_v34  ;;  %v10774_v21 = vadd.f32 %v836_v3, %v10645_v35  ;;  %v1468_v35 = vrot.slane %v1467_v51, 4  ;;  %v1484_v27 = vshll.u32 %v10794_v18, 16 }
 0x107   : > { %v1458_v44 = vrot.slane %v1457_v5, 4  ;;  %v1472_v59 = vrot.slane %v1470_v15, 5 }
 0x109   : > { %v1473_v62 = vsel %vm10316_vm3, %v1468_v35, %v1472_v59  ;;  %v8574_v59 = vld [vmem:[%s14755_s1 + $0x88] sm:$0x11] }
 0x10a   : > { %v1603_v51 = vunpack.c.l.b16 %v1473_v62 }
 0x10c   : > { %v1026_v11 = vpop.f32.mrf.mxu0  ;;  %v1075_v54 = vpop.f32.mrf.mxu1 }
 0x10d   : > { %v10778_v19 = vadd.f32 %v1026_v11, %v10636_v23  ;;  %v10781_v34 = vadd.f32 %v1075_v54, %v10639_v58  ;;  %v789_v45 = vpop.f32.mrf.mxu2  ;;  %v838_v22 = vpop.f32.mrf.mxu3  ;;  %v8514_v23 = vld [vmem:[%s10288_s16 + $0x30] sm:$0xf]  ;;  %v1463_v58 = vsel %vm10316_vm3, %v1458_v44, %v1462_v33  ;;  %v1486_v44 = vrot.slane %v1484_v27, 5 }
 0x10e   : > { %v10784_v60 = vadd.f32 %v789_v45, %v10681_v14  ;;  %v10787_v46 = vadd.f32 %v838_v22, %v10683_v4  ;;  %v1475_v61 = vshrl.u32 %v8514_v23, 16  ;;  %v1478_v14 = vshll.u32 %v8514_v23, 16 }
 0x10f   : > { %8541 = vmatmul.msk.bf16.gmra.mxu0 %vm543_vm4, %v1615_v52  ;;  %8549 = vmatmul.msk.bf16.gmra.mxu1 %vm543_vm4, %v1615_v52  ;;  %v1488_v4 = vshrl.u32 %v10794_v18, 16  ;;  %v1602_v5 = vunpack.c.l.b16 %v1463_v58  ;;  %v1921_v22 = vunpack.c.h.b16 %v8574_v59 }
 0x110   : > { %v1477_v11 = vrot.slane %v1475_v61, 4  ;;  %v1480_v54 = vrot.slane %v1478_v14, 5 }
 0x111   : > { %v1490_v35 = vrot.slane %v1488_v4, 4  ;;  %v1925_v58 = vpack.c.b16 %v1921_v22, %v1921_v22  ;;  %v1616_v14 = vpack.c.b16 %v1603_v51, %v1602_v5  ;;  %v8577_v5 = vld [vmem:[%s14755_s1 + $0x78] sm:$0xf]  ;;  %v9949_v51 = vld [vmem:[%s14755_s1 + $0x7c] sm:$0xf0] }
 0x112   : > { %8494 = vmatmul.msk.bf16.gmra.mxu2 %vm543_vm4, %v9941_v10  ;;  %8502 = vmatmul.msk.bf16.gmra.mxu3 %vm543_vm4, %v9941_v10  ;;  %v10820_v10 = vld [vmem:[%s10288_s16 + $0x38] sm:$0x1]  ;;  %v1481_v62 = vor.u32 %v1480_v54, %v1477_v11 }
 0x113   : > { %v1491_v61 = vor.u32 %v1490_v35, %v1486_v44  ;;  %v1494_v27 = vshll.u32 %v10820_v10, 16 }
 0x114   : > { %v1028_v3 = vpop.f32.mrf.mxu0  ;;  %v1077_v47 = vpop.f32.mrf.mxu1  ;;  %v1482_v54 = vrot.slane %v1481_v62, 4  ;;  %v8517_v62 = vld [vmem:[%s10288_s16 + $0x3c] sm:$0xf] }
 0x115   : > { %v10805_v39 = vadd.f32 %v1028_v3, %v10661_v48  ;;  %v10808_v33 = vadd.f32 %v1077_v47, %v10664_v49  ;;  %v792_v15 = vpop.f32.mrf.mxu2  ;;  %v841_v52 = vpop.f32.mrf.mxu3  ;;  %v1920_v49 = vunpack.c.l.b16 %v8574_v59  ;;  %v1956_v3 = vsel %vm568_vm0, %v1925_v58, 0  ;;  %v8579_v59 = vld [vmem:[%s14755_s1 + $0x80] sm:$0xf0] }
 0x116   : > { %v10814_v45 = vadd.f32 %v792_v15, %v10695_v7  ;;  %v10817_v48 = vadd.f32 %v841_v52, %v10697_v8  ;;  %2013 = vmatpush.bf16.msrb.mxu3 %v1956_v3  ;;  %v9948_v52 = vld [vmem:[%s14755_s1 + $0x7c] sm:$0xf]  ;;  %v1492_v35 = vrot.slane %v1491_v61, 4  ;;  %v1496_v58 = vrot.slane %v1494_v27, 5  ;;  %v10854_v61 = vld [vmem:[%s10288_s16 + $0x40] sm:$0xf] }
 0x117   : > { %v1924_v23 = vpack.c.b16 %v1920_v49, %v1920_v49  ;;  %14805 = vst [vmem:[#allocation7_spill] sm:$0xff] %v10854_v61  ;;  %v1499_v27 = vshrl.u32 %v8517_v62, 16 }
 0x119   : > { %v1953_v4 = vsel %vm568_vm0, %v1924_v23, 0  ;;  %v9942_v23 = vld [vmem:[%s10288_s16 + $0x54] sm:$0xff] }
 0x11a   : > { %1964 = vmatpush.bf16.msrb.mxu2 %v1953_v4  ;;  %v8582_v4 = vor.u32 %v9948_v52, %v8579_v59 }
 0x11c   : > { %v1031_v7 = vpop.f32.mrf.mxu0  ;;  %v1080_v47 = vpop.f32.mrf.mxu1  ;;  %2014 = vmatpush.bf16.msrb.mxu3 %v8582_v4 }
 0x11d   : > { %v10826_v8 = vadd.f32 %v1031_v7, %v10686_v37  ;;  %v10829_v15 = vadd.f32 %v1080_v47, %v10689_v20  ;;  %v794_v11 = vpop.f32.mrf.mxu2  ;;  %v843_v37 = vpop.f32.mrf.mxu3  ;;  %v8578_v20 = vor.u32 %v9949_v51, %v8577_v5  ;;  %v1502_v7 = vshll.u32 %v8517_v62, 16 }
 0x11e   : > { %v10844_v49 = vadd.f32 %v794_v11, %v10718_v56  ;;  %v10847_v22 = vadd.f32 %v843_v37, %v10720_v57  ;;  %v1487_v56 = vsel %vm10316_vm3, %v1482_v54, %v1486_v44  ;;  %v1497_v57 = vsel %vm10316_vm3, %v1492_v35, %v1496_v58  ;;  %v10875_v58 = vld [vmem:[%s10288_s16 + $0x44] sm:$0x1] }
 0x11f   : > { %8542 = vmatmul.msk.bf16.gmra.mxu0 %vm543_vm4, %v1616_v14  ;;  %8550 = vmatmul.msk.bf16.gmra.mxu1 %vm543_vm4, %v1616_v14  ;;  %v1508_v47 = vshll.u32 %v10854_v61, 16  ;;  %v1512_v5 = vshrl.u32 %v10854_v61, 16  ;;  %v1604_v37 = vunpack.c.l.b16 %v1487_v56  ;;  %v1605_v54 = vunpack.c.l.b16 %v1497_v57  ;;  %14806 = vst [vmem:[#allocation8_spill] sm:$0xff] %v10875_v58 }
 0x120   : > { %1965 = vmatpush.bf16.msrb.mxu2 %v8578_v20  ;;  %v1501_v35 = vrot.slane %v1499_v27, 4  ;;  %v1504_v20 = vrot.slane %v1502_v7, 5 }
 0x121   : > { %v1510_v59 = vrot.slane %v1508_v47, 5  ;;  %v8520_v47 = vld [vmem:[%s10288_s16 + $0x48] sm:$0xf] }
 0x122   : > { %8495 = vmatmul.msk.bf16.gmra.mxu2 %vm543_vm4, %v9942_v23  ;;  %8503 = vmatmul.msk.bf16.gmra.mxu3 %vm543_vm4, %v9942_v23  ;;  %v1514_v23 = vrot.slane %v1512_v5, 4  ;;  %v9943_v5 = vld [vmem:[%s10288_s16 + $0x60] sm:$0xff] }
 0x124   : > { %v1033_v3 = vpop.f32.mrf.mxu0  ;;  %v1082_v14 = vpop.f32.mrf.mxu1 }
 0x125   : > { %v10865_v51 = vadd.f32 %v1033_v3, %v10700_v6  ;;  %v10868_v52 = vadd.f32 %v1082_v14, %v10703_v42  ;;  %v10870_v11 = vpop.f32.mrf.mxu2  ;;  %v10872_v44 = vpop.f32.mrf.mxu3  ;;  %v1617_v6 = vpack.c.b16 %v1605_v54, %v1604_v37  ;;  %v1505_v42 = vor.u32 %v1504_v20, %v1501_v35  ;;  %v10893_v37 = vld [vmem:[%s10288_s16 + $0x4c] sm:$0xf] }
 0x126   : > { %v1515_v3 = vor.u32 %v1514_v23, %v1510_v59  ;;  %v1518_v14 = vshll.u32 %v10875_v58, 16  ;;  %14809 = vst [vmem:[#allocation11_spill] sm:$0xff] %v10893_v37  ;;  %v1831_v23 = vrot.slane %v10671_v55, 5 }
 0x127   : > { %v1506_v54 = vrot.slane %v1505_v42, 4 }
 0x128   : > { %v1516_v35 = vrot.slane %v1515_v3, 4  ;;  %v1520_v20 = vrot.slane %v1518_v14, 5  ;;  %v1833_v3 = vrot.slane %v1831_v23, 4  ;;  %v1834_v14 = vrot.slane %v10692_v53, 5 }
 0x129   : > { %v1511_v42 = vsel %vm10316_vm3, %v1506_v54, %v1510_v59 }
 0x12a   : > { %v1521_v55 = vsel %vm10316_vm3, %v1516_v35, %v1520_v20  ;;  %v1606_v54 = vunpack.c.l.b16 %v1511_v42  ;;  %v10917_v20 = vld [vmem:[%s10288_s16 + $0x50] sm:$0x1] }
 0x12b   : > { %v1607_v35 = vunpack.c.l.b16 %v1521_v55  ;;  %14812 = vst [vmem:[#allocation14_spill] sm:$0xff] %v10917_v20 }
 0x12c   : > { %v1036_v4 = vpop.f32.mrf.mxu0  ;;  %v1085_v62 = vpop.f32.mrf.mxu1 }
 0x12d   : > { %v10879_v56 = vadd.f32 %v1036_v4, %v10725_v16  ;;  %v10882_v57 = vadd.f32 %v1085_v62, %v10728_v17  ;;  %v10884_v27 = vpop.f32.mrf.mxu2  ;;  %v10886_v7 = vpop.f32.mrf.mxu3  ;;  %v8556_v16 = vld [vmem:[%s10288_s16 + $0xc] sm:$0xe]  ;;  %v1523_v17 = vshrl.u32 %v8520_v47, 16  ;;  %v1526_v4 = vshll.u32 %v8520_v47, 16 }
 0x12e   : > { %v1532_v62 = vshll.u32 %v10893_v37, 16 }
 0x12f   : > { %14807 = vst [vmem:[#allocation9_spill] sm:$0xff] %v10879_v56  ;;  %8543 = vmatmul.msk.bf16.gmra.mxu0 %vm543_vm4, %v1617_v6  ;;  %8551 = vmatmul.msk.bf16.gmra.mxu1 %vm543_vm4, %v1617_v6  ;;  %v8564_v56 = vrot.slane %v8556_v16, 9  ;;  %v1528_v16 = vrot.slane %v1526_v4, 5  ;;  %v1618_v4 = vpack.c.b16 %v1607_v35, %v1606_v54 }
 0x130   : > { %14808 = vst [vmem:[#allocation10_spill] sm:$0xff] %v10882_v57  ;;  %v1536_v57 = vshrl.u32 %v10893_v37, 16  ;;  %v1534_v61 = vrot.slane %v1532_v62, 5 }
 0x131   : > { %v1832_v53 = vsel %vm10471_vm7, %v8564_v56, %v1831_v23  ;;  %v8557_v23 = vld [vmem:[%s10288_s16 + $0x18] sm:$0xe] }
 0x132   : > { %8496 = vmatmul.msk.bf16.gmra.mxu2 %vm543_vm4, %v9943_v5  ;;  %8504 = vmatmul.msk.bf16.gmra.mxu3 %vm543_vm4, %v9943_v5  ;;  %v1525_v5 = vrot.slane %v1523_v17, 4  ;;  %v1538_v59 = vrot.slane %v1536_v57, 4  ;;  %v1542_v17 = vshll.u32 %v10917_v20, 16  ;;  %v8565_v35 = vrot.slane %v8557_v23, 9 }
 0x134   : > { %v1038_v6 = vpop.f32.mrf.mxu0  ;;  %v1087_v58 = vpop.f32.mrf.mxu1 }
 0x135   : > { %v10907_v47 = vadd.f32 %v1038_v6, %v10745_v36  ;;  %v10910_v37 = vadd.f32 %v1087_v58, %v10748_v41  ;;  %v10912_v32 = vpop.f32.mrf.mxu2  ;;  %v10914_v30 = vpop.f32.mrf.mxu3  ;;  %v1835_v36 = vsel %vm10471_vm7, %v1833_v3, %v1834_v14  ;;  %v1529_v41 = vor.u32 %v1528_v16, %v1525_v5 }
 0x136   : > { %v1539_v58 = vor.u32 %v1538_v59, %v1534_v61  ;;  %v1889_v6 = vunpack.c.l.b16 %v1832_v53  ;;  %v1890_v62 = vunpack.c.l.b16 %v1835_v36  ;;  %v1838_v3 = vrot.slane %v10710_v9, 5  ;;  %v10940_v53 = vld [vmem:[%s10288_s16 + $0x58] sm:$0xf] }
 0x137   : > { %14810 = vst [vmem:[#allocation12_spill] sm:$0xff] %v10907_v47  ;;  %v1530_v56 = vrot.slane %v1529_v41, 4  ;;  %v1544_v59 = vrot.slane %v1542_v17, 5  ;;  %v1841_v9 = vrot.slane %v10731_v29, 5 }
 0x138   : > { %14811 = vst [vmem:[#allocation13_spill] sm:$0xff] %v10910_v37  ;;  %v1540_v16 = vrot.slane %v1539_v58, 4  ;;  %v1905_v54 = vpack.c.b16 %v1890_v62, %v1889_v6  ;;  %v1840_v36 = vrot.slane %v1838_v3, 4  ;;  %v1560_v6 = vshrl.u32 %v10940_v53, 16 }
 0x139   : > { %14815 = vst [vmem:[#allocation17_spill] sm:$0xff] %v10940_v53 }
 0x13a   : > { %v1545_v41 = vsel %vm10316_vm3, %v1540_v16, %v1544_v59 }
 0x13c   : > { %v1041_v57 = vpop.f32.mrf.mxu0  ;;  %v1090_v42 = vpop.f32.mrf.mxu1 }
 0x13d   : > { %v10925_v55 = vadd.f32 %v1041_v57, %v10771_v43  ;;  %v10928_v37 = vadd.f32 %v1090_v42, %v10774_v21  ;;  %v10932_v14 = vpop.f32.mrf.mxu2  ;;  %v10934_v5 = vpop.f32.mrf.mxu3  ;;  %v8523_v43 = vld [vmem:[%s10288_s16 + $0x54] sm:$0xf]  ;;  %v1535_v21 = vsel %vm10316_vm3, %v1530_v56, %v1534_v61  ;;  %v8617_v61 = vld [vmem:[%s14755_s1 + $0xa0] sm:$0x11]  ;;  %v1839_v42 = vsel %vm10471_vm7, %v8565_v35, %v1838_v3 }
 0x13e   : > { %v1547_v58 = vshrl.u32 %v8523_v43, 16  ;;  %v1550_v17 = vshll.u32 %v8523_v43, 16  ;;  %v1608_v29 = vunpack.c.l.b16 %v1535_v21  ;;  %v2156_v56 = vunpack.c.l.b16 %v8617_v61 }
 0x13f   : > { %14813 = vst [vmem:[#allocation15_spill] sm:$0xff] %v10925_v55  ;;  %8544 = vmatmul.msk.bf16.gmra.mxu0 %vm543_vm4, %v1618_v4  ;;  %8552 = vmatmul.msk.bf16.gmra.mxu1 %vm543_vm4, %v1618_v4  ;;  %v1556_v4 = vshll.u32 %v10940_v53, 16  ;;  %v2157_v23 = vunpack.c.h.b16 %v8617_v61  ;;  %v1842_v43 = vsel %vm10471_vm7, %v1840_v36, %v1841_v9  ;;  %v1562_v61 = vrot.slane %v1560_v6, 4 }
 0x140   : > { %14814 = vst [vmem:[#allocation16_spill] sm:$0xff] %v10928_v37  ;;  %v1549_v55 = vrot.slane %v1547_v58, 4  ;;  %v1552_v21 = vrot.slane %v1550_v17, 5  ;;  %v2160_v20 = vpack.c.b16 %v2156_v56, %v2156_v56  ;;  %v1891_v9 = vunpack.c.l.b16 %v1839_v42 }
 0x141   : > { %v2161_v47 = vpack.c.b16 %v2157_v23, %v2157_v23  ;;  %v1892_v58 = vunpack.c.l.b16 %v1842_v43  ;;  %v10994_v43 = vld [vmem:[%s10288_s16 + $0x64] sm:$0xf] }
 0x142   : > { %8583 = vmatmul.msk.bf16.vlgmr.msrb.gmra.mxu2 %vm543_vm4, %v1905_v54  ;;  %8591 = vmatmul.msk.bf16.vlgmr.msrb.gmra.mxu3 %vm543_vm4, %v1905_v54  ;;  %v1609_v54 = vunpack.c.l.b16 %v1545_v41  ;;  %v2189_v41 = vsel %vm568_vm0, %v2160_v20, 0  ;;  %v1553_v17 = vor.u32 %v1552_v21, %v1549_v55  ;;  %v1845_v55 = vrot.slane %v10742_v50, 5 }
 0x143   : > { %v2192_v36 = vsel %vm568_vm0, %v2161_v47, 0  ;;  %2200 = vmatpush.bf16.msrb.mxu0 %v2189_v41  ;;  %v1906_v6 = vpack.c.b16 %v1892_v58, %v1891_v9 }
 0x144   : > { %v1043_v62 = vpop.f32.mrf.mxu0  ;;  %v1092_v57 = vpop.f32.mrf.mxu1  ;;  %2249 = vmatpush.bf16.msrb.mxu1 %v2192_v36  ;;  %v1554_v42 = vrot.slane %v1553_v17, 4  ;;  %v1580_v17 = vshll.u32 %v10994_v43, 16 }
 0x145   : > { %v10957_v16 = vadd.f32 %v1043_v62, %v10784_v60  ;;  %v10960_v59 = vadd.f32 %v1092_v57, %v10787_v46  ;;  %v1257_v53 = vpop.f32.mrf.mxu2  ;;  %v1306_v37 = vpop.f32.mrf.mxu3  ;;  %v1558_v60 = vrot.slane %v1556_v4, 5  ;;  %v10971_v46 = vld [vmem:[%s10288_s16 + $0x5c] sm:$0x1]  ;;  %v1619_v62 = vpack.c.b16 %v1609_v54, %v1608_v29  ;;  %v8526_v54 = vld [vmem:[%s10288_s16 + $0x60] sm:$0xf] }
 0x146   : > { %v10965_v3 = vadd.f32 %v1257_v53, %v10735_v63  ;;  %v10968_v35 = vadd.f32 %v1306_v37, %v10738_v0  ;;  %v1566_v63 = vshll.u32 %v10971_v46, 16  ;;  %v1571_v9 = vshrl.u32 %v8526_v54, 16 }
 0x147   : > { %v1563_v57 = vor.u32 %v1562_v61, %v1558_v60  ;;  %v1559_v50 = vsel %vm10316_vm3, %v1554_v42, %v1558_v60  ;;  %v1848_v61 = vrot.slane %v10768_v28, 5  ;;  %v1574_v58 = vshll.u32 %v8526_v54, 16 }
 0x148   : > { %v1568_v23 = vrot.slane %v1566_v63, 5  ;;  %v1573_v42 = vrot.slane %v1571_v9, 4 }
 0x14c   : > { %v1046_v0 = vpop.f32.mrf.mxu0  ;;  %v1095_v37 = vpop.f32.mrf.mxu1 }
 0x14d   : > { %v10977_v53 = vadd.f32 %v1046_v0, %v10814_v45  ;;  %v10980_v20 = vadd.f32 %v1095_v37, %v10817_v48  ;;  %v1259_v47 = vpop.f32.mrf.mxu2  ;;  %v1308_v4 = vpop.f32.mrf.mxu3  ;;  %v1564_v45 = vrot.slane %v1563_v57, 4  ;;  %v8558_v48 = vld [vmem:[%s10288_s16 + $0x24] sm:$0xe]  ;;  %v1610_v37 = vunpack.c.l.b16 %v1559_v50 }
 0x14e   : > { %v10984_v29 = vadd.f32 %v1259_v47, %v10762_v26  ;;  %v10987_v56 = vadd.f32 %v1308_v4, %v10765_v40  ;;  %v8566_v21 = vrot.slane %v8558_v48, 9  ;;  %v1847_v40 = vrot.slane %v1845_v55, 4  ;;  %v11022_v48 = vld [vmem:[%s10288_s16 + $0x68] sm:$0x1] }
 0x14f   : > { %8545 = vmatmul.msk.bf16.gmra.mxu0 %vm543_vm4, %v1619_v62  ;;  %8553 = vmatmul.msk.bf16.gmra.mxu1 %vm543_vm4, %v1619_v62  ;;  %v1569_v26 = vsel %vm10316_vm3, %v1564_v45, %v1568_v23  ;;  %v1584_v62 = vshrl.u32 %v10994_v43, 16  ;;  %v1576_v45 = vrot.slane %v1574_v58, 5  ;;  %v8652_v58 = vld [vmem:[%s14755_s1 + $0x90] sm:$0xf] }
 0x150   : > { %v1846_v28 = vsel %vm10471_vm7, %v8566_v21, %v1845_v55  ;;  %v798_v55 = vadd.f32 %v10870_v11, %v10542_v1  ;;  %v9959_v1 = vld [vmem:[%s14755_s1 + $0x94] sm:$0xf0] }
 0x151   : > { %v1586_v23 = vrot.slane %v1584_v62, 4  ;;  %v1893_v54 = vunpack.c.l.b16 %v1846_v28  ;;  %v8653_v62 = vor.u32 %v9959_v1, %v8652_v58  ;;  %v803_v58 = vadd.f32 %v10912_v32, %v10570_v24 }
 0x152   : > { %8584 = vmatmul.msk.bf16.gmra.mxu2 %vm543_vm4, %v1906_v6  ;;  %8592 = vmatmul.msk.bf16.gmra.mxu3 %vm543_vm4, %v1906_v6  ;;  %v1611_v6 = vunpack.c.l.b16 %v1569_v26  ;;  %v852_v1 = vadd.f32 %v10914_v30, %v10572_v25  ;;  %v14816_v30 = vld [vmem:[#allocation7_spill] sm:$0xff] }
 0x153   : > { %2201 = vmatpush.bf16.msrb.mxu0 %v8653_v62  ;;  %v1859_v32 = vrot.slane %v14816_v30, 5 }
 0x154   : > { %v1048_v41 = vpop.f32.mrf.mxu0  ;;  %v1097_v36 = vpop.f32.mrf.mxu1 }
 0x155   : > { %v11006_v57 = vadd.f32 %v1048_v41, %v10844_v49  ;;  %v11009_v60 = vadd.f32 %v1097_v36, %v10847_v22  ;;  %v1262_v63 = vpop.f32.mrf.mxu2  ;;  %v1311_v0 = vpop.f32.mrf.mxu3  ;;  %v1849_v49 = vsel %vm10471_vm7, %v1847_v40, %v1848_v61  ;;  %v1582_v22 = vrot.slane %v1580_v17, 5 }
 0x156   : > { %v11014_v47 = vadd.f32 %v1262_v63, %v10778_v19  ;;  %v11017_v4 = vadd.f32 %v1311_v0, %v10781_v34  ;;  %v1894_v50 = vunpack.c.l.b16 %v1849_v49  ;;  %v847_v19 = vadd.f32 %v10872_v44, %v10544_v31  ;;  %v9958_v31 = vld [vmem:[%s14755_s1 + $0x94] sm:$0xf]  ;;  %v8654_v63 = vld [vmem:[%s14755_s1 + $0x98] sm:$0xf0] }
 0x157   : > { %v1620_v34 = vpack.c.b16 %v1611_v6, %v1610_v37  ;;  %v1577_v41 = vor.u32 %v1576_v45, %v1573_v42  ;;  %v1587_v36 = vor.u32 %v1586_v23, %v1582_v22  ;;  %v1590_v40 = vshll.u32 %v11022_v48, 16  ;;  %v8559_v45 = vld [vmem:[%s10288_s16 + $0x30] sm:$0xe] }
 0x158   : > { %v1907_v17 = vpack.c.b16 %v1894_v50, %v1893_v54  ;;  %v8657_v28 = vor.u32 %v9958_v31, %v8654_v63  ;;  %v1852_v23 = vrot.slane %v10794_v18, 5  ;;  %v8567_v54 = vrot.slane %v8559_v45, 9 }
 0x159   : > { %v1578_v6 = vrot.slane %v1577_v41, 4  ;;  %v1588_v49 = vrot.slane %v1587_v36, 4  ;;  %v1592_v42 = vrot.slane %v1590_v40, 5 }
 0x15a   : > { %2250 = vmatpush.bf16.msrb.mxu1 %v8657_v28  ;;  %v1853_v40 = vsel %vm10471_vm7, %v8567_v54, %v1852_v23  ;;  %v1861_v54 = vrot.slane %v1859_v32, 4 }
 0x15b   : > { %v1593_v18 = vsel %vm10316_vm3, %v1588_v49, %v1592_v42  ;;  %v1895_v31 = vunpack.c.l.b16 %v1853_v40  ;;  %v8560_v49 = vld [vmem:[%s10288_s16 + $0x3c] sm:$0xe]  ;;  %v14817_v42 = vld [vmem:[#allocation5_spill] sm:$0xff] }
 0x15c   : > { %v1051_v21 = vpop.f32.mrf.mxu0  ;;  %v1100_v26 = vpop.f32.mrf.mxu1  ;;  %v805_v45 = vadd.f32 %v10932_v14, %v14817_v42 }
 0x15d   : > { %v11029_v61 = vadd.f32 %v1051_v21, %v798_v55  ;;  %v11031_v9 = vadd.f32 %v1100_v26, %v847_v19  ;;  %v1264_v11 = vpop.f32.mrf.mxu2  ;;  %v1313_v44 = vpop.f32.mrf.mxu3  ;;  %v1583_v19 = vsel %vm10316_vm3, %v1578_v6, %v1582_v22  ;;  %v1855_v21 = vrot.slane %v10820_v10, 5 }
 0x15e   : > { %v11046_v0 = vadd.f32 %v1264_v11, %v10805_v39  ;;  %v11049_v37 = vadd.f32 %v1313_v44, %v10808_v33  ;;  %v800_v39 = vadd.f32 %v10884_v27, %v10552_v12  ;;  %v849_v33 = vadd.f32 %v10886_v7, %v10554_v13 }
 0x15f   : > { %8546 = vmatmul.msk.bf16.gmra.mxu0 %vm543_vm4, %v1620_v34  ;;  %8554 = vmatmul.msk.bf16.gmra.mxu1 %vm543_vm4, %v1620_v34  ;;  %v1854_v34 = vrot.slane %v1852_v23, 4  ;;  %v1612_v36 = vunpack.c.l.b16 %v1583_v19  ;;  %v1613_v22 = vunpack.c.l.b16 %v1593_v18  ;;  %v14818_v23 = vld [vmem:[#allocation6_spill] sm:$0xff] }
 0x161   : > { %v1856_v10 = vsel %vm10471_vm7, %v1854_v34, %v1855_v21  ;;  %v14820_v21 = vld [vmem:[#allocation9_spill] sm:$0xff] }
 0x162   : > { %8585 = vmatmul.msk.bf16.gmra.mxu2 %vm543_vm4, %v1907_v17  ;;  %8593 = vmatmul.msk.bf16.gmra.mxu3 %vm543_vm4, %v1907_v17  ;;  %v1896_v11 = vunpack.c.l.b16 %v1856_v10 }
 0x164   : > { %v1053_v50 = vpop.f32.mrf.mxu0  ;;  %v1102_v55 = vpop.f32.mrf.mxu1  ;;  %v1908_v25 = vpack.c.b16 %v1896_v11, %v1895_v31 }
 0x165   : > { %v11066_v12 = vadd.f32 %v1053_v50, %v800_v39  ;;  %v11068_v27 = vadd.f32 %v1102_v55, %v849_v33  ;;  %v1267_v13 = vpop.f32.mrf.mxu2  ;;  %v1316_v7 = vpop.f32.mrf.mxu3  ;;  %v854_v39 = vadd.f32 %v10934_v5, %v14818_v23  ;;  %v8568_v33 = vrot.slane %v8560_v49, 9  ;;  %v14819_v50 = vld [vmem:[#allocation8_spill] sm:$0xff]  ;;  %v14821_v5 = vld [vmem:[#allocation10_spill] sm:$0xff]  ;;  %v14824_v49 = vld [vmem:[#allocation11_spill] sm:$0xff] }
 0x166   : > { %v11071_v26 = vadd.f32 %v1267_v13, %v10826_v8  ;;  %v11074_v41 = vadd.f32 %v1316_v7, %v10829_v15  ;;  %v1621_v8 = vpack.c.b16 %v1613_v22, %v1612_v36  ;;  %v1862_v55 = vrot.slane %v14819_v50, 5 }
 0x167   : > { %v1860_v36 = vsel %vm10471_vm7, %v8568_v33, %v1859_v32  ;;  %v1866_v42 = vrot.slane %v14824_v49, 5 }
 0x168   : > { %v1863_v22 = vsel %vm10471_vm7, %v1861_v54, %v1862_v55  ;;  %v1897_v40 = vunpack.c.l.b16 %v1860_v36 }
 0x169   : > { %v1898_v10 = vunpack.c.l.b16 %v1863_v22 }
 0x16b   : > { %v1909_v32 = vpack.c.b16 %v1898_v10, %v1897_v40  ;;  %v9951_v10 = vld [vmem:[%s10288_s16 + $0x24] sm:$0xff] }
 0x16c   : > { %v1056_v15 = vpop.f32.mrf.mxu0  ;;  %v1105_v44 = vpop.f32.mrf.mxu1 }
 0x16d   : > { %v11084_v17 = vadd.f32 %v1056_v15, %v803_v58  ;;  %v11086_v62 = vadd.f32 %v1105_v44, %v852_v1  ;;  %v1269_v63 = vpop.f32.mrf.mxu2  ;;  %v1318_v28 = vpop.f32.mrf.mxu3  ;;  %v9950_v58 = vld [vmem:[%s10288_s16 + $0x18] sm:$0xff] }
 0x16e   : > { %v11089_v6 = vadd.f32 %v1269_v63, %v10865_v51  ;;  %v11092_v24 = vadd.f32 %v1318_v28, %v10868_v52  ;;  %v14822_v63 = vld [vmem:[#allocation12_spill] sm:$0xff] }
 0x16f   : > { %8547 = vmatmul.msk.bf16.gmra.mxu0 %vm543_vm4, %v1621_v8  ;;  %8555 = vmatmul.msk.bf16.gmra.mxu1 %vm543_vm4, %v1621_v8 }
 0x172   : > { %8586 = vmatmul.msk.bf16.gmra.mxu2 %vm543_vm4, %v1908_v25  ;;  %8594 = vmatmul.msk.bf16.gmra.mxu3 %vm543_vm4, %v1908_v25  ;;  %v14823_v25 = vld [vmem:[#allocation13_spill] sm:$0xff] }
 0x174   : > { %v1058_v51 = vpop.f32.mrf.mxu0  ;;  %v1107_v52 = vpop.f32.mrf.mxu1 }
 0x175   : > { %v11105_v19 = vadd.f32 %v1058_v51, %v805_v45  ;;  %v11107_v18 = vadd.f32 %v1107_v52, %v854_v39  ;;  %v1272_v34 = vpop.f32.mrf.mxu2  ;;  %v1321_v14 = vpop.f32.mrf.mxu3  ;;  %v1868_v39 = vrot.slane %v1866_v42, 4  ;;  %v14825_v51 = vld [vmem:[#allocation14_spill] sm:$0xff] }
 0x176   : > { %v11110_v13 = vadd.f32 %v1272_v34, %v14820_v21  ;;  %v11113_v7 = vadd.f32 %v1321_v14, %v14821_v5  ;;  %v1869_v52 = vrot.slane %v14825_v51, 5  ;;  %v14826_v34 = vld [vmem:[#allocation15_spill] sm:$0xff]  ;;  %v14827_v21 = vld [vmem:[#allocation16_spill] sm:$0xff] }
 0x178   : > { %v1870_v22 = vsel %vm10471_vm7, %v1868_v39, %v1869_v52 }
 0x179   : > { %v1900_v40 = vunpack.c.l.b16 %v1870_v22 }
 0x17c   : > { %v1676_v1 = vpop.f32.mrf.mxu0  ;;  %v1725_v8 = vpop.f32.mrf.mxu1 }
 0x17d   : > { %v11121_v31 = vadd.f32 %v1676_v1, %v10965_v3  ;;  %v11124_v11 = vadd.f32 %v1725_v8, %v10968_v35  ;;  %v1274_v15 = vpop.f32.mrf.mxu2  ;;  %v1323_v44 = vpop.f32.mrf.mxu3  ;;  %v8561_v3 = vld [vmem:[%s10288_s16 + $0x48] sm:$0xe] }
 0x17e   : > { %v11127_v28 = vadd.f32 %v1274_v15, %v14822_v63  ;;  %v11130_v30 = vadd.f32 %v1323_v44, %v14823_v25  ;;  %v8569_v23 = vrot.slane %v8561_v3, 9  ;;  %v14828_v63 = vld [vmem:[#allocation17_spill] sm:$0xff] }
 0x17f   : > { %8658 = vmatmul.msk.bf16.vlgmr.msrb.gmra.mxu0 %vm543_vm4, %v9950_v58  ;;  %8666 = vmatmul.msk.bf16.vlgmr.msrb.gmra.mxu1 %vm543_vm4, %v9950_v58  ;;  %v1873_v25 = vrot.slane %v14828_v63, 5  ;;  %v9961_v63 = vld [vmem:[%s14755_s1 + $0xac] sm:$0xf0] }
 0x180   : > { %v1867_v36 = vsel %vm10471_vm7, %v8569_v23, %v1866_v42 }
 0x182   : > { %8587 = vmatmul.msk.bf16.gmra.mxu2 %vm543_vm4, %v1909_v32  ;;  %8595 = vmatmul.msk.bf16.gmra.mxu3 %vm543_vm4, %v1909_v32 }
 0x184   : > { %v1678_v35 = vpop.f32.mrf.mxu0  ;;  %v1727_v45 = vpop.f32.mrf.mxu1 }
 0x185   : > { %v11140_v33 = vadd.f32 %v1678_v35, %v10984_v29  ;;  %v11143_v54 = vadd.f32 %v1727_v45, %v10987_v56  ;;  %v1277_v50 = vpop.f32.mrf.mxu2  ;;  %v1326_v55 = vpop.f32.mrf.mxu3  ;;  %v1899_v29 = vunpack.c.l.b16 %v1867_v36  ;;  %v1875_v35 = vrot.slane %v1873_v25, 4 }
 0x186   : > { %v11146_v14 = vadd.f32 %v1277_v50, %v14826_v34  ;;  %v11149_v5 = vadd.f32 %v1326_v55, %v14827_v21  ;;  %v8700_v50 = vld [vmem:[%s14755_s1 + $0xb8] sm:$0x11] }
 0x187   : > { %v1910_v42 = vpack.c.b16 %v1900_v40, %v1899_v29  ;;  %v2576_v34 = vunpack.c.h.b16 %v8700_v50  ;;  %v9952_v40 = vld [vmem:[%s10288_s16 + $0x30] sm:$0xff] }
 0x189   : > { %v2580_v36 = vpack.c.b16 %v2576_v34, %v2576_v34 }
 0x18c   : > { %v1681_v56 = vpop.f32.mrf.mxu0  ;;  %v1730_v58 = vpop.f32.mrf.mxu1 }
 0x18d   : > { %v11157_v1 = vadd.f32 %v1681_v56, %v11014_v47  ;;  %v11160_v8 = vadd.f32 %v1730_v58, %v11017_v4  ;;  %v1279_v15 = vpop.f32.mrf.mxu2  ;;  %v1328_v44 = vpop.f32.mrf.mxu3  ;;  %v8562_v47 = vld [vmem:[%s10288_s16 + $0x54] sm:$0xe]  ;;  %v1876_v4 = vrot.slane %v10971_v46, 5  ;;  %v2611_v56 = vsel %vm568_vm0, %v2580_v36, 0 }
 0x18e   : > { %v11164_v32 = vadd.f32 %v1279_v15, %v10957_v16  ;;  %v11167_v49 = vadd.f32 %v1328_v44, %v10960_v59  ;;  %v8570_v3 = vrot.slane %v8562_v47, 9  ;;  %2668 = vmatpush.bf16.msra.mxu3 %v2611_v56  ;;  %v8703_v44 = vld [vmem:[%s14755_s1 + $0xa8] sm:$0xf] }
 0x18f   : > { %8659 = vmatmul.msk.bf16.gmra.mxu0 %vm543_vm4, %v9951_v10  ;;  %8667 = vmatmul.msk.bf16.gmra.mxu1 %vm543_vm4, %v9951_v10  ;;  %v1877_v46 = vsel %vm10471_vm7, %v1875_v35, %v1876_v4 }
 0x190   : > { %v1874_v52 = vsel %vm10471_vm7, %v8570_v3, %v1873_v25  ;;  %v1902_v29 = vunpack.c.l.b16 %v1877_v46  ;;  %v9960_v25 = vld [vmem:[%s14755_s1 + $0xac] sm:$0xf]  ;;  %v8705_v3 = vld [vmem:[%s14755_s1 + $0xb0] sm:$0xf0] }
 0x191   : > { %v1901_v22 = vunpack.c.l.b16 %v1874_v52 }
 0x192   : > { %8588 = vmatmul.msk.bf16.gmra.mxu2 %vm543_vm4, %v1910_v42  ;;  %8596 = vmatmul.msk.bf16.gmra.mxu3 %vm543_vm4, %v1910_v42 }
 0x193   : > { %v1911_v47 = vpack.c.b16 %v1902_v29, %v1901_v22 }
 0x194   : > { %v1683_v45 = vpop.f32.mrf.mxu0  ;;  %v1732_v16 = vpop.f32.mrf.mxu1 }
 0x195   : > { %v11176_v59 = vadd.f32 %v1683_v45, %v11046_v0  ;;  %v11179_v23 = vadd.f32 %v1732_v16, %v11049_v37  ;;  %v1282_v39 = vpop.f32.mrf.mxu2  ;;  %v1331_v51 = vpop.f32.mrf.mxu3  ;;  %v2575_v37 = vunpack.c.l.b16 %v8700_v50  ;;  %v8708_v45 = vor.u32 %v9960_v25, %v8705_v3 }
 0x196   : > { %v11189_v55 = vadd.f32 %v1282_v39, %v10977_v53  ;;  %v11192_v0 = vadd.f32 %v1331_v51, %v10980_v20  ;;  %v1880_v16 = vrot.slane %v10994_v43, 5  ;;  %v8563_v39 = vld [vmem:[%s10288_s16 + $0x60] sm:$0xe]  ;;  %v8674_v51 = vld [vmem:[%s10288_s16 + $0x18] sm:$0xf] }
 0x197   : > { %v2579_v21 = vpack.c.b16 %v2575_v37, %v2575_v37  ;;  %2669 = vmatpush.bf16.msra.mxu3 %v8708_v45  ;;  %v8571_v46 = vrot.slane %v8563_v39, 9  ;;  %v1883_v37 = vrot.slane %v11022_v48, 5  ;;  %v2349_v22 = vshrl.u32 %v8674_v51, 16 }
 0x198   : > { %v1882_v50 = vrot.slane %v1880_v16, 4  ;;  %v2352_v29 = vshll.u32 %v8674_v51, 16 }
 0x199   : > { %v2608_v10 = vsel %vm568_vm0, %v2579_v21, 0 }
 0x19a   : > { %2619 = vmatpush.bf16.msra.mxu2 %v2608_v10 }
 0x19c   : > { %v1686_v58 = vpop.f32.mrf.mxu0  ;;  %v1735_v15 = vpop.f32.mrf.mxu1 }
 0x19d   : > { %v11198_v53 = vadd.f32 %v1686_v58, %v11071_v26  ;;  %v11201_v20 = vadd.f32 %v1735_v15, %v11074_v41  ;;  %v1284_v42 = vpop.f32.mrf.mxu2  ;;  %v1333_v26 = vpop.f32.mrf.mxu3  ;;  %v8704_v41 = vor.u32 %v9961_v63, %v8703_v44  ;;  %v2351_v58 = vrot.slane %v2349_v22, 4 }
 0x19e   : > { %v11216_v35 = vadd.f32 %v1284_v42, %v11006_v57  ;;  %v11219_v4 = vadd.f32 %v1333_v26, %v11009_v60  ;;  %v11229_v57 = vld [vmem:[%s10288_s16 + $0x1c] sm:$0xf]  ;;  %v2354_v15 = vrot.slane %v2352_v29, 5 }
 0x19f   : > { %8660 = vmatmul.msk.bf16.gmra.mxu0 %vm543_vm4, %v9952_v40  ;;  %8668 = vmatmul.msk.bf16.gmra.mxu1 %vm543_vm4, %v9952_v40  ;;  %v2358_v40 = vshll.u32 %v11229_v57, 16  ;;  %v2362_v10 = vshrl.u32 %v11229_v57, 16  ;;  %v9953_v26 = vld [vmem:[%s10288_s16 + $0x3c] sm:$0xff] }
 0x1a0   : > { %2620 = vmatpush.bf16.msra.mxu2 %v8704_v41  ;;  %v2355_v39 = vor.u32 %v2354_v15, %v2351_v58 }
 0x1a1   : > { %v2360_v44 = vrot.slane %v2358_v40, 5  ;;  %v2364_v63 = vrot.slane %v2362_v10, 4 }
 0x1a2   : > { %8589 = vmatmul.msk.bf16.gmra.mxu2 %vm543_vm4, %v1911_v47  ;;  %8597 = vmatmul.msk.bf16.gmra.mxu3 %vm543_vm4, %v1911_v47  ;;  %v11252_v47 = vld [vmem:[%s10288_s16 + $0x20] sm:$0x1] }
 0x1a3   : > { %v2365_v51 = vor.u32 %v2364_v63, %v2360_v44 }
 0x1a4   : > { %v1688_v52 = vpop.f32.mrf.mxu0  ;;  %v1737_v60 = vpop.f32.mrf.mxu1 }
 0x1a5   : > { %v11233_v34 = vadd.f32 %v1688_v52, %v11089_v6  ;;  %v11236_v43 = vadd.f32 %v1737_v60, %v11092_v24  ;;  %v1287_v21 = vpop.f32.mrf.mxu2  ;;  %v1336_v36 = vpop.f32.mrf.mxu3  ;;  %v1881_v6 = vsel %vm10471_vm7, %v8571_v46, %v1880_v16  ;;  %v1884_v24 = vsel %vm10471_vm7, %v1882_v50, %v1883_v37 }
 0x1a6   : > { %v11241_v56 = vadd.f32 %v1287_v21, %v11029_v61  ;;  %v11244_v48 = vadd.f32 %v1336_v36, %v11031_v9  ;;  %v1903_v25 = vunpack.c.l.b16 %v1881_v6  ;;  %v1904_v42 = vunpack.c.l.b16 %v1884_v24  ;;  %v8677_v21 = vld [vmem:[%s10288_s16 + $0x24] sm:$0xf] }
 0x1a7   : > { %v2368_v52 = vshll.u32 %v11252_v47, 16  ;;  %v2373_v58 = vshrl.u32 %v8677_v21, 16  ;;  %v2376_v15 = vshll.u32 %v8677_v21, 16 }
 0x1a8   : > { %v1912_v50 = vpack.c.b16 %v1904_v42, %v1903_v25 }
 0x1a9   : > { %v2370_v37 = vrot.slane %v2368_v52, 5 }
 0x1ac   : > { %v1691_v61 = vpop.f32.mrf.mxu0  ;;  %v1740_v41 = vpop.f32.mrf.mxu1 }
 0x1ad   : > { %v11255_v9 = vadd.f32 %v1691_v61, %v11110_v13  ;;  %v11258_v3 = vadd.f32 %v1740_v41, %v11113_v7  ;;  %v1289_v45 = vpop.f32.mrf.mxu2  ;;  %v1338_v16 = vpop.f32.mrf.mxu3  ;;  %v2356_v13 = vrot.slane %v2355_v39, 4  ;;  %v2366_v7 = vrot.slane %v2365_v51, 4  ;;  %v9954_v41 = vld [vmem:[%s10288_s16 + $0x48] sm:$0xff] }
 0x1ae   : > { %v11262_v60 = vadd.f32 %v1289_v45, %v11066_v12  ;;  %v11265_v46 = vadd.f32 %v1338_v16, %v11068_v27  ;;  %v11273_v12 = vld [vmem:[%s10288_s16 + $0x28] sm:$0xf]  ;;  %v2375_v61 = vrot.slane %v2373_v58, 4 }
 0x1af   : > { %8661 = vmatmul.msk.bf16.gmra.mxu0 %vm543_vm4, %v9953_v26  ;;  %8669 = vmatmul.msk.bf16.gmra.mxu1 %vm543_vm4, %v9953_v26  ;;  %v2361_v6 = vsel %vm10316_vm3, %v2356_v13, %v2360_v44  ;;  %v2371_v24 = vsel %vm10316_vm3, %v2366_v7, %v2370_v37  ;;  %v2386_v25 = vshrl.u32 %v11273_v12, 16  ;;  %v2378_v44 = vrot.slane %v2376_v15, 5 }
 0x1b0   : > { %v2544_v42 = vunpack.c.l.b16 %v2361_v6  ;;  %v2545_v26 = vunpack.c.l.b16 %v2371_v24 }
 0x1b1   : > { %v2388_v16 = vrot.slane %v2386_v25, 4  ;;  %v2379_v37 = vor.u32 %v2378_v44, %v2375_v61 }
 0x1b2   : > { %8590 = vmatmul.msk.bf16.gmra.mxu2 %vm543_vm4, %v1912_v50  ;;  %8598 = vmatmul.msk.bf16.gmra.mxu3 %vm543_vm4, %v1912_v50  ;;  %v2560_v7 = vpack.c.b16 %v2545_v26, %v2544_v42 }
 0x1b4   : > { %v1693_v36 = vpop.f32.mrf.mxu0  ;;  %v1742_v22 = vpop.f32.mrf.mxu1 }
 0x1b5   : > { %v11276_v27 = vadd.f32 %v1693_v36, %v11127_v28  ;;  %v11279_v29 = vadd.f32 %v1742_v22, %v11130_v30  ;;  %v1292_v40 = vpop.f32.mrf.mxu2  ;;  %v1341_v10 = vpop.f32.mrf.mxu3  ;;  %v2382_v30 = vshll.u32 %v11273_v12, 16 }
 0x1b6   : > { %v11286_v63 = vadd.f32 %v1292_v40, %v11084_v17  ;;  %v11289_v28 = vadd.f32 %v1341_v10, %v11086_v62  ;;  %v11295_v17 = vld [vmem:[%s10288_s16 + $0x2c] sm:$0x1]  ;;  %v8680_v40 = vld [vmem:[%s10288_s16 + $0x30] sm:$0xf]  ;;  %v2380_v10 = vrot.slane %v2379_v37, 4 }
 0x1b7   : > { %v2384_v45 = vrot.slane %v2382_v30, 5  ;;  %v2397_v15 = vshrl.u32 %v8680_v40, 16  ;;  %v2400_v30 = vshll.u32 %v8680_v40, 16 }
 0x1b9   : > { %v2389_v22 = vor.u32 %v2388_v16, %v2384_v45  ;;  %v2399_v37 = vrot.slane %v2397_v15, 4 }
 0x1bc   : > { %v1696_v39 = vpop.f32.mrf.mxu0  ;;  %v1745_v51 = vpop.f32.mrf.mxu1 }
 0x1bd   : > { %v11298_v62 = vadd.f32 %v1696_v39, %v11146_v14  ;;  %v11301_v52 = vadd.f32 %v1745_v51, %v11149_v5  ;;  %v1294_v50 = vpop.f32.mrf.mxu2  ;;  %v1343_v13 = vpop.f32.mrf.mxu3  ;;  %v2392_v14 = vshll.u32 %v11295_v17, 16  ;;  %v11314_v5 = vld [vmem:[%s10288_s16 + $0x34] sm:$0xf] }
 0x1be   : > { %v11304_v21 = vadd.f32 %v1294_v50, %v11105_v19  ;;  %v11307_v36 = vadd.f32 %v1343_v13, %v11107_v18  ;;  %v2390_v19 = vrot.slane %v2389_v22, 4  ;;  %v8743_v18 = vld [vmem:[%s14755_s1 + $0xd0] sm:$0x11]  ;;  %v2406_v44 = vshll.u32 %v11314_v5, 16 }
 0x1bf   : > { %8662 = vmatmul.msk.bf16.gmra.mxu0 %vm543_vm4, %v9954_v41  ;;  %8670 = vmatmul.msk.bf16.gmra.mxu1 %vm543_vm4, %v9954_v41  ;;  %v2394_v6 = vrot.slane %v2392_v14, 5  ;;  %v2866_v25 = vunpack.c.l.b16 %v8743_v18  ;;  %v2867_v42 = vunpack.c.h.b16 %v8743_v18  ;;  %v2410_v41 = vshrl.u32 %v11314_v5, 16 }
 0x1c0   : > { %v2402_v22 = vrot.slane %v2400_v30, 5  ;;  %v2408_v18 = vrot.slane %v2406_v44, 5 }
 0x1c1   : > { %v2870_v51 = vpack.c.b16 %v2866_v25, %v2866_v25  ;;  %v2871_v50 = vpack.c.b16 %v2867_v42, %v2867_v42 }
 0x1c2   : > { %8709 = vmatmul.msk.bf16.vlgmr.msra.gmra.mxu2 %vm543_vm4, %v2560_v7  ;;  %8717 = vmatmul.msk.bf16.vlgmr.msra.gmra.mxu3 %vm543_vm4, %v2560_v7 }
 0x1c3   : > { %v2899_v14 = vsel %vm568_vm0, %v2870_v51, 0  ;;  %v2902_v40 = vsel %vm568_vm0, %v2871_v50, 0 }
 0x1c4   : > { %v1698_v24 = vpop.f32.mrf.mxu0  ;;  %v1747_v58 = vpop.f32.mrf.mxu1  ;;  %2910 = vmatpush.bf16.msra.mxu0 %v2899_v14  ;;  %2959 = vmatpush.bf16.msra.mxu1 %v2902_v40 }
 0x1c5   : > { %v11322_v26 = vadd.f32 %v1698_v24, %v11164_v32  ;;  %v11325_v61 = vadd.f32 %v1747_v58, %v11167_v49  ;;  %v1967_v16 = vpop.f32.mrf.mxu2  ;;  %v2016_v39 = vpop.f32.mrf.mxu3  ;;  %v2385_v32 = vsel %vm10316_vm3, %v2380_v10, %v2384_v45  ;;  %v2395_v49 = vsel %vm10316_vm3, %v2390_v19, %v2394_v6 }
 0x1c6   : > { %v11330_v13 = vadd.f32 %v1967_v16, %v11121_v31  ;;  %v11333_v7 = vadd.f32 %v2016_v39, %v11124_v11  ;;  %v2412_v24 = vrot.slane %v2410_v41, 4  ;;  %v11342_v31 = vld [vmem:[%s10288_s16 + $0x38] sm:$0x1]  ;;  %v2546_v58 = vunpack.c.l.b16 %v2385_v32  ;;  %v8683_v32 = vld [vmem:[%s10288_s16 + $0x3c] sm:$0xf] }
 0x1c7   : > { %v9955_v11 = vld [vmem:[%s10288_s16 + $0x54] sm:$0xff]  ;;  %v2547_v25 = vunpack.c.l.b16 %v2395_v49  ;;  %v2403_v10 = vor.u32 %v2402_v22, %v2399_v37  ;;  %v2416_v30 = vshll.u32 %v11342_v31, 16  ;;  %v11364_v49 = vld [vmem:[%s10288_s16 + $0x40] sm:$0xf] }
 0x1c8   : > { %v2413_v15 = vor.u32 %v2412_v24, %v2408_v18 }
 0x1c9   : > { %v2404_v51 = vrot.slane %v2403_v10, 4  ;;  %v2418_v50 = vrot.slane %v2416_v30, 5 }
 0x1cb   : > { %v2409_v14 = vsel %vm10316_vm3, %v2404_v51, %v2408_v18 }
 0x1cc   : > { %v1701_v42 = vpop.f32.mrf.mxu0  ;;  %v1750_v45 = vpop.f32.mrf.mxu1  ;;  %v2548_v18 = vunpack.c.l.b16 %v2409_v14 }
 0x1cd   : > { %v11346_v19 = vadd.f32 %v1701_v42, %v11189_v55  ;;  %v11349_v6 = vadd.f32 %v1750_v45, %v11192_v0  ;;  %v1969_v44 = vpop.f32.mrf.mxu2  ;;  %v2018_v41 = vpop.f32.mrf.mxu3  ;;  %v2561_v55 = vpack.c.b16 %v2547_v25, %v2546_v58  ;;  %v2414_v0 = vrot.slane %v2413_v15, 4 }
 0x1ce   : > { %v11353_v16 = vadd.f32 %v1969_v44, %v11140_v33  ;;  %v11356_v39 = vadd.f32 %v2018_v41, %v11143_v54  ;;  %v2421_v58 = vshrl.u32 %v8683_v32, 16  ;;  %v2424_v25 = vshll.u32 %v8683_v32, 16 }
 0x1cf   : > { %8663 = vmatmul.msk.bf16.gmra.mxu0 %vm543_vm4, %v9955_v11  ;;  %8671 = vmatmul.msk.bf16.gmra.mxu1 %vm543_vm4, %v9955_v11  ;;  %v2419_v40 = vsel %vm10316_vm3, %v2414_v0, %v2418_v50  ;;  %v2430_v42 = vshll.u32 %v11364_v49, 16  ;;  %v11386_v50 = vld [vmem:[%s10288_s16 + $0x44] sm:$0x1] }
 0x1d0   : > { %v2549_v10 = vunpack.c.l.b16 %v2419_v40  ;;  %v2423_v15 = vrot.slane %v2421_v58, 4  ;;  %v2426_v30 = vrot.slane %v2424_v25, 5  ;;  %v8748_v58 = vld [vmem:[%s14755_s1 + $0xc8] sm:$0xf0] }
 0x1d1   : > { %v2432_v44 = vrot.slane %v2430_v42, 5 }
 0x1d2   : > { %8710 = vmatmul.msk.bf16.gmra.mxu2 %vm543_vm4, %v2561_v55  ;;  %8718 = vmatmul.msk.bf16.gmra.mxu3 %vm543_vm4, %v2561_v55  ;;  %v9956_v55 = vld [vmem:[%s10288_s16 + $0x60] sm:$0xff]  ;;  %v2562_v40 = vpack.c.b16 %v2549_v10, %v2548_v18  ;;  %v8686_v10 = vld [vmem:[%s10288_s16 + $0x48] sm:$0xf] }
 0x1d4   : > { %v1703_v33 = vpop.f32.mrf.mxu0  ;;  %v1752_v37 = vpop.f32.mrf.mxu1 }
 0x1d5   : > { %v11367_v54 = vadd.f32 %v1703_v33, %v11216_v35  ;;  %v11370_v22 = vadd.f32 %v1752_v37, %v11219_v4  ;;  %v1972_v24 = vpop.f32.mrf.mxu2  ;;  %v2021_v11 = vpop.f32.mrf.mxu3  ;;  %v2434_v35 = vshrl.u32 %v11364_v49, 16  ;;  %v9963_v33 = vld [vmem:[%s14755_s1 + $0xc4] sm:$0xf0]  ;;  %v9962_v37 = vld [vmem:[%s14755_s1 + $0xc4] sm:$0xf] }
 0x1d6   : > { %v11379_v45 = vadd.f32 %v1972_v24, %v11157_v1  ;;  %v11382_v4 = vadd.f32 %v2021_v11, %v11160_v8  ;;  %v8746_v8 = vld [vmem:[%s14755_s1 + $0xc0] sm:$0xf]  ;;  %v2427_v24 = vor.u32 %v2426_v30, %v2423_v15  ;;  %v8751_v18 = vor.u32 %v9962_v37, %v8748_v58  ;;  %v11417_v15 = vld [vmem:[%s10288_s16 + $0x4c] sm:$0xf] }
 0x1d7   : > { %v2436_v41 = vrot.slane %v2434_v35, 4  ;;  %v8747_v11 = vor.u32 %v9963_v33, %v8746_v8  ;;  %v2440_v35 = vshll.u32 %v11386_v50, 16  ;;  %v2448_v8 = vshll.u32 %v8686_v10, 16 }
 0x1d8   : > { %2960 = vmatpush.bf16.msra.mxu1 %v8751_v18  ;;  %v2454_v37 = vshll.u32 %v11417_v15, 16 }
 0x1d9   : > { %2911 = vmatpush.bf16.msra.mxu0 %v8747_v11  ;;  %v2450_v58 = vrot.slane %v2448_v8, 5 }
 0x1dc   : > { %v1706_v51 = vpop.f32.mrf.mxu0  ;;  %v1755_v0 = vpop.f32.mrf.mxu1 }
 0x1dd   : > { %v11389_v32 = vadd.f32 %v1706_v51, %v11241_v56  ;;  %v11392_v1 = vadd.f32 %v1755_v0, %v11244_v48  ;;  %v1974_v14 = vpop.f32.mrf.mxu2  ;;  %v2023_v56 = vpop.f32.mrf.mxu3  ;;  %v2437_v48 = vor.u32 %v2436_v41, %v2432_v44  ;;  %v2445_v0 = vshrl.u32 %v8686_v10, 16 }
 0x1de   : > { %v11407_v25 = vadd.f32 %v1974_v14, %v11176_v59  ;;  %v11410_v42 = vadd.f32 %v2023_v56, %v11179_v23  ;;  %v2428_v59 = vrot.slane %v2427_v24, 4  ;;  %v2442_v23 = vrot.slane %v2440_v35, 5 }
 0x1df   : > { %8664 = vmatmul.msk.bf16.gmra.mxu0 %vm543_vm4, %v9956_v55  ;;  %8672 = vmatmul.msk.bf16.gmra.mxu1 %vm543_vm4, %v9956_v55  ;;  %v2438_v30 = vrot.slane %v2437_v48, 4  ;;  %v2458_v14 = vshrl.u32 %v11417_v15, 16  ;;  %v2447_v11 = vrot.slane %v2445_v0, 4  ;;  %v2456_v35 = vrot.slane %v2454_v37, 5 }
 0x1e1   : > { %v2460_v18 = vrot.slane %v2458_v14, 4 }
 0x1e2   : > { %8711 = vmatmul.msk.bf16.gmra.mxu2 %vm543_vm4, %v2562_v40  ;;  %8719 = vmatmul.msk.bf16.gmra.mxu3 %vm543_vm4, %v2562_v40 }
 0x1e4   : > { %v1708_v41 = vpop.f32.mrf.mxu0  ;;  %v1757_v51 = vpop.f32.mrf.mxu1 }
 0x1e5   : > { %v11422_v55 = vadd.f32 %v1708_v41, %v11262_v60  ;;  %v11425_v33 = vadd.f32 %v1757_v51, %v11265_v46  ;;  %v1977_v56 = vpop.f32.mrf.mxu2  ;;  %v2026_v40 = vpop.f32.mrf.mxu3  ;;  %v2433_v60 = vsel %vm10316_vm3, %v2428_v59, %v2432_v44  ;;  %v2443_v46 = vsel %vm10316_vm3, %v2438_v30, %v2442_v23  ;;  %v11440_v51 = vld [vmem:[%s10288_s16 + $0x50] sm:$0x1] }
 0x1e6   : > { %v11430_v24 = vadd.f32 %v1977_v56, %v11198_v53  ;;  %v11433_v48 = vadd.f32 %v2026_v40, %v11201_v20  ;;  %v2550_v10 = vunpack.c.l.b16 %v2433_v60  ;;  %v2551_v41 = vunpack.c.l.b16 %v2443_v46  ;;  %v8725_v53 = vld [vmem:[%s10288_s16 + $0x18] sm:$0xe] }
 0x1e7   : > { %14829 = vst [vmem:[#allocation7_spill] sm:$0xff] %v11422_v55  ;;  %v2777_v56 = vrot.slane %v11229_v57, 5  ;;  %v2451_v55 = vor.u32 %v2450_v58, %v2447_v11  ;;  %v2461_v30 = vor.u32 %v2460_v18, %v2456_v35  ;;  %v2464_v23 = vshll.u32 %v11440_v51, 16  ;;  %v8689_v18 = vld [vmem:[%s10288_s16 + $0x54] sm:$0xf] }
 0x1e8   : > { %14830 = vst [vmem:[#allocation5_spill] sm:$0xff] %v11425_v33  ;;  %v9957_v33 = vld [vmem:[%s10288_s16 + $0x6c] sm:$0xff]  ;;  %v2563_v37 = vpack.c.b16 %v2551_v41, %v2550_v10  ;;  %v8733_v14 = vrot.slane %v8725_v53, 9 }
 0x1e9   : > { %v2452_v46 = vrot.slane %v2451_v55, 4  ;;  %v2462_v11 = vrot.slane %v2461_v30, 4  ;;  %v2466_v58 = vrot.slane %v2464_v23, 5 }
 0x1eb   : > { %v2457_v53 = vsel %vm10316_vm3, %v2452_v46, %v2456_v35 }
 0x1ec   : > { %v1711_v20 = vpop.f32.mrf.mxu0  ;;  %v1760_v40 = vpop.f32.mrf.mxu1 }
 0x1ed   : > { %v11446_v44 = vadd.f32 %v1711_v20, %v11286_v63  ;;  %v11449_v59 = vadd.f32 %v1760_v40, %v11289_v28  ;;  %v1979_v0 = vpop.f32.mrf.mxu2  ;;  %v2028_v8 = vpop.f32.mrf.mxu3  ;;  %v2779_v63 = vrot.slane %v2777_v56, 4  ;;  %v2780_v28 = vrot.slane %v11252_v47, 5 }
 0x1ee   : > { %v11453_v60 = vadd.f32 %v1979_v0, %v11233_v34  ;;  %v11456_v57 = vadd.f32 %v2028_v8, %v11236_v43  ;;  %v2778_v34 = vsel %vm10471_vm7, %v8733_v14, %v2777_v56  ;;  %v2467_v56 = vsel %vm10316_vm3, %v2462_v11, %v2466_v58 }
 0x1ef   : > { %8665 = vmatmul.msk.bf16.gmra.mxu0 %vm543_vm4, %v9957_v33  ;;  %8673 = vmatmul.msk.bf16.gmra.mxu1 %vm543_vm4, %v9957_v33  ;;  %v2781_v43 = vsel %vm10471_vm7, %v2779_v63, %v2780_v28  ;;  %v11469_v33 = vld [vmem:[%s10288_s16 + $0x58] sm:$0xf]  ;;  %v2835_v30 = vunpack.c.l.b16 %v2778_v34  ;;  %v2469_v0 = vshrl.u32 %v8689_v18, 16  ;;  %v2472_v8 = vshll.u32 %v8689_v18, 16 }
 0x1f0   : > { %v2836_v23 = vunpack.c.l.b16 %v2781_v43  ;;  %v2482_v35 = vshrl.u32 %v11469_v33, 16  ;;  %v2552_v14 = vunpack.c.l.b16 %v2457_v53  ;;  %v2553_v63 = vunpack.c.l.b16 %v2467_v56  ;;  %v8726_v53 = vld [vmem:[%s10288_s16 + $0x24] sm:$0xe] }
 0x1f1   : > { %v2471_v28 = vrot.slane %v2469_v0, 4  ;;  %v2474_v46 = vrot.slane %v2472_v8, 5 }
 0x1f2   : > { %8712 = vmatmul.msk.bf16.gmra.mxu2 %vm543_vm4, %v2563_v37  ;;  %8720 = vmatmul.msk.bf16.gmra.mxu3 %vm543_vm4, %v2563_v37  ;;  %v2851_v11 = vpack.c.b16 %v2836_v23, %v2835_v30  ;;  %v2484_v34 = vrot.slane %v2482_v35, 4  ;;  %v8692_v35 = vld [vmem:[%s10288_s16 + $0x60] sm:$0xf] }
 0x1f3   : > { %v2475_v30 = vor.u32 %v2474_v46, %v2471_v28 }
 0x1f4   : > { %v1713_v10 = vpop.f32.mrf.mxu0  ;;  %v1762_v41 = vpop.f32.mrf.mxu1 }
 0x1f5   : > { %v11472_v47 = vadd.f32 %v1713_v10, %v11304_v21  ;;  %v11475_v55 = vadd.f32 %v1762_v41, %v11307_v36  ;;  %v1982_v20 = vpop.f32.mrf.mxu2  ;;  %v2031_v40 = vpop.f32.mrf.mxu3  ;;  %v2478_v36 = vshll.u32 %v11469_v33, 16  ;;  %v11490_v10 = vld [vmem:[%s10288_s16 + $0x5c] sm:$0x1] }
 0x1f6   : > { %v11482_v37 = vadd.f32 %v1982_v20, %v11255_v9  ;;  %v11485_v21 = vadd.f32 %v2031_v40, %v11258_v3  ;;  %v2784_v9 = vrot.slane %v11273_v12, 5  ;;  %v2564_v40 = vpack.c.b16 %v2553_v63, %v2552_v14  ;;  %v11512_v14 = vld [vmem:[%s10288_s16 + $0x64] sm:$0xf] }
 0x1f7   : > { %14831 = vst [vmem:[#allocation6_spill] sm:$0xff] %v11472_v47  ;;  %v2480_v58 = vrot.slane %v2478_v36, 5  ;;  %v2787_v36 = vrot.slane %v11295_v17, 5  ;;  %v2496_v17 = vshll.u32 %v8692_v35, 16  ;;  %v8727_v47 = vld [vmem:[%s10288_s16 + $0x30] sm:$0xe] }
 0x1f8   : > { %14832 = vst [vmem:[#allocation8_spill] sm:$0xff] %v11475_v55  ;;  %v2786_v8 = vrot.slane %v2784_v9, 4 }
 0x1f9   : > { %v2485_v12 = vor.u32 %v2484_v34, %v2480_v58 }
 0x1fa   : > { %v2788_v34 = vsel %vm10471_vm7, %v2786_v8, %v2787_v36  ;;  %v2498_v36 = vrot.slane %v2496_v17, 5 }
 0x1fc   : > { %v2203_v43 = vpop.f32.mrf.mxu0  ;;  %v2252_v18 = vpop.f32.mrf.mxu1 }
 0x1fd   : > { %v11494_v3 = vadd.f32 %v2203_v43, %v11330_v13  ;;  %v11497_v41 = vadd.f32 %v2252_v18, %v11333_v7  ;;  %v1984_v56 = vpop.f32.mrf.mxu2  ;;  %v2033_v20 = vpop.f32.mrf.mxu3  ;;  %v2488_v13 = vshll.u32 %v11490_v10, 16  ;;  %v8734_v7 = vrot.slane %v8726_v53, 9 }
 0x1fe   : > { %v11501_v23 = vadd.f32 %v1984_v56, %v11276_v27  ;;  %v11504_v0 = vadd.f32 %v2033_v20, %v11279_v29  ;;  %v2476_v27 = vrot.slane %v2475_v30, 4  ;;  %v2486_v29 = vrot.slane %v2485_v12, 4 }
 0x1ff   : > { %8752 = vmatmul.msk.bf16.vlgmr.msra.gmra.mxu0 %vm543_vm4, %v2851_v11  ;;  %8760 = vmatmul.msk.bf16.vlgmr.msra.gmra.mxu1 %vm543_vm4, %v2851_v11  ;;  %v2490_v63 = vrot.slane %v2488_v13, 5  ;;  %v2785_v11 = vsel %vm10471_vm7, %v8734_v7, %v2784_v9  ;;  %v2493_v43 = vshrl.u32 %v8692_v35, 16  ;;  %v2502_v56 = vshll.u32 %v11512_v14, 16 }
 0x200   : > { %v2506_v20 = vshrl.u32 %v11512_v14, 16  ;;  %v2837_v13 = vunpack.c.l.b16 %v2785_v11  ;;  %v2481_v7 = vsel %vm10316_vm3, %v2476_v27, %v2480_v58 }
 0x201   : > { %v2495_v8 = vrot.slane %v2493_v43, 4  ;;  %v2504_v35 = vrot.slane %v2502_v56, 5 }
 0x202   : > { %8713 = vmatmul.msk.bf16.gmra.mxu2 %vm543_vm4, %v2564_v40  ;;  %8721 = vmatmul.msk.bf16.gmra.mxu3 %vm543_vm4, %v2564_v40 }
 0x204   : > { %v2205_v28 = vpop.f32.mrf.mxu0  ;;  %v2254_v46 = vpop.f32.mrf.mxu1 }
 0x205   : > { %v11521_v18 = vadd.f32 %v2205_v28, %v11353_v16  ;;  %v11524_v53 = vadd.f32 %v2254_v46, %v11356_v39  ;;  %v1987_v40 = vpop.f32.mrf.mxu2  ;;  %v2036_v30 = vpop.f32.mrf.mxu3  ;;  %v2838_v16 = vunpack.c.l.b16 %v2788_v34  ;;  %v2491_v39 = vsel %vm10316_vm3, %v2486_v29, %v2490_v63  ;;  %v11539_v46 = vld [vmem:[%s10288_s16 + $0x68] sm:$0x1] }
 0x206   : > { %v11529_v9 = vadd.f32 %v1987_v40, %v11298_v62  ;;  %v11532_v12 = vadd.f32 %v2036_v30, %v11301_v52  ;;  %v2508_v28 = vrot.slane %v2506_v20, 4  ;;  %v2554_v62 = vunpack.c.l.b16 %v2481_v7 }
 0x207   : > { %v2555_v40 = vunpack.c.l.b16 %v2491_v39  ;;  %v2852_v55 = vpack.c.b16 %v2838_v16, %v2837_v13  ;;  %v2791_v52 = vrot.slane %v11314_v5, 5  ;;  %v2499_v34 = vor.u32 %v2498_v36, %v2495_v8  ;;  %v8695_v8 = vld [vmem:[%s10288_s16 + $0x6c] sm:$0xf] }
 0x208   : > { %v2509_v29 = vor.u32 %v2508_v28, %v2504_v35  ;;  %v2512_v63 = vshll.u32 %v11539_v46, 16  ;;  %v8735_v5 = vrot.slane %v8727_v47, 9  ;;  %v2794_v20 = vrot.slane %v11342_v31, 5  ;;  %v11565_v47 = vld [vmem:[%s10288_s16 + $0x70] sm:$0xf] }
 0x209   : > { %v2565_v56 = vpack.c.b16 %v2555_v40, %v2554_v62 }
 0x20a   : > { %v2510_v13 = vrot.slane %v2509_v29, 4  ;;  %v2514_v16 = vrot.slane %v2512_v63, 5  ;;  %v2792_v7 = vsel %vm10471_vm7, %v8735_v5, %v2791_v52  ;;  %v2517_v29 = vshrl.u32 %v8695_v8, 16 }
 0x20b   : > { %v2520_v63 = vshll.u32 %v8695_v8, 16 }
 0x20c   : > { %v2208_v11 = vpop.f32.mrf.mxu0  ;;  %v2257_v30 = vpop.f32.mrf.mxu1  ;;  %v2515_v40 = vsel %vm10316_vm3, %v2510_v13, %v2514_v16 }
 0x20d   : > { %v11544_v58 = vadd.f32 %v2208_v11, %v11379_v45  ;;  %v11547_v27 = vadd.f32 %v2257_v30, %v11382_v4  ;;  %v11550_v43 = vpop.f32.mrf.mxu2  ;;  %v11552_v17 = vpop.f32.mrf.mxu3  ;;  %v2793_v45 = vrot.slane %v2791_v52, 4  ;;  %v2500_v4 = vrot.slane %v2499_v34, 4 }
 0x20e   : > { %v2839_v30 = vunpack.c.l.b16 %v2792_v7  ;;  %v2522_v13 = vrot.slane %v2520_v63, 5 }
 0x20f   : > { %8753 = vmatmul.msk.bf16.gmra.mxu0 %vm543_vm4, %v2852_v55  ;;  %8761 = vmatmul.msk.bf16.gmra.mxu1 %vm543_vm4, %v2852_v55  ;;  %v2795_v39 = vsel %vm10471_vm7, %v2793_v45, %v2794_v20  ;;  %v2505_v62 = vsel %vm10316_vm3, %v2500_v4, %v2504_v35  ;;  %v2530_v35 = vshrl.u32 %v11565_v47, 16  ;;  %v2557_v45 = vunpack.c.l.b16 %v2515_v40 }
 0x210   : > { %v2840_v34 = vunpack.c.l.b16 %v2795_v39  ;;  %v2556_v5 = vunpack.c.l.b16 %v2505_v62  ;;  %v2519_v4 = vrot.slane %v2517_v29, 4 }
 0x211   : > { %v2532_v7 = vrot.slane %v2530_v35, 4 }
 0x212   : > { %8714 = vmatmul.msk.bf16.gmra.mxu2 %vm543_vm4, %v2565_v56  ;;  %8722 = vmatmul.msk.bf16.gmra.mxu3 %vm543_vm4, %v2565_v56  ;;  %v2853_v20 = vpack.c.b16 %v2840_v34, %v2839_v30  ;;  %v2523_v30 = vor.u32 %v2522_v13, %v2519_v4 }
 0x214   : > { %v2210_v36 = vpop.f32.mrf.mxu0  ;;  %v2259_v55 = vpop.f32.mrf.mxu1  ;;  %v2524_v63 = vrot.slane %v2523_v30, 4 }
 0x215   : > { %v11568_v31 = vadd.f32 %v2210_v36, %v11407_v25  ;;  %v11571_v28 = vadd.f32 %v2259_v55, %v11410_v42  ;;  %v1992_v52 = vpop.f32.mrf.mxu2  ;;  %v2041_v11 = vpop.f32.mrf.mxu3  ;;  %v2526_v42 = vshll.u32 %v11565_v47, 16  ;;  %v11593_v55 = vld [vmem:[%s10288_s16 + $0x74] sm:$0x1] }
 0x216   : > { %v11578_v56 = vadd.f32 %v1992_v52, %v11346_v19  ;;  %v11581_v25 = vadd.f32 %v2041_v11, %v11349_v6  ;;  %v2798_v19 = vrot.slane %v11364_v49, 5  ;;  %v8728_v52 = vld [vmem:[%s10288_s16 + $0x3c] sm:$0xe]  ;;  %v2566_v11 = vpack.c.b16 %v2557_v45, %v2556_v5 }
 0x217   : > { %v2528_v16 = vrot.slane %v2526_v42, 5  ;;  %v8736_v34 = vrot.slane %v8728_v52, 9 }
 0x218   : > { %v2800_v29 = vrot.slane %v2798_v19, 4 }
 0x219   : > { %v2533_v49 = vor.u32 %v2532_v7, %v2528_v16  ;;  %v2529_v30 = vsel %vm10316_vm3, %v2524_v63, %v2528_v16 }
 0x21b   : > { %v2534_v5 = vrot.slane %v2533_v49, 4  ;;  %v2558_v49 = vunpack.c.l.b16 %v2529_v30 }
 0x21c   : > { %v2213_v39 = vpop.f32.mrf.mxu0  ;;  %v2262_v8 = vpop.f32.mrf.mxu1 }
 0x21d   : > { %v11587_v36 = vadd.f32 %v2213_v39, %v11430_v24  ;;  %v11590_v6 = vadd.f32 %v2262_v8, %v11433_v48  ;;  %v11596_v62 = vpop.f32.mrf.mxu2  ;;  %v11598_v40 = vpop.f32.mrf.mxu3  ;;  %v2536_v24 = vshll.u32 %v11593_v55, 16  ;;  %v2801_v48 = vrot.slane %v11386_v50, 5 }
 0x21f   : > { %8754 = vmatmul.msk.bf16.gmra.mxu0 %vm543_vm4, %v2853_v20  ;;  %8762 = vmatmul.msk.bf16.gmra.mxu1 %vm543_vm4, %v2853_v20  ;;  %v2538_v45 = vrot.slane %v2536_v24, 5  ;;  %v2799_v20 = vsel %vm10471_vm7, %v8736_v34, %v2798_v19  ;;  %v2802_v4 = vsel %vm10471_vm7, %v2800_v29, %v2801_v48  ;;  %v2805_v48 = vrot.slane %v11417_v15, 5 }
 0x220   : > { %v2842_v19 = vunpack.c.l.b16 %v2802_v4  ;;  %v2808_v15 = vrot.slane %v11440_v51, 5 }
 0x222   : > { %8715 = vmatmul.msk.bf16.gmra.mxu2 %vm543_vm4, %v2566_v11  ;;  %8723 = vmatmul.msk.bf16.gmra.mxu3 %vm543_vm4, %v2566_v11  ;;  %v2841_v11 = vunpack.c.l.b16 %v2799_v20 }
 0x224   : > { %v2215_v42 = vpop.f32.mrf.mxu0  ;;  %v2264_v35 = vpop.f32.mrf.mxu1  ;;  %v2854_v24 = vpack.c.b16 %v2842_v19, %v2841_v11 }
 0x225   : > { %v11611_v13 = vadd.f32 %v2215_v42, %v11453_v60  ;;  %v11614_v50 = vadd.f32 %v2264_v35, %v11456_v57  ;;  %v1997_v7 = vpop.f32.mrf.mxu2  ;;  %v2046_v39 = vpop.f32.mrf.mxu3  ;;  %v2539_v60 = vsel %vm10316_vm3, %v2534_v5, %v2538_v45  ;;  %v8729_v42 = vld [vmem:[%s10288_s16 + $0x48] sm:$0xe]  ;;  %v2807_v45 = vrot.slane %v2805_v48, 4 }
 0x226   : > { %v11617_v8 = vadd.f32 %v1997_v7, %v11389_v32  ;;  %v11620_v52 = vadd.f32 %v2046_v39, %v11392_v1  ;;  %v2559_v57 = vunpack.c.l.b16 %v2539_v60  ;;  %v8737_v5 = vrot.slane %v8729_v42, 9 }
 0x227   : > { %v2809_v4 = vsel %vm10471_vm7, %v2807_v45, %v2808_v15 }
 0x228   : > { %v2567_v63 = vpack.c.b16 %v2559_v57, %v2558_v49  ;;  %v2806_v20 = vsel %vm10471_vm7, %v8737_v5, %v2805_v48  ;;  %v2844_v49 = vunpack.c.l.b16 %v2809_v4  ;;  %v8730_v48 = vld [vmem:[%s10288_s16 + $0x54] sm:$0xe] }
 0x229   : > { %v2843_v60 = vunpack.c.l.b16 %v2806_v20 }
 0x22b   : > { %v2855_v57 = vpack.c.b16 %v2844_v49, %v2843_v60 }
 0x22c   : > { %v2218_v34 = vpop.f32.mrf.mxu0  ;;  %v2267_v29 = vpop.f32.mrf.mxu1 }
 0x22d   : > { %v11628_v32 = vadd.f32 %v2218_v34, %v11482_v37  ;;  %v11631_v1 = vadd.f32 %v2267_v29, %v11485_v21  ;;  %v11634_v35 = vpop.f32.mrf.mxu2  ;;  %v11636_v16 = vpop.f32.mrf.mxu3  ;;  %v2812_v29 = vrot.slane %v11469_v33, 5  ;;  %v2815_v33 = vrot.slane %v11490_v10, 5 }
 0x22e   : > { %v2819_v10 = vrot.slane %v11512_v14, 5  ;;  %v8844_v14 = vld [vmem:[%s14757_s3 + $0x100] sm:$0xf] }
 0x22f   : > { %8755 = vmatmul.msk.bf16.gmra.mxu0 %vm543_vm4, %v2854_v24  ;;  %8763 = vmatmul.msk.bf16.gmra.mxu1 %vm543_vm4, %v2854_v24 }
 0x232   : > { %8716 = vmatmul.msk.bf16.gmra.mxu2 %vm543_vm4, %v2567_v63  ;;  %8724 = vmatmul.msk.bf16.gmra.mxu3 %vm543_vm4, %v2567_v63  ;;  %v2814_v63 = vrot.slane %v2812_v29, 4 }
 0x234   : > { %v2220_v37 = vpop.f32.mrf.mxu0  ;;  %v2269_v21 = vpop.f32.mrf.mxu1  ;;  %v2816_v45 = vsel %vm10471_vm7, %v2814_v63, %v2815_v33 }
 0x235   : > { %v11648_v7 = vadd.f32 %v2220_v37, %v11501_v23  ;;  %v11651_v39 = vadd.f32 %v2269_v21, %v11504_v0  ;;  %v2002_v51 = vpop.f32.mrf.mxu2  ;;  %v2051_v11 = vpop.f32.mrf.mxu3  ;;  %v2846_v37 = vunpack.c.l.b16 %v2816_v45 }
 0x236   : > { %v11654_v19 = vadd.f32 %v2002_v51, %v11446_v44  ;;  %v11657_v30 = vadd.f32 %v2051_v11, %v11449_v59  ;;  %v8738_v59 = vrot.slane %v8730_v48, 9 }
 0x237   : > { %14833 = vst [vmem:[#allocation9_spill] sm:$0xff] %v11648_v7 }
 0x238   : > { %14834 = vst [vmem:[#allocation10_spill] sm:$0xff] %v11651_v39 }
 0x23c   : > { %v2223_v24 = vpop.f32.mrf.mxu0  ;;  %v2272_v34 = vpop.f32.mrf.mxu1 }
 0x23d   : > { %v11661_v23 = vadd.f32 %v2223_v24, %v11529_v9  ;;  %v11664_v0 = vadd.f32 %v2272_v34, %v11532_v12  ;;  %v11667_v42 = vpop.f32.mrf.mxu2  ;;  %v11669_v44 = vpop.f32.mrf.mxu3  ;;  %v2813_v12 = vsel %vm10471_vm7, %v8738_v59, %v2812_v29  ;;  %v2821_v34 = vrot.slane %v2819_v10, 4 }
 0x23e   : > { %v2845_v15 = vunpack.c.l.b16 %v2813_v12  ;;  %v2822_v29 = vrot.slane %v11539_v46, 5 }
 0x23f   : > { %14835 = vst [vmem:[#allocation12_spill] sm:$0xff] %v11661_v23  ;;  %8756 = vmatmul.msk.bf16.gmra.mxu0 %vm543_vm4, %v2855_v57  ;;  %8764 = vmatmul.msk.bf16.gmra.mxu1 %vm543_vm4, %v2855_v57  ;;  %v8731_v57 = vld [vmem:[%s10288_s16 + $0x60] sm:$0xe] }
 0x240   : > { %14836 = vst [vmem:[#allocation13_spill] sm:$0xff] %v11664_v0  ;;  %v2856_v4 = vpack.c.b16 %v2846_v37, %v2845_v15  ;;  %v8739_v24 = vrot.slane %v8731_v57, 9  ;;  %v2823_v46 = vsel %vm10471_vm7, %v2821_v34, %v2822_v29  ;;  %v8836_v37 = vld [vmem:[%s14757_s3 + $0xf0] sm:$0xf]  ;;  %v2826_v34 = vrot.slane %v11565_v47, 5 }
 0x241   : > { %v2848_v15 = vunpack.c.l.b16 %v2823_v46  ;;  %v8828_v29 = vld [vmem:[%s14757_s3 + $0xe0] sm:$0xf]  ;;  %v8732_v46 = vld [vmem:[%s10288_s16 + $0x6c] sm:$0xe] }
 0x242   : > { %v2820_v33 = vsel %vm10471_vm7, %v8739_v24, %v2819_v10  ;;  %v8846_v10 = vld [vmem:[%s14757_s3 + $0x108] sm:$0xf0] }
 0x243   : > { %v2847_v45 = vunpack.c.l.b16 %v2820_v33 }
 0x244   : > { %v11674_v5 = vpop.f32.mrf.mxu0  ;;  %v11676_v9 = vpop.f32.mrf.mxu1 }
 0x245   : > { %v11682_v21 = vpop.f32.mrf.mxu2  ;;  %v11684_v20 = vpop.f32.mrf.mxu3  ;;  %v2857_v24 = vpack.c.b16 %v2848_v15, %v2847_v45  ;;  %v10010_v15 = vld [vmem:[%s14757_s3 + $0xf4] sm:$0xf] }
 0x24c   : > { %v2228_v51 = vpop.f32.mrf.mxu0  ;;  %v2277_v11 = vpop.f32.mrf.mxu1 }
 0x24d   : > { %v11688_v60 = vadd.f32 %v2228_v51, %v11578_v56  ;;  %v11691_v49 = vadd.f32 %v2277_v11, %v11581_v25  ;;  %v11697_v48 = vpop.f32.mrf.mxu2  ;;  %v11699_v59 = vpop.f32.mrf.mxu3  ;;  %v10013_v56 = vld [vmem:[%s14757_s3 + $0x104] sm:$0xf0]  ;;  %v10012_v51 = vld [vmem:[%s14757_s3 + $0x104] sm:$0xf] }
 0x24e   : > { %v8845_v12 = vor.u32 %v10013_v56, %v8844_v14  ;;  %v8849_v57 = vor.u32 %v10012_v51, %v8846_v10  ;;  %v10009_v14 = vld [vmem:[%s14757_s3 + $0xe4] sm:$0xf0]  ;;  %v8838_v51 = vld [vmem:[%s14757_s3 + $0xf8] sm:$0xf0]  ;;  %v2828_v10 = vrot.slane %v2826_v34, 4 }
 0x24f   : > { %14837 = vst [vmem:[#allocation11_spill] sm:$0xff] %v11688_v60  ;;  %8757 = vmatmul.msk.bf16.gmra.mxu0 %vm543_vm4, %v2856_v4  ;;  %8765 = vmatmul.msk.bf16.gmra.mxu1 %vm543_vm4, %v2856_v4  ;;  %v10011_v4 = vld [vmem:[%s14757_s3 + $0xf4] sm:$0xf0] }
 0x250   : > { %14838 = vst [vmem:[#allocation14_spill] sm:$0xff] %v11691_v49  ;;  %3819 = vmatpush.bf16.msrb.mxu2 %v8845_v12  ;;  %v8837_v11 = vor.u32 %v10011_v4, %v8836_v37  ;;  %3917 = vmatpush.bf16.msrb.mxu0 %v8849_v57  ;;  %v8829_v12 = vor.u32 %v10009_v14, %v8828_v29  ;;  %v10015_v57 = vld [vmem:[%s14757_s3 + $0x114] sm:$0xf0]  ;;  %v2829_v29 = vrot.slane %v11593_v55, 5  ;;  %v10002_v49 = vld [vmem:[%s14757_s3 + $0xb4] sm:$0xf] }
 0x254   : > { %v11707_v25 = vpop.f32.mrf.mxu0  ;;  %v11709_v63 = vpop.f32.mrf.mxu1  ;;  %3820 = vmatpush.bf16.msrb.mxu2 %v8837_v11  ;;  %v8841_v11 = vor.u32 %v10010_v15, %v8838_v51  ;;  %v8830_v15 = vld [vmem:[%s14757_s3 + $0xe8] sm:$0xf0] }
 0x255   : > { %v11735_v37 = vpop.f32.mrf.mxu2  ;;  %v11737_v4 = vpop.f32.mrf.mxu3 }
 0x256   : > { %3918 = vmatpush.bf16.msrb.mxu0 %v8841_v11  ;;  %v8812_v11 = vld [vmem:[%s14757_s3 + $0xc0] sm:$0xf] }
 0x258   : > { %3821 = vmatpush.bf16.msrb.mxu2 %v8829_v12  ;;  %v10008_v12 = vld [vmem:[%s14757_s3 + $0xe4] sm:$0xf] }
 0x259   : > { %v8833_v51 = vor.u32 %v10008_v12, %v8830_v15  ;;  %v10006_v12 = vld [vmem:[%s14757_s3 + $0xd4] sm:$0xf] }
 0x25b   : > { %3919 = vmatpush.bf16.msrb.mxu0 %v8833_v51 }
 0x25c   : > { %v2233_v56 = vpop.f32.mrf.mxu0  ;;  %v2282_v33 = vpop.f32.mrf.mxu1 }
 0x25d   : > { %v11740_v45 = vadd.f32 %v2233_v56, %v11617_v8  ;;  %v11743_v47 = vadd.f32 %v2282_v33, %v11620_v52  ;;  %v8740_v8 = vrot.slane %v8732_v46, 9  ;;  %v8852_v52 = vld [vmem:[%s14757_s3 + $0x110] sm:$0xf]  ;;  %v10007_v33 = vld [vmem:[%s14757_s3 + $0xd4] sm:$0xf0]  ;;  %v10216_v46 = vmov 0  }
 0x25e   : > { %v8853_v14 = vor.u32 %v10015_v57, %v8852_v52  ;;  %3128 = vst.msk [vmem:[#allocation2 + $0x18] sm:$0xff] %vm11762_vm10, %v10216_v46  ;;  %v10005_v52 = vld [vmem:[%s14757_s3 + $0xc4] sm:$0xf0] }
 0x25f   : > { %14839 = vst [vmem:[#allocation15_spill] sm:$0xff] %v11740_v45  ;;  %8758 = vmatmul.msk.bf16.gmra.mxu0 %vm543_vm4, %v2857_v24  ;;  %8766 = vmatmul.msk.bf16.gmra.mxu1 %vm543_vm4, %v2857_v24  ;;  %v8820_v24 = vld [vmem:[%s14757_s3 + $0xd0] sm:$0xf] }
 0x260   : > { %14840 = vst [vmem:[#allocation16_spill] sm:$0xff] %v11743_v47  ;;  %v8821_v55 = vor.u32 %v10007_v33, %v8820_v24  ;;  %3875 = vmatpush.bf16.msrb.mxu3 %v8853_v14  ;;  %v2827_v24 = vsel %vm10471_vm7, %v8740_v8, %v2826_v34  ;;  %v2830_v33 = vsel %vm10471_vm7, %v2828_v10, %v2829_v29  ;;  %v8822_v34 = vld [vmem:[%s14757_s3 + $0xd8] sm:$0xf0]  ;;  %v11816_v10 = vpop.f32.mrf.mxu2  ;;  %v11818_v29 = vpop.f32.mrf.mxu3 }
 0x261   : > { %3123 = vst.msk [vmem:[#allocation2] sm:$0xff] %vm11762_vm10, %v10216_v46  ;;  %v8825_v8 = vor.u32 %v10006_v12, %v8822_v34  ;;  %v2849_v15 = vunpack.c.l.b16 %v2827_v24  ;;  %v2850_v51 = vunpack.c.l.b16 %v2830_v33  ;;  %v10004_v33 = vld [vmem:[%s14757_s3 + $0xc4] sm:$0xf] }
 0x262   : > { %3124 = vst.msk [vmem:[#allocation2 + $0x8] sm:$0xff] %vm11762_vm10, %v10216_v46  ;;  %3822 = vmatpush.bf16.msrb.mxu2 %v8821_v55  ;;  %v8813_v55 = vor.u32 %v10005_v52, %v8812_v11  ;;  %v8804_v11 = vld [vmem:[%s14757_s3 + $0xb0] sm:$0xf]  ;;  %v10003_v52 = vld [vmem:[%s14757_s3 + $0xb4] sm:$0xf0] }
 0x263   : > { %3129 = vst.msk [vmem:[#allocation2 + $0x20] sm:$0xff] %vm11762_vm10, %v10216_v46  ;;  %3920 = vmatpush.bf16.msrb.mxu0 %v8825_v8  ;;  %v8805_v24 = vor.u32 %v10003_v52, %v8804_v11  ;;  %v2858_v12 = vpack.c.b16 %v2850_v51, %v2849_v15  ;;  %v8796_v8 = vld [vmem:[%s14757_s3 + $0xa0] sm:$0xf]  ;;  %v10001_v11 = vld [vmem:[%s14757_s3 + $0xa4] sm:$0xf0] }
 0x264   : > { %v11793_v57 = vpop.f32.mrf.mxu0  ;;  %v11795_v14 = vpop.f32.mrf.mxu1  ;;  %3131 = vst.msk [vmem:[#allocation2 + $0x30] sm:$0xff] %vm11762_vm10, %v10216_v46  ;;  %v10014_v15 = vld [vmem:[%s14757_s3 + $0x114] sm:$0xf]  ;;  %v8854_v51 = vld [vmem:[%s14757_s3 + $0x118] sm:$0xf0] }
 0x265   : > { %3132 = vst.msk [vmem:[#allocation2 + $0x38] sm:$0xff] %vm11762_vm10, %v10216_v46  ;;  %v8857_v45 = vor.u32 %v10014_v15, %v8854_v51  ;;  %v10000_v51 = vld [vmem:[%s14757_s3 + $0xa4] sm:$0xf] }
 0x266   : > { %3134 = vst.msk [vmem:[#allocation2 + $0x48] sm:$0xff] %vm11762_vm10, %v10216_v46  ;;  %3823 = vmatpush.bf16.msrb.mxu2 %v8813_v55  ;;  %v8814_v55 = vld [vmem:[%s14757_s3 + $0xc8] sm:$0xf0] }
 0x267   : > { %3135 = vst.msk [vmem:[#allocation2 + $0x50] sm:$0xff] %vm11762_vm10, %v10216_v46  ;;  %v8817_v34 = vor.u32 %v10004_v33, %v8814_v55  ;;  %3973 = vmatpush.bf16.msrb.mxu1 %v8857_v45  ;;  %v8798_v45 = vld [vmem:[%s14757_s3 + $0xa8] sm:$0xf0] }
 0x268   : > { %3137 = vst.msk [vmem:[#allocation2 + $0x60] sm:$0xff] %vm11762_vm10, %v10216_v46  ;;  %v3395_v60 = vld [vmem:[#allocation2] sm:$0xff]  ;;  %v11896_v15 = vpop.f32.mrf.mxu3 }
 0x269   : > { %3138 = vst.msk [vmem:[#allocation2 + $0x68] sm:$0xff] %vm11762_vm10, %v10216_v46  ;;  %3921 = vmatpush.bf16.msrb.mxu0 %v8817_v34  ;;  %v9999_v34 = vld [vmem:[%s14757_s3 + $0x94] sm:$0xf0] }
 0x26a   : > { %3140 = vst.msk [vmem:[#allocation2 + $0x78] sm:$0xff] %vm11762_vm10, %v10216_v46  ;;  %3824 = vmatpush.bf16.msrb.mxu2 %v8805_v24  ;;  %v8797_v24 = vor.u32 %v10001_v11, %v8796_v8  ;;  %v3396_v8 = vld [vmem:[#allocation2 + $0x8] sm:$0xff]  ;;  %v3438_v11 = vshrl.u32 %v3395_v60, 16 }
 0x26b   : > { %3141 = vst.msk [vmem:[#allocation2 + $0x80] sm:$0xff] %vm11762_vm10, %v10216_v46 }
 0x26c   : > { %v2238_v52 = vpop.f32.mrf.mxu0  ;;  %v2287_v47 = vpop.f32.mrf.mxu1  ;;  %3143 = vst.msk [vmem:[#allocation2 + $0x90] sm:$0xff] %vm11762_vm10, %v10216_v46 }
 0x26d   : > { %v11863_v33 = vadd.f32 %v2238_v52, %v11654_v19  ;;  %v11866_v55 = vadd.f32 %v2287_v47, %v11657_v30  ;;  %3144 = vst.msk [vmem:[#allocation2 + $0x98] sm:$0xff] %vm11762_vm10, %v10216_v46  ;;  %v8806_v19 = vld [vmem:[%s14757_s3 + $0xb8] sm:$0xf0]  ;;  %v8788_v47 = vld [vmem:[%s14757_s3 + $0x90] sm:$0xf]  ;;  %v3441_v52 = vshll.u32 %v3395_v60, 16  ;;  %v8801_v60 = vor.u32 %v10000_v51, %v8798_v45 }
 0x26e   : > { %3146 = vst.msk [vmem:[#allocation2 + $0xa8] sm:$0xff] %vm11762_vm10, %v10216_v46  ;;  %v8809_v30 = vor.u32 %v10002_v49, %v8806_v19  ;;  %3825 = vmatpush.bf16.msrb.mxu2 %v8797_v24  ;;  %v11894_v49 = vpop.f32.mrf.mxu2  ;;  %v3447_v24 = vshll.u32 %v3396_v8, 16  ;;  %v3451_v19 = vshrl.u32 %v3396_v8, 16  ;;  %v9998_v8 = vld [vmem:[%s14757_s3 + $0x94] sm:$0xf] }
 0x26f   : > { %14843 = vst [vmem:[#allocation17_spill] sm:$0xff] %v11863_v33  ;;  %8759 = vmatmul.msk.bf16.gmra.mxu0 %vm543_vm4, %v2858_v12  ;;  %8767 = vmatmul.msk.bf16.gmra.mxu1 %vm543_vm4, %v2858_v12  ;;  %v8789_v12 = vor.u32 %v9999_v34, %v8788_v47  ;;  %v3440_v47 = vrot.slane %v3438_v11, 4  ;;  %v3443_v34 = vrot.slane %v3441_v52, 5  ;;  %v8790_v11 = vld [vmem:[%s14757_s3 + $0x98] sm:$0xf0]  ;;  %vm12000_vm4 = vmor %vm3184_vm1, %vm11988_vm15 }
 0x270   : > { %14844 = vst [vmem:[#allocation18_spill] sm:$0xff] %v11866_v55  ;;  %3922 = vmatpush.bf16.msrb.mxu0 %v8809_v30  ;;  %v3449_v52 = vrot.slane %v3447_v24, 5  ;;  %v3453_v51 = vrot.slane %v3451_v19, 4  ;;  %v2711_v24 = vadd.f32 %v11682_v21, %v11494_v3 }
 0x271   : > { %3147 = vst.msk [vmem:[#allocation2 + $0xb0] sm:$0xff] %vm11762_vm10, %v10216_v46  ;;  %v3444_v45 = vor.u32 %v3443_v34, %v3440_v47  ;;  %v2712_v47 = vadd.f32 %v11684_v20, %v11497_v41 }
 0x272   : > { %3149 = vst.msk [vmem:[#allocation2 + $0xc0] sm:$0xff] %vm11762_vm10, %v10216_v46  ;;  %3826 = vmatpush.bf16.msrb.mxu2 %v8789_v12  ;;  %v8793_v12 = vor.u32 %v9998_v8, %v8790_v11  ;;  %v3454_v19 = vor.u32 %v3453_v51, %v3449_v52  ;;  %v11959_v8 = vpop.f32.mrf.mxu3 }
 0x273   : > { %3150 = vst.msk [vmem:[#allocation2 + $0xc8] sm:$0xff] %vm11762_vm10, %v10216_v46  ;;  %v3445_v3 = vrot.slane %v3444_v45, 4 }
 0x274   : > { %3152 = vst.msk [vmem:[#allocation2 + $0xd8] sm:$0xff] %vm11762_vm10, %v10216_v46  ;;  %v11919_v55 = vpop.f32.mrf.mxu0  ;;  %v11921_v33 = vpop.f32.mrf.mxu1  ;;  %3923 = vmatpush.bf16.msrb.mxu0 %v8801_v60  ;;  %v3034_v60 = vld [vmem:[%s14756_s2] sm:$0x3] }
 0x275   : > { %3153 = vst.msk [vmem:[#allocation2 + $0xe0] sm:$0xff] %vm11762_vm10, %v10216_v46  ;;  %v11961_v11 = vperm.slane %v3034_v60, 0  ;;  %v11963_v2 = vperm.slane %v3034_v60, 1  ;;  %v3455_v60 = vrot.slane %v3454_v19, 4  ;;  %v3450_v39 = vsel %vm10316_vm3, %v3445_v3, %v3449_v52 }
 0x276   : > { %3130 = vst.msk [vmem:[#allocation2 + $0x28] sm:$0x11] %vm11915_vm12, %v10216_v46  ;;  %v11957_v34 = vpop.f32.mrf.mxu2  ;;  %v3648_v30 = vunpack.c.l.b16 %v3450_v39  ;;  %v3649_v19 = vunpack.c.h.b16 %v3450_v39 }
 0x277   : > { %3127 = vst.msk [vmem:[#allocation2 + $0x10] sm:$0x11] %vm11915_vm12, %v10216_v46 }
 0x278   : > { %3133 = vst.msk [vmem:[#allocation2 + $0x40] sm:$0x11] %vm11915_vm12, %v10216_v46  ;;  %3924 = vmatpush.bf16.msrb.mxu0 %v8793_v12 }
 0x279   : > { %3136 = vst.msk [vmem:[#allocation2 + $0x58] sm:$0x11] %vm11915_vm12, %v10216_v46 }
 0x27a   : > { %3139 = vst.msk [vmem:[#allocation2 + $0x70] sm:$0x11] %vm11915_vm12, %v10216_v46  ;;  %v11994_v52 = vpop.f32.mrf.mxu3 }
 0x27b   : > { %3142 = vst.msk [vmem:[#allocation2 + $0x88] sm:$0x11] %vm11915_vm12, %v10216_v46 }
 0x27c   : > { %3145 = vst.msk [vmem:[#allocation2 + $0xa0] sm:$0x11] %vm11915_vm12, %v10216_v46  ;;  %v2913_v21 = vpop.f32.mrf.mxu0  ;;  %v2962_v12 = vpop.f32.mrf.mxu1 }
 0x27d   : > { %3148 = vst.msk [vmem:[#allocation2 + $0xb8] sm:$0x11] %vm11915_vm12, %v10216_v46  ;;  %v3002_v41 = vadd.f32 %v2913_v21, %v2711_v24  ;;  %v3003_v20 = vadd.f32 %v2962_v12, %v2712_v47  ;;  %v2713_v47 = vadd.f32 %v11697_v48, %v11521_v18 }
 0x27e   : > { %3151 = vst.msk [vmem:[#allocation2 + $0xd0] sm:$0x11] %vm11915_vm12, %v10216_v46  ;;  %v3429_v51 = vld [vmem:[#allocation2 + $0x10] sm:$0x11]  ;;  %v11992_v48 = vpop.f32.mrf.mxu2 }
 0x27f   : > { %3154 = vst.msk [vmem:[#allocation2 + $0xe8] sm:$0x11] %vm11915_vm12, %v10216_v46  ;;  %v3457_v0 = vshll.u32 %v3429_v51, 16  ;;  %v3040_v45 = vadd.f32 %v11961_v11, %v3002_v41  ;;  %v3041_v23 = vadd.f32 %v11963_v2, %v3003_v20  ;;  %v2714_v41 = vadd.f32 %v11699_v59, %v11524_v53  ;;  %vm3194_vm12 = vmand %vm3125_vm11, %vm3193_vm6 }
 0x280   : > { %vm12027_vm0 = vmor %vm3194_vm12, %vm3191_vm9 }
 0x281   : > { %v3459_v24 = vrot.slane %v3457_v0, 5  ;;  %v3072_v21 = vmax.f32 %v3040_v45, 0.0  ;;  %v3073_v12 = vmax.f32 %v3041_v23, 0.0 }
 0x283   : > { %v3460_v46 = vsel %vm10316_vm3, %v3455_v60, %v3459_v24  ;;  %v3104_v20 = vpack.c.bf16 %v3073_v12, %v3072_v21 }
 0x284   : > { %v3650_v51 = vunpack.c.l.b16 %v3460_v46  ;;  %v3651_v7 = vunpack.c.h.b16 %v3460_v46  ;;  %v2915_v18 = vpop.f32.mrf.mxu0  ;;  %v2964_v23 = vpop.f32.mrf.mxu1  ;;  %v3186_v46 = vld [vmem:[#allocation2 + $0x18] sm:$0xff] }
 0x285   : > { %v3159_v3 = vshrl.u32 %v3104_v20, 16  ;;  %v3004_v39 = vadd.f32 %v2915_v18, %v2713_v47  ;;  %v3005_v60 = vadd.f32 %v2964_v23, %v2714_v41  ;;  %v3162_v24 = vshll.u32 %v3104_v20, 16 }
 0x286   : > { %v3680_v53 = vpack.c.b16 %v3650_v51, %v3648_v30  ;;  %v3681_v59 = vpack.c.b16 %v3651_v7, %v3649_v19  ;;  %v2715_v30 = vadd.f32 %v11735_v37, %v11544_v58  ;;  %v2716_v19 = vadd.f32 %v11737_v4, %v11547_v27  ;;  %v12016_v58 = vpop.f32.mrf.mxu2  ;;  %v12018_v27 = vpop.f32.mrf.mxu3 }
 0x287   : > { %v3161_v45 = vrot.slane %v3159_v3, 7  ;;  %v3042_v21 = vadd.f32 %v11961_v11, %v3004_v39  ;;  %v3043_v38 = vadd.f32 %v11963_v2, %v3005_v60 }
 0x288   : > { %3827 = vmatmul.bf16.vlgmr.msrb.gmra.mxu2 %v3680_v53  ;;  %8858 = vmatmul.msk.bf16.vlgmr.msrb.gmra.mxu3 %vm3794_vm2, %v3681_v59 }
 0x289   : > { %v3164_v47 = vor.u32 %v3162_v24, %v3161_v45  ;;  %v3074_v41 = vmax.f32 %v3042_v21, 0.0  ;;  %3925 = vmatmul.bf16.vlgmr.msrb.gmra.mxu0 %v3680_v53  ;;  %8866 = vmatmul.msk.bf16.vlgmr.msrb.gmra.mxu1 %vm3794_vm2, %v3681_v59  ;;  %v3075_v7 = vmax.f32 %v3043_v38, 0.0  ;;  %v3196_v24 = vld [vmem:[#allocation2 + $0x28] sm:$0x11] }
 0x28b   : > { %v3187_v20 = vsel %vm12000_vm4, %v3164_v47, %v3186_v46  ;;  %v3105_v51 = vpack.c.bf16 %v3075_v7, %v3074_v41  ;;  %v3165_v47 = vrot.slane %v3161_v45, 4 }
 0x28c   : > { %3188 = vst [vmem:[#allocation2 + $0x18] sm:$0xff] %v3187_v20  ;;  %v2918_v0 = vpop.f32.mrf.mxu0  ;;  %v2967_v18 = vpop.f32.mrf.mxu1 }
 0x28d   : > { %v3006_v38 = vadd.f32 %v2918_v0, %v2715_v30  ;;  %v3007_v23 = vadd.f32 %v2967_v18, %v2716_v19  ;;  %v3167_v3 = vshrl.u32 %v3105_v51, 16  ;;  %v3170_v53 = vshll.u32 %v3105_v51, 16 }
 0x28e   : > { %v3462_v30 = vshrl.u32 %v3187_v20, 16  ;;  %v2717_v19 = vadd.f32 %v11816_v10, %v11568_v31  ;;  %v2718_v0 = vadd.f32 %v11818_v29, %v11571_v28  ;;  %v2074_v51 = vadd.f32 %v11550_v43, %v11322_v26  ;;  %v14855_v43 = vld [vmem:[#allocation7_spill] sm:$0xff]  ;;  %v14856_v29 = vld [vmem:[#allocation5_spill] sm:$0xff] }
 0x28f   : > { %v3044_v37 = vadd.f32 %v11961_v11, %v3006_v38  ;;  %v3045_v4 = vadd.f32 %v11963_v2, %v3007_v23  ;;  %v3169_v60 = vrot.slane %v3167_v3, 7  ;;  %v3465_v38 = vshll.u32 %v3187_v20, 16 }
 0x290   : > { %v2075_v23 = vadd.f32 %v11552_v17, %v11325_v61  ;;  %v2078_v31 = vadd.f32 %v11596_v62, %v11367_v54  ;;  %v2079_v61 = vadd.f32 %v11598_v40, %v11370_v22  ;;  %v2082_v17 = vadd.f32 %v11634_v35, %v14855_v43  ;;  %v3220_v35 = vld [vmem:[#allocation2 + $0x30] sm:$0xff] }
 0x291   : > { %v3076_v21 = vmax.f32 %v3044_v37, 0.0  ;;  %v3077_v46 = vmax.f32 %v3045_v4, 0.0  ;;  %v3172_v41 = vor.u32 %v3170_v53, %v3169_v60  ;;  %v3174_v7 = vrot.slane %v3169_v60, 4 }
 0x292   : > { %v2083_v20 = vadd.f32 %v11636_v16, %v14856_v29  ;;  %v3464_v60 = vrot.slane %v3462_v30, 4  ;;  %v12061_v40 = vadd.f32 %v11674_v5, %v2074_v51  ;;  %v2642_v30 = vpop.f32.mrf.mxu2  ;;  %v12077_v5 = vadd.f32 %v11793_v57, %v2082_v17  ;;  %v3224_v29 = vld [vmem:[#allocation2 + $0x40] sm:$0x11] }
 0x293   : > { %v3106_v18 = vpack.c.bf16 %v3077_v46, %v3076_v21  ;;  %v3173_v45 = vsel %vm12023_vm13, %v3165_v47, %v3172_v41  ;;  %v3197_v3 = vsel %vm12027_vm0, %v3174_v7, %v3196_v24  ;;  %v3467_v24 = vrot.slane %v3465_v38, 5  ;;  %v14857_v21 = vld [vmem:[#allocation6_spill] sm:$0xff]  ;;  %v14858_v47 = vld [vmem:[#allocation8_spill] sm:$0xff] }
 0x294   : > { %v2920_v37 = vpop.f32.mrf.mxu0  ;;  %v2969_v4 = vpop.f32.mrf.mxu1  ;;  %3189 = vst.msk [vmem:[#allocation2 + $0x20] sm:$0xff] %vm11762_vm10, %v3173_v45  ;;  %v2086_v46 = vadd.f32 %v11667_v42, %v14857_v21  ;;  %v2087_v22 = vadd.f32 %v11669_v44, %v14858_v47  ;;  %v12065_v41 = vadd.f32 %v11676_v9, %v2075_v23  ;;  %v12068_v7 = vadd.f32 %v11707_v25, %v2078_v31 }
 0x295   : > { %v3200_v28 = vshrl.u32 %v3106_v18, 16  ;;  %v3008_v10 = vadd.f32 %v2920_v37, %v2717_v19  ;;  %v3009_v26 = vadd.f32 %v2969_v4, %v2718_v0  ;;  %3198 = vst [vmem:[#allocation2 + $0x28] sm:$0x11] %v3197_v3  ;;  %v3203_v54 = vshll.u32 %v3106_v18, 16  ;;  %v12070_v19 = vpop.f32.mrf.mxu3 }
 0x296   : > { %v12074_v44 = vadd.f32 %v11709_v63, %v2079_v61  ;;  %v12080_v18 = vadd.f32 %v11795_v14, %v2083_v20  ;;  %v2719_v25 = vadd.f32 %v11894_v49, %v11587_v36  ;;  %v2720_v38 = vadd.f32 %v11896_v15, %v11590_v6 }
 0x297   : > { %v12053_v53 = vrot.slane %v3200_v28, 7  ;;  %v3046_v62 = vadd.f32 %v11961_v11, %v3008_v10  ;;  %v3047_v16 = vadd.f32 %v11963_v2, %v3009_v26  ;;  %v3468_v23 = vor.u32 %v3467_v24, %v3464_v60  ;;  %v14859_v24 = vld [vmem:[#allocation9_spill] sm:$0xff] }
 0x298   : > { %v2721_v63 = vadd.f32 %v11957_v34, %v11611_v13  ;;  %v2722_v57 = vadd.f32 %v11959_v8, %v11614_v50  ;;  %v12093_v14 = vadd.f32 %v11919_v55, %v2086_v46  ;;  %v12103_v50 = vadd.f32 %v11992_v48, %v11628_v32  ;;  %v14860_v46 = vld [vmem:[#allocation10_spill] sm:$0xff] }
 0x299   : > { %v3205_v42 = vor.u32 %v3203_v54, %v12053_v53  ;;  %v3078_v0 = vmax.f32 %v3046_v62, 0.0  ;;  %v3079_v9 = vmax.f32 %v3047_v16, 0.0  ;;  %v12107_v55 = vadd.f32 %v11994_v52, %v11631_v1 }
 0x29a   : > { %v12110_v34 = vadd.f32 %v11921_v33, %v2087_v22  ;;  %v3469_v10 = vrot.slane %v3468_v23, 4  ;;  %v3206_v48 = vrot.slane %v12053_v53, 4  ;;  %v12118_v21 = vadd.f32 %v12016_v58, %v14859_v24  ;;  %v2644_v22 = vpop.f32.mrf.mxu2  ;;  %v14862_v23 = vld [vmem:[#allocation12_spill] sm:$0xff] }
 0x29b   : > { %v3221_v51 = vsel %vm12000_vm4, %v3205_v42, %v3220_v35  ;;  %v3107_v45 = vpack.c.bf16 %v3079_v9, %v3078_v0  ;;  %v12095_v49 = vld [vmem:[#allocation2 + $0x20] sm:$0xff]  ;;  %v12122_v47 = vadd.f32 %v12018_v27, %v14860_v46 }
 0x29c   : > { %3222 = vst [vmem:[#allocation2 + $0x30] sm:$0xff] %v3221_v51  ;;  %v2923_v3 = vpop.f32.mrf.mxu0  ;;  %v2972_v36 = vpop.f32.mrf.mxu1  ;;  %v12097_v37 = vld [vmem:[#allocation2 + $0x28] sm:$0x11]  ;;  %v3471_v4 = vshll.u32 %v12095_v49, 16  ;;  %v3475_v13 = vshrl.u32 %v12095_v49, 16  ;;  %v3486_v20 = vshrl.u32 %v3221_v51, 16 }
 0x29d   : > { %v3010_v6 = vadd.f32 %v2923_v3, %v2719_v25  ;;  %v3011_v15 = vadd.f32 %v2972_v36, %v2720_v38  ;;  %v3208_v8 = vshrl.u32 %v3107_v45, 16  ;;  %v3481_v26 = vshll.u32 %v12097_v37, 16  ;;  %v2693_v35 = vpop.f32.mrf.mxu3 }
 0x29e   : > { %v3211_v43 = vshll.u32 %v3107_v45, 16  ;;  %v3473_v17 = vrot.slane %v3471_v4, 5  ;;  %v3477_v32 = vrot.slane %v3475_v13, 4  ;;  %v3489_v62 = vshll.u32 %v3221_v51, 16 }
 0x29f   : > { %v3048_v31 = vadd.f32 %v11961_v11, %v3010_v6  ;;  %v3049_v28 = vadd.f32 %v11963_v2, %v3011_v15  ;;  %v3210_v61 = vrot.slane %v3208_v8, 7  ;;  %v3483_v53 = vrot.slane %v3481_v26, 5 }
 0x2a0   : > { %v3478_v54 = vor.u32 %v3477_v32, %v3473_v17  ;;  %v3474_v58 = vsel %vm10316_vm3, %v3469_v10, %v3473_v17  ;;  %v12131_v45 = vadd.f32 %v2642_v30, %v14862_v23  ;;  %v3488_v15 = vrot.slane %v3486_v20, 4  ;;  %v3248_v10 = vld [vmem:[#allocation2 + $0x48] sm:$0xff]  ;;  %v4398_v32 = vld [vmem:[#allocation2 + $0x18] sm:$0xee] }
 0x2a1   : > { %v3080_v1 = vmax.f32 %v3048_v31, 0.0  ;;  %v3081_v52 = vmax.f32 %v3049_v28, 0.0  ;;  %v3213_v33 = vor.u32 %v3211_v43, %v3210_v61  ;;  %v3215_v60 = vrot.slane %v3210_v61, 4 }
 0x2a2   : > { %v3479_v51 = vrot.slane %v3478_v54, 4  ;;  %v3491_v4 = vrot.slane %v3489_v62, 5  ;;  %v4430_v13 = vrot.slane %v12095_v49, 5  ;;  %v3652_v28 = vunpack.c.l.b16 %v3474_v58 }
 0x2a3   : > { %v3108_v16 = vpack.c.bf16 %v3081_v52, %v3080_v1  ;;  %v3214_v42 = vsel %vm12023_vm13, %v3206_v48, %v3213_v33  ;;  %v3225_v0 = vsel %vm12027_vm0, %v3215_v60, %v3224_v29  ;;  %v3653_v61 = vunpack.c.h.b16 %v3474_v58  ;;  %v14863_v33 = vld [vmem:[#allocation13_spill] sm:$0xff] }
 0x2a4   : > { %v2925_v9 = vpop.f32.mrf.mxu0  ;;  %v2974_v25 = vpop.f32.mrf.mxu1  ;;  %3223 = vst.msk [vmem:[#allocation2 + $0x38] sm:$0xff] %vm11762_vm10, %v3214_v42  ;;  %v3484_v6 = vsel %vm10316_vm3, %v3479_v51, %v3483_v53  ;;  %v4432_v48 = vrot.slane %v4430_v13, 4  ;;  %v4433_v29 = vrot.slane %v12097_v37, 5  ;;  %v3492_v20 = vor.u32 %v3491_v4, %v3488_v15 }
 0x2a5   : > { %v3228_v27 = vshrl.u32 %v3108_v16, 16  ;;  %v3012_v3 = vadd.f32 %v2925_v9, %v2721_v63  ;;  %v3013_v36 = vadd.f32 %v2974_v25, %v2722_v57  ;;  %3226 = vst [vmem:[#allocation2 + $0x40] sm:$0x11] %v3225_v0  ;;  %v3231_v31 = vshll.u32 %v3108_v16, 16  ;;  %v2647_v25 = vpop.f32.mrf.mxu2  ;;  %v2696_v58 = vpop.f32.mrf.mxu3 }
 0x2a6   : > { %v3654_v63 = vunpack.c.l.b16 %v3484_v6  ;;  %v3655_v57 = vunpack.c.h.b16 %v3484_v6  ;;  %v12146_v60 = vadd.f32 %v12070_v19, %v14863_v33  ;;  %v12149_v54 = vadd.f32 %v2644_v22, %v12061_v40 }
 0x2a7   : > { %v12138_v8 = vrot.slane %v3228_v27, 7  ;;  %v3050_v30 = vadd.f32 %v11961_v11, %v3012_v3  ;;  %v3051_v26 = vadd.f32 %v11963_v2, %v3013_v36  ;;  %v12155_v46 = vsel %vm10471_vm7, %v4432_v48, %v4433_v29 }
 0x2a8   : > { %v3682_v1 = vpack.c.b16 %v3654_v63, %v3652_v28  ;;  %v3683_v52 = vpack.c.b16 %v3655_v57, %v3653_v61  ;;  %v12158_v37 = vadd.f32 %v2693_v35, %v12065_v41  ;;  %v9027_v40 = vrot.slane %v4398_v32, 9  ;;  %v3252_v28 = vld [vmem:[#allocation2 + $0x58] sm:$0x11] }
 0x2a9   : > { %v3233_v43 = vor.u32 %v3231_v31, %v12138_v8  ;;  %v3082_v17 = vmax.f32 %v3050_v30, 0.0  ;;  %v3083_v49 = vmax.f32 %v3051_v26, 0.0  ;;  %v3234_v51 = vrot.slane %v12138_v8, 4 }
 0x2aa   : > { %3832 = vmatmul.bf16.gmra.mxu2 %v3682_v1  ;;  %8859 = vmatmul.msk.bf16.gmra.mxu3 %vm3794_vm2, %v3683_v52  ;;  %v3493_v27 = vrot.slane %v3492_v20, 4  ;;  %v4431_v3 = vsel %vm10471_vm7, %v9027_v40, %v4430_v13  ;;  %v4502_v13 = vunpack.c.l.b16 %v12155_v46 }
 0x2ab   : > { %v3249_v62 = vsel %vm12000_vm4, %v3233_v43, %v3248_v10  ;;  %v3109_v16 = vpack.c.bf16 %v3083_v49, %v3082_v17  ;;  %v12161_v42 = vld [vmem:[#allocation2 + $0x38] sm:$0xff]  ;;  %3930 = vmatmul.bf16.gmra.mxu0 %v3682_v1  ;;  %8867 = vmatmul.msk.bf16.gmra.mxu1 %vm3794_vm2, %v3683_v52  ;;  %v4500_v61 = vunpack.c.l.b16 %v4431_v3  ;;  %v4501_v29 = vunpack.c.h.b16 %v4431_v3 }
 0x2ac   : > { %3250 = vst [vmem:[#allocation2 + $0x48] sm:$0xff] %v3249_v62  ;;  %v2928_v19 = vpop.f32.mrf.mxu0  ;;  %v2977_v53 = vpop.f32.mrf.mxu1  ;;  %v12166_v9 = vld [vmem:[#allocation2 + $0x40] sm:$0x11]  ;;  %v3495_v41 = vshll.u32 %v12161_v42, 16  ;;  %v3499_v35 = vshrl.u32 %v12161_v42, 16  ;;  %v3510_v6 = vshrl.u32 %v3249_v62, 16 }
 0x2ad   : > { %v3014_v22 = vadd.f32 %v2928_v19, %v12103_v50  ;;  %v3015_v0 = vadd.f32 %v2977_v53, %v12107_v55  ;;  %v3236_v23 = vshrl.u32 %v3109_v16, 16  ;;  %v3239_v36 = vshll.u32 %v3109_v16, 16 }
 0x2ae   : > { %v3497_v4 = vrot.slane %v3495_v41, 5  ;;  %v3501_v31 = vrot.slane %v3499_v35, 4  ;;  %v3505_v30 = vshll.u32 %v12166_v9, 16  ;;  %v3513_v8 = vshll.u32 %v3249_v62, 16 }
 0x2af   : > { %v3052_v50 = vadd.f32 %v11961_v11, %v3014_v22  ;;  %v3053_v55 = vadd.f32 %v11963_v2, %v3015_v0  ;;  %v3238_v15 = vrot.slane %v3236_v23, 7  ;;  %v3512_v48 = vrot.slane %v3510_v6, 4 }
 0x2b0   : > { %v3502_v43 = vor.u32 %v3501_v31, %v3497_v4  ;;  %v3498_v32 = vsel %vm10316_vm3, %v3493_v27, %v3497_v4  ;;  %v3507_v62 = vrot.slane %v3505_v30, 5  ;;  %v3515_v40 = vrot.slane %v3513_v8, 5  ;;  %v14865_v4 = vld [vmem:[#allocation11_spill] sm:$0xff] }
 0x2b1   : > { %v3084_v10 = vmax.f32 %v3052_v50, 0.0  ;;  %v3085_v26 = vmax.f32 %v3053_v55, 0.0  ;;  %v3241_v63 = vor.u32 %v3239_v36, %v3238_v15  ;;  %v3243_v57 = vrot.slane %v3238_v15, 4  ;;  %v2649_v36 = vpop.f32.mrf.mxu2  ;;  %v3276_v50 = vld [vmem:[#allocation2 + $0x60] sm:$0xff] }
 0x2b2   : > { %v3503_v33 = vrot.slane %v3502_v43, 4  ;;  %v3656_v0 = vunpack.c.l.b16 %v3498_v32  ;;  %v4503_v41 = vunpack.c.h.b16 %v12155_v46  ;;  %v12190_v35 = vpack.c.b16 %v4502_v13, %v4500_v61 }
 0x2b3   : > { %v3110_v17 = vpack.c.bf16 %v3085_v26, %v3084_v10  ;;  %v3242_v49 = vsel %vm12023_vm13, %v3234_v51, %v3241_v63  ;;  %v3253_v1 = vsel %vm12027_vm0, %v3243_v57, %v3252_v28  ;;  %v3657_v3 = vunpack.c.h.b16 %v3498_v32  ;;  %v4399_v10 = vld [vmem:[#allocation2 + $0x30] sm:$0xee]  ;;  %v14866_v57 = vld [vmem:[#allocation14_spill] sm:$0xff] }
 0x2b4   : > { %v2930_v52 = vpop.f32.mrf.mxu0  ;;  %v2979_v20 = vpop.f32.mrf.mxu1  ;;  %3251 = vst.msk [vmem:[#allocation2 + $0x50] sm:$0xff] %vm11762_vm10, %v3242_v49  ;;  %v3508_v22 = vsel %vm10316_vm3, %v3503_v33, %v3507_v62  ;;  %v12196_v15 = vpack.c.b16 %v4503_v41, %v4501_v29  ;;  %v12199_v31 = vadd.f32 %v2647_v25, %v14865_v4  ;;  %v3516_v28 = vor.u32 %v3515_v40, %v3512_v48 }
 0x2b5   : > { %v3256_v16 = vshrl.u32 %v3110_v17, 16  ;;  %v3016_v19 = vadd.f32 %v2930_v52, %v12118_v21  ;;  %v3017_v53 = vadd.f32 %v2979_v20, %v12122_v47  ;;  %3254 = vst [vmem:[#allocation2 + $0x58] sm:$0x11] %v3253_v1  ;;  %v3259_v23 = vshll.u32 %v3110_v17, 16  ;;  %v2698_v21 = vpop.f32.mrf.mxu3 }
 0x2b6   : > { %v3658_v55 = vunpack.c.l.b16 %v3508_v22  ;;  %v3659_v6 = vunpack.c.h.b16 %v3508_v22  ;;  %v4437_v63 = vrot.slane %v12161_v42, 5  ;;  %v12204_v43 = vadd.f32 %v2696_v58, %v14866_v57 }
 0x2b7   : > { %v12192_v51 = vrot.slane %v3256_v16, 7  ;;  %v3054_v27 = vadd.f32 %v11961_v11, %v3016_v19  ;;  %v3055_v47 = vadd.f32 %v11963_v2, %v3017_v53  ;;  %v12207_v13 = vadd.f32 %v2649_v36, %v12068_v7 }
 0x2b8   : > { %v3684_v8 = vpack.c.b16 %v3658_v55, %v3656_v0  ;;  %v3685_v61 = vpack.c.b16 %v3659_v6, %v3657_v3  ;;  %v12210_v17 = vadd.f32 %v2698_v21, %v12074_v44  ;;  %v9028_v1 = vrot.slane %v4399_v10, 9  ;;  %v3280_v3 = vld [vmem:[#allocation2 + $0x70] sm:$0x11] }
 0x2b9   : > { %v3261_v46 = vor.u32 %v3259_v23, %v12192_v51  ;;  %v3086_v30 = vmax.f32 %v3054_v27, 0.0  ;;  %v3087_v26 = vmax.f32 %v3055_v47, 0.0  ;;  %v3262_v62 = vrot.slane %v12192_v51, 4 }
 0x2ba   : > { %3837 = vmatmul.bf16.gmra.mxu2 %v3684_v8  ;;  %8860 = vmatmul.msk.bf16.gmra.mxu3 %vm3794_vm2, %v3685_v61  ;;  %v3517_v19 = vrot.slane %v3516_v28, 4  ;;  %v4438_v53 = vsel %vm10471_vm7, %v9028_v1, %v4437_v63  ;;  %v4440_v28 = vrot.slane %v12166_v9, 5 }
 0x2bb   : > { %v3277_v25 = vsel %vm12000_vm4, %v3261_v46, %v3276_v50  ;;  %v3111_v32 = vpack.c.bf16 %v3087_v26, %v3086_v30  ;;  %v12215_v42 = vld [vmem:[#allocation2 + $0x50] sm:$0xff]  ;;  %3935 = vmatmul.bf16.gmra.mxu0 %v3684_v8  ;;  %8868 = vmatmul.msk.bf16.gmra.mxu1 %vm3794_vm2, %v3685_v61  ;;  %v4504_v10 = vunpack.c.l.b16 %v4438_v53 }
 0x2bc   : > { %3278 = vst [vmem:[#allocation2 + $0x60] sm:$0xff] %v3277_v25  ;;  %v2933_v48 = vpop.f32.mrf.mxu0  ;;  %v2982_v29 = vpop.f32.mrf.mxu1  ;;  %v3534_v58 = vshrl.u32 %v3277_v25, 16  ;;  %v3537_v49 = vshll.u32 %v3277_v25, 16  ;;  %v12220_v52 = vld [vmem:[#allocation2 + $0x58] sm:$0x11]  ;;  %v3519_v20 = vshll.u32 %v12215_v42, 16 }
 0x2bd   : > { %v3018_v7 = vadd.f32 %v2933_v48, %v12131_v45  ;;  %v3019_v44 = vadd.f32 %v2982_v29, %v12146_v60  ;;  %v3523_v33 = vshrl.u32 %v12215_v42, 16  ;;  %v3264_v16 = vshrl.u32 %v3111_v32, 16 }
 0x2be   : > { %v3529_v45 = vshll.u32 %v12220_v52, 16  ;;  %v4439_v60 = vrot.slane %v4437_v63, 4  ;;  %v3267_v41 = vshll.u32 %v3111_v32, 16  ;;  %v3521_v23 = vrot.slane %v3519_v20, 5 }
 0x2bf   : > { %v3056_v40 = vadd.f32 %v11961_v11, %v3018_v7  ;;  %v3057_v22 = vadd.f32 %v11963_v2, %v3019_v44  ;;  %v3266_v0 = vrot.slane %v3264_v16, 7  ;;  %v3525_v27 = vrot.slane %v3523_v33, 4  ;;  %v2701_v16 = vpop.f32.mrf.mxu3 }
 0x2c0   : > { %v3536_v51 = vrot.slane %v3534_v58, 4  ;;  %v3539_v50 = vrot.slane %v3537_v49, 5  ;;  %v3522_v6 = vsel %vm10316_vm3, %v3517_v19, %v3521_v23  ;;  %v3531_v30 = vrot.slane %v3529_v45, 5 }
 0x2c1   : > { %v3088_v36 = vmax.f32 %v3056_v40, 0.0  ;;  %v3089_v21 = vmax.f32 %v3057_v22, 0.0  ;;  %v3269_v47 = vor.u32 %v3267_v41, %v3266_v0  ;;  %v3271_v55 = vrot.slane %v3266_v0, 4 }
 0x2c2   : > { %v3526_v4 = vor.u32 %v3525_v27, %v3521_v23  ;;  %v3660_v25 = vunpack.c.l.b16 %v3522_v6  ;;  %v3661_v9 = vunpack.c.h.b16 %v3522_v6  ;;  %v3540_v1 = vor.u32 %v3539_v50, %v3536_v51  ;;  %v4400_v27 = vld [vmem:[#allocation2 + $0x48] sm:$0xee]  ;;  %v14867_v50 = vld [vmem:[#allocation15_spill] sm:$0xff] }
 0x2c3   : > { %v3112_v46 = vpack.c.bf16 %v3089_v21, %v3088_v36  ;;  %v3270_v26 = vsel %vm12023_vm13, %v3262_v62, %v3269_v47  ;;  %v3281_v8 = vsel %vm12027_vm0, %v3271_v55, %v3280_v3  ;;  %v4441_v7 = vsel %vm10471_vm7, %v4439_v60, %v4440_v28  ;;  %v14868_v55 = vld [vmem:[#allocation16_spill] sm:$0xff] }
 0x2c4   : > { %v2935_v61 = vpop.f32.mrf.mxu0  ;;  %v2984_v63 = vpop.f32.mrf.mxu1  ;;  %v3527_v57 = vrot.slane %v3526_v4, 4  ;;  %3279 = vst.msk [vmem:[#allocation2 + $0x68] sm:$0xff] %vm11762_vm10, %v3270_v26  ;;  %v4505_v40 = vunpack.c.h.b16 %v4438_v53  ;;  %v4506_v22 = vunpack.c.l.b16 %v4441_v7  ;;  %v4507_v45 = vunpack.c.h.b16 %v4441_v7 }
 0x2c5   : > { %v3284_v32 = vshrl.u32 %v3112_v46, 16  ;;  %v3020_v48 = vadd.f32 %v2935_v61, %v12149_v54  ;;  %v3021_v29 = vadd.f32 %v2984_v63, %v12158_v37  ;;  %3282 = vst [vmem:[#allocation2 + $0x70] sm:$0x11] %v3281_v8  ;;  %v3287_v58 = vshll.u32 %v3112_v46, 16  ;;  %v2652_v54 = vpop.f32.mrf.mxu2  ;;  %v3304_v37 = vld [vmem:[#allocation2 + $0x78] sm:$0xff] }
 0x2c6   : > { %v3532_v49 = vsel %vm10316_vm3, %v3527_v57, %v3531_v30  ;;  %v4444_v60 = vrot.slane %v12215_v42, 5  ;;  %v12251_v21 = vpack.c.b16 %v4506_v22, %v4504_v10  ;;  %v12253_v51 = vpack.c.b16 %v4507_v45, %v4505_v40 }
 0x2c7   : > { %v12245_v44 = vrot.slane %v3284_v32, 7  ;;  %v3058_v20 = vadd.f32 %v11961_v11, %v3020_v48  ;;  %v3059_v33 = vadd.f32 %v11963_v2, %v3021_v29  ;;  %v3662_v62 = vunpack.c.l.b16 %v3532_v49 }
 0x2c8   : > { %v3663_v19 = vunpack.c.h.b16 %v3532_v49  ;;  %v12256_v47 = vadd.f32 %v2652_v54, %v14867_v50  ;;  %v12259_v53 = vadd.f32 %v2701_v16, %v14868_v55  ;;  %v3541_v28 = vrot.slane %v3540_v1, 4 }
 0x2c9   : > { %v3289_v0 = vor.u32 %v3287_v58, %v12245_v44  ;;  %v3090_v41 = vmax.f32 %v3058_v20, 0.0  ;;  %v3091_v23 = vmax.f32 %v3059_v33, 0.0  ;;  %v3686_v3 = vpack.c.b16 %v3662_v62, %v3660_v25 }
 0x2ca   : > { %v3687_v36 = vpack.c.b16 %v3663_v19, %v3661_v9  ;;  %v9029_v8 = vrot.slane %v4400_v27, 9  ;;  %v3290_v61 = vrot.slane %v12245_v44, 4  ;;  %v4446_v45 = vrot.slane %v4444_v60, 4 }
 0x2cb   : > { %v3305_v6 = vsel %vm12000_vm4, %v3289_v0, %v3304_v37  ;;  %v3113_v4 = vpack.c.bf16 %v3091_v23, %v3090_v41  ;;  %3842 = vmatmul.bf16.gmra.mxu2 %v3686_v3  ;;  %v12264_v30 = vld [vmem:[#allocation2 + $0x68] sm:$0xff]  ;;  %3940 = vmatmul.bf16.gmra.mxu0 %v3686_v3  ;;  %v12281_v23 = vpop.f32.mrf.mxu3 }
 0x2cc   : > { %3306 = vst [vmem:[#allocation2 + $0x78] sm:$0xff] %v3305_v6  ;;  %8861 = vmatmul.msk.bf16.gmra.mxu3 %vm3794_vm2, %v3687_v36  ;;  %v2938_v42 = vpop.f32.mrf.mxu0  ;;  %v2987_v46 = vpop.f32.mrf.mxu1  ;;  %v3558_v10 = vshrl.u32 %v3305_v6, 16  ;;  %v3561_v26 = vshll.u32 %v3305_v6, 16  ;;  %8869 = vmatmul.msk.bf16.gmra.mxu1 %vm3794_vm2, %v3687_v36  ;;  %v12270_v32 = vld [vmem:[#allocation2 + $0x70] sm:$0x11]  ;;  %v3543_v29 = vshll.u32 %v12264_v30, 16  ;;  %v4445_v58 = vsel %vm10471_vm7, %v9029_v8, %v4444_v60 }
 0x2cd   : > { %v3292_v63 = vshrl.u32 %v3113_v4, 16  ;;  %v3022_v57 = vadd.f32 %v2938_v42, %v12199_v31  ;;  %v3023_v25 = vadd.f32 %v2987_v46, %v12204_v43  ;;  %v3295_v48 = vshll.u32 %v3113_v4, 16  ;;  %v3308_v31 = vld [vmem:[#allocation2 + $0x88] sm:$0x11]  ;;  %v2654_v41 = vpop.f32.mrf.mxu2 }
 0x2ce   : > { %v3547_v9 = vshrl.u32 %v12264_v30, 16  ;;  %v3553_v44 = vshll.u32 %v12270_v32, 16  ;;  %v3545_v20 = vrot.slane %v3543_v29, 5  ;;  %v3560_v33 = vrot.slane %v3558_v10, 4 }
 0x2cf   : > { %v3294_v49 = vrot.slane %v3292_v63, 7  ;;  %v3060_v1 = vadd.f32 %v11961_v11, %v3022_v57  ;;  %v3061_v7 = vadd.f32 %v11963_v2, %v3023_v25  ;;  %v3563_v62 = vrot.slane %v3561_v26, 5 }
 0x2d0   : > { %v3549_v43 = vrot.slane %v3547_v9, 4  ;;  %v3546_v40 = vsel %vm10316_vm3, %v3541_v28, %v3545_v20  ;;  %v4508_v0 = vunpack.c.l.b16 %v4445_v58  ;;  %v4509_v50 = vunpack.c.h.b16 %v4445_v58  ;;  %v3332_v58 = vld [vmem:[#allocation2 + $0x90] sm:$0xff] }
 0x2d1   : > { %v3297_v54 = vor.u32 %v3295_v48, %v3294_v49  ;;  %v3299_v16 = vrot.slane %v3294_v49, 4  ;;  %v3092_v37 = vmax.f32 %v3060_v1, 0.0  ;;  %v3093_v19 = vmax.f32 %v3061_v7, 0.0 }
 0x2d2   : > { %v3550_v22 = vor.u32 %v3549_v43, %v3545_v20  ;;  %v3555_v42 = vrot.slane %v3553_v44, 5  ;;  %v3564_v60 = vor.u32 %v3563_v62, %v3560_v33  ;;  %v4447_v46 = vrot.slane %v12220_v52, 5 }
 0x2d3   : > { %v3298_v27 = vsel %vm12023_vm13, %v3290_v61, %v3297_v54  ;;  %v3309_v3 = vsel %vm12027_vm0, %v3299_v16, %v3308_v31  ;;  %v3114_v36 = vpack.c.bf16 %v3093_v19, %v3092_v37  ;;  %v3664_v8 = vunpack.c.l.b16 %v3546_v40 }
 0x2d4   : > { %3307 = vst.msk [vmem:[#allocation2 + $0x80] sm:$0xff] %vm11762_vm10, %v3298_v27  ;;  %v2940_v55 = vpop.f32.mrf.mxu0  ;;  %v2989_v6 = vpop.f32.mrf.mxu1  ;;  %v3551_v4 = vrot.slane %v3550_v22, 4  ;;  %v3665_v57 = vunpack.c.h.b16 %v3546_v40  ;;  %v4448_v25 = vsel %vm10471_vm7, %v4446_v45, %v4447_v46  ;;  %v3565_v49 = vrot.slane %v3564_v60, 4  ;;  %v8996_v45 = vld [vmem:[%s14757_s3 + $0x70] sm:$0xf] }
 0x2d5   : > { %3310 = vst [vmem:[#allocation2 + $0x88] sm:$0x11] %v3309_v3  ;;  %v3312_v28 = vshrl.u32 %v3114_v36, 16  ;;  %v3024_v10 = vadd.f32 %v2940_v55, %v12207_v13  ;;  %v3025_v26 = vadd.f32 %v2989_v6, %v12210_v17  ;;  %v3315_v61 = vshll.u32 %v3114_v36, 16  ;;  %v12325_v6 = vpop.f32.mrf.mxu2 }
 0x2d6   : > { %v3556_v63 = vsel %vm10316_vm3, %v3551_v4, %v3555_v42  ;;  %v4510_v17 = vunpack.c.l.b16 %v4448_v25  ;;  %v4511_v1 = vunpack.c.h.b16 %v4448_v25  ;;  %v4451_v20 = vrot.slane %v12264_v30, 5  ;;  %v3336_v25 = vld [vmem:[#allocation2 + $0xa0] sm:$0x11]  ;;  %v8950_v30 = vld [vmem:[%s14757_s3 + $0x18] sm:$0xf0] }
 0x2d7   : > { %v12296_v48 = vrot.slane %v3312_v28, 7  ;;  %v3062_v29 = vadd.f32 %v11961_v11, %v3024_v10  ;;  %v3063_v52 = vadd.f32 %v11963_v2, %v3025_v26  ;;  %v3666_v9 = vunpack.c.l.b16 %v3556_v63  ;;  %v9994_v28 = vld [vmem:[%s14757_s3 + $0x74] sm:$0xf]  ;;  %v8998_v10 = vld [vmem:[%s14757_s3 + $0x78] sm:$0xf0]  ;;  %v12336_v26 = vpop.f32.mrf.mxu3 }
 0x2d8   : > { %v3667_v13 = vunpack.c.h.b16 %v3556_v63  ;;  %v12302_v62 = vpack.c.b16 %v4510_v17, %v4508_v0  ;;  %v12304_v54 = vpack.c.b16 %v4511_v1, %v4509_v50  ;;  %v12307_v16 = vadd.f32 %v2654_v41, %v12077_v5  ;;  %v9995_v0 = vld [vmem:[%s14757_s3 + $0x74] sm:$0xf0]  ;;  %v8988_v17 = vld [vmem:[%s14757_s3 + $0x60] sm:$0xf]  ;;  %v9993_v1 = vld [vmem:[%s14757_s3 + $0x64] sm:$0xf0] }
 0x2d9   : > { %v3317_v7 = vor.u32 %v3315_v61, %v12296_v48  ;;  %v3094_v44 = vmax.f32 %v3062_v29, 0.0  ;;  %v3095_v31 = vmax.f32 %v3063_v52, 0.0  ;;  %v3688_v43 = vpack.c.b16 %v3666_v9, %v3664_v8 }
 0x2da   : > { %v3689_v33 = vpack.c.b16 %v3667_v13, %v3665_v57  ;;  %v3318_v37 = vrot.slane %v12296_v48, 4  ;;  %v8997_v55 = vor.u32 %v9995_v0, %v8996_v45  ;;  %v2738_v52 = vadd.f32 %v12281_v23, %v12080_v18 }
 0x2db   : > { %v3333_v19 = vsel %vm12000_vm4, %v3317_v7, %v3332_v58  ;;  %v3115_v40 = vpack.c.bf16 %v3095_v31, %v3094_v44  ;;  %v12312_v22 = vld [vmem:[#allocation2 + $0x80] sm:$0xff]  ;;  %3847 = vmatmul.bf16.gmra.mxu2 %v3688_v43  ;;  %3945 = vmatmul.bf16.gmra.mxu0 %v3688_v43  ;;  %v9001_v13 = vor.u32 %v9994_v28, %v8998_v10  ;;  %v8982_v28 = vld [vmem:[%s14757_s3 + $0x58] sm:$0xf0] }
 0x2dc   : > { %3334 = vst [vmem:[#allocation2 + $0x90] sm:$0xff] %v3333_v19  ;;  %8862 = vmatmul.msk.bf16.gmra.mxu3 %vm3794_vm2, %v3689_v33  ;;  %v2943_v5 = vpop.f32.mrf.mxu0  ;;  %v2992_v41 = vpop.f32.mrf.mxu1  ;;  %v12321_v27 = vld [vmem:[#allocation2 + $0x88] sm:$0x11]  ;;  %v3567_v3 = vshll.u32 %v12312_v22, 16  ;;  %v3571_v36 = vshrl.u32 %v12312_v22, 16  ;;  %v3582_v50 = vshrl.u32 %v3333_v19, 16  ;;  %8870 = vmatmul.msk.bf16.gmra.mxu1 %vm3794_vm2, %v3689_v33 }
 0x2dd   : > { %v3320_v4 = vshrl.u32 %v3115_v40, 16  ;;  %v3323_v42 = vshll.u32 %v3115_v40, 16  ;;  %v3026_v60 = vadd.f32 %v2943_v5, %v12256_v47  ;;  %v3027_v46 = vadd.f32 %v2992_v41, %v12259_v53  ;;  %4201 = vmatpush.bf16.msra.mxu2 %v8997_v55  ;;  %v9992_v7 = vld [vmem:[%s14757_s3 + $0x64] sm:$0xf]  ;;  %4299 = vmatpush.bf16.msra.mxu0 %v9001_v13  ;;  %v3360_v13 = vld [vmem:[#allocation2 + $0xa8] sm:$0xff] }
 0x2de   : > { %v3569_v8 = vrot.slane %v3567_v3, 5  ;;  %v3573_v61 = vrot.slane %v3571_v36, 4  ;;  %v3577_v63 = vshll.u32 %v12321_v27, 16  ;;  %v12339_v57 = vrot.slane %v3582_v50, 4  ;;  %v8980_v3 = vld [vmem:[%s14757_s3 + $0x50] sm:$0xf] }
 0x2df   : > { %v3322_v47 = vrot.slane %v3320_v4, 7  ;;  %v3064_v53 = vadd.f32 %v11961_v11, %v3026_v60  ;;  %v3065_v48 = vadd.f32 %v11963_v2, %v3027_v46  ;;  %v3585_v29 = vshll.u32 %v3333_v19, 16  ;;  %v9991_v36 = vld [vmem:[%s14757_s3 + $0x54] sm:$0xf0]  ;;  %v9990_v50 = vld [vmem:[%s14757_s3 + $0x54] sm:$0xf] }
 0x2e0   : > { %v3570_v9 = vsel %vm10316_vm3, %v3565_v49, %v3569_v8  ;;  %v3574_v58 = vor.u32 %v3573_v61, %v3569_v8  ;;  %v8990_v49 = vld [vmem:[%s14757_s3 + $0x68] sm:$0xf0]  ;;  %v3579_v33 = vrot.slane %v3577_v63, 5  ;;  %v8989_v41 = vor.u32 %v9993_v1, %v8988_v17  ;;  %v9004_v63 = vld [vmem:[%s14757_s3 + $0x80] sm:$0xf] }
 0x2e1   : > { %v3325_v44 = vor.u32 %v3323_v42, %v3322_v47  ;;  %v3327_v31 = vrot.slane %v3322_v47, 4  ;;  %v3096_v18 = vmax.f32 %v3064_v53, 0.0  ;;  %v3097_v23 = vmax.f32 %v3065_v48, 0.0 }
 0x2e2   : > { %v3575_v43 = vrot.slane %v3574_v58, 4  ;;  %v3668_v19 = vunpack.c.l.b16 %v3570_v9  ;;  %v12359_v40 = vrot.slane %v3585_v29, 5  ;;  %v3669_v42 = vunpack.c.h.b16 %v3570_v9  ;;  %4202 = vmatpush.bf16.msra.mxu2 %v8989_v41  ;;  %v9997_v29 = vld [vmem:[%s14757_s3 + $0x84] sm:$0xf0]  ;;  %v2659_v9 = vpop.f32.mrf.mxu2 }
 0x2e3   : > { %v3326_v45 = vsel %vm12023_vm13, %v3318_v37, %v3325_v44  ;;  %v3337_v0 = vsel %vm12027_vm0, %v3327_v31, %v3336_v25  ;;  %v3116_v5 = vpack.c.bf16 %v3097_v23, %v3096_v18  ;;  %v8993_v46 = vor.u32 %v9992_v7, %v8990_v49  ;;  %v4401_v25 = vld [vmem:[#allocation2 + $0x60] sm:$0xee]  ;;  %v9006_v44 = vld [vmem:[%s14757_s3 + $0x88] sm:$0xf0]  ;;  %v2708_v49 = vpop.f32.mrf.mxu3 }
 0x2e4   : > { %3335 = vst.msk [vmem:[#allocation2 + $0x98] sm:$0xff] %vm11762_vm10, %v3326_v45  ;;  %v2945_v37 = vpop.f32.mrf.mxu0  ;;  %v2994_v55 = vpop.f32.mrf.mxu1  ;;  %v3580_v4 = vsel %vm10316_vm3, %v3575_v43, %v3579_v33  ;;  %v3588_v60 = vor.u32 %v12359_v40, %v12339_v57  ;;  %v8981_v47 = vor.u32 %v9991_v36, %v8980_v3  ;;  %v9005_v7 = vor.u32 %v9997_v29, %v9004_v63  ;;  %v8972_v31 = vld [vmem:[%s14757_s3 + $0x40] sm:$0xf]  ;;  %v9989_v45 = vld [vmem:[%s14757_s3 + $0x44] sm:$0xf0] }
 0x2e5   : > { %3338 = vst [vmem:[#allocation2 + $0xa0] sm:$0x11] %v3337_v0  ;;  %v3340_v10 = vshrl.u32 %v3116_v5, 16  ;;  %v3028_v8 = vadd.f32 %v2945_v37, %v12307_v16  ;;  %v3029_v61 = vadd.f32 %v2994_v55, %v2738_v52  ;;  %v3343_v53 = vshll.u32 %v3116_v5, 16  ;;  %4300 = vmatpush.bf16.msra.mxu0 %v8993_v46  ;;  %v9996_v16 = vld [vmem:[%s14757_s3 + $0x84] sm:$0xf] }
 0x2e6   : > { %v3670_v48 = vunpack.c.l.b16 %v3580_v4  ;;  %v3671_v57 = vunpack.c.h.b16 %v3580_v4  ;;  %v8985_v52 = vor.u32 %v9990_v50, %v8982_v28  ;;  %v14869_v18 = vld [vmem:[#allocation17_spill] sm:$0xff]  ;;  %v9009_v40 = vor.u32 %v9996_v16, %v9006_v44  ;;  %v8974_v5 = vld [vmem:[%s14757_s3 + $0x48] sm:$0xf0]  ;;  %4257 = vmatpush.bf16.msra.mxu3 %v9005_v7  ;;  %4203 = vmatpush.bf16.msra.mxu2 %v8981_v47 }
 0x2e7   : > { %v12393_v58 = vrot.slane %v3340_v10, 7  ;;  %v3066_v17 = vadd.f32 %v11961_v11, %v3028_v8  ;;  %v3067_v1 = vadd.f32 %v11963_v2, %v3029_v61  ;;  %v2739_v23 = vadd.f32 %v12325_v6, %v14869_v18  ;;  %v9988_v0 = vld [vmem:[%s14757_s3 + $0x44] sm:$0xf]  ;;  %v14870_v41 = vld [vmem:[#allocation18_spill] sm:$0xff]  ;;  %v9987_v8 = vld [vmem:[%s14757_s3 + $0x34] sm:$0xf0] }
 0x2e8   : > { %v3690_v43 = vpack.c.b16 %v3670_v48, %v3668_v19  ;;  %v3691_v33 = vpack.c.b16 %v3671_v57, %v3669_v42  ;;  %v2740_v3 = vadd.f32 %v12336_v26, %v14870_v41  ;;  %v12418_v50 = vadd.f32 %v2659_v9, %v12093_v14  ;;  %4355 = vmatpush.bf16.msra.mxu1 %v9009_v40  ;;  %v8964_v14 = vld [vmem:[%s14757_s3 + $0x30] sm:$0xf]  ;;  %v8966_v9 = vld [vmem:[%s14757_s3 + $0x38] sm:$0xf0] }
 0x2e9   : > { %v3345_v6 = vor.u32 %v3343_v53, %v12393_v58  ;;  %v3098_v19 = vmax.f32 %v3066_v17, 0.0  ;;  %v3099_v36 = vmax.f32 %v3067_v1, 0.0  ;;  %4301 = vmatpush.bf16.msra.mxu0 %v8985_v52  ;;  %v8973_v37 = vor.u32 %v9989_v45, %v8972_v31  ;;  %v9986_v52 = vld [vmem:[%s14757_s3 + $0x34] sm:$0xf]  ;;  %v3364_v31 = vld [vmem:[#allocation2 + $0xb8] sm:$0x11] }
 0x2ea   : > { %v8977_v55 = vor.u32 %v9988_v0, %v8974_v5  ;;  %v9030_v4 = vrot.slane %v4401_v25, 9  ;;  %v12421_v42 = vadd.f32 %v2708_v49, %v12110_v34  ;;  %v3589_v10 = vrot.slane %v3588_v60, 4  ;;  %v8956_v49 = vld [vmem:[%s14757_s3 + $0x20] sm:$0xf]  ;;  %v9985_v0 = vld [vmem:[%s14757_s3 + $0x24] sm:$0xf0] }
 0x2eb   : > { %v12425_v26 = vsel %vm12000_vm4, %v3345_v6, %v3360_v13  ;;  %v3117_v46 = vpack.c.bf16 %v3099_v36, %v3098_v19  ;;  %v12427_v28 = vld [vmem:[#allocation2 + $0x98] sm:$0xff]  ;;  %v3346_v61 = vrot.slane %v12393_v58, 4  ;;  %3852 = vmatmul.bf16.gmra.mxu2 %v3690_v43  ;;  %3950 = vmatmul.bf16.gmra.mxu0 %v3690_v43  ;;  %v8965_v1 = vor.u32 %v9987_v8, %v8964_v14  ;;  %v9984_v5 = vld [vmem:[%s14757_s3 + $0x24] sm:$0xf]  ;;  %v8958_v36 = vld [vmem:[%s14757_s3 + $0x28] sm:$0xf0] }
 0x2ec   : > { %3362 = vst [vmem:[#allocation2 + $0xa8] sm:$0xff] %v12425_v26  ;;  %8863 = vmatmul.msk.bf16.gmra.mxu3 %vm3794_vm2, %v3691_v33  ;;  %v2948_v34 = vpop.f32.mrf.mxu0  ;;  %v2997_v63 = vpop.f32.mrf.mxu1  ;;  %v12438_v47 = vld [vmem:[#allocation2 + $0xa0] sm:$0x11]  ;;  %v3591_v60 = vshll.u32 %v12427_v28, 16  ;;  %v3595_v25 = vshrl.u32 %v12427_v28, 16  ;;  %v12446_v53 = vsel %vm10471_vm7, %v9030_v4, %v4451_v20  ;;  %8871 = vmatmul.msk.bf16.gmra.mxu1 %vm3794_vm2, %v3691_v33  ;;  %v3606_v16 = vshrl.u32 %v12425_v26, 16 }
 0x2ed   : > { %v3348_v48 = vshrl.u32 %v3117_v46, 16  ;;  %v3030_v57 = vadd.f32 %v2948_v34, %v2739_v23  ;;  %v3031_v29 = vadd.f32 %v2997_v63, %v2740_v3  ;;  %v3601_v17 = vshll.u32 %v12438_v47, 16  ;;  %4204 = vmatpush.bf16.msra.mxu2 %v8973_v37  ;;  %4302 = vmatpush.bf16.msra.mxu0 %v8977_v55  ;;  %v9983_v63 = vld [vmem:[%s14757_s3 + $0x14] sm:$0xf0] }
 0x2ee   : > { %v3593_v58 = vrot.slane %v3591_v60, 5  ;;  %v3597_v13 = vrot.slane %v3595_v25, 4  ;;  %v3351_v44 = vshll.u32 %v3117_v46, 16  ;;  %v3609_v40 = vshll.u32 %v12425_v26, 16  ;;  %v8948_v26 = vld [vmem:[%s14757_s3 + $0x10] sm:$0xf] }
 0x2ef   : > { %v3350_v7 = vrot.slane %v3348_v48, 7  ;;  %v3068_v18 = vadd.f32 %v11961_v11, %v3030_v57  ;;  %v3069_v23 = vadd.f32 %v11963_v2, %v3031_v29  ;;  %v8969_v45 = vor.u32 %v9986_v52, %v8966_v9  ;;  %v9982_v60 = vld [vmem:[%s14757_s3 + $0x14] sm:$0xf] }
 0x2f0   : > { %v3594_v43 = vsel %vm10316_vm3, %v3589_v10, %v3593_v58  ;;  %v3598_v33 = vor.u32 %v3597_v13, %v3593_v58  ;;  %v3603_v55 = vrot.slane %v3601_v17, 5  ;;  %v12474_v4 = vrot.slane %v3606_v16, 4 }
 0x2f1   : > { %v3353_v41 = vor.u32 %v3351_v44, %v3350_v7  ;;  %v3355_v3 = vrot.slane %v3350_v7, 4  ;;  %v3100_v6 = vmax.f32 %v3068_v18, 0.0  ;;  %v3101_v19 = vmax.f32 %v3069_v23, 0.0  ;;  %4205 = vmatpush.bf16.msra.mxu2 %v8965_v1  ;;  %4303 = vmatpush.bf16.msra.mxu0 %v8969_v45  ;;  %v8940_v44 = vld [vmem:[%s14757_s3] sm:$0xf] }
 0x2f2   : > { %v3599_v37 = vrot.slane %v3598_v33, 4  ;;  %v4453_v46 = vrot.slane %v4451_v20, 4  ;;  %v8957_v34 = vor.u32 %v9985_v0, %v8956_v49  ;;  %v3672_v48 = vunpack.c.l.b16 %v3594_v43  ;;  %v9980_v49 = vld [vmem:[%s14757_s3 + $0x4] sm:$0xf] }
 0x2f3   : > { %v3354_v10 = vsel %vm12023_vm13, %v3346_v61, %v3353_v41  ;;  %v3365_v14 = vsel %vm12027_vm0, %v3355_v3, %v3364_v31  ;;  %v3118_v8 = vpack.c.bf16 %v3101_v19, %v3100_v6  ;;  %v3673_v57 = vunpack.c.h.b16 %v3594_v43  ;;  %v9981_v31 = vld [vmem:[%s14757_s3 + $0x4] sm:$0xf0]  ;;  %v8942_v43 = vld [vmem:[%s14757_s3 + $0x8] sm:$0xf0]  ;;  %v3388_v33 = vld [vmem:[#allocation2 + $0xc0] sm:$0xff] }
 0x2f4   : > { %3363 = vst.msk [vmem:[#allocation2 + $0xb0] sm:$0xff] %vm11762_vm10, %v3354_v10  ;;  %v2950_v20 = vpop.f32.mrf.mxu0  ;;  %v2999_v61 = vpop.f32.mrf.mxu1  ;;  %v3604_v25 = vsel %vm10316_vm3, %v3599_v37, %v3603_v55  ;;  %v8961_v29 = vor.u32 %v9984_v5, %v8958_v36  ;;  %v3611_v58 = vrot.slane %v3609_v40, 5  ;;  %v8949_v1 = vor.u32 %v9983_v63, %v8948_v26 }
 0x2f5   : > { %3366 = vst [vmem:[#allocation2 + $0xb8] sm:$0x11] %v3365_v14  ;;  %v3368_v16 = vshrl.u32 %v3118_v8, 16  ;;  %v3032_v52 = vadd.f32 %v2950_v20, %v12418_v50  ;;  %v3033_v9 = vadd.f32 %v2999_v61, %v12421_v42  ;;  %v3674_v13 = vunpack.c.l.b16 %v3604_v25  ;;  %4206 = vmatpush.bf16.msra.mxu2 %v8957_v34 }
 0x2f6   : > { %v3675_v17 = vunpack.c.h.b16 %v3604_v25  ;;  %4304 = vmatpush.bf16.msra.mxu0 %v8961_v29  ;;  %v8953_v7 = vor.u32 %v9982_v60, %v8950_v30  ;;  %v3371_v50 = vshll.u32 %v3118_v8, 16  ;;  %v4454_v0 = vrot.slane %v12270_v32, 5 }
 0x2f7   : > { %v12506_v18 = vrot.slane %v3368_v16, 7  ;;  %v3070_v42 = vadd.f32 %v11961_v11, %v3032_v52  ;;  %v3071_v23 = vadd.f32 %v11963_v2, %v3033_v9  ;;  %v3692_v40 = vpack.c.b16 %v3674_v13, %v3672_v48  ;;  %v4402_v2 = vld [vmem:[#allocation2 + $0x78] sm:$0xee]  ;;  %v3392_v9 = vld [vmem:[#allocation2 + $0xd0] sm:$0x11] }
 0x2f8   : > { %v3693_v45 = vpack.c.b16 %v3675_v17, %v3673_v57  ;;  %v3612_v11 = vor.u32 %v3611_v58, %v12474_v4  ;;  %v8941_v6 = vor.u32 %v9981_v31, %v8940_v44  ;;  %v8945_v19 = vor.u32 %v9980_v49, %v8942_v43  ;;  %v4403_v31 = vld [vmem:[#allocation2 + $0x90] sm:$0xee] }
 0x2f9   : > { %v3373_v5 = vor.u32 %v3371_v50, %v12506_v18  ;;  %v3102_v41 = vmax.f32 %v3070_v42, 0.0  ;;  %v3103_v3 = vmax.f32 %v3071_v23, 0.0  ;;  %4207 = vmatpush.bf16.msra.mxu2 %v8949_v1  ;;  %v4455_v36 = vsel %vm10471_vm7, %v4453_v46, %v4454_v0 }
 0x2fa   : > { %4305 = vmatpush.bf16.msra.mxu0 %v8953_v7  ;;  %v4512_v37 = vunpack.c.l.b16 %v12446_v53  ;;  %v4514_v10 = vunpack.c.l.b16 %v4455_v36  ;;  %v4458_v14 = vrot.slane %v12312_v22, 5  ;;  %v4513_v34 = vunpack.c.h.b16 %v12446_v53 }
 0x2fb   : > { %v3389_v55 = vsel %vm12000_vm4, %v3373_v5, %v3388_v33  ;;  %v3119_v32 = vpack.c.bf16 %v3103_v3, %v3102_v41  ;;  %v12524_v26 = vld [vmem:[#allocation2 + $0xb0] sm:$0xff]  ;;  %3857 = vmatmul.bf16.gmra.mxu2 %v3692_v40  ;;  %v9031_v12 = vrot.slane %v4402_v2, 9  ;;  %3955 = vmatmul.bf16.gmra.mxu0 %v3692_v40  ;;  %v3613_v60 = vrot.slane %v3612_v11, 4  ;;  %v4404_v41 = vld [vmem:[#allocation2 + $0xa8] sm:$0xee] }
 0x2fc   : > { %3390 = vst [vmem:[#allocation2 + $0xc0] sm:$0xff] %v3389_v55  ;;  %8864 = vmatmul.msk.bf16.gmra.mxu3 %vm3794_vm2, %v3693_v45  ;;  %v12528_v4 = vld [vmem:[#allocation2 + $0xb8] sm:$0x11]  ;;  %v3615_v8 = vshll.u32 %v12524_v26, 16  ;;  %v3619_v46 = vshrl.u32 %v12524_v26, 16  ;;  %8872 = vmatmul.msk.bf16.gmra.mxu1 %vm3794_vm2, %v3693_v45  ;;  %v4515_v30 = vunpack.c.h.b16 %v4455_v36  ;;  %v12535_v48 = vpack.c.b16 %v4514_v10, %v4512_v37 }
 0x2fd   : > { %v3376_v63 = vshrl.u32 %v3119_v32, 16  ;;  %v3625_v22 = vshll.u32 %v12528_v4, 16  ;;  %v3379_v20 = vshll.u32 %v3119_v32, 16  ;;  %4208 = vmatpush.bf16.msra.mxu2 %v8941_v6  ;;  %v4459_v53 = vsel %vm10471_vm7, %v9031_v12, %v4458_v14 }
 0x2fe   : > { %v3617_v61 = vrot.slane %v3615_v8, 5  ;;  %v3621_v25 = vrot.slane %v3619_v46, 4  ;;  %4306 = vmatpush.bf16.msra.mxu0 %v8945_v19  ;;  %v12537_v29 = vpack.c.b16 %v4515_v30, %v4513_v34  ;;  %v4460_v16 = vrot.slane %v4458_v14, 4 }
 0x2ff   : > { %v3378_v57 = vrot.slane %v3376_v63, 7  ;;  %v3374_v52 = vrot.slane %v12506_v18, 4  ;;  %v4461_v13 = vrot.slane %v12321_v27, 5  ;;  %v3627_v44 = vrot.slane %v3625_v22, 5 }
 0x300   : > { %v3622_v58 = vor.u32 %v3621_v25, %v3617_v61  ;;  %v3618_v7 = vsel %vm10316_vm3, %v3613_v60, %v3617_v61  ;;  %v4516_v23 = vunpack.c.l.b16 %v4459_v53  ;;  %v4517_v49 = vunpack.c.h.b16 %v4459_v53 }
 0x301   : > { %v3381_v17 = vor.u32 %v3379_v20, %v3378_v57  ;;  %v3383_v1 = vrot.slane %v3378_v57, 4  ;;  %v4462_v42 = vsel %vm10471_vm7, %v4460_v16, %v4461_v13  ;;  %v3676_v45 = vunpack.c.l.b16 %v3618_v7  ;;  %v8876_v13 = vld [vmem:[#allocation2] sm:$0xf] }
 0x302   : > { %v3623_v50 = vrot.slane %v3622_v58, 4  ;;  %v4518_v27 = vunpack.c.l.b16 %v4462_v42  ;;  %v4519_v33 = vunpack.c.h.b16 %v4462_v42  ;;  %v9032_v0 = vrot.slane %v4403_v31, 9  ;;  %v5976_v42 = vld [vmem:[#allocation2 + $0x18] sm:$0xee] }
 0x303   : > { %v3382_v18 = vsel %vm12023_vm13, %v3374_v52, %v3381_v17  ;;  %v3393_v43 = vsel %vm12027_vm0, %v3383_v1, %v3392_v9  ;;  %v4465_v5 = vrot.slane %v12427_v28, 5  ;;  %v3677_v2 = vunpack.c.h.b16 %v3618_v7  ;;  %v9965_v17 = vld [vmem:[#allocation2 + $0x4] sm:$0xf0]  ;;  %v9964_v1 = vld [vmem:[#allocation2 + $0x4] sm:$0xf] }
 0x304   : > { %3391 = vst.msk [vmem:[#allocation2 + $0xc8] sm:$0xff] %vm11762_vm10, %v3382_v18  ;;  %v3628_v40 = vsel %vm10316_vm3, %v3623_v50, %v3627_v44  ;;  %v12556_v11 = vpack.c.b16 %v4518_v27, %v4516_v23  ;;  %v12558_v59 = vpack.c.b16 %v4519_v33, %v4517_v49  ;;  %v4468_v37 = vrot.slane %v12438_v47, 5  ;;  %v8878_v7 = vld [vmem:[#allocation2 + $0x8] sm:$0xf0]  ;;  %v5344_v50 = vld [vmem:[#allocation2 + $0x20] sm:$0xff] }
 0x305   : > { %3394 = vst [vmem:[#allocation2 + $0xd0] sm:$0x11] %v3393_v43  ;;  %v3678_v3 = vunpack.c.l.b16 %v3628_v40  ;;  %v3679_v39 = vunpack.c.h.b16 %v3628_v40  ;;  %v4466_v56 = vsel %vm10471_vm7, %v9032_v0, %v4465_v5  ;;  %v4467_v36 = vrot.slane %v4465_v5, 4  ;;  %v5345_v23 = vld [vmem:[#allocation2 + $0x28] sm:$0x11]  ;;  %v5347_v43 = vld [vmem:[#allocation2 + $0x38] sm:$0xff] }
 0x306   : > { %v3926_v6 = vpop.f32.mrf.mxu0  ;;  %v3975_v19 = vpop.f32.mrf.mxu1  ;;  %v9033_v28 = vrot.slane %v4404_v41, 9  ;;  %v4472_v8 = vrot.slane %v12524_v26, 5  ;;  %v4520_v46 = vunpack.c.l.b16 %v4466_v56  ;;  %v4521_v34 = vunpack.c.h.b16 %v4466_v56  ;;  %v5348_v0 = vld [vmem:[#allocation2 + $0x40] sm:$0x11] }
 0x307   : > { %v12563_v55 = vadd.f32 %v3975_v19, %v3926_v6  ;;  %v3694_v32 = vpack.c.b16 %v3678_v3, %v3676_v45  ;;  %v3695_v10 = vpack.c.b16 %v3679_v39, %v3677_v2  ;;  %v4469_v14 = vsel %vm10471_vm7, %v4467_v36, %v4468_v37  ;;  %v5977_v45 = vld [vmem:[#allocation2 + $0x30] sm:$0xee] }
 0x308   : > { %v4522_v12 = vunpack.c.l.b16 %v4469_v14  ;;  %v4523_v63 = vunpack.c.h.b16 %v4469_v14  ;;  %v4473_v60 = vsel %vm10471_vm7, %v9033_v28, %v4472_v8  ;;  %v4474_v22 = vrot.slane %v4472_v8, 4 }
 0x309   : > { %v4475_v47 = vrot.slane %v12528_v4, 5  ;;  %v4524_v53 = vunpack.c.l.b16 %v4473_v60  ;;  %v4525_v16 = vunpack.c.h.b16 %v4473_v60  ;;  %v8877_v44 = vor.u32 %v9965_v17, %v8876_v13 }
 0x30a   : > { %v12571_v61 = vpack.c.b16 %v4522_v12, %v4520_v46  ;;  %v12573_v25 = vpack.c.b16 %v4523_v63, %v4521_v34  ;;  %v8881_v31 = vor.u32 %v9964_v1, %v8878_v7  ;;  %v9416_v49 = vrot.slane %v5976_v42, 9  ;;  %v5978_v34 = vld [vmem:[#allocation2 + $0x48] sm:$0xee]  ;;  %v9967_v12 = vld [vmem:[#allocation2 + $0x1c] sm:$0xf0] }
 0x30b   : > { %v3828_v30 = vpop.f32.mrf.mxu2  ;;  %v3877_v20 = vpop.f32.mrf.mxu3  ;;  %3862 = vmatmul.bf16.gmra.mxu2 %v3694_v32  ;;  %v4476_v57 = vsel %vm10471_vm7, %v4474_v22, %v4475_v47  ;;  %3960 = vmatmul.bf16.gmra.mxu0 %v3694_v32  ;;  %v6010_v18 = vrot.slane %v5344_v50, 5  ;;  %v6013_v40 = vrot.slane %v5345_v23, 5  ;;  %v6017_v41 = vrot.slane %v5347_v43, 5  ;;  %v8886_v63 = vld [vmem:[#allocation2 + $0x20] sm:$0xf0] }
 0x30c   : > { %8865 = vmatmul.msk.bf16.gmra.mxu3 %vm3794_vm2, %v3695_v10  ;;  %v12576_v26 = vadd.f32 %v3877_v20, %v3828_v30  ;;  %8873 = vmatmul.msk.bf16.gmra.mxu1 %vm3794_vm2, %v3695_v10  ;;  %v4526_v4 = vunpack.c.l.b16 %v4476_v57  ;;  %v4527_v52 = vunpack.c.h.b16 %v4476_v57  ;;  %v9417_v19 = vrot.slane %v5977_v45, 9  ;;  %v5350_v10 = vld [vmem:[#allocation2 + $0x50] sm:$0xff]  ;;  %v5351_v47 = vld [vmem:[#allocation2 + $0x58] sm:$0x11] }
 0x30d   : > { %v6011_v27 = vsel %vm10471_vm7, %v9416_v49, %v6010_v18  ;;  %v6012_v33 = vrot.slane %v6010_v18, 4  ;;  %v6019_v37 = vrot.slane %v6017_v41, 4  ;;  %v6020_v28 = vrot.slane %v5348_v0, 5  ;;  %v8884_v57 = vld [vmem:[#allocation2 + $0x18] sm:$0xf] }
 0x30e   : > { %v12581_v9 = vpack.c.b16 %v4526_v4, %v4524_v53  ;;  %v12583_v58 = vpack.c.b16 %v4527_v52, %v4525_v16  ;;  %v12591_v3 = vpop.f32.mrf.mxu0  ;;  %v12593_v39 = vpop.f32.mrf.mxu1  ;;  %v6083_v2 = vunpack.c.l.b16 %v6011_v27  ;;  %v6084_v56 = vunpack.c.h.b16 %v6011_v27  ;;  %v9966_v53 = vld [vmem:[#allocation2 + $0x1c] sm:$0xf] }
 0x30f   : > { %v6014_v5 = vsel %vm10471_vm7, %v6012_v33, %v6013_v40  ;;  %v6018_v32 = vsel %vm10471_vm7, %v9417_v19, %v6017_v41  ;;  %v6021_v46 = vsel %vm10471_vm7, %v6019_v37, %v6020_v28  ;;  %v9418_v52 = vrot.slane %v5978_v34, 9  ;;  %v5979_v37 = vld [vmem:[#allocation2 + $0x60] sm:$0xee]  ;;  %v9969_v34 = vld [vmem:[#allocation2 + $0x34] sm:$0xf0] }
 0x310   : > { %14871 = vst [vmem:[#allocation7_spill] sm:$0xff] %v12581_v9  ;;  %v6085_v6 = vunpack.c.l.b16 %v6014_v5  ;;  %v6086_v36 = vunpack.c.h.b16 %v6014_v5  ;;  %v6087_v30 = vunpack.c.l.b16 %v6018_v32  ;;  %v6089_v20 = vunpack.c.l.b16 %v6021_v46 }
 0x311   : > { %14872 = vst [vmem:[#allocation5_spill] sm:$0xff] %v12583_v58  ;;  %v6088_v16 = vunpack.c.h.b16 %v6018_v32  ;;  %v6090_v4 = vunpack.c.h.b16 %v6021_v46  ;;  %v6024_v13 = vrot.slane %v5350_v10, 5  ;;  %v8885_v17 = vor.u32 %v9967_v12, %v8884_v57  ;;  %v5354_v32 = vld [vmem:[#allocation2 + $0x70] sm:$0x11] }
 0x312   : > { %v12597_v14 = vpack.c.b16 %v6085_v6, %v6083_v2  ;;  %v12599_v8 = vpack.c.b16 %v6086_v36, %v6084_v56  ;;  %v8889_v1 = vor.u32 %v9966_v53, %v8886_v63  ;;  %v12607_v7 = vpack.c.b16 %v6089_v20, %v6087_v30  ;;  %v5353_v36 = vld [vmem:[#allocation2 + $0x68] sm:$0xff] }
 0x313   : > { %v12603_v60 = vpop.f32.mrf.mxu2  ;;  %v12605_v22 = vpop.f32.mrf.mxu3  ;;  %v12609_v50 = vpack.c.b16 %v6090_v4, %v6088_v16  ;;  %v6025_v42 = vsel %vm10471_vm7, %v9418_v52, %v6024_v13  ;;  %v6026_v23 = vrot.slane %v6024_v13, 4  ;;  %v6027_v49 = vrot.slane %v5351_v47, 5  ;;  %v8894_v47 = vld [vmem:[#allocation2 + $0x38] sm:$0xf0]  ;;  %v8892_v16 = vld [vmem:[#allocation2 + $0x30] sm:$0xf] }
 0x314   : > { %14873 = vst [vmem:[#allocation6_spill] sm:$0xff] %v12597_v14  ;;  %v6091_v27 = vunpack.c.l.b16 %v6025_v42  ;;  %v6092_v33 = vunpack.c.h.b16 %v6025_v42  ;;  %v9419_v10 = vrot.slane %v5979_v37, 9  ;;  %v6031_v46 = vrot.slane %v5353_v36, 5  ;;  %v9968_v52 = vld [vmem:[#allocation2 + $0x34] sm:$0xf] }
 0x315   : > { %14874 = vst [vmem:[#allocation8_spill] sm:$0xff] %v12599_v8  ;;  %v6028_v43 = vsel %vm10471_vm7, %v6026_v23, %v6027_v49  ;;  %v6034_v57 = vrot.slane %v5354_v32, 5  ;;  %v8893_v4 = vor.u32 %v9969_v34, %v8892_v16  ;;  %v5980_v36 = vld [vmem:[#allocation2 + $0x78] sm:$0xee]  ;;  %v5357_v32 = vld [vmem:[#allocation2 + $0x88] sm:$0x11] }
 0x316   : > { %14875 = vst [vmem:[#allocation9_spill] sm:$0xff] %v12607_v7  ;;  %v6093_v40 = vunpack.c.l.b16 %v6028_v43  ;;  %v6094_v45 = vunpack.c.h.b16 %v6028_v43  ;;  %v6032_v30 = vsel %vm10471_vm7, %v9419_v10, %v6031_v46  ;;  %v6033_v20 = vrot.slane %v6031_v46, 4  ;;  %v9971_v34 = vld [vmem:[#allocation2 + $0x4c] sm:$0xf0]  ;;  %v9976_v14 = vld [vmem:[#allocation2 + $0x94] sm:$0xf] }
 0x317   : > { %14876 = vst [vmem:[#allocation10_spill] sm:$0xff] %v12609_v50  ;;  %v6096_v43 = vunpack.c.h.b16 %v6032_v30  ;;  %v9420_v10 = vrot.slane %v5980_v36, 9  ;;  %v8924_v8 = vld [vmem:[#allocation2 + $0x90] sm:$0xf] }
 0x318   : > { %v12619_v41 = vpack.c.b16 %v6093_v40, %v6091_v27  ;;  %v12621_v2 = vpack.c.b16 %v6094_v45, %v6092_v33  ;;  %v6035_v13 = vsel %vm10471_vm7, %v6033_v20, %v6034_v57  ;;  %v6041_v57 = vrot.slane %v5357_v32, 5 }
 0x319   : > { %v6097_v42 = vunpack.c.l.b16 %v6035_v13  ;;  %v6098_v23 = vunpack.c.h.b16 %v6035_v13  ;;  %v9970_v13 = vld [vmem:[#allocation2 + $0x4c] sm:$0xf] }
 0x31a   : > { %14877 = vst [vmem:[#allocation12_spill] sm:$0xff] %v12619_v41 }
 0x31b   : > { %4209 = vmatmul.bf16.vlgmr.msra.gmra.mxu2 %v8877_v44  ;;  %4307 = vmatmul.bf16.vlgmr.msra.gmra.mxu0 %v8877_v44  ;;  %14878 = vst [vmem:[#allocation13_spill] sm:$0xff] %v12621_v2  ;;  %v12639_v33 = vpack.c.b16 %v6098_v23, %v6096_v43  ;;  %v9974_v2 = vld [vmem:[#allocation2 + $0x7c] sm:$0xf] }
 0x31c   : > { %9010 = vmatmul.msk.bf16.vlgmr.msra.gmra.mxu3 %vm3794_vm2, %v8881_v31  ;;  %9018 = vmatmul.msk.bf16.vlgmr.msra.gmra.mxu1 %vm3794_vm2, %v8881_v31 }
 0x31d   : > { %14880 = vst [vmem:[#allocation11_spill] sm:$0xff] %v12639_v33 }
 0x328   : > { %v3931_v44 = vpop.f32.mrf.mxu0  ;;  %v3980_v31 = vpop.f32.mrf.mxu1 }
 0x329   : > { %v12613_v18 = vadd.f32 %v3980_v31, %v3931_v44  ;;  %v8897_v44 = vor.u32 %v9968_v52, %v8894_v47  ;;  %v6095_v31 = vunpack.c.l.b16 %v6032_v30  ;;  %v8902_v47 = vld [vmem:[#allocation2 + $0x50] sm:$0xf0] }
 0x32b   : > { %4214 = vmatmul.bf16.gmra.mxu2 %v8885_v17  ;;  %4312 = vmatmul.bf16.gmra.mxu0 %v8885_v17  ;;  %v12636_v27 = vpack.c.b16 %v6097_v42, %v6095_v31  ;;  %v8905_v31 = vor.u32 %v9970_v13, %v8902_v47  ;;  %v5360_v47 = vld [vmem:[#allocation2 + $0xa0] sm:$0x11]  ;;  %v8910_v13 = vld [vmem:[#allocation2 + $0x68] sm:$0xf0] }
 0x32c   : > { %9011 = vmatmul.msk.bf16.gmra.mxu3 %vm3794_vm2, %v8889_v1  ;;  %9019 = vmatmul.msk.bf16.gmra.mxu1 %vm3794_vm2, %v8889_v1 }
 0x32d   : > { %v3833_v0 = vpop.f32.mrf.mxu2  ;;  %v3882_v5 = vpop.f32.mrf.mxu3  ;;  %14879 = vst [vmem:[#allocation4_spill] sm:$0xff] %v12636_v27 }
 0x32e   : > { %v12623_v6 = vadd.f32 %v3882_v5, %v3833_v0 }
 0x330   : > { %v3933_v19 = vpop.f32.mrf.mxu0  ;;  %v3982_v56 = vpop.f32.mrf.mxu1 }
 0x331   : > { %v12625_v28 = vadd.f32 %v3982_v56, %v3933_v19  ;;  %v5356_v56 = vld [vmem:[#allocation2 + $0x80] sm:$0xff] }
 0x332   : > { %v6038_v46 = vrot.slane %v5356_v56, 5 }
 0x334   : > { %v6039_v30 = vsel %vm10471_vm7, %v9420_v10, %v6038_v46  ;;  %v6040_v20 = vrot.slane %v6038_v46, 4 }
 0x335   : > { %v3835_v12 = vpop.f32.mrf.mxu2  ;;  %v3884_v63 = vpop.f32.mrf.mxu3  ;;  %v6099_v42 = vunpack.c.l.b16 %v6039_v30 }
 0x336   : > { %v12629_v53 = vadd.f32 %v3884_v63, %v3835_v12 }
 0x338   : > { %v3936_v17 = vpop.f32.mrf.mxu0  ;;  %v3985_v1 = vpop.f32.mrf.mxu1 }
 0x339   : > { %v12633_v49 = vadd.f32 %v3985_v1, %v3936_v17  ;;  %v6042_v17 = vsel %vm10471_vm7, %v6040_v20, %v6041_v57  ;;  %v9973_v57 = vld [vmem:[#allocation2 + $0x64] sm:$0xf0] }
 0x33a   : > { %v6101_v23 = vunpack.c.l.b16 %v6042_v17  ;;  %v6102_v43 = vunpack.c.h.b16 %v6042_v17 }
 0x33b   : > { %4219 = vmatmul.bf16.gmra.mxu2 %v8893_v4  ;;  %4317 = vmatmul.bf16.gmra.mxu0 %v8893_v4  ;;  %v8900_v4 = vld [vmem:[#allocation2 + $0x48] sm:$0xf] }
 0x33c   : > { %9012 = vmatmul.msk.bf16.gmra.mxu3 %vm3794_vm2, %v8897_v44  ;;  %9020 = vmatmul.msk.bf16.gmra.mxu1 %vm3794_vm2, %v8897_v44  ;;  %v8901_v52 = vor.u32 %v9971_v34, %v8900_v4  ;;  %v5359_v34 = vld [vmem:[#allocation2 + $0x98] sm:$0xff] }
 0x33d   : > { %v3838_v40 = vpop.f32.mrf.mxu2  ;;  %v3887_v45 = vpop.f32.mrf.mxu3  ;;  %v6045_v20 = vrot.slane %v5359_v34, 5 }
 0x33e   : > { %v12641_v0 = vadd.f32 %v3887_v45, %v3838_v40  ;;  %v6100_v45 = vunpack.c.h.b16 %v6039_v30 }
 0x340   : > { %v3938_v5 = vpop.f32.mrf.mxu0  ;;  %v3987_v19 = vpop.f32.mrf.mxu1 }
 0x341   : > { %v12643_v37 = vadd.f32 %v3987_v19, %v3938_v5  ;;  %v12654_v5 = vpack.c.b16 %v6101_v23, %v6099_v42  ;;  %v12657_v19 = vpack.c.b16 %v6102_v43, %v6100_v45  ;;  %v8908_v42 = vld [vmem:[#allocation2 + $0x60] sm:$0xf]  ;;  %v9972_v43 = vld [vmem:[#allocation2 + $0x64] sm:$0xf] }
 0x342   : > { %v8909_v23 = vor.u32 %v9973_v57, %v8908_v42  ;;  %v9118_v57 = vld [vmem:[%s14757_s3 + $0x1a0] sm:$0xf] }
 0x343   : > { %14881 = vst [vmem:[#allocation14_spill] sm:$0xff] %v12654_v5 }
 0x344   : > { %14882 = vst [vmem:[#allocation15_spill] sm:$0xff] %v12657_v19 }
 0x345   : > { %v3840_v12 = vpop.f32.mrf.mxu2  ;;  %v3889_v63 = vpop.f32.mrf.mxu3 }
 0x346   : > { %v12647_v16 = vadd.f32 %v3889_v63, %v3840_v12  ;;  %v5981_v12 = vld [vmem:[#allocation2 + $0x90] sm:$0xee] }
 0x347   : > { %v9421_v30 = vrot.slane %v5981_v12, 9 }
 0x348   : > { %v3941_v1 = vpop.f32.mrf.mxu0 }
 0x349   : > { %v3990_v44 = vpop.f32.mrf.mxu1  ;;  %v6046_v17 = vsel %vm10471_vm7, %v9421_v30, %v6045_v20  ;;  %v9110_v30 = vld [vmem:[%s14757_s3 + $0x190] sm:$0xf] }
 0x34a   : > { %v12651_v40 = vadd.f32 %v3990_v44, %v3941_v1  ;;  %v6047_v1 = vrot.slane %v6045_v20, 4  ;;  %v6048_v44 = vrot.slane %v5360_v47, 5  ;;  %v6104_v5 = vunpack.c.h.b16 %v6046_v17  ;;  %v10031_v20 = vld [vmem:[%s14757_s3 + $0x194] sm:$0xf0] }
 0x34b   : > { %4224 = vmatmul.bf16.gmra.mxu2 %v8901_v52  ;;  %4322 = vmatmul.bf16.gmra.mxu0 %v8901_v52 }
 0x34c   : > { %9013 = vmatmul.msk.bf16.gmra.mxu3 %vm3794_vm2, %v8905_v31  ;;  %9021 = vmatmul.msk.bf16.gmra.mxu1 %vm3794_vm2, %v8905_v31  ;;  %v6049_v45 = vsel %vm10471_vm7, %v6047_v1, %v6048_v44  ;;  %v9112_v1 = vld [vmem:[%s14757_s3 + $0x198] sm:$0xf0] }
 0x34d   : > { %v6105_v34 = vunpack.c.l.b16 %v6049_v45  ;;  %v6106_v12 = vunpack.c.h.b16 %v6049_v45 }
 0x34e   : > { %v3843_v56 = vpop.f32.mrf.mxu2 }
 0x34f   : > { %v3892_v36 = vpop.f32.mrf.mxu3 }
 0x350   : > { %v12659_v32 = vadd.f32 %v3892_v36, %v3843_v56  ;;  %v3943_v10 = vpop.f32.mrf.mxu0 }
 0x351   : > { %v3992_v46 = vpop.f32.mrf.mxu1 }
 0x352   : > { %v12661_v63 = vadd.f32 %v3992_v46, %v3943_v10  ;;  %v8913_v10 = vor.u32 %v9972_v43, %v8910_v13  ;;  %v6103_v46 = vunpack.c.l.b16 %v6046_v17  ;;  %v10033_v13 = vld [vmem:[%s14757_s3 + $0x1a4] sm:$0xf0]  ;;  %v10030_v17 = vld [vmem:[%s14757_s3 + $0x194] sm:$0xf] }
 0x353   : > { %v9115_v43 = vor.u32 %v10030_v17, %v9112_v1 }
 0x354   : > { %v12672_v47 = vpack.c.b16 %v6105_v34, %v6103_v46  ;;  %v10029_v46 = vld [vmem:[%s14757_s3 + $0x184] sm:$0xf0]  ;;  %v10028_v34 = vld [vmem:[%s14757_s3 + $0x184] sm:$0xf] }
 0x355   : > { %4764 = vmatpush.bf16.msrb.mxu0 %v9115_v43  ;;  %v9975_v43 = vld [vmem:[#allocation2 + $0x7c] sm:$0xf0] }
 0x356   : > { %v3845_v4 = vpop.f32.mrf.mxu2  ;;  %14883 = vst [vmem:[#allocation16_spill] sm:$0xff] %v12672_v47 }
 0x357   : > { %v3894_v52 = vpop.f32.mrf.mxu3 }
 0x358   : > { %v12665_v31 = vadd.f32 %v3894_v52, %v3845_v4  ;;  %v3946_v56 = vpop.f32.mrf.mxu0  ;;  %v12684_v4 = vpack.c.b16 %v6106_v12, %v6104_v5  ;;  %v9111_v52 = vor.u32 %v10031_v20, %v9110_v30  ;;  %v5362_v12 = vld [vmem:[#allocation2 + $0xb0] sm:$0xff]  ;;  %v5982_v30 = vld [vmem:[#allocation2 + $0xa8] sm:$0xee] }
 0x359   : > { %v3995_v36 = vpop.f32.mrf.mxu1  ;;  %v9422_v47 = vrot.slane %v5982_v30, 9  ;;  %v6052_v33 = vrot.slane %v5362_v12, 5 }
 0x35a   : > { %v12669_v19 = vadd.f32 %v3995_v36, %v3946_v56  ;;  %14884 = vst [vmem:[#allocation17_spill] sm:$0xff] %v12684_v4  ;;  %4666 = vmatpush.bf16.msrb.mxu2 %v9111_v52  ;;  %v10032_v52 = vld [vmem:[%s14757_s3 + $0x1a4] sm:$0xf]  ;;  %v8916_v4 = vld [vmem:[#allocation2 + $0x78] sm:$0xf] }
 0x35b   : > { %4229 = vmatmul.bf16.gmra.mxu2 %v8909_v23  ;;  %4327 = vmatmul.bf16.gmra.mxu0 %v8909_v23  ;;  %v9119_v23 = vor.u32 %v10033_v13, %v9118_v57  ;;  %v9104_v57 = vld [vmem:[%s14757_s3 + $0x188] sm:$0xf0]  ;;  %v8917_v27 = vor.u32 %v9975_v43, %v8916_v4  ;;  %v6053_v41 = vsel %vm10471_vm7, %v9422_v47, %v6052_v33  ;;  %v6054_v50 = vrot.slane %v6052_v33, 4  ;;  %v10025_v4 = vld [vmem:[%s14757_s3 + $0x164] sm:$0xf0] }
 0x35c   : > { %9014 = vmatmul.msk.bf16.gmra.mxu3 %vm3794_vm2, %v8913_v10  ;;  %9022 = vmatmul.msk.bf16.gmra.mxu1 %vm3794_vm2, %v8913_v10  ;;  %v9102_v10 = vld [vmem:[%s14757_s3 + $0x180] sm:$0xf]  ;;  %v9120_v13 = vld [vmem:[%s14757_s3 + $0x1a8] sm:$0xf0]  ;;  %v9107_v17 = vor.u32 %v10028_v34, %v9104_v57  ;;  %v8918_v34 = vld [vmem:[#allocation2 + $0x80] sm:$0xf0]  ;;  %v6107_v30 = vunpack.c.l.b16 %v6053_v41 }
 0x35d   : > { %4722 = vmatpush.bf16.msrb.mxu3 %v9119_v23  ;;  %v9103_v20 = vor.u32 %v10029_v46, %v9102_v10  ;;  %v9123_v1 = vor.u32 %v10032_v52, %v9120_v13  ;;  %v10026_v23 = vld [vmem:[%s14757_s3 + $0x174] sm:$0xf]  ;;  %v5363_v52 = vld [vmem:[#allocation2 + $0xb8] sm:$0x11]  ;;  %v9088_v47 = vld [vmem:[%s14757_s3 + $0x168] sm:$0xf0] }
 0x35e   : > { %v3848_v44 = vpop.f32.mrf.mxu2  ;;  %4765 = vmatpush.bf16.msrb.mxu0 %v9107_v17  ;;  %v6055_v7 = vrot.slane %v5363_v52, 5  ;;  %v9078_v43 = vld [vmem:[%s14757_s3 + $0x150] sm:$0xf] }
 0x35f   : > { %v3897_v42 = vpop.f32.mrf.mxu3  ;;  %4667 = vmatpush.bf16.msrb.mxu2 %v9103_v20  ;;  %4820 = vmatpush.bf16.msrb.mxu1 %v9123_v1  ;;  %v9086_v1 = vld [vmem:[%s14757_s3 + $0x160] sm:$0xf] }
 0x360   : > { %v12695_v45 = vadd.f32 %v3897_v42, %v3848_v44  ;;  %v3948_v5 = vpop.f32.mrf.mxu0  ;;  %v9094_v44 = vld [vmem:[%s14757_s3 + $0x170] sm:$0xf]  ;;  %v10027_v42 = vld [vmem:[%s14757_s3 + $0x174] sm:$0xf0]  ;;  %v9087_v33 = vor.u32 %v10025_v4, %v9086_v1  ;;  %v6056_v12 = vsel %vm10471_vm7, %v6054_v50, %v6055_v7  ;;  %v5365_v4 = vld [vmem:[#allocation2 + $0xc8] sm:$0xff] }
 0x361   : > { %v3997_v56 = vpop.f32.mrf.mxu1  ;;  %v6110_v7 = vunpack.c.h.b16 %v6056_v12 }
 0x362   : > { %v12697_v36 = vadd.f32 %v3997_v56, %v3948_v5  ;;  %v9095_v5 = vor.u32 %v10027_v42, %v9094_v44  ;;  %v9096_v56 = vld [vmem:[%s14757_s3 + $0x178] sm:$0xf0]  ;;  %v8921_v42 = vor.u32 %v9974_v2, %v8918_v34  ;;  %v10024_v2 = vld [vmem:[%s14757_s3 + $0x164] sm:$0xf] }
 0x363   : > { %v9099_v57 = vor.u32 %v10026_v23, %v9096_v56  ;;  %v9091_v23 = vor.u32 %v10024_v2, %v9088_v47  ;;  %v10022_v56 = vld [vmem:[%s14757_s3 + $0x154] sm:$0xf] }
 0x364   : > { %4668 = vmatpush.bf16.msrb.mxu2 %v9095_v5  ;;  %v10023_v5 = vld [vmem:[%s14757_s3 + $0x154] sm:$0xf0]  ;;  %v5366_v2 = vld [vmem:[#allocation2 + $0xd0] sm:$0x11] }
 0x365   : > { %4766 = vmatpush.bf16.msrb.mxu0 %v9099_v57  ;;  %v9079_v50 = vor.u32 %v10023_v5, %v9078_v43  ;;  %v9072_v5 = vld [vmem:[%s14757_s3 + $0x148] sm:$0xf0] }
 0x366   : > { %v3850_v10 = vpop.f32.mrf.mxu2 }
 0x367   : > { %v3899_v46 = vpop.f32.mrf.mxu3 }
 0x368   : > { %v12729_v13 = vadd.f32 %v3899_v46, %v3850_v10  ;;  %v3951_v20 = vpop.f32.mrf.mxu0  ;;  %v6108_v10 = vunpack.c.h.b16 %v6053_v41  ;;  %v6109_v46 = vunpack.c.l.b16 %v6056_v12  ;;  %4669 = vmatpush.bf16.msrb.mxu2 %v9087_v33  ;;  %v5983_v33 = vld [vmem:[#allocation2 + $0xc0] sm:$0xee] }
 0x369   : > { %v4000_v44 = vpop.f32.mrf.mxu1  ;;  %4767 = vmatpush.bf16.msrb.mxu0 %v9091_v23  ;;  %v9070_v12 = vld [vmem:[%s14757_s3 + $0x140] sm:$0xf]  ;;  %v10020_v23 = vld [vmem:[%s14757_s3 + $0x144] sm:$0xf] }
 0x36a   : > { %v12733_v17 = vadd.f32 %v4000_v44, %v3951_v20  ;;  %v12763_v20 = vpack.c.b16 %v6109_v46, %v6107_v30  ;;  %v12765_v44 = vpack.c.b16 %v6110_v7, %v6108_v10  ;;  %v10021_v30 = vld [vmem:[%s14757_s3 + $0x144] sm:$0xf0]  ;;  %v10019_v10 = vld [vmem:[%s14757_s3 + $0x134] sm:$0xf0]  ;;  %v9075_v46 = vor.u32 %v10020_v23, %v9072_v5  ;;  %v10018_v7 = vld [vmem:[%s14757_s3 + $0x134] sm:$0xf] }
 0x36b   : > { %4234 = vmatmul.bf16.gmra.mxu2 %v8917_v27  ;;  %4332 = vmatmul.bf16.gmra.mxu0 %v8917_v27  ;;  %v9080_v27 = vld [vmem:[%s14757_s3 + $0x158] sm:$0xf0]  ;;  %v9071_v43 = vor.u32 %v10021_v30, %v9070_v12 }
 0x36c   : > { %9015 = vmatmul.msk.bf16.gmra.mxu3 %vm3794_vm2, %v8921_v42  ;;  %9023 = vmatmul.msk.bf16.gmra.mxu1 %vm3794_vm2, %v8921_v42  ;;  %v9083_v52 = vor.u32 %v10022_v56, %v9080_v27  ;;  %14885 = vst [vmem:[#allocation18_spill] sm:$0xff] %v12763_v20  ;;  %v9062_v56 = vld [vmem:[%s14757_s3 + $0x130] sm:$0xf]  ;;  %v9423_v27 = vrot.slane %v5983_v33, 9 }
 0x36d   : > { %14886 = vst [vmem:[#allocation19_spill] sm:$0xff] %v12765_v44  ;;  %4670 = vmatpush.bf16.msrb.mxu2 %v9079_v50  ;;  %v9064_v50 = vld [vmem:[%s14757_s3 + $0x138] sm:$0xf0]  ;;  %v6062_v44 = vrot.slane %v5366_v2, 5 }
 0x36e   : > { %v3853_v34 = vpop.f32.mrf.mxu2  ;;  %4768 = vmatpush.bf16.msrb.mxu0 %v9083_v52  ;;  %v8926_v52 = vld [vmem:[#allocation2 + $0x98] sm:$0xf0]  ;;  %v9067_v30 = vor.u32 %v10018_v7, %v9064_v50 }
 0x36f   : > { %v3902_v57 = vpop.f32.mrf.mxu3  ;;  %v8929_v33 = vor.u32 %v9976_v14, %v8926_v52  ;;  %v9054_v14 = vld [vmem:[%s14757_s3 + $0x120] sm:$0xf] }
 0x370   : > { %v12767_v42 = vadd.f32 %v3902_v57, %v3853_v34  ;;  %v3953_v1 = vpop.f32.mrf.mxu0  ;;  %v6059_v34 = vrot.slane %v5365_v4, 5  ;;  %v9977_v57 = vld [vmem:[#allocation2 + $0x94] sm:$0xf0] }
 0x371   : > { %v4002_v41 = vpop.f32.mrf.mxu1  ;;  %4671 = vmatpush.bf16.msrb.mxu2 %v9071_v43  ;;  %v8925_v38 = vor.u32 %v9977_v57, %v8924_v8  ;;  %v9056_v57 = vld [vmem:[%s14757_s3 + $0x128] sm:$0xf0] }
 0x372   : > { %v12769_v47 = vadd.f32 %v4002_v41, %v3953_v1  ;;  %v9063_v1 = vor.u32 %v10019_v10, %v9062_v56  ;;  %4769 = vmatpush.bf16.msrb.mxu0 %v9075_v46  ;;  %v6060_v23 = vsel %vm10471_vm7, %v9423_v27, %v6059_v34  ;;  %v6061_v5 = vrot.slane %v6059_v34, 4  ;;  %v10016_v27 = vld [vmem:[%s14757_s3 + $0x124] sm:$0xf] }
 0x373   : > { %v6111_v10 = vunpack.c.l.b16 %v6060_v23  ;;  %v6112_v46 = vunpack.c.h.b16 %v6060_v23 }
 0x374   : > { %v6063_v4 = vsel %vm10471_vm7, %v6061_v5, %v6062_v44  ;;  %v10017_v44 = vld [vmem:[%s14757_s3 + $0x124] sm:$0xf0] }
 0x375   : > { %4672 = vmatpush.bf16.msrb.mxu2 %v9063_v1  ;;  %v6113_v7 = vunpack.c.l.b16 %v6063_v4  ;;  %v6114_v50 = vunpack.c.h.b16 %v6063_v4  ;;  %v9055_v34 = vor.u32 %v10017_v44, %v9054_v14  ;;  %v9059_v1 = vor.u32 %v10016_v27, %v9056_v57  ;;  %v9979_v4 = vld [vmem:[#allocation2 + $0xac] sm:$0xf0] }
 0x376   : > { %v3855_v41 = vpop.f32.mrf.mxu2  ;;  %4770 = vmatpush.bf16.msrb.mxu0 %v9067_v30 }
 0x377   : > { %v3904_v12 = vpop.f32.mrf.mxu3  ;;  %v12804_v2 = vpack.c.b16 %v6113_v7, %v6111_v10  ;;  %v12806_v8 = vpack.c.b16 %v6114_v50, %v6112_v46  ;;  %v8932_v10 = vld [vmem:[#allocation2 + $0xa8] sm:$0xf]  ;;  %v9978_v46 = vld [vmem:[#allocation2 + $0xac] sm:$0xf] }
 0x378   : > { %v12797_v20 = vadd.f32 %v3904_v12, %v3855_v41  ;;  %v3956_v43 = vpop.f32.mrf.mxu0  ;;  %v10188_v7 = vld [vmem:[#allocation2 + $0x8] sm:$0xff]  ;;  %v8933_v27 = vor.u32 %v9979_v4, %v8932_v10 }
 0x379   : > { %v4005_v56 = vpop.f32.mrf.mxu1  ;;  %14887 = vst [vmem:[#allocation20_spill] sm:$0xff] %v12804_v2  ;;  %4673 = vmatpush.bf16.msrb.mxu2 %v9055_v34  ;;  %v4423_v50 = vrot.slane %v10188_v7, 5  ;;  %v4397_v34 = vld [vmem:[#allocation2] sm:$0xee] }
 0x37a   : > { %v12801_v58 = vadd.f32 %v4005_v56, %v3956_v43  ;;  %14888 = vst [vmem:[#allocation21_spill] sm:$0xff] %v12806_v8  ;;  %4771 = vmatpush.bf16.msrb.mxu0 %v9059_v1  ;;  %v8934_v43 = vld [vmem:[#allocation2 + $0xb0] sm:$0xf0] }
 0x37b   : > { %4239 = vmatmul.bf16.gmra.mxu2 %v8925_v38  ;;  %4337 = vmatmul.bf16.gmra.mxu0 %v8925_v38  ;;  %v8937_v57 = vor.u32 %v9978_v46, %v8934_v43  ;;  %v4425_v1 = vrot.slane %v4423_v50, 4 }
 0x37c   : > { %9016 = vmatmul.msk.bf16.gmra.mxu3 %vm3794_vm2, %v8929_v33  ;;  %9024 = vmatmul.msk.bf16.gmra.mxu1 %vm3794_vm2, %v8929_v33 }
 0x37e   : > { %v3858_v38 = vpop.f32.mrf.mxu2 }
 0x37f   : > { %v3907_v52 = vpop.f32.mrf.mxu3 }
 0x380   : > { %v12821_v41 = vadd.f32 %v3907_v52, %v3858_v38  ;;  %v3958_v12 = vpop.f32.mrf.mxu0  ;;  %v9026_v52 = vrot.slane %v4397_v34, 9 }
 0x381   : > { %v4007_v30 = vpop.f32.mrf.mxu1 }
 0x382   : > { %v12823_v23 = vadd.f32 %v4007_v30, %v3958_v12  ;;  %v10189_v12 = vld [vmem:[#allocation2 + $0x10] sm:$0x11]  ;;  %v4424_v4 = vsel %vm10471_vm7, %v9026_v52, %v4423_v50 }
 0x383   : > { %v4426_v30 = vrot.slane %v10189_v12, 5 }
 0x385   : > { %v4427_v43 = vsel %vm10471_vm7, %v4425_v1, %v4426_v30 }
 0x386   : > { %v3860_v5 = vpop.f32.mrf.mxu2  ;;  %v4499_v34 = vunpack.c.h.b16 %v4427_v43 }
 0x387   : > { %v3909_v33 = vpop.f32.mrf.mxu3 }
 0x388   : > { %v12825_v56 = vadd.f32 %v3909_v33, %v3860_v5  ;;  %v3961_v14 = vpop.f32.mrf.mxu0 }
 0x389   : > { %v4010_v44 = vpop.f32.mrf.mxu1 }
 0x38a   : > { %v12827_v38 = vadd.f32 %v4010_v44, %v3961_v14  ;;  %v4496_v44 = vunpack.c.l.b16 %v4424_v4 }
 0x38b   : > { %4244 = vmatmul.bf16.gmra.mxu2 %v8933_v27  ;;  %4342 = vmatmul.bf16.gmra.mxu0 %v8933_v27  ;;  %v4497_v27 = vunpack.c.h.b16 %v4424_v4 }
 0x38c   : > { %9017 = vmatmul.msk.bf16.gmra.mxu3 %vm3794_vm2, %v8937_v57  ;;  %9025 = vmatmul.msk.bf16.gmra.mxu1 %vm3794_vm2, %v8937_v57  ;;  %v4498_v57 = vunpack.c.l.b16 %v4427_v43 }
 0x38e   : > { %v3863_v5 = vpop.f32.mrf.mxu2 }
 0x38f   : > { %v3912_v33 = vpop.f32.mrf.mxu3 }
 0x390   : > { %v12831_v7 = vadd.f32 %v3912_v33, %v3863_v5  ;;  %v3963_v10 = vpop.f32.mrf.mxu0  ;;  %v4528_v5 = vpack.c.b16 %v4498_v57, %v4496_v44  ;;  %v4529_v33 = vpack.c.b16 %v4499_v34, %v4497_v27 }
 0x391   : > { %v4012_v46 = vpop.f32.mrf.mxu1 }
 0x392   : > { %14889 = vst [vmem:[#allocation22_spill] sm:$0xff] %v12831_v7  ;;  %v12837_v14 = vadd.f32 %v4012_v46, %v3963_v10 }
 0x396   : > { %v3865_v8 = vpop.f32.mrf.mxu2 }
 0x397   : > { %v3914_v12 = vpop.f32.mrf.mxu3 }
 0x398   : > { %v12839_v2 = vadd.f32 %v3914_v12, %v3865_v8  ;;  %v4308_v7 = vpop.f32.mrf.mxu0  ;;  %v3978_v8 = vadd.f32 %v12593_v39, %v12591_v3 }
 0x399   : > { %v4357_v9 = vpop.f32.mrf.mxu1  ;;  %v4309_v50 = vadd.f32 %v4308_v7, %v12563_v55 }
 0x39b   : > { %4674 = vmatmul.bf16.vlgmr.msrb.gmra.mxu2 %v4528_v5  ;;  %v12843_v52 = vadd.f32 %v4357_v9, %v4309_v50  ;;  %4772 = vmatmul.bf16.vlgmr.msrb.gmra.mxu0 %v4528_v5  ;;  %v3880_v9 = vadd.f32 %v12605_v22, %v12603_v60  ;;  %v6943_v22 = vld [vmem:[#allocation2 + $0x98] sm:$0xff] }
 0x39c   : > { %9124 = vmatmul.msk.bf16.vlgmr.msrb.gmra.mxu3 %vm3794_vm2, %v4529_v33  ;;  %9132 = vmatmul.msk.bf16.vlgmr.msrb.gmra.mxu1 %vm3794_vm2, %v4529_v33  ;;  %v7567_v33 = vld [vmem:[#allocation2 + $0x90] sm:$0xee] }
 0x39e   : > { %v4210_v1 = vpop.f32.mrf.mxu2 }
 0x39f   : > { %v4259_v30 = vpop.f32.mrf.mxu3  ;;  %v4211_v4 = vadd.f32 %v4210_v1, %v12576_v26  ;;  %v6944_v1 = vld [vmem:[#allocation2 + $0xa0] sm:$0x11] }
 0x3a0   : > { %v4310_v10 = vpop.f32.mrf.mxu0 }
 0x3a1   : > { %v12849_v43 = vadd.f32 %v4259_v30, %v4211_v4  ;;  %v4359_v46 = vpop.f32.mrf.mxu1  ;;  %v4311_v55 = vadd.f32 %v4310_v10, %v3978_v8  ;;  %v9810_v8 = vrot.slane %v7567_v33, 9  ;;  %v7625_v10 = vrot.slane %v6943_v22, 5 }
 0x3a3   : > { %v12851_v7 = vadd.f32 %v4359_v46, %v4311_v55  ;;  %v7627_v55 = vrot.slane %v7625_v10, 4 }
 0x3a6   : > { %v4212_v44 = vpop.f32.mrf.mxu2 }
 0x3a7   : > { %v4261_v27 = vpop.f32.mrf.mxu3  ;;  %v4213_v57 = vadd.f32 %v4212_v44, %v3880_v9 }
 0x3a8   : > { %v4313_v12 = vpop.f32.mrf.mxu0 }
 0x3a9   : > { %v12855_v34 = vadd.f32 %v4261_v27, %v4213_v57  ;;  %v4362_v26 = vpop.f32.mrf.mxu1  ;;  %v4314_v5 = vadd.f32 %v4313_v12, %v12613_v18 }
 0x3ab   : > { %4679 = vmatmul.bf16.gmra.mxu2 %v12190_v35  ;;  %v12861_v3 = vadd.f32 %v4362_v26, %v4314_v5  ;;  %4777 = vmatmul.bf16.gmra.mxu0 %v12190_v35  ;;  %v7626_v35 = vsel %vm10471_vm7, %v9810_v8, %v7625_v10 }
 0x3ac   : > { %9125 = vmatmul.msk.bf16.gmra.mxu3 %vm3794_vm2, %v12196_v15  ;;  %9133 = vmatmul.msk.bf16.gmra.mxu1 %vm3794_vm2, %v12196_v15  ;;  %v7628_v15 = vrot.slane %v6944_v1, 5  ;;  %v7686_v57 = vunpack.c.l.b16 %v7626_v35  ;;  %v7687_v12 = vunpack.c.h.b16 %v7626_v35 }
 0x3ae   : > { %v4215_v39 = vpop.f32.mrf.mxu2  ;;  %v7629_v44 = vsel %vm10471_vm7, %v7627_v55, %v7628_v15 }
 0x3af   : > { %v4264_v60 = vpop.f32.mrf.mxu3  ;;  %v4216_v50 = vadd.f32 %v4215_v39, %v12623_v6  ;;  %v7688_v26 = vunpack.c.l.b16 %v7629_v44  ;;  %v7689_v5 = vunpack.c.h.b16 %v7629_v44 }
 0x3b0   : > { %v4315_v30 = vpop.f32.mrf.mxu0 }
 0x3b1   : > { %v12867_v18 = vadd.f32 %v4264_v60, %v4216_v50  ;;  %v4364_v4 = vpop.f32.mrf.mxu1  ;;  %v4316_v46 = vadd.f32 %v4315_v30, %v12625_v28  ;;  %v12877_v60 = vpack.c.b16 %v7688_v26, %v7686_v57  ;;  %v12879_v28 = vpack.c.b16 %v7689_v5, %v7687_v12 }
 0x3b3   : > { %v12872_v9 = vadd.f32 %v4364_v4, %v4316_v46  ;;  %14890 = vst [vmem:[#allocation23_spill] sm:$0xff] %v12877_v60 }
 0x3b4   : > { %14891 = vst [vmem:[#allocation24_spill] sm:$0xff] %v12879_v28  ;;  %v10205_v28 = vld [vmem:[#allocation2 + $0xd0] sm:$0x11] }
 0x3b6   : > { %v4217_v6 = vpop.f32.mrf.mxu2 }
 0x3b7   : > { %v4266_v27 = vpop.f32.mrf.mxu3  ;;  %v4218_v39 = vadd.f32 %v4217_v6, %v12629_v53 }
 0x3b8   : > { %v4318_v33 = vpop.f32.mrf.mxu0 }
 0x3b9   : > { %v12881_v22 = vadd.f32 %v4266_v27, %v4218_v39  ;;  %v4367_v50 = vpop.f32.mrf.mxu1  ;;  %v4319_v1 = vadd.f32 %v4318_v33, %v12633_v49 }
 0x3bb   : > { %4684 = vmatmul.bf16.gmra.mxu2 %v12251_v21  ;;  %v12887_v30 = vadd.f32 %v4367_v50, %v4319_v1  ;;  %4782 = vmatmul.bf16.gmra.mxu0 %v12251_v21 }
 0x3bc   : > { %9126 = vmatmul.msk.bf16.gmra.mxu3 %vm3794_vm2, %v12253_v51  ;;  %9134 = vmatmul.msk.bf16.gmra.mxu1 %vm3794_vm2, %v12253_v51 }
 0x3be   : > { %v4220_v53 = vpop.f32.mrf.mxu2 }
 0x3bf   : > { %v4269_v4 = vpop.f32.mrf.mxu3  ;;  %v4221_v8 = vadd.f32 %v4220_v53, %v12641_v0 }
 0x3c0   : > { %v4320_v46 = vpop.f32.mrf.mxu0 }
 0x3c1   : > { %v12893_v10 = vadd.f32 %v4269_v4, %v4221_v8  ;;  %v4369_v49 = vpop.f32.mrf.mxu1  ;;  %v4321_v35 = vadd.f32 %v4320_v46, %v12643_v37 }
 0x3c3   : > { %v12896_v55 = vadd.f32 %v4369_v49, %v4321_v35  ;;  %v9282_v49 = vld [vmem:[%s14757_s3 + $0x228] sm:$0xf0] }
 0x3c6   : > { %v4222_v15 = vpop.f32.mrf.mxu2 }
 0x3c7   : > { %v4271_v44 = vpop.f32.mrf.mxu3  ;;  %v4223_v6 = vadd.f32 %v4222_v15, %v12647_v16 }
 0x3c8   : > { %v4323_v27 = vpop.f32.mrf.mxu0 }
 0x3c9   : > { %v12899_v21 = vadd.f32 %v4271_v44, %v4223_v6  ;;  %v4372_v51 = vpop.f32.mrf.mxu1  ;;  %v4324_v57 = vadd.f32 %v4323_v27, %v12651_v40 }
 0x3cb   : > { %4689 = vmatmul.bf16.gmra.mxu2 %v12302_v62  ;;  %v12905_v0 = vadd.f32 %v4372_v51, %v4324_v57  ;;  %4787 = vmatmul.bf16.gmra.mxu0 %v12302_v62 }
 0x3cc   : > { %9127 = vmatmul.msk.bf16.gmra.mxu3 %vm3794_vm2, %v12304_v54  ;;  %9135 = vmatmul.msk.bf16.gmra.mxu1 %vm3794_vm2, %v12304_v54 }
 0x3ce   : > { %v4225_v37 = vpop.f32.mrf.mxu2 }
 0x3cf   : > { %v4274_v16 = vpop.f32.mrf.mxu3  ;;  %v4226_v12 = vadd.f32 %v4225_v37, %v12659_v32 }
 0x3d0   : > { %v4325_v5 = vpop.f32.mrf.mxu0 }
 0x3d1   : > { %v12911_v26 = vadd.f32 %v4274_v16, %v4226_v12  ;;  %v4374_v40 = vpop.f32.mrf.mxu1  ;;  %v4326_v39 = vadd.f32 %v4325_v5, %v12661_v63  ;;  %v9280_v63 = vld [vmem:[%s14757_s3 + $0x220] sm:$0xf]  ;;  %v9272_v5 = vld [vmem:[%s14757_s3 + $0x210] sm:$0xf] }
 0x3d3   : > { %v12914_v33 = vadd.f32 %v4374_v40, %v4326_v39  ;;  %v10063_v40 = vld [vmem:[%s14757_s3 + $0x214] sm:$0xf0] }
 0x3d4   : > { %v9273_v39 = vor.u32 %v10063_v40, %v9272_v5 }
 0x3d6   : > { %v4227_v50 = vpop.f32.mrf.mxu2 }
 0x3d7   : > { %v4276_v1 = vpop.f32.mrf.mxu3  ;;  %v4228_v53 = vadd.f32 %v4227_v50, %v12665_v31  ;;  %v9288_v31 = vld [vmem:[%s14757_s3 + $0x230] sm:$0xf]  ;;  %v9274_v50 = vld [vmem:[%s14757_s3 + $0x218] sm:$0xf0] }
 0x3d8   : > { %v4328_v4 = vpop.f32.mrf.mxu0 }
 0x3d9   : > { %v12917_v62 = vadd.f32 %v4276_v1, %v4228_v53  ;;  %v4377_v54 = vpop.f32.mrf.mxu1  ;;  %v4329_v8 = vadd.f32 %v4328_v4, %v12669_v19  ;;  %v10065_v19 = vld [vmem:[%s14757_s3 + $0x224] sm:$0xf0]  ;;  %v9290_v1 = vld [vmem:[%s14757_s3 + $0x238] sm:$0xf0] }
 0x3da   : > { %v9281_v46 = vor.u32 %v10065_v19, %v9280_v63  ;;  %v9264_v63 = vld [vmem:[%s14757_s3 + $0x200] sm:$0xf]  ;;  %v10061_v19 = vld [vmem:[%s14757_s3 + $0x204] sm:$0xf0] }
 0x3db   : > { %4694 = vmatmul.bf16.gmra.mxu2 %v12535_v48  ;;  %v12923_v32 = vadd.f32 %v4377_v54, %v4329_v8  ;;  %4792 = vmatmul.bf16.gmra.mxu0 %v12535_v48  ;;  %v10067_v48 = vld [vmem:[%s14757_s3 + $0x234] sm:$0xf0] }
 0x3dc   : > { %9128 = vmatmul.msk.bf16.gmra.mxu3 %vm3794_vm2, %v12537_v29  ;;  %9136 = vmatmul.msk.bf16.gmra.mxu1 %vm3794_vm2, %v12537_v29  ;;  %v10064_v29 = vld [vmem:[%s14757_s3 + $0x224] sm:$0xf]  ;;  %v9289_v44 = vor.u32 %v10067_v48, %v9288_v31  ;;  %v9266_v48 = vld [vmem:[%s14757_s3 + $0x208] sm:$0xf0] }
 0x3dd   : > { %v9285_v6 = vor.u32 %v10064_v29, %v9282_v49  ;;  %5115 = vmatpush.bf16.msra.mxu2 %v9281_v46  ;;  %v10060_v31 = vld [vmem:[%s14757_s3 + $0x204] sm:$0xf] }
 0x3de   : > { %v4230_v35 = vpop.f32.mrf.mxu2  ;;  %5171 = vmatpush.bf16.msra.mxu3 %v9289_v44  ;;  %v9269_v44 = vor.u32 %v10060_v31, %v9266_v48  ;;  %v9240_v31 = vld [vmem:[%s14757_s3 + $0x1d0] sm:$0xf] }
 0x3df   : > { %v4279_v15 = vpop.f32.mrf.mxu3  ;;  %v4231_v27 = vadd.f32 %v4230_v35, %v12695_v45  ;;  %5213 = vmatpush.bf16.msra.mxu0 %v9285_v6  ;;  %v10062_v45 = vld [vmem:[%s14757_s3 + $0x214] sm:$0xf] }
 0x3e0   : > { %v4330_v57 = vpop.f32.mrf.mxu0  ;;  %v9277_v54 = vor.u32 %v10062_v45, %v9274_v50  ;;  %v10057_v45 = vld [vmem:[%s14757_s3 + $0x1e4] sm:$0xf0]  ;;  %v9250_v50 = vld [vmem:[%s14757_s3 + $0x1e8] sm:$0xf0] }
 0x3e1   : > { %v12947_v51 = vadd.f32 %v4279_v15, %v4231_v27  ;;  %v4379_v37 = vpop.f32.mrf.mxu1  ;;  %v4331_v16 = vadd.f32 %v4330_v57, %v12697_v36  ;;  %v10066_v36 = vld [vmem:[%s14757_s3 + $0x234] sm:$0xf]  ;;  %5116 = vmatpush.bf16.msra.mxu2 %v9273_v39  ;;  %v9265_v15 = vor.u32 %v10061_v19, %v9264_v63  ;;  %v9256_v27 = vld [vmem:[%s14757_s3 + $0x1f0] sm:$0xf]  ;;  %v10056_v39 = vld [vmem:[%s14757_s3 + $0x1e4] sm:$0xf] }
 0x3e2   : > { %v9293_v8 = vor.u32 %v10066_v36, %v9290_v1  ;;  %v10058_v57 = vld [vmem:[%s14757_s3 + $0x1f4] sm:$0xf] }
 0x3e3   : > { %v12950_v12 = vadd.f32 %v4379_v37, %v4331_v16  ;;  %5214 = vmatpush.bf16.msra.mxu0 %v9277_v54 }
 0x3e4   : > { %5269 = vmatpush.bf16.msra.mxu1 %v9293_v8  ;;  %v9253_v8 = vor.u32 %v10056_v39, %v9250_v50  ;;  %v10050_v39 = vld [vmem:[%s14757_s3 + $0x1b4] sm:$0xf] }
 0x3e5   : > { %5117 = vmatpush.bf16.msra.mxu2 %v9265_v15 }
 0x3e6   : > { %v4232_v53 = vpop.f32.mrf.mxu2 }
 0x3e7   : > { %v4281_v4 = vpop.f32.mrf.mxu3  ;;  %v4233_v46 = vadd.f32 %v4232_v53, %v12729_v13  ;;  %5215 = vmatpush.bf16.msra.mxu0 %v9269_v44 }
 0x3e8   : > { %v4333_v49 = vpop.f32.mrf.mxu0 }
 0x3e9   : > { %v12983_v29 = vadd.f32 %v4281_v4, %v4233_v46  ;;  %v4382_v35 = vpop.f32.mrf.mxu1  ;;  %v4334_v6 = vadd.f32 %v4333_v49, %v12733_v17  ;;  %v10059_v17 = vld [vmem:[%s14757_s3 + $0x1f4] sm:$0xf0]  ;;  %v10054_v46 = vld [vmem:[%s14757_s3 + $0x1d4] sm:$0xf]  ;;  %v9232_v49 = vld [vmem:[%s14757_s3 + $0x1c0] sm:$0xf] }
 0x3ea   : > { %v9257_v37 = vor.u32 %v10059_v17, %v9256_v27  ;;  %v10052_v27 = vld [vmem:[%s14757_s3 + $0x1c4] sm:$0xf]  ;;  %v9234_v17 = vld [vmem:[%s14757_s3 + $0x1c8] sm:$0xf0] }
 0x3eb   : > { %4699 = vmatmul.bf16.gmra.mxu2 %v12556_v11  ;;  %v12989_v13 = vadd.f32 %v4382_v35, %v4334_v6  ;;  %4797 = vmatmul.bf16.gmra.mxu0 %v12556_v11  ;;  %v9258_v11 = vld [vmem:[%s14757_s3 + $0x1f8] sm:$0xf0]  ;;  %v10053_v6 = vld [vmem:[%s14757_s3 + $0x1c4] sm:$0xf0] }
 0x3ec   : > { %9129 = vmatmul.msk.bf16.gmra.mxu3 %vm3794_vm2, %v12558_v59  ;;  %9137 = vmatmul.msk.bf16.gmra.mxu1 %vm3794_vm2, %v12558_v59  ;;  %v9248_v59 = vld [vmem:[%s14757_s3 + $0x1e0] sm:$0xf]  ;;  %v9261_v40 = vor.u32 %v10058_v57, %v9258_v11 }
 0x3ed   : > { %5118 = vmatpush.bf16.msra.mxu2 %v9257_v37  ;;  %v9249_v54 = vor.u32 %v10057_v45, %v9248_v59 }
 0x3ee   : > { %v4235_v16 = vpop.f32.mrf.mxu2  ;;  %5216 = vmatpush.bf16.msra.mxu0 %v9261_v40 }
 0x3ef   : > { %v4284_v5 = vpop.f32.mrf.mxu3  ;;  %v4236_v36 = vadd.f32 %v4235_v16, %v12767_v42  ;;  %v10055_v42 = vld [vmem:[%s14757_s3 + $0x1d4] sm:$0xf0]  ;;  %v9233_v16 = vor.u32 %v10053_v6, %v9232_v49  ;;  %v14893_v6 = vld [vmem:[#allocation5_spill] sm:$0xff] }
 0x3f0   : > { %v4335_v53 = vpop.f32.mrf.mxu0  ;;  %v9241_v48 = vor.u32 %v10055_v42, %v9240_v31 }
 0x3f1   : > { %v13019_v1 = vadd.f32 %v4284_v5, %v4236_v36  ;;  %v4384_v4 = vpop.f32.mrf.mxu1  ;;  %v4336_v63 = vadd.f32 %v4335_v53, %v12769_v47  ;;  %5119 = vmatpush.bf16.msra.mxu2 %v9249_v54  ;;  %v9242_v47 = vld [vmem:[%s14757_s3 + $0x1d8] sm:$0xf0]  ;;  %v9237_v5 = vor.u32 %v10052_v27, %v9234_v17  ;;  %v14894_v17 = vld [vmem:[#allocation22_spill] sm:$0xff] }
 0x3f2   : > { %5217 = vmatpush.bf16.msra.mxu0 %v9253_v8  ;;  %v9245_v44 = vor.u32 %v10054_v46, %v9242_v47 }
 0x3f3   : > { %v13022_v19 = vadd.f32 %v4384_v4, %v4336_v63 }
 0x3f5   : > { %5120 = vmatpush.bf16.msra.mxu2 %v9241_v48 }
 0x3f6   : > { %v4237_v35 = vpop.f32.mrf.mxu2  ;;  %5218 = vmatpush.bf16.msra.mxu0 %v9245_v44  ;;  %v14892_v44 = vld [vmem:[#allocation7_spill] sm:$0xff] }
 0x3f7   : > { %v4286_v15 = vpop.f32.mrf.mxu3  ;;  %v4238_v57 = vadd.f32 %v4237_v35, %v12797_v20  ;;  %v9224_v20 = vld [vmem:[%s14757_s3 + $0x1b0] sm:$0xf] }
 0x3f8   : > { %v4338_v11 = vpop.f32.mrf.mxu0 }
 0x3f9   : > { %v13049_v37 = vadd.f32 %v4286_v15, %v4238_v57  ;;  %v4387_v59 = vpop.f32.mrf.mxu1  ;;  %v4339_v40 = vadd.f32 %v4338_v11, %v12801_v58  ;;  %v10051_v58 = vld [vmem:[%s14757_s3 + $0x1b4] sm:$0xf0]  ;;  %5121 = vmatpush.bf16.msra.mxu2 %v9233_v16 }
 0x3fa   : > { %5219 = vmatpush.bf16.msra.mxu0 %v9237_v5  ;;  %v9225_v50 = vor.u32 %v10051_v58, %v9224_v20  ;;  %v10035_v58 = vld [vmem:[#allocation2 + $0x1c] sm:$0xf0] }
 0x3fb   : > { %4704 = vmatmul.bf16.gmra.mxu2 %v12571_v61  ;;  %v13055_v45 = vadd.f32 %v4387_v59, %v4339_v40  ;;  %4802 = vmatmul.bf16.gmra.mxu0 %v12571_v61  ;;  %v9226_v61 = vld [vmem:[%s14757_s3 + $0x1b8] sm:$0xf0] }
 0x3fc   : > { %9130 = vmatmul.msk.bf16.gmra.mxu3 %vm3794_vm2, %v12573_v25  ;;  %9138 = vmatmul.msk.bf16.gmra.mxu1 %vm3794_vm2, %v12573_v25  ;;  %v9229_v53 = vor.u32 %v10050_v39, %v9226_v61  ;;  %v9162_v39 = vld [vmem:[#allocation2 + $0x20] sm:$0xf0]  ;;  %v9160_v61 = vld [vmem:[#allocation2 + $0x18] sm:$0xf] }
 0x3fd   : > { %5122 = vmatpush.bf16.msra.mxu2 %v9225_v50 }
 0x3fe   : > { %v4240_v25 = vpop.f32.mrf.mxu2  ;;  %5220 = vmatpush.bf16.msra.mxu0 %v9229_v53 }
 0x3ff   : > { %v4289_v36 = vpop.f32.mrf.mxu3  ;;  %v4241_v4 = vadd.f32 %v4240_v25, %v12821_v41  ;;  %v10034_v25 = vld [vmem:[#allocation2 + $0x1c] sm:$0xf] }
 0x400   : > { %v4340_v8 = vpop.f32.mrf.mxu0 }
 0x401   : > { %v13073_v54 = vadd.f32 %v4289_v36, %v4241_v4  ;;  %v4389_v63 = vpop.f32.mrf.mxu1  ;;  %v4341_v31 = vadd.f32 %v4340_v8, %v12823_v23  ;;  %v9161_v8 = vor.u32 %v10035_v58, %v9160_v61 }
 0x403   : > { %v13076_v42 = vadd.f32 %v4389_v63, %v4341_v31  ;;  %v9165_v63 = vor.u32 %v10034_v25, %v9162_v39 }
 0x406   : > { %v4242_v46 = vpop.f32.mrf.mxu2 }
 0x407   : > { %v4291_v48 = vpop.f32.mrf.mxu3  ;;  %v4243_v47 = vadd.f32 %v4242_v46, %v12825_v56 }
 0x408   : > { %v4343_v35 = vpop.f32.mrf.mxu0 }
 0x409   : > { %v13079_v49 = vadd.f32 %v4291_v48, %v4243_v47  ;;  %v4392_v15 = vpop.f32.mrf.mxu1  ;;  %v4344_v41 = vadd.f32 %v4343_v35, %v12827_v38 }
 0x40b   : > { %4709 = vmatmul.bf16.gmra.mxu2 %v14892_v44  ;;  %v13085_v27 = vadd.f32 %v4392_v15, %v4344_v41  ;;  %4807 = vmatmul.bf16.gmra.mxu0 %v14892_v44 }
 0x40c   : > { %9131 = vmatmul.msk.bf16.gmra.mxu3 %vm3794_vm2, %v14893_v6  ;;  %9139 = vmatmul.msk.bf16.gmra.mxu1 %vm3794_vm2, %v14893_v6 }
 0x40e   : > { %v4245_v23 = vpop.f32.mrf.mxu2 }
 0x40f   : > { %v4294_v56 = vpop.f32.mrf.mxu3  ;;  %v4246_v57 = vadd.f32 %v4245_v23, %v14894_v17 }
 0x410   : > { %v4345_v59 = vpop.f32.mrf.mxu0 }
 0x411   : > { %v13091_v11 = vadd.f32 %v4294_v56, %v4246_v57  ;;  %v4394_v38 = vpop.f32.mrf.mxu1  ;;  %v4346_v16 = vadd.f32 %v4345_v59, %v12837_v14  ;;  %v10037_v56 = vld [vmem:[#allocation2 + $0x34] sm:$0xf0]  ;;  %v9168_v57 = vld [vmem:[#allocation2 + $0x30] sm:$0xf]  ;;  %v10036_v59 = vld [vmem:[#allocation2 + $0x34] sm:$0xf] }
 0x413   : > { %v13094_v5 = vadd.f32 %v4394_v38, %v4346_v16 }
 0x416   : > { %v4247_v40 = vpop.f32.mrf.mxu2 }
 0x417   : > { %v4296_v20 = vpop.f32.mrf.mxu3  ;;  %v4248_v50 = vadd.f32 %v4247_v40, %v12839_v2 }
 0x418   : > { %v4773_v53 = vpop.f32.mrf.mxu0 }
 0x419   : > { %v13097_v36 = vadd.f32 %v4296_v20, %v4248_v50  ;;  %v4822_v4 = vpop.f32.mrf.mxu1 }
 0x41a   : > { %v4823_v31 = vadd.f32 %v4822_v4, %v4773_v53 }
 0x41b   : > { %5123 = vmatmul.bf16.vlgmr.msra.gmra.mxu2 %v9161_v8  ;;  %5221 = vmatmul.bf16.vlgmr.msra.gmra.mxu0 %v9161_v8 }
 0x41c   : > { %9294 = vmatmul.msk.bf16.vlgmr.msra.gmra.mxu3 %vm3794_vm2, %v9165_v63  ;;  %v13101_v14 = vadd.f32 %v4823_v31, %v12843_v52  ;;  %9302 = vmatmul.msk.bf16.vlgmr.msra.gmra.mxu1 %vm3794_vm2, %v9165_v63  ;;  %v9170_v52 = vld [vmem:[#allocation2 + $0x38] sm:$0xf0] }
 0x41d   : > { %v9173_v20 = vor.u32 %v10036_v59, %v9170_v52 }
 0x41e   : > { %v4675_v46 = vpop.f32.mrf.mxu2 }
 0x41f   : > { %v4724_v2 = vpop.f32.mrf.mxu3 }
 0x420   : > { %v4725_v48 = vadd.f32 %v4724_v2, %v4675_v46  ;;  %v4775_v35 = vpop.f32.mrf.mxu0  ;;  %v10039_v46 = vld [vmem:[#allocation2 + $0x4c] sm:$0xf0] }
 0x421   : > { %v4824_v15 = vpop.f32.mrf.mxu1 }
 0x422   : > { %v13105_v47 = vadd.f32 %v4725_v48, %v12849_v43  ;;  %v4825_v41 = vadd.f32 %v4824_v15, %v4775_v35  ;;  %v9169_v43 = vor.u32 %v10037_v56, %v9168_v57  ;;  %v9176_v48 = vld [vmem:[#allocation2 + $0x48] sm:$0xf]  ;;  %v10038_v35 = vld [vmem:[#allocation2 + $0x4c] sm:$0xf] }
 0x424   : > { %v13108_v44 = vadd.f32 %v4825_v41, %v12851_v7 }
 0x426   : > { %v4677_v6 = vpop.f32.mrf.mxu2 }
 0x427   : > { %v4726_v23 = vpop.f32.mrf.mxu3 }
 0x428   : > { %v4727_v17 = vadd.f32 %v4726_v23, %v4677_v6  ;;  %v4778_v16 = vpop.f32.mrf.mxu0 }
 0x429   : > { %v4827_v40 = vpop.f32.mrf.mxu1 }
 0x42a   : > { %v13111_v38 = vadd.f32 %v4727_v17, %v12855_v34  ;;  %v4828_v58 = vadd.f32 %v4827_v40, %v4778_v16 }
 0x42b   : > { %5128 = vmatmul.bf16.gmra.mxu2 %v9169_v43  ;;  %5226 = vmatmul.bf16.gmra.mxu0 %v9169_v43 }
 0x42c   : > { %9295 = vmatmul.msk.bf16.gmra.mxu3 %vm3794_vm2, %v9173_v20  ;;  %v13115_v7 = vadd.f32 %v4828_v58, %v12861_v3  ;;  %9303 = vmatmul.msk.bf16.gmra.mxu1 %vm3794_vm2, %v9173_v20  ;;  %v9178_v3 = vld [vmem:[#allocation2 + $0x50] sm:$0xf0] }
 0x42d   : > { %v9181_v23 = vor.u32 %v10038_v35, %v9178_v3 }
 0x42e   : > { %v4680_v39 = vpop.f32.mrf.mxu2 }
 0x42f   : > { %v4729_v50 = vpop.f32.mrf.mxu3 }
 0x430   : > { %v4730_v61 = vadd.f32 %v4729_v50, %v4680_v39  ;;  %v4780_v25 = vpop.f32.mrf.mxu0  ;;  %v10041_v39 = vld [vmem:[#allocation2 + $0x64] sm:$0xf0] }
 0x431   : > { %v4829_v53 = vpop.f32.mrf.mxu1 }
 0x432   : > { %v13119_v34 = vadd.f32 %v4730_v61, %v12867_v18  ;;  %v4830_v4 = vadd.f32 %v4829_v53, %v4780_v25  ;;  %v9177_v18 = vor.u32 %v10039_v46, %v9176_v48  ;;  %v9184_v61 = vld [vmem:[#allocation2 + $0x60] sm:$0xf]  ;;  %v10040_v25 = vld [vmem:[#allocation2 + $0x64] sm:$0xf] }
 0x434   : > { %v13122_v8 = vadd.f32 %v4830_v4, %v12872_v9 }
 0x436   : > { %v4682_v63 = vpop.f32.mrf.mxu2 }
 0x437   : > { %v4731_v31 = vpop.f32.mrf.mxu3 }
 0x438   : > { %v4732_v2 = vadd.f32 %v4731_v31, %v4682_v63  ;;  %v4783_v41 = vpop.f32.mrf.mxu0 }
 0x439   : > { %v4832_v6 = vpop.f32.mrf.mxu1 }
 0x43a   : > { %v13125_v15 = vadd.f32 %v4732_v2, %v12881_v22  ;;  %v4833_v56 = vadd.f32 %v4832_v6, %v4783_v41 }
 0x43b   : > { %5133 = vmatmul.bf16.gmra.mxu2 %v9177_v18  ;;  %5231 = vmatmul.bf16.gmra.mxu0 %v9177_v18 }
 0x43c   : > { %9296 = vmatmul.msk.bf16.gmra.mxu3 %vm3794_vm2, %v9181_v23  ;;  %v13129_v9 = vadd.f32 %v4833_v56, %v12887_v30  ;;  %9304 = vmatmul.msk.bf16.gmra.mxu1 %vm3794_vm2, %v9181_v23  ;;  %v9186_v30 = vld [vmem:[#allocation2 + $0x68] sm:$0xf0] }
 0x43d   : > { %v9189_v31 = vor.u32 %v10040_v25, %v9186_v30  ;;  %v9386_v30 = vld [vmem:[%s14757_s3 + $0x2b0] sm:$0xf]  ;;  %v10082_v25 = vld [vmem:[%s14757_s3 + $0x2b4] sm:$0xf] }
 0x43e   : > { %v4685_v52 = vpop.f32.mrf.mxu2 }
 0x43f   : > { %v4734_v17 = vpop.f32.mrf.mxu3 }
 0x440   : > { %v4735_v57 = vadd.f32 %v4734_v17, %v4685_v52  ;;  %v4785_v59 = vpop.f32.mrf.mxu0  ;;  %v10043_v52 = vld [vmem:[#allocation2 + $0x7c] sm:$0xf0] }
 0x441   : > { %v4834_v16 = vpop.f32.mrf.mxu1 }
 0x442   : > { %v13133_v22 = vadd.f32 %v4735_v57, %v12893_v10  ;;  %v4835_v40 = vadd.f32 %v4834_v16, %v4785_v59  ;;  %v9185_v10 = vor.u32 %v10041_v39, %v9184_v61  ;;  %v9192_v57 = vld [vmem:[#allocation2 + $0x78] sm:$0xf]  ;;  %v10042_v59 = vld [vmem:[#allocation2 + $0x7c] sm:$0xf] }
 0x444   : > { %v13136_v43 = vadd.f32 %v4835_v40, %v12896_v55 }
 0x446   : > { %v4687_v20 = vpop.f32.mrf.mxu2 }
 0x447   : > { %v4736_v58 = vpop.f32.mrf.mxu3 }
 0x448   : > { %v4737_v50 = vadd.f32 %v4736_v58, %v4687_v20  ;;  %v4788_v4 = vpop.f32.mrf.mxu0 }
 0x449   : > { %v4837_v63 = vpop.f32.mrf.mxu1 }
 0x44a   : > { %v13139_v53 = vadd.f32 %v4737_v50, %v12899_v21  ;;  %v4838_v46 = vadd.f32 %v4837_v63, %v4788_v4  ;;  %v9394_v50 = vld [vmem:[%s14757_s3 + $0x2c0] sm:$0xf]  ;;  %v9388_v4 = vld [vmem:[%s14757_s3 + $0x2b8] sm:$0xf0] }
 0x44b   : > { %5138 = vmatmul.bf16.gmra.mxu2 %v9185_v10  ;;  %5236 = vmatmul.bf16.gmra.mxu0 %v9185_v10 }
 0x44c   : > { %9297 = vmatmul.msk.bf16.gmra.mxu3 %vm3794_vm2, %v9189_v31  ;;  %v13143_v55 = vadd.f32 %v4838_v46, %v12905_v0  ;;  %9305 = vmatmul.msk.bf16.gmra.mxu1 %vm3794_vm2, %v9189_v31  ;;  %v9194_v0 = vld [vmem:[#allocation2 + $0x80] sm:$0xf0]  ;;  %v9391_v46 = vor.u32 %v10082_v25, %v9388_v4  ;;  %v10044_v4 = vld [vmem:[#allocation2 + $0x94] sm:$0xf] }
 0x44d   : > { %v9197_v58 = vor.u32 %v10042_v59, %v9194_v0  ;;  %v10081_v0 = vld [vmem:[%s14757_s3 + $0x2a4] sm:$0xf0]  ;;  %v9396_v59 = vld [vmem:[%s14757_s3 + $0x2c8] sm:$0xf0] }
 0x44e   : > { %v4690_v3 = vpop.f32.mrf.mxu2  ;;  %5846 = vmatpush.bf16.msrb.mxu0 %v9391_v46 }
 0x44f   : > { %v4739_v2 = vpop.f32.mrf.mxu3 }
 0x450   : > { %v4740_v48 = vadd.f32 %v4739_v2, %v4690_v3  ;;  %v4790_v35 = vpop.f32.mrf.mxu0 }
 0x451   : > { %v4839_v41 = vpop.f32.mrf.mxu1 }
 0x452   : > { %v13147_v21 = vadd.f32 %v4740_v48, %v12911_v26  ;;  %v4840_v6 = vadd.f32 %v4839_v41, %v4790_v35  ;;  %v9193_v26 = vor.u32 %v10043_v52, %v9192_v57  ;;  %v9378_v52 = vld [vmem:[%s14757_s3 + $0x2a0] sm:$0xf]  ;;  %v9380_v57 = vld [vmem:[%s14757_s3 + $0x2a8] sm:$0xf0] }
 0x454   : > { %v13150_v18 = vadd.f32 %v4840_v6, %v12914_v33  ;;  %v10045_v6 = vld [vmem:[#allocation2 + $0x94] sm:$0xf0] }
 0x456   : > { %v4692_v23 = vpop.f32.mrf.mxu2 }
 0x457   : > { %v4741_v56 = vpop.f32.mrf.mxu3 }
 0x458   : > { %v4742_v17 = vadd.f32 %v4741_v56, %v4692_v23  ;;  %v4793_v40 = vpop.f32.mrf.mxu0  ;;  %v9202_v56 = vld [vmem:[#allocation2 + $0x98] sm:$0xf0] }
 0x459   : > { %v4842_v20 = vpop.f32.mrf.mxu1  ;;  %v9205_v46 = vor.u32 %v10044_v4, %v9202_v56  ;;  %v10076_v56 = vld [vmem:[%s14757_s3 + $0x284] sm:$0xf] }
 0x45a   : > { %v13153_v16 = vadd.f32 %v4742_v17, %v12917_v62  ;;  %v4843_v39 = vadd.f32 %v4842_v20, %v4793_v40  ;;  %v10083_v62 = vld [vmem:[%s14757_s3 + $0x2b4] sm:$0xf0]  ;;  %v9379_v17 = vor.u32 %v10081_v0, %v9378_v52  ;;  %v9354_v0 = vld [vmem:[%s14757_s3 + $0x270] sm:$0xf]  ;;  %v10072_v4 = vld [vmem:[%s14757_s3 + $0x264] sm:$0xf] }
 0x45b   : > { %5143 = vmatmul.bf16.gmra.mxu2 %v9193_v26  ;;  %5241 = vmatmul.bf16.gmra.mxu0 %v9193_v26  ;;  %v9387_v61 = vor.u32 %v10083_v62, %v9386_v30  ;;  %v10079_v30 = vld [vmem:[%s14757_s3 + $0x294] sm:$0xf0]  ;;  %v10078_v62 = vld [vmem:[%s14757_s3 + $0x294] sm:$0xf] }
 0x45c   : > { %9298 = vmatmul.msk.bf16.gmra.mxu3 %vm3794_vm2, %v9197_v58  ;;  %v13157_v33 = vadd.f32 %v4843_v39, %v12923_v32  ;;  %9306 = vmatmul.msk.bf16.gmra.mxu1 %vm3794_vm2, %v9197_v58  ;;  %v10085_v32 = vld [vmem:[%s14757_s3 + $0x2c4] sm:$0xf0]  ;;  %v9370_v39 = vld [vmem:[%s14757_s3 + $0x290] sm:$0xf] }
 0x45d   : > { %v9395_v31 = vor.u32 %v10085_v32, %v9394_v50  ;;  %5748 = vmatpush.bf16.msrb.mxu2 %v9387_v61  ;;  %v9200_v61 = vld [vmem:[#allocation2 + $0x90] sm:$0xf]  ;;  %v9372_v32 = vld [vmem:[%s14757_s3 + $0x298] sm:$0xf0] }
 0x45e   : > { %v4695_v63 = vpop.f32.mrf.mxu2  ;;  %v9201_v25 = vor.u32 %v10045_v6, %v9200_v61  ;;  %v10077_v6 = vld [vmem:[%s14757_s3 + $0x284] sm:$0xf0]  ;;  %v10047_v61 = vld [vmem:[#allocation2 + $0xac] sm:$0xf0] }
 0x45f   : > { %v4744_v10 = vpop.f32.mrf.mxu3  ;;  %5804 = vmatpush.bf16.msrb.mxu3 %v9395_v31 }
 0x460   : > { %v4745_v3 = vadd.f32 %v4744_v10, %v4695_v63  ;;  %v4795_v48 = vpop.f32.mrf.mxu0 }
 0x461   : > { %v4844_v35 = vpop.f32.mrf.mxu1  ;;  %5749 = vmatpush.bf16.msrb.mxu2 %v9379_v17 }
 0x462   : > { %v13179_v2 = vadd.f32 %v4745_v3, %v12947_v51  ;;  %v4845_v41 = vadd.f32 %v4844_v35, %v4795_v48  ;;  %v10080_v51 = vld [vmem:[%s14757_s3 + $0x2a4] sm:$0xf]  ;;  %v9371_v3 = vor.u32 %v10079_v30, %v9370_v39  ;;  %v9375_v48 = vor.u32 %v10078_v62, %v9372_v32 }
 0x463   : > { %v9383_v26 = vor.u32 %v10080_v51, %v9380_v57 }
 0x464   : > { %v13182_v23 = vadd.f32 %v4845_v41, %v12950_v12  ;;  %v10084_v12 = vld [vmem:[%s14757_s3 + $0x2c4] sm:$0xf] }
 0x465   : > { %v9399_v58 = vor.u32 %v10084_v12, %v9396_v59  ;;  %5847 = vmatpush.bf16.msrb.mxu0 %v9383_v26  ;;  %5750 = vmatpush.bf16.msrb.mxu2 %v9371_v3  ;;  %v10075_v12 = vld [vmem:[%s14757_s3 + $0x274] sm:$0xf0]  ;;  %v10074_v59 = vld [vmem:[%s14757_s3 + $0x274] sm:$0xf] }
 0x466   : > { %v4697_v40 = vpop.f32.mrf.mxu2  ;;  %v9355_v30 = vor.u32 %v10075_v12, %v9354_v0  ;;  %v10046_v0 = vld [vmem:[#allocation2 + $0xac] sm:$0xf] }
 0x467   : > { %v4746_v20 = vpop.f32.mrf.mxu3  ;;  %5902 = vmatpush.bf16.msrb.mxu1 %v9399_v58 }
 0x468   : > { %v4747_v50 = vadd.f32 %v4746_v20, %v4697_v40  ;;  %v4798_v10 = vpop.f32.mrf.mxu0  ;;  %v9356_v40 = vld [vmem:[%s14757_s3 + $0x278] sm:$0xf0] }
 0x469   : > { %v4847_v31 = vpop.f32.mrf.mxu1  ;;  %5848 = vmatpush.bf16.msrb.mxu0 %v9375_v48  ;;  %v9359_v62 = vor.u32 %v10074_v59, %v9356_v40 }
 0x46a   : > { %v13215_v63 = vadd.f32 %v4747_v50, %v12983_v29  ;;  %v4848_v35 = vadd.f32 %v4847_v31, %v4798_v10  ;;  %v9362_v29 = vld [vmem:[%s14757_s3 + $0x280] sm:$0xf]  ;;  %v9210_v10 = vld [vmem:[#allocation2 + $0xb0] sm:$0xf0] }
 0x46b   : > { %5148 = vmatmul.bf16.gmra.mxu2 %v9201_v25  ;;  %5246 = vmatmul.bf16.gmra.mxu0 %v9201_v25  ;;  %v9363_v52 = vor.u32 %v10077_v6, %v9362_v29  ;;  %v9346_v25 = vld [vmem:[%s14757_s3 + $0x260] sm:$0xf]  ;;  %v10071_v29 = vld [vmem:[%s14757_s3 + $0x254] sm:$0xf0]  ;;  %v10070_v6 = vld [vmem:[%s14757_s3 + $0x254] sm:$0xf] }
 0x46c   : > { %9299 = vmatmul.msk.bf16.gmra.mxu3 %vm3794_vm2, %v9205_v46  ;;  %v13219_v41 = vadd.f32 %v4848_v35, %v12989_v13  ;;  %9307 = vmatmul.msk.bf16.gmra.mxu1 %vm3794_vm2, %v9205_v46  ;;  %v9364_v13 = vld [vmem:[%s14757_s3 + $0x288] sm:$0xf0]  ;;  %v9338_v46 = vld [vmem:[%s14757_s3 + $0x250] sm:$0xf] }
 0x46d   : > { %v9367_v57 = vor.u32 %v10076_v56, %v9364_v13  ;;  %5751 = vmatpush.bf16.msrb.mxu2 %v9363_v52  ;;  %v9340_v56 = vld [vmem:[%s14757_s3 + $0x258] sm:$0xf0]  ;;  %v9208_v13 = vld [vmem:[#allocation2 + $0xa8] sm:$0xf]  ;;  %v9339_v40 = vor.u32 %v10071_v29, %v9338_v46 }
 0x46e   : > { %v4700_v51 = vpop.f32.mrf.mxu2 }
 0x46f   : > { %v4749_v17 = vpop.f32.mrf.mxu3  ;;  %5849 = vmatpush.bf16.msrb.mxu0 %v9367_v57 }
 0x470   : > { %v4750_v20 = vadd.f32 %v4749_v17, %v4700_v51  ;;  %v4800_v58 = vpop.f32.mrf.mxu0  ;;  %v9209_v51 = vor.u32 %v10047_v61, %v9208_v13  ;;  %v9213_v17 = vor.u32 %v10046_v0, %v9210_v10 }
 0x471   : > { %v4849_v39 = vpop.f32.mrf.mxu1  ;;  %5752 = vmatpush.bf16.msrb.mxu2 %v9355_v30  ;;  %v10069_v30 = vld [vmem:[%s14757_s3 + $0x244] sm:$0xf0] }
 0x472   : > { %v13247_v26 = vadd.f32 %v4750_v20, %v13019_v1  ;;  %v4850_v50 = vadd.f32 %v4849_v39, %v4800_v58  ;;  %v10073_v1 = vld [vmem:[%s14757_s3 + $0x264] sm:$0xf0]  ;;  %v9343_v20 = vor.u32 %v10070_v6, %v9340_v56 }
 0x473   : > { %5850 = vmatpush.bf16.msrb.mxu0 %v9359_v62  ;;  %v9347_v31 = vor.u32 %v10073_v1, %v9346_v25  ;;  %v10068_v62 = vld [vmem:[%s14757_s3 + $0x244] sm:$0xf] }
 0x474   : > { %v13250_v32 = vadd.f32 %v4850_v50, %v13022_v19  ;;  %v9348_v19 = vld [vmem:[%s14757_s3 + $0x268] sm:$0xf0] }
 0x475   : > { %v9351_v35 = vor.u32 %v10072_v4, %v9348_v19  ;;  %5753 = vmatpush.bf16.msrb.mxu2 %v9347_v31 }
 0x476   : > { %v4702_v3 = vpop.f32.mrf.mxu2 }
 0x477   : > { %v4751_v48 = vpop.f32.mrf.mxu3  ;;  %5851 = vmatpush.bf16.msrb.mxu0 %v9351_v35 }
 0x478   : > { %v4752_v52 = vadd.f32 %v4751_v48, %v4702_v3  ;;  %v4803_v12 = vpop.f32.mrf.mxu0  ;;  %v5343_v3 = vld [vmem:[#allocation2 + $0x18] sm:$0xff]  ;;  %v10190_v48 = vld [vmem:[#allocation2 + $0x20] sm:$0xff] }
 0x479   : > { %v4852_v59 = vpop.f32.mrf.mxu1  ;;  %5754 = vmatpush.bf16.msrb.mxu2 %v9339_v40  ;;  %v5377_v35 = vshll.u32 %v10190_v48, 16  ;;  %v5381_v29 = vshrl.u32 %v10190_v48, 16  ;;  %v5368_v56 = vshrl.u32 %v5343_v3, 16  ;;  %v9216_v40 = vld [vmem:[#allocation2 + $0xc0] sm:$0xf] }
 0x47a   : > { %v13277_v57 = vadd.f32 %v4752_v52, %v13049_v37  ;;  %v4853_v58 = vadd.f32 %v4852_v59, %v4803_v12  ;;  %v9330_v37 = vld [vmem:[%s14757_s3 + $0x240] sm:$0xf]  ;;  %v5371_v52 = vshll.u32 %v5343_v3, 16 }
 0x47b   : > { %5153 = vmatmul.bf16.gmra.mxu2 %v9209_v51  ;;  %5251 = vmatmul.bf16.gmra.mxu0 %v9209_v51  ;;  %v9331_v50 = vor.u32 %v10069_v30, %v9330_v37  ;;  %v10049_v51 = vld [vmem:[#allocation2 + $0xc4] sm:$0xf0]  ;;  %v5383_v12 = vrot.slane %v5381_v29, 4 }
 0x47c   : > { %9300 = vmatmul.msk.bf16.gmra.mxu3 %vm3794_vm2, %v9213_v17  ;;  %v13281_v39 = vadd.f32 %v4853_v58, %v13055_v45  ;;  %9308 = vmatmul.msk.bf16.gmra.mxu1 %vm3794_vm2, %v9213_v17  ;;  %v9332_v45 = vld [vmem:[%s14757_s3 + $0x248] sm:$0xf0] }
 0x47d   : > { %5852 = vmatpush.bf16.msrb.mxu0 %v9343_v20  ;;  %v9335_v1 = vor.u32 %v10068_v62, %v9332_v45  ;;  %5755 = vmatpush.bf16.msrb.mxu2 %v9331_v50  ;;  %v9218_v17 = vld [vmem:[#allocation2 + $0xc8] sm:$0xf0]  ;;  %v10048_v20 = vld [vmem:[#allocation2 + $0xc4] sm:$0xf]  ;;  %v9217_v62 = vor.u32 %v10049_v51, %v9216_v40  ;;  %v5370_v45 = vrot.slane %v5368_v56, 4 }
 0x47e   : > { %v4705_v61 = vpop.f32.mrf.mxu2  ;;  %v9221_v50 = vor.u32 %v10048_v20, %v9218_v17 }
 0x47f   : > { %v4754_v25 = vpop.f32.mrf.mxu3 }
 0x480   : > { %v4755_v4 = vadd.f32 %v4754_v25, %v4705_v61  ;;  %v4805_v31 = vpop.f32.mrf.mxu0  ;;  %v5373_v61 = vrot.slane %v5371_v52, 5 }
 0x481   : > { %v4854_v19 = vpop.f32.mrf.mxu1  ;;  %5853 = vmatpush.bf16.msrb.mxu0 %v9335_v1 }
 0x482   : > { %v13297_v10 = vadd.f32 %v4755_v4, %v13073_v54  ;;  %v4855_v46 = vadd.f32 %v4854_v19, %v4805_v31  ;;  %v5379_v54 = vrot.slane %v5377_v35, 5  ;;  %v10191_v4 = vld [vmem:[#allocation2 + $0x28] sm:$0x11] }
 0x484   : > { %v13300_v6 = vadd.f32 %v4855_v46, %v13076_v42  ;;  %v5384_v25 = vor.u32 %v5383_v12, %v5379_v54  ;;  %v5374_v46 = vor.u32 %v5373_v61, %v5370_v45 }
 0x486   : > { %v4707_v13 = vpop.f32.mrf.mxu2  ;;  %v5385_v3 = vrot.slane %v5384_v25, 4  ;;  %v5375_v17 = vrot.slane %v5374_v46, 4 }
 0x487   : > { %v4756_v0 = vpop.f32.mrf.mxu3 }
 0x488   : > { %v4757_v59 = vadd.f32 %v4756_v0, %v4707_v13  ;;  %v4808_v37 = vpop.f32.mrf.mxu0  ;;  %v5346_v13 = vld [vmem:[#allocation2 + $0x30] sm:$0xff]  ;;  %v10192_v0 = vld [vmem:[#allocation2 + $0x38] sm:$0xff] }
 0x489   : > { %v4857_v30 = vpop.f32.mrf.mxu1  ;;  %v5405_v40 = vshrl.u32 %v10192_v0, 16 }
 0x48a   : > { %v13303_v58 = vadd.f32 %v4757_v59, %v13079_v49  ;;  %v4858_v42 = vadd.f32 %v4857_v30, %v4808_v37  ;;  %v5387_v49 = vshll.u32 %v10191_v4, 16  ;;  %v5380_v37 = vsel %vm10316_vm3, %v5375_v17, %v5379_v54 }
 0x48b   : > { %5158 = vmatmul.bf16.gmra.mxu2 %v9217_v62  ;;  %5256 = vmatmul.bf16.gmra.mxu0 %v9217_v62  ;;  %v5392_v30 = vshrl.u32 %v5346_v13, 16  ;;  %v5407_v25 = vrot.slane %v5405_v40, 4 }
 0x48c   : > { %9301 = vmatmul.msk.bf16.gmra.mxu3 %vm3794_vm2, %v9221_v50  ;;  %v13307_v1 = vadd.f32 %v4858_v42, %v13085_v27  ;;  %9309 = vmatmul.msk.bf16.gmra.mxu1 %vm3794_vm2, %v9221_v50  ;;  %v5389_v35 = vrot.slane %v5387_v49, 5  ;;  %v5401_v27 = vshll.u32 %v10192_v0, 16  ;;  %v5395_v50 = vshll.u32 %v5346_v13, 16  ;;  %v10193_v0 = vld [vmem:[#allocation2 + $0x40] sm:$0x11] }
 0x48d   : > { %v5578_v49 = vunpack.c.l.b16 %v5380_v37 }
 0x48e   : > { %v4710_v31 = vpop.f32.mrf.mxu2  ;;  %v5390_v59 = vsel %vm10316_vm3, %v5385_v3, %v5389_v35  ;;  %v5403_v61 = vrot.slane %v5401_v27, 5  ;;  %v5397_v54 = vrot.slane %v5395_v50, 5  ;;  %v5411_v27 = vshll.u32 %v10193_v0, 16 }
 0x48f   : > { %v4759_v19 = vpop.f32.mrf.mxu3  ;;  %v5581_v62 = vunpack.c.h.b16 %v5390_v59 }
 0x490   : > { %v4760_v48 = vadd.f32 %v4759_v19, %v4710_v31  ;;  %v4810_v56 = vpop.f32.mrf.mxu0  ;;  %v5579_v31 = vunpack.c.h.b16 %v5380_v37  ;;  %v5394_v19 = vrot.slane %v5392_v30, 4  ;;  %v5413_v37 = vrot.slane %v5411_v27, 5 }
 0x491   : > { %v4859_v52 = vpop.f32.mrf.mxu1 }
 0x492   : > { %v13311_v29 = vadd.f32 %v4760_v48, %v13091_v11  ;;  %v4860_v51 = vadd.f32 %v4859_v52, %v4810_v56  ;;  %v5580_v11 = vunpack.c.l.b16 %v5390_v59  ;;  %v5611_v35 = vpack.c.b16 %v5581_v62, %v5579_v31 }
 0x493   : > { %v5408_v52 = vor.u32 %v5407_v25, %v5403_v61  ;;  %v10194_v25 = vld [vmem:[#allocation2 + $0x50] sm:$0xff] }
 0x494   : > { %v13316_v20 = vadd.f32 %v4860_v51, %v13094_v5  ;;  %v5610_v48 = vpack.c.b16 %v5580_v11, %v5578_v49  ;;  %v5429_v49 = vshrl.u32 %v10194_v25, 16 }
 0x495   : > { %v5409_v59 = vrot.slane %v5408_v52, 4 }
 0x496   : > { %v4712_v42 = vpop.f32.mrf.mxu2  ;;  %v5431_v52 = vrot.slane %v5429_v49, 4 }
 0x497   : > { %v4761_v45 = vpop.f32.mrf.mxu3 }
 0x498   : > { %v4762_v4 = vadd.f32 %v4761_v45, %v4712_v42  ;;  %v5222_v5 = vpop.f32.mrf.mxu0  ;;  %v5349_v42 = vld [vmem:[#allocation2 + $0x48] sm:$0xff]  ;;  %v5414_v45 = vsel %vm10316_vm3, %v5409_v59, %v5413_v37 }
 0x499   : > { %v5271_v3 = vpop.f32.mrf.mxu1 }
 0x49a   : > { %v13321_v46 = vadd.f32 %v4762_v4, %v13097_v36  ;;  %v5272_v56 = vadd.f32 %v5271_v3, %v5222_v5  ;;  %v5398_v36 = vor.u32 %v5397_v54, %v5394_v19  ;;  %v5425_v4 = vshll.u32 %v10194_v25, 16 }
 0x49b   : > { %5756 = vmatmul.bf16.vlgmr.msrb.gmra.mxu2 %v5610_v48  ;;  %5854 = vmatmul.bf16.vlgmr.msrb.gmra.mxu0 %v5610_v48  ;;  %v5416_v5 = vshrl.u32 %v5349_v42, 16  ;;  %v5585_v3 = vunpack.c.h.b16 %v5414_v45  ;;  %v5419_v48 = vshll.u32 %v5349_v42, 16  ;;  %v10195_v42 = vld [vmem:[#allocation2 + $0x58] sm:$0x11] }
 0x49c   : > { %9400 = vmatmul.msk.bf16.vlgmr.msrb.gmra.mxu3 %vm3794_vm2, %v5611_v35  ;;  %v13325_v13 = vadd.f32 %v5272_v56, %v13101_v14  ;;  %9408 = vmatmul.msk.bf16.vlgmr.msrb.gmra.mxu1 %vm3794_vm2, %v5611_v35  ;;  %v5399_v50 = vrot.slane %v5398_v36, 4  ;;  %v5427_v56 = vrot.slane %v5425_v4, 5 }
 0x49e   : > { %v5124_v51 = vpop.f32.mrf.mxu2  ;;  %v5404_v19 = vsel %vm10316_vm3, %v5399_v50, %v5403_v61  ;;  %v5421_v61 = vrot.slane %v5419_v48, 5 }
 0x49f   : > { %v5173_v17 = vpop.f32.mrf.mxu3  ;;  %v5582_v27 = vunpack.c.l.b16 %v5404_v19  ;;  %v5583_v36 = vunpack.c.h.b16 %v5404_v19 }
 0x4a0   : > { %v5174_v40 = vadd.f32 %v5173_v17, %v5124_v51  ;;  %v5224_v11 = vpop.f32.mrf.mxu0  ;;  %v5418_v51 = vrot.slane %v5416_v5, 4 }
 0x4a1   : > { %v5273_v62 = vpop.f32.mrf.mxu1  ;;  %v5613_v37 = vpack.c.b16 %v5585_v3, %v5583_v36 }
 0x4a2   : > { %v13329_v30 = vadd.f32 %v5174_v40, %v13105_v47  ;;  %v5274_v14 = vadd.f32 %v5273_v62, %v5224_v11  ;;  %v5584_v47 = vunpack.c.l.b16 %v5414_v45  ;;  %v5432_v62 = vor.u32 %v5431_v52, %v5427_v56  ;;  %v10196_v52 = vld [vmem:[#allocation2 + $0x68] sm:$0xff] }
 0x4a4   : > { %v13334_v31 = vadd.f32 %v5274_v14, %v13108_v44  ;;  %v5612_v40 = vpack.c.b16 %v5584_v47, %v5582_v27  ;;  %v5435_v14 = vshll.u32 %v10195_v42, 16  ;;  %v5433_v4 = vrot.slane %v5432_v62, 4 }
 0x4a5   : > { %v5453_v27 = vshrl.u32 %v10196_v52, 16 }
 0x4a6   : > { %v5126_v35 = vpop.f32.mrf.mxu2  ;;  %v5437_v19 = vrot.slane %v5435_v14, 5 }
 0x4a7   : > { %v5175_v54 = vpop.f32.mrf.mxu3  ;;  %v5455_v62 = vrot.slane %v5453_v27, 4 }
 0x4a8   : > { %v5176_v0 = vadd.f32 %v5175_v54, %v5126_v35  ;;  %v5227_v44 = vpop.f32.mrf.mxu0  ;;  %v5352_v35 = vld [vmem:[#allocation2 + $0x60] sm:$0xff]  ;;  %v5438_v54 = vsel %vm10316_vm3, %v5433_v4, %v5437_v19 }
 0x4a9   : > { %v5276_v59 = vpop.f32.mrf.mxu1 }
 0x4aa   : > { %v13339_v17 = vadd.f32 %v5176_v0, %v13111_v38  ;;  %v5277_v11 = vadd.f32 %v5276_v59, %v5227_v44  ;;  %v5422_v38 = vor.u32 %v5421_v61, %v5418_v51  ;;  %v5449_v0 = vshll.u32 %v10196_v52, 16 }
 0x4ab   : > { %5761 = vmatmul.bf16.gmra.mxu2 %v5612_v40  ;;  %5859 = vmatmul.bf16.gmra.mxu0 %v5612_v40  ;;  %v5440_v44 = vshrl.u32 %v5352_v35, 16  ;;  %v5589_v59 = vunpack.c.h.b16 %v5438_v54  ;;  %v5443_v40 = vshll.u32 %v5352_v35, 16  ;;  %v10197_v35 = vld [vmem:[#allocation2 + $0x70] sm:$0x11] }
 0x4ac   : > { %9401 = vmatmul.msk.bf16.gmra.mxu3 %vm3794_vm2, %v5613_v37  ;;  %v13343_v50 = vadd.f32 %v5277_v11, %v13115_v7  ;;  %9409 = vmatmul.msk.bf16.gmra.mxu1 %vm3794_vm2, %v5613_v37  ;;  %v5423_v48 = vrot.slane %v5422_v38, 4  ;;  %v5451_v11 = vrot.slane %v5449_v0, 5 }
 0x4ae   : > { %v5129_v45 = vpop.f32.mrf.mxu2  ;;  %v5428_v51 = vsel %vm10316_vm3, %v5423_v48, %v5427_v56  ;;  %v5445_v56 = vrot.slane %v5443_v40, 5 }
 0x4af   : > { %v5178_v25 = vpop.f32.mrf.mxu3  ;;  %v5586_v14 = vunpack.c.l.b16 %v5428_v51  ;;  %v5587_v38 = vunpack.c.h.b16 %v5428_v51 }
 0x4b0   : > { %v5179_v49 = vadd.f32 %v5178_v25, %v5129_v45  ;;  %v5229_v47 = vpop.f32.mrf.mxu0  ;;  %v5442_v45 = vrot.slane %v5440_v44, 4 }
 0x4b1   : > { %v5278_v3 = vpop.f32.mrf.mxu1  ;;  %v5615_v19 = vpack.c.b16 %v5589_v59, %v5587_v38 }
 0x4b2   : > { %v13347_v5 = vadd.f32 %v5179_v49, %v13119_v34  ;;  %v5279_v7 = vadd.f32 %v5278_v3, %v5229_v47  ;;  %v5588_v34 = vunpack.c.l.b16 %v5438_v54  ;;  %v5456_v3 = vor.u32 %v5455_v62, %v5451_v11 }
 0x4b4   : > { %v13352_v36 = vadd.f32 %v5279_v7, %v13122_v8  ;;  %v5614_v49 = vpack.c.b16 %v5588_v34, %v5586_v14  ;;  %v5459_v7 = vshll.u32 %v10197_v35, 16  ;;  %v5457_v0 = vrot.slane %v5456_v3, 4  ;;  %v5355_v14 = vld [vmem:[#allocation2 + $0x78] sm:$0xff] }
 0x4b6   : > { %v5131_v37 = vpop.f32.mrf.mxu2  ;;  %v5461_v51 = vrot.slane %v5459_v7, 5 }
 0x4b7   : > { %v5180_v61 = vpop.f32.mrf.mxu3 }
 0x4b8   : > { %v5181_v42 = vadd.f32 %v5180_v61, %v5131_v37  ;;  %v5232_v8 = vpop.f32.mrf.mxu0  ;;  %v10198_v61 = vld [vmem:[#allocation2 + $0x80] sm:$0xff] }
 0x4b9   : > { %v5281_v4 = vpop.f32.mrf.mxu1  ;;  %v5473_v62 = vshll.u32 %v10198_v61, 16 }
 0x4ba   : > { %v13357_v25 = vadd.f32 %v5181_v42, %v13125_v15  ;;  %v5282_v47 = vadd.f32 %v5281_v4, %v5232_v8  ;;  %v5446_v15 = vor.u32 %v5445_v56, %v5442_v45  ;;  %v5477_v42 = vshrl.u32 %v10198_v61, 16 }
 0x4bb   : > { %5766 = vmatmul.bf16.gmra.mxu2 %v5614_v49  ;;  %5864 = vmatmul.bf16.gmra.mxu0 %v5614_v49  ;;  %v5467_v56 = vshll.u32 %v5355_v14, 16 }
 0x4bc   : > { %9402 = vmatmul.msk.bf16.gmra.mxu3 %vm3794_vm2, %v5615_v19  ;;  %v13361_v48 = vadd.f32 %v5282_v47, %v13129_v9  ;;  %9410 = vmatmul.msk.bf16.gmra.mxu1 %vm3794_vm2, %v5615_v19  ;;  %v5447_v40 = vrot.slane %v5446_v15, 4  ;;  %v5462_v9 = vsel %vm10316_vm3, %v5457_v0, %v5461_v51  ;;  %v5464_v19 = vshrl.u32 %v5355_v14, 16 }
 0x4bd   : > { %v5592_v8 = vunpack.c.l.b16 %v5462_v9  ;;  %v5475_v47 = vrot.slane %v5473_v62, 5  ;;  %v5479_v3 = vrot.slane %v5477_v42, 4 }
 0x4be   : > { %v5134_v54 = vpop.f32.mrf.mxu2  ;;  %v5452_v45 = vsel %vm10316_vm3, %v5447_v40, %v5451_v11  ;;  %v5466_v11 = vrot.slane %v5464_v19, 4 }
 0x4bf   : > { %v5183_v52 = vpop.f32.mrf.mxu3  ;;  %v5590_v7 = vunpack.c.l.b16 %v5452_v45  ;;  %v5591_v15 = vunpack.c.h.b16 %v5452_v45  ;;  %v10200_v45 = vld [vmem:[#allocation2 + $0x98] sm:$0xff] }
 0x4c0   : > { %v5184_v27 = vadd.f32 %v5183_v52, %v5134_v54  ;;  %v5234_v34 = vpop.f32.mrf.mxu0 }
 0x4c1   : > { %v5283_v59 = vpop.f32.mrf.mxu1  ;;  %v5616_v0 = vpack.c.b16 %v5592_v8, %v5590_v7  ;;  %v5497_v8 = vshll.u32 %v10200_v45, 16 }
 0x4c2   : > { %v13365_v44 = vadd.f32 %v5184_v27, %v13133_v22  ;;  %v5284_v37 = vadd.f32 %v5283_v59, %v5234_v34  ;;  %v5593_v22 = vunpack.c.h.b16 %v5462_v9  ;;  %v5469_v34 = vrot.slane %v5467_v56, 5  ;;  %v5358_v56 = vld [vmem:[#allocation2 + $0x90] sm:$0xff] }
 0x4c3   : > { %v5480_v59 = vor.u32 %v5479_v3, %v5475_v47 }
 0x4c4   : > { %v13370_v38 = vadd.f32 %v5284_v37, %v13136_v43  ;;  %v5617_v27 = vpack.c.b16 %v5593_v22, %v5591_v15  ;;  %v10199_v37 = vld [vmem:[#allocation2 + $0x88] sm:$0x11]  ;;  %v5470_v62 = vor.u32 %v5469_v34, %v5466_v11  ;;  %v5501_v22 = vshrl.u32 %v10200_v45, 16 }
 0x4c5   : > { %v5481_v42 = vrot.slane %v5480_v59, 4  ;;  %v5499_v15 = vrot.slane %v5497_v8, 5 }
 0x4c6   : > { %v5136_v4 = vpop.f32.mrf.mxu2 }
 0x4c7   : > { %v5185_v49 = vpop.f32.mrf.mxu3 }
 0x4c8   : > { %v5186_v35 = vadd.f32 %v5185_v49, %v5136_v4  ;;  %v5237_v52 = vpop.f32.mrf.mxu0 }
 0x4c9   : > { %v5286_v43 = vpop.f32.mrf.mxu1 }
 0x4ca   : > { %v13375_v54 = vadd.f32 %v5186_v35, %v13139_v53  ;;  %v5287_v51 = vadd.f32 %v5286_v43, %v5237_v52  ;;  %v5483_v53 = vshll.u32 %v10199_v37, 16  ;;  %v5471_v35 = vrot.slane %v5470_v62, 4 }
 0x4cb   : > { %5771 = vmatmul.bf16.gmra.mxu2 %v5616_v0  ;;  %5869 = vmatmul.bf16.gmra.mxu0 %v5616_v0  ;;  %v5503_v52 = vrot.slane %v5501_v22, 4 }
 0x4cc   : > { %9403 = vmatmul.msk.bf16.gmra.mxu3 %vm3794_vm2, %v5617_v27  ;;  %v13379_v40 = vadd.f32 %v5287_v51, %v13143_v55  ;;  %9411 = vmatmul.msk.bf16.gmra.mxu1 %vm3794_vm2, %v5617_v27  ;;  %v5485_v4 = vrot.slane %v5483_v53, 5  ;;  %v5476_v0 = vsel %vm10316_vm3, %v5471_v35, %v5475_v47  ;;  %v5488_v27 = vshrl.u32 %v5358_v56, 16  ;;  %v10101_v35 = vld [vmem:[%s14757_s3 + $0x344] sm:$0xf0] }
 0x4cd   : > { %v5491_v51 = vshll.u32 %v5358_v56, 16  ;;  %v5594_v53 = vunpack.c.l.b16 %v5476_v0 }
 0x4ce   : > { %v5139_v9 = vpop.f32.mrf.mxu2  ;;  %v5486_v7 = vsel %vm10316_vm3, %v5481_v42, %v5485_v4  ;;  %v5490_v62 = vrot.slane %v5488_v27, 4  ;;  %v9502_v27 = vld [vmem:[%s14757_s3 + $0x348] sm:$0xf0] }
 0x4cf   : > { %v5188_v61 = vpop.f32.mrf.mxu3  ;;  %v5597_v11 = vunpack.c.h.b16 %v5486_v7  ;;  %v5493_v42 = vrot.slane %v5491_v51, 5 }
 0x4d0   : > { %v5189_v14 = vadd.f32 %v5188_v61, %v5139_v9  ;;  %v5239_v19 = vpop.f32.mrf.mxu0  ;;  %v5595_v9 = vunpack.c.h.b16 %v5476_v0  ;;  %v5504_v61 = vor.u32 %v5503_v52, %v5499_v15  ;;  %v10100_v0 = vld [vmem:[%s14757_s3 + $0x344] sm:$0xf] }
 0x4d1   : > { %v5288_v55 = vpop.f32.mrf.mxu1 }
 0x4d2   : > { %v13383_v49 = vadd.f32 %v5189_v14, %v13147_v21  ;;  %v5289_v3 = vadd.f32 %v5288_v55, %v5239_v19  ;;  %v5596_v21 = vunpack.c.l.b16 %v5486_v7  ;;  %v5619_v22 = vpack.c.b16 %v5597_v11, %v5595_v9  ;;  %v10201_v19 = vld [vmem:[#allocation2 + $0xa0] sm:$0x11]  ;;  %v9508_v7 = vld [vmem:[%s14757_s3 + $0x350] sm:$0xf] }
 0x4d3   : > { %v5505_v4 = vrot.slane %v5504_v61, 4  ;;  %v5507_v55 = vshll.u32 %v10201_v19, 16 }
 0x4d4   : > { %v13388_v43 = vadd.f32 %v5289_v3, %v13150_v18  ;;  %v5618_v8 = vpack.c.b16 %v5596_v21, %v5594_v53  ;;  %v5494_v3 = vor.u32 %v5493_v42, %v5490_v62  ;;  %v10202_v53 = vld [vmem:[#allocation2 + $0xb0] sm:$0xff]  ;;  %v5361_v42 = vld [vmem:[#allocation2 + $0xa8] sm:$0xff] }
 0x4d5   : > { %v5521_v9 = vshll.u32 %v10202_v53, 16  ;;  %v5525_v61 = vshrl.u32 %v10202_v53, 16 }
 0x4d6   : > { %v5141_v34 = vpop.f32.mrf.mxu2  ;;  %v5495_v62 = vrot.slane %v5494_v3, 4 }
 0x4d7   : > { %v5190_v59 = vpop.f32.mrf.mxu3  ;;  %v5527_v3 = vrot.slane %v5525_v61, 4  ;;  %v10097_v61 = vld [vmem:[%s14757_s3 + $0x324] sm:$0xf0] }
 0x4d8   : > { %v5191_v37 = vadd.f32 %v5190_v59, %v5141_v34  ;;  %v5242_v18 = vpop.f32.mrf.mxu0  ;;  %v9505_v34 = vor.u32 %v10100_v0, %v9502_v27  ;;  %v5500_v19 = vsel %vm10316_vm3, %v5495_v62, %v5499_v15  ;;  %v10098_v15 = vld [vmem:[%s14757_s3 + $0x334] sm:$0xf]  ;;  %v10096_v62 = vld [vmem:[%s14757_s3 + $0x324] sm:$0xf] }
 0x4d9   : > { %v5291_v45 = vpop.f32.mrf.mxu1  ;;  %v10102_v27 = vld [vmem:[%s14757_s3 + $0x354] sm:$0xf] }
 0x4da   : > { %v13393_v14 = vadd.f32 %v5191_v37, %v13153_v16  ;;  %v5292_v47 = vadd.f32 %v5291_v45, %v5242_v18  ;;  %v9500_v16 = vld [vmem:[%s14757_s3 + $0x340] sm:$0xf]  ;;  %v5509_v37 = vrot.slane %v5507_v55, 5  ;;  %6351 = vmatpush.bf16.msra.mxu0 %v9505_v34  ;;  %v5512_v55 = vshrl.u32 %v5361_v42, 16 }
 0x4db   : > { %5776 = vmatmul.bf16.gmra.mxu2 %v5618_v8  ;;  %5874 = vmatmul.bf16.gmra.mxu0 %v5618_v8  ;;  %v9501_v52 = vor.u32 %v10101_v35, %v9500_v16  ;;  %v5515_v16 = vshll.u32 %v5361_v42, 16  ;;  %v13425_v35 = vrot.slane %v5521_v9, 5  ;;  %v5598_v34 = vunpack.c.l.b16 %v5500_v19  ;;  %v9484_v9 = vld [vmem:[%s14757_s3 + $0x320] sm:$0xf] }
 0x4dc   : > { %9404 = vmatmul.msk.bf16.gmra.mxu3 %vm3794_vm2, %v5619_v22  ;;  %v13397_v56 = vadd.f32 %v5292_v47, %v13157_v33  ;;  %9412 = vmatmul.msk.bf16.gmra.mxu1 %vm3794_vm2, %v5619_v22  ;;  %v10103_v33 = vld [vmem:[%s14757_s3 + $0x354] sm:$0xf0]  ;;  %v5510_v22 = vsel %vm10316_vm3, %v5505_v4, %v5509_v37 }
 0x4dd   : > { %v9509_v11 = vor.u32 %v10103_v33, %v9508_v7  ;;  %6253 = vmatpush.bf16.msra.mxu2 %v9501_v52  ;;  %v5600_v52 = vunpack.c.l.b16 %v5510_v22  ;;  %v9492_v33 = vld [vmem:[%s14757_s3 + $0x330] sm:$0xf]  ;;  %v10099_v4 = vld [vmem:[%s14757_s3 + $0x334] sm:$0xf0] }
 0x4de   : > { %v5144_v51 = vpop.f32.mrf.mxu2  ;;  %v9493_v0 = vor.u32 %v10099_v4, %v9492_v33  ;;  %v5517_v33 = vrot.slane %v5515_v16, 5  ;;  %v10095_v16 = vld [vmem:[%s14757_s3 + $0x314] sm:$0xf0] }
 0x4df   : > { %v5193_v21 = vpop.f32.mrf.mxu3  ;;  %6309 = vmatpush.bf16.msra.mxu3 %v9509_v11 }
 0x4e0   : > { %v5194_v59 = vadd.f32 %v5193_v21, %v5144_v51  ;;  %v5244_v45 = vpop.f32.mrf.mxu0  ;;  %v9510_v51 = vld [vmem:[%s14757_s3 + $0x358] sm:$0xf0] }
 0x4e1   : > { %v5293_v8 = vpop.f32.mrf.mxu1  ;;  %v9513_v53 = vor.u32 %v10102_v27, %v9510_v51  ;;  %6254 = vmatpush.bf16.msra.mxu2 %v9493_v0  ;;  %v10203_v27 = vld [vmem:[#allocation2 + $0xb8] sm:$0x11] }
 0x4e2   : > { %v13419_v18 = vadd.f32 %v5194_v59, %v13179_v2  ;;  %v5294_v47 = vadd.f32 %v5293_v8, %v5244_v45  ;;  %v5601_v2 = vunpack.c.h.b16 %v5510_v22  ;;  %v5599_v59 = vunpack.c.h.b16 %v5500_v19  ;;  %v9486_v8 = vld [vmem:[%s14757_s3 + $0x328] sm:$0xf0] }
 0x4e3   : > { %v5528_v45 = vor.u32 %v5527_v3, %v13425_v35  ;;  %v5620_v22 = vpack.c.b16 %v5600_v52, %v5598_v34  ;;  %v5514_v19 = vrot.slane %v5512_v55, 4  ;;  %6407 = vmatpush.bf16.msra.mxu1 %v9513_v53  ;;  %v5531_v51 = vshll.u32 %v10203_v27, 16 }
 0x4e4   : > { %v13428_v7 = vadd.f32 %v5294_v47, %v13182_v23  ;;  %v9494_v23 = vld [vmem:[%s14757_s3 + $0x338] sm:$0xf0]  ;;  %v5621_v47 = vpack.c.b16 %v5601_v2, %v5599_v59  ;;  %v9489_v3 = vor.u32 %v10096_v62, %v9486_v8  ;;  %v10094_v2 = vld [vmem:[%s14757_s3 + $0x314] sm:$0xf]  ;;  %v10093_v62 = vld [vmem:[%s14757_s3 + $0x304] sm:$0xf0] }
 0x4e5   : > { %v9497_v37 = vor.u32 %v10098_v15, %v9494_v23  ;;  %v5518_v55 = vor.u32 %v5517_v33, %v5514_v19  ;;  %v5533_v34 = vrot.slane %v5531_v51, 5  ;;  %v9478_v59 = vld [vmem:[%s14757_s3 + $0x318] sm:$0xf0]  ;;  %v5364_v19 = vld [vmem:[#allocation2 + $0xc0] sm:$0xff]  ;;  %v10204_v33 = vld [vmem:[#allocation2 + $0xc8] sm:$0xff] }
 0x4e6   : > { %v5146_v21 = vpop.f32.mrf.mxu2 }
 0x4e7   : > { %v5195_v11 = vpop.f32.mrf.mxu3  ;;  %6352 = vmatpush.bf16.msra.mxu0 %v9497_v37  ;;  %v9468_v37 = vld [vmem:[%s14757_s3 + $0x300] sm:$0xf] }
 0x4e8   : > { %v5196_v42 = vadd.f32 %v5195_v11, %v5146_v21  ;;  %v5247_v15 = vpop.f32.mrf.mxu0  ;;  %v9485_v21 = vor.u32 %v10097_v61, %v9484_v9  ;;  %v5529_v11 = vrot.slane %v5528_v45, 4  ;;  %v9481_v61 = vor.u32 %v10094_v2, %v9478_v59  ;;  %v9470_v45 = vld [vmem:[%s14757_s3 + $0x308] sm:$0xf0]  ;;  %v10091_v59 = vld [vmem:[%s14757_s3 + $0x2f4] sm:$0xf0] }
 0x4e9   : > { %v5296_v23 = vpop.f32.mrf.mxu1 }
 0x4ea   : > { %v13462_v4 = vadd.f32 %v5196_v42, %v13215_v63  ;;  %v5297_v0 = vadd.f32 %v5296_v23, %v5247_v15  ;;  %v9476_v63 = vld [vmem:[%s14757_s3 + $0x310] sm:$0xf]  ;;  %6255 = vmatpush.bf16.msra.mxu2 %v9485_v21  ;;  %v10092_v42 = vld [vmem:[%s14757_s3 + $0x304] sm:$0xf]  ;;  %v5545_v15 = vshll.u32 %v10204_v33, 16  ;;  %v5549_v21 = vshrl.u32 %v10204_v33, 16 }
 0x4eb   : > { %5781 = vmatmul.bf16.gmra.mxu2 %v5620_v22  ;;  %5879 = vmatmul.bf16.gmra.mxu0 %v5620_v22  ;;  %v5519_v22 = vrot.slane %v5518_v55, 4  ;;  %v9454_v33 = vld [vmem:[%s14757_s3 + $0x2e8] sm:$0xf0] }
 0x4ec   : > { %9405 = vmatmul.msk.bf16.gmra.mxu3 %vm3794_vm2, %v5621_v47  ;;  %v13466_v52 = vadd.f32 %v5297_v0, %v13219_v41  ;;  %9413 = vmatmul.msk.bf16.gmra.mxu1 %vm3794_vm2, %v5621_v47  ;;  %v9477_v41 = vor.u32 %v10095_v16, %v9476_v63  ;;  %v5534_v47 = vsel %vm10316_vm3, %v5529_v11, %v5533_v34  ;;  %v5536_v16 = vshrl.u32 %v5364_v19, 16 }
 0x4ed   : > { %6353 = vmatpush.bf16.msra.mxu0 %v9489_v3  ;;  %v9469_v3 = vor.u32 %v10093_v62, %v9468_v37  ;;  %v9473_v0 = vor.u32 %v10092_v42, %v9470_v45  ;;  %v5524_v55 = vsel %vm10316_vm3, %v5519_v22, %v13425_v35  ;;  %v5539_v11 = vshll.u32 %v5364_v19, 16  ;;  %v10090_v37 = vld [vmem:[%s14757_s3 + $0x2f4] sm:$0xf]  ;;  %v10088_v19 = vld [vmem:[%s14757_s3 + $0x2e4] sm:$0xf] }
 0x4ee   : > { %v5149_v53 = vpop.f32.mrf.mxu2  ;;  %6256 = vmatpush.bf16.msra.mxu2 %v9477_v41  ;;  %v5604_v34 = vunpack.c.l.b16 %v5534_v47  ;;  %v9460_v41 = vld [vmem:[%s14757_s3 + $0x2f0] sm:$0xf]  ;;  %v5547_v35 = vrot.slane %v5545_v15, 5  ;;  %v5602_v45 = vunpack.c.l.b16 %v5524_v55 }
 0x4ef   : > { %v5198_v9 = vpop.f32.mrf.mxu3 }
 0x4f0   : > { %v5199_v8 = vadd.f32 %v5198_v9, %v5149_v53  ;;  %v5249_v27 = vpop.f32.mrf.mxu0  ;;  %v5551_v53 = vrot.slane %v5549_v21, 4  ;;  %v9462_v9 = vld [vmem:[%s14757_s3 + $0x2f8] sm:$0xf0] }
 0x4f1   : > { %v5298_v51 = vpop.f32.mrf.mxu1  ;;  %6354 = vmatpush.bf16.msra.mxu0 %v9481_v61  ;;  %v9452_v61 = vld [vmem:[%s14757_s3 + $0x2e0] sm:$0xf]  ;;  %v9465_v22 = vor.u32 %v10090_v37, %v9462_v9  ;;  %v5541_v37 = vrot.slane %v5539_v11, 5  ;;  %v10086_v11 = vld [vmem:[%s14757_s3 + $0x2d4] sm:$0xf] }
 0x4f2   : > { %v13496_v23 = vadd.f32 %v5199_v8, %v13247_v26  ;;  %v5299_v63 = vadd.f32 %v5298_v51, %v5249_v27  ;;  %v5605_v26 = vunpack.c.h.b16 %v5534_v47  ;;  %6257 = vmatpush.bf16.msra.mxu2 %v9469_v3  ;;  %v5603_v8 = vunpack.c.h.b16 %v5524_v55  ;;  %v10089_v47 = vld [vmem:[%s14757_s3 + $0x2e4] sm:$0xf0] }
 0x4f3   : > { %v5622_v27 = vpack.c.b16 %v5604_v34, %v5602_v45  ;;  %v9457_v55 = vor.u32 %v10088_v19, %v9454_v33  ;;  %v5552_v9 = vor.u32 %v5551_v53, %v5547_v35 }
 0x4f4   : > { %v13502_v2 = vadd.f32 %v5299_v63, %v13250_v32  ;;  %v9461_v32 = vor.u32 %v10091_v59, %v9460_v41  ;;  %v5623_v51 = vpack.c.b16 %v5605_v26, %v5603_v8  ;;  %v9453_v63 = vor.u32 %v10089_v47, %v9452_v61 }
 0x4f5   : > { %6355 = vmatpush.bf16.msra.mxu0 %v9473_v0  ;;  %v5538_v59 = vrot.slane %v5536_v16, 4  ;;  %v10087_v16 = vld [vmem:[%s14757_s3 + $0x2d4] sm:$0xf0]  ;;  %v5553_v61 = vrot.slane %v5552_v9, 4 }
 0x4f6   : > { %v5151_v62 = vpop.f32.mrf.mxu2  ;;  %6258 = vmatpush.bf16.msra.mxu2 %v9461_v32 }
 0x4f7   : > { %v5200_v42 = vpop.f32.mrf.mxu3  ;;  %v5542_v32 = vor.u32 %v5541_v37, %v5538_v59 }
 0x4f8   : > { %v5201_v15 = vadd.f32 %v5200_v42, %v5151_v62  ;;  %v5252_v3 = vpop.f32.mrf.mxu0  ;;  %v5555_v62 = vshll.u32 %v10205_v28, 16 }
 0x4f9   : > { %v5301_v0 = vpop.f32.mrf.mxu1  ;;  %6356 = vmatpush.bf16.msra.mxu0 %v9465_v22 }
 0x4fa   : > { %v13529_v21 = vadd.f32 %v5201_v15, %v13277_v57  ;;  %v5302_v41 = vadd.f32 %v5301_v0, %v5252_v3  ;;  %v9444_v57 = vld [vmem:[%s14757_s3 + $0x2d0] sm:$0xf]  ;;  %6259 = vmatpush.bf16.msra.mxu2 %v9453_v63  ;;  %v5557_v8 = vrot.slane %v5555_v62, 5  ;;  %v5543_v15 = vrot.slane %v5542_v32, 4 }
 0x4fb   : > { %5786 = vmatmul.bf16.gmra.mxu2 %v5622_v27  ;;  %5884 = vmatmul.bf16.gmra.mxu0 %v5622_v27  ;;  %v9445_v28 = vor.u32 %v10087_v16, %v9444_v57 }
 0x4fc   : > { %9406 = vmatmul.msk.bf16.gmra.mxu3 %vm3794_vm2, %v5623_v51  ;;  %v13533_v34 = vadd.f32 %v5302_v41, %v13281_v39  ;;  %9414 = vmatmul.msk.bf16.gmra.mxu1 %vm3794_vm2, %v5623_v51  ;;  %v9446_v39 = vld [vmem:[%s14757_s3 + $0x2d8] sm:$0xf0]  ;;  %v5558_v27 = vsel %vm10316_vm3, %v5553_v61, %v5557_v8  ;;  %v5548_v3 = vsel %vm10316_vm3, %v5543_v15, %v5547_v35 }
 0x4fd   : > { %6357 = vmatpush.bf16.msra.mxu0 %v9457_v55  ;;  %v9449_v42 = vor.u32 %v10086_v11, %v9446_v39  ;;  %v5608_v0 = vunpack.c.l.b16 %v5558_v27  ;;  %v5609_v63 = vunpack.c.h.b16 %v5558_v27  ;;  %v5606_v59 = vunpack.c.l.b16 %v5548_v3  ;;  %v14896_v27 = vld [vmem:[#allocation6_spill] sm:$0xff] }
 0x4fe   : > { %v5154_v26 = vpop.f32.mrf.mxu2  ;;  %6260 = vmatpush.bf16.msra.mxu2 %v9445_v28  ;;  %v5607_v37 = vunpack.c.h.b16 %v5548_v3  ;;  %v14897_v3 = vld [vmem:[#allocation8_spill] sm:$0xff] }
 0x4ff   : > { %v5203_v53 = vpop.f32.mrf.mxu3  ;;  %v5624_v16 = vpack.c.b16 %v5608_v0, %v5606_v59 }
 0x500   : > { %v5204_v45 = vadd.f32 %v5203_v53, %v5154_v26  ;;  %v5254_v47 = vpop.f32.mrf.mxu0  ;;  %v5625_v11 = vpack.c.b16 %v5609_v63, %v5607_v37 }
 0x501   : > { %v5303_v19 = vpop.f32.mrf.mxu1  ;;  %6358 = vmatpush.bf16.msra.mxu0 %v9449_v42 }
 0x502   : > { %v13549_v22 = vadd.f32 %v5204_v45, %v13297_v10  ;;  %v5304_v33 = vadd.f32 %v5303_v19, %v5254_v47 }
 0x504   : > { %v13554_v51 = vadd.f32 %v5304_v33, %v13300_v6 }
 0x506   : > { %v5156_v55 = vpop.f32.mrf.mxu2 }
 0x507   : > { %v5205_v10 = vpop.f32.mrf.mxu3 }
 0x508   : > { %v5206_v41 = vadd.f32 %v5205_v10, %v5156_v55  ;;  %v5257_v62 = vpop.f32.mrf.mxu0 }
 0x509   : > { %v5306_v57 = vpop.f32.mrf.mxu1 }
 0x50a   : > { %v13559_v9 = vadd.f32 %v5206_v41, %v13303_v58  ;;  %v5307_v28 = vadd.f32 %v5306_v57, %v5257_v62 }
 0x50b   : > { %5791 = vmatmul.bf16.gmra.mxu2 %v5624_v16  ;;  %5889 = vmatmul.bf16.gmra.mxu0 %v5624_v16 }
 0x50c   : > { %9407 = vmatmul.msk.bf16.gmra.mxu3 %vm3794_vm2, %v5625_v11  ;;  %v13563_v6 = vadd.f32 %v5307_v28, %v13307_v1  ;;  %9415 = vmatmul.msk.bf16.gmra.mxu1 %vm3794_vm2, %v5625_v11 }
 0x50e   : > { %v5159_v35 = vpop.f32.mrf.mxu2 }
 0x50f   : > { %v5208_v39 = vpop.f32.mrf.mxu3 }
 0x510   : > { %v5209_v26 = vadd.f32 %v5208_v39, %v5159_v35  ;;  %v5259_v53 = vpop.f32.mrf.mxu0  ;;  %v14898_v35 = vld [vmem:[#allocation9_spill] sm:$0xff]  ;;  %v14899_v39 = vld [vmem:[#allocation10_spill] sm:$0xff] }
 0x511   : > { %v5308_v32 = vpop.f32.mrf.mxu1 }
 0x512   : > { %v13567_v58 = vadd.f32 %v5209_v26, %v13311_v29  ;;  %v5309_v61 = vadd.f32 %v5308_v32, %v5259_v53 }
 0x514   : > { %v13570_v42 = vadd.f32 %v5309_v61, %v13316_v20 }
 0x516   : > { %v5161_v45 = vpop.f32.mrf.mxu2 }
 0x517   : > { %v5210_v8 = vpop.f32.mrf.mxu3 }
 0x518   : > { %v5211_v47 = vadd.f32 %v5210_v8, %v5161_v45  ;;  %v5855_v19 = vpop.f32.mrf.mxu0 }
 0x519   : > { %v5904_v33 = vpop.f32.mrf.mxu1 }
 0x51a   : > { %v13573_v1 = vadd.f32 %v5211_v47, %v13321_v46  ;;  %v5905_v15 = vadd.f32 %v5904_v33, %v5855_v19 }
 0x51b   : > { %6261 = vmatmul.bf16.vlgmr.msra.gmra.mxu2 %v14896_v27  ;;  %6359 = vmatmul.bf16.vlgmr.msra.gmra.mxu0 %v14896_v27 }
 0x51c   : > { %9514 = vmatmul.msk.bf16.vlgmr.msra.gmra.mxu3 %vm3794_vm2, %v14897_v3  ;;  %v13579_v29 = vadd.f32 %v5905_v15, %v13325_v13  ;;  %9522 = vmatmul.msk.bf16.vlgmr.msra.gmra.mxu1 %vm3794_vm2, %v14897_v3 }
 0x51e   : > { %v5757_v20 = vpop.f32.mrf.mxu2 }
 0x51f   : > { %v5806_v0 = vpop.f32.mrf.mxu3 }
 0x520   : > { %v5807_v46 = vadd.f32 %v5806_v0, %v5757_v20  ;;  %v5857_v55 = vpop.f32.mrf.mxu0  ;;  %v14900_v20 = vld [vmem:[#allocation12_spill] sm:$0xff]  ;;  %v14901_v0 = vld [vmem:[#allocation13_spill] sm:$0xff] }
 0x521   : > { %v5906_v10 = vpop.f32.mrf.mxu1 }
 0x522   : > { %v13585_v63 = vadd.f32 %v5807_v46, %v13329_v30  ;;  %v5907_v41 = vadd.f32 %v5906_v10, %v5857_v55 }
 0x524   : > { %v13588_v59 = vadd.f32 %v5907_v41, %v13334_v31 }
 0x526   : > { %v5759_v37 = vpop.f32.mrf.mxu2 }
 0x527   : > { %v5808_v13 = vpop.f32.mrf.mxu3 }
 0x528   : > { %v5809_v62 = vadd.f32 %v5808_v13, %v5759_v37  ;;  %v5860_v16 = vpop.f32.mrf.mxu0 }
 0x529   : > { %v5909_v11 = vpop.f32.mrf.mxu1 }
 0x52a   : > { %v13591_v57 = vadd.f32 %v5809_v62, %v13339_v17  ;;  %v5910_v28 = vadd.f32 %v5909_v11, %v5860_v16 }
 0x52b   : > { %6266 = vmatmul.bf16.gmra.mxu2 %v14898_v35  ;;  %6364 = vmatmul.bf16.gmra.mxu0 %v14898_v35 }
 0x52c   : > { %9515 = vmatmul.msk.bf16.gmra.mxu3 %vm3794_vm2, %v14899_v39  ;;  %v13597_v30 = vadd.f32 %v5910_v28, %v13343_v50  ;;  %9523 = vmatmul.msk.bf16.gmra.mxu1 %vm3794_vm2, %v14899_v39 }
 0x52e   : > { %v5762_v31 = vpop.f32.mrf.mxu2 }
 0x52f   : > { %v5811_v26 = vpop.f32.mrf.mxu3 }
 0x530   : > { %v5812_v17 = vadd.f32 %v5811_v26, %v5762_v31  ;;  %v5862_v32 = vpop.f32.mrf.mxu0  ;;  %v14902_v31 = vld [vmem:[#allocation4_spill] sm:$0xff]  ;;  %v14903_v26 = vld [vmem:[#allocation11_spill] sm:$0xff] }
 0x531   : > { %v5911_v61 = vpop.f32.mrf.mxu1 }
 0x532   : > { %v13603_v53 = vadd.f32 %v5812_v17, %v13347_v5  ;;  %v5912_v45 = vadd.f32 %v5911_v61, %v5862_v32 }
 0x534   : > { %v13606_v8 = vadd.f32 %v5912_v45, %v13352_v36 }
 0x536   : > { %v5764_v47 = vpop.f32.mrf.mxu2 }
 0x537   : > { %v5813_v50 = vpop.f32.mrf.mxu3 }
 0x538   : > { %v5814_v19 = vadd.f32 %v5813_v50, %v5764_v47  ;;  %v5865_v15 = vpop.f32.mrf.mxu0 }
 0x539   : > { %v5914_v27 = vpop.f32.mrf.mxu1 }
 0x53a   : > { %v13609_v33 = vadd.f32 %v5814_v19, %v13357_v25  ;;  %v5915_v3 = vadd.f32 %v5914_v27, %v5865_v15 }
 0x53b   : > { %6271 = vmatmul.bf16.gmra.mxu2 %v14900_v20  ;;  %6369 = vmatmul.bf16.gmra.mxu0 %v14900_v20 }
 0x53c   : > { %9516 = vmatmul.msk.bf16.gmra.mxu3 %vm3794_vm2, %v14901_v0  ;;  %v13615_v5 = vadd.f32 %v5915_v3, %v13361_v48  ;;  %9524 = vmatmul.msk.bf16.gmra.mxu1 %vm3794_vm2, %v14901_v0 }
 0x53e   : > { %v5767_v36 = vpop.f32.mrf.mxu2 }
 0x53f   : > { %v5816_v46 = vpop.f32.mrf.mxu3 }
 0x540   : > { %v5817_v25 = vadd.f32 %v5816_v46, %v5767_v36  ;;  %v5867_v10 = vpop.f32.mrf.mxu0  ;;  %v14904_v36 = vld [vmem:[#allocation14_spill] sm:$0xff]  ;;  %v14905_v46 = vld [vmem:[#allocation15_spill] sm:$0xff] }
 0x541   : > { %v5916_v41 = vpop.f32.mrf.mxu1 }
 0x542   : > { %v13621_v55 = vadd.f32 %v5817_v25, %v13365_v44  ;;  %v5917_v37 = vadd.f32 %v5916_v41, %v5867_v10  ;;  %v9678_v25 = vld [vmem:[%s14757_s3 + $0x3e0] sm:$0xf]  ;;  %v10134_v41 = vld [vmem:[%s14757_s3 + $0x3d4] sm:$0xf] }
 0x544   : > { %v13624_v13 = vadd.f32 %v5917_v37, %v13370_v38  ;;  %v9672_v37 = vld [vmem:[%s14757_s3 + $0x3d8] sm:$0xf0] }
 0x546   : > { %v5769_v62 = vpop.f32.mrf.mxu2 }
 0x547   : > { %v5818_v48 = vpop.f32.mrf.mxu3 }
 0x548   : > { %v5819_v16 = vadd.f32 %v5818_v48, %v5769_v62  ;;  %v5870_v28 = vpop.f32.mrf.mxu0 }
 0x549   : > { %v5919_v35 = vpop.f32.mrf.mxu1 }
 0x54a   : > { %v13627_v11 = vadd.f32 %v5819_v16, %v13375_v54  ;;  %v5920_v39 = vadd.f32 %v5919_v35, %v5870_v28  ;;  %v9675_v28 = vor.u32 %v10134_v41, %v9672_v37 }
 0x54b   : > { %6276 = vmatmul.bf16.gmra.mxu2 %v14902_v31  ;;  %6374 = vmatmul.bf16.gmra.mxu0 %v14902_v31 }
 0x54c   : > { %9517 = vmatmul.msk.bf16.gmra.mxu3 %vm3794_vm2, %v14903_v26  ;;  %v13633_v44 = vadd.f32 %v5920_v39, %v13379_v40  ;;  %9525 = vmatmul.msk.bf16.gmra.mxu1 %vm3794_vm2, %v14903_v26 }
 0x54d   : > { %6800 = vmatpush.bf16.msrb.mxu0 %v9675_v28 }
 0x54e   : > { %v5772_v38 = vpop.f32.mrf.mxu2 }
 0x54f   : > { %v5821_v17 = vpop.f32.mrf.mxu3 }
 0x550   : > { %v5822_v54 = vadd.f32 %v5821_v17, %v5772_v38  ;;  %v5872_v61 = vpop.f32.mrf.mxu0 }
 0x551   : > { %v5921_v45 = vpop.f32.mrf.mxu1 }
 0x552   : > { %v13639_v32 = vadd.f32 %v5822_v54, %v13383_v49  ;;  %v5922_v47 = vadd.f32 %v5921_v45, %v5872_v61  ;;  %v9662_v54 = vld [vmem:[%s14757_s3 + $0x3c0] sm:$0xf]  ;;  %v10133_v61 = vld [vmem:[%s14757_s3 + $0x3c4] sm:$0xf0]  ;;  %v10132_v45 = vld [vmem:[%s14757_s3 + $0x3c4] sm:$0xf] }
 0x554   : > { %v13642_v50 = vadd.f32 %v5922_v47, %v13388_v43  ;;  %v9670_v43 = vld [vmem:[%s14757_s3 + $0x3d0] sm:$0xf]  ;;  %v9664_v47 = vld [vmem:[%s14757_s3 + $0x3c8] sm:$0xf0] }
 0x556   : > { %v5774_v19 = vpop.f32.mrf.mxu2 }
 0x557   : > { %v5823_v40 = vpop.f32.mrf.mxu3 }
 0x558   : > { %v5824_v15 = vadd.f32 %v5823_v40, %v5774_v19  ;;  %v5875_v3 = vpop.f32.mrf.mxu0  ;;  %v9680_v19 = vld [vmem:[%s14757_s3 + $0x3e8] sm:$0xf0] }
 0x559   : > { %v5924_v20 = vpop.f32.mrf.mxu1 }
 0x55a   : > { %v13645_v27 = vadd.f32 %v5824_v15, %v13393_v14  ;;  %v5925_v0 = vadd.f32 %v5924_v20, %v5875_v3  ;;  %v10135_v14 = vld [vmem:[%s14757_s3 + $0x3d4] sm:$0xf0]  ;;  %v9667_v3 = vor.u32 %v10132_v45, %v9664_v47  ;;  %v10126_v47 = vld [vmem:[%s14757_s3 + $0x394] sm:$0xf] }
 0x55b   : > { %6281 = vmatmul.bf16.gmra.mxu2 %v14904_v36  ;;  %6379 = vmatmul.bf16.gmra.mxu0 %v14904_v36  ;;  %v9671_v10 = vor.u32 %v10135_v14, %v9670_v43  ;;  %v10131_v36 = vld [vmem:[%s14757_s3 + $0x3b4] sm:$0xf0]  ;;  %v9656_v14 = vld [vmem:[%s14757_s3 + $0x3b8] sm:$0xf0] }
 0x55c   : > { %9518 = vmatmul.msk.bf16.gmra.mxu3 %vm3794_vm2, %v14905_v46  ;;  %v13651_v49 = vadd.f32 %v5925_v0, %v13397_v56  ;;  %9526 = vmatmul.msk.bf16.gmra.mxu1 %vm3794_vm2, %v14905_v46  ;;  %v10137_v56 = vld [vmem:[%s14757_s3 + $0x3e4] sm:$0xf0]  ;;  %v9654_v0 = vld [vmem:[%s14757_s3 + $0x3b0] sm:$0xf]  ;;  %v10130_v46 = vld [vmem:[%s14757_s3 + $0x3b4] sm:$0xf] }
 0x55d   : > { %v9679_v16 = vor.u32 %v10137_v56, %v9678_v25  ;;  %6702 = vmatpush.bf16.msrb.mxu2 %v9671_v10  ;;  %6801 = vmatpush.bf16.msrb.mxu0 %v9667_v3  ;;  %v9655_v41 = vor.u32 %v10131_v36, %v9654_v0  ;;  %v9659_v37 = vor.u32 %v10130_v46, %v9656_v14  ;;  %v10125_v14 = vld [vmem:[%s14757_s3 + $0x384] sm:$0xf0] }
 0x55e   : > { %v5777_v62 = vpop.f32.mrf.mxu2 }
 0x55f   : > { %v5826_v48 = vpop.f32.mrf.mxu3  ;;  %6758 = vmatpush.bf16.msrb.mxu3 %v9679_v16  ;;  %v14907_v16 = vld [vmem:[#allocation17_spill] sm:$0xff] }
 0x560   : > { %v5827_v35 = vadd.f32 %v5826_v48, %v5777_v62  ;;  %v5877_v31 = vpop.f32.mrf.mxu0  ;;  %v14906_v48 = vld [vmem:[#allocation16_spill] sm:$0xff] }
 0x561   : > { %v5926_v26 = vpop.f32.mrf.mxu1  ;;  %6802 = vmatpush.bf16.msrb.mxu0 %v9659_v37 }
 0x562   : > { %v13675_v39 = vadd.f32 %v5827_v35, %v13419_v18  ;;  %v5927_v38 = vadd.f32 %v5926_v26, %v5877_v31  ;;  %v9663_v18 = vor.u32 %v10133_v61, %v9662_v54  ;;  %v10129_v35 = vld [vmem:[%s14757_s3 + $0x3a4] sm:$0xf0]  ;;  %v10128_v31 = vld [vmem:[%s14757_s3 + $0x3a4] sm:$0xf]  ;;  %v9648_v26 = vld [vmem:[%s14757_s3 + $0x3a8] sm:$0xf0] }
 0x563   : > { %v9651_v45 = vor.u32 %v10128_v31, %v9648_v26 }
 0x564   : > { %v13678_v17 = vadd.f32 %v5927_v38, %v13428_v7  ;;  %v10136_v7 = vld [vmem:[%s14757_s3 + $0x3e4] sm:$0xf]  ;;  %6703 = vmatpush.bf16.msrb.mxu2 %v9663_v18  ;;  %v9638_v38 = vld [vmem:[%s14757_s3 + $0x390] sm:$0xf]  ;;  %v10127_v18 = vld [vmem:[%s14757_s3 + $0x394] sm:$0xf0] }
 0x565   : > { %v9683_v20 = vor.u32 %v10136_v7, %v9680_v19  ;;  %v9640_v7 = vld [vmem:[%s14757_s3 + $0x398] sm:$0xf0]  ;;  %6803 = vmatpush.bf16.msrb.mxu0 %v9651_v45  ;;  %v14908_v45 = vld [vmem:[#allocation18_spill] sm:$0xff] }
 0x566   : > { %v5779_v40 = vpop.f32.mrf.mxu2  ;;  %v9643_v0 = vor.u32 %v10126_v47, %v9640_v7  ;;  %v10121_v7 = vld [vmem:[%s14757_s3 + $0x364] sm:$0xf0] }
 0x567   : > { %v5828_v15 = vpop.f32.mrf.mxu3  ;;  %6856 = vmatpush.bf16.msrb.mxu1 %v9683_v20  ;;  %v9639_v20 = vor.u32 %v10127_v18, %v9638_v38  ;;  %v14909_v18 = vld [vmem:[#allocation19_spill] sm:$0xff] }
 0x568   : > { %v5829_v43 = vadd.f32 %v5828_v15, %v5779_v40  ;;  %v5880_v10 = vpop.f32.mrf.mxu0  ;;  %6704 = vmatpush.bf16.msrb.mxu2 %v9655_v41 }
 0x569   : > { %v5929_v56 = vpop.f32.mrf.mxu1  ;;  %6804 = vmatpush.bf16.msrb.mxu0 %v9643_v0 }
 0x56a   : > { %v13711_v25 = vadd.f32 %v5829_v43, %v13462_v4  ;;  %v5930_v62 = vadd.f32 %v5929_v56, %v5880_v10  ;;  %v9646_v4 = vld [vmem:[%s14757_s3 + $0x3a0] sm:$0xf]  ;;  %v9622_v56 = vld [vmem:[%s14757_s3 + $0x370] sm:$0xf] }
 0x56b   : > { %6286 = vmatmul.bf16.gmra.mxu2 %v14906_v48  ;;  %6384 = vmatmul.bf16.gmra.mxu0 %v14906_v48  ;;  %v9630_v43 = vld [vmem:[%s14757_s3 + $0x380] sm:$0xf]  ;;  %v10123_v48 = vld [vmem:[%s14757_s3 + $0x374] sm:$0xf0] }
 0x56c   : > { %9519 = vmatmul.msk.bf16.gmra.mxu3 %vm3794_vm2, %v14907_v16  ;;  %v13717_v28 = vadd.f32 %v5930_v62, %v13466_v52  ;;  %9527 = vmatmul.msk.bf16.gmra.mxu1 %vm3794_vm2, %v14907_v16  ;;  %v9647_v52 = vor.u32 %v10129_v35, %v9646_v4  ;;  %v9631_v10 = vor.u32 %v10125_v14, %v9630_v43  ;;  %v10122_v16 = vld [vmem:[%s14757_s3 + $0x374] sm:$0xf]  ;;  %v9624_v4 = vld [vmem:[%s14757_s3 + $0x378] sm:$0xf0] }
 0x56d   : > { %v9623_v38 = vor.u32 %v10123_v48, %v9622_v56 }
 0x56e   : > { %v5782_v54 = vpop.f32.mrf.mxu2  ;;  %6705 = vmatpush.bf16.msrb.mxu2 %v9647_v52 }
 0x56f   : > { %v5831_v61 = vpop.f32.mrf.mxu3 }
 0x570   : > { %v5832_v19 = vadd.f32 %v5831_v61, %v5782_v54  ;;  %v5882_v15 = vpop.f32.mrf.mxu0  ;;  %v9627_v54 = vor.u32 %v10122_v16, %v9624_v4 }
 0x571   : > { %v5931_v3 = vpop.f32.mrf.mxu1 }
 0x572   : > { %v13747_v40 = vadd.f32 %v5832_v19, %v13496_v23  ;;  %v5932_v36 = vadd.f32 %v5931_v3, %v5882_v15  ;;  %v10124_v23 = vld [vmem:[%s14757_s3 + $0x384] sm:$0xf]  ;;  %6706 = vmatpush.bf16.msrb.mxu2 %v9639_v20  ;;  %v9616_v15 = vld [vmem:[%s14757_s3 + $0x368] sm:$0xf0] }
 0x573   : > { %v10120_v19 = vld [vmem:[%s14757_s3 + $0x364] sm:$0xf] }
 0x574   : > { %v13750_v46 = vadd.f32 %v5932_v36, %v13502_v2  ;;  %v9632_v2 = vld [vmem:[%s14757_s3 + $0x388] sm:$0xf0]  ;;  %v9619_v0 = vor.u32 %v10120_v19, %v9616_v15  ;;  %v9552_v19 = vld [vmem:[#allocation2 + $0x38] sm:$0xf0]  ;;  %v9550_v15 = vld [vmem:[#allocation2 + $0x30] sm:$0xf] }
 0x575   : > { %v9635_v62 = vor.u32 %v10124_v23, %v9632_v2 }
 0x576   : > { %v5784_v41 = vpop.f32.mrf.mxu2  ;;  %6707 = vmatpush.bf16.msrb.mxu2 %v9631_v10 }
 0x577   : > { %v5833_v37 = vpop.f32.mrf.mxu3  ;;  %6805 = vmatpush.bf16.msrb.mxu0 %v9635_v62 }
 0x578   : > { %v5834_v35 = vadd.f32 %v5833_v37, %v5784_v41  ;;  %v5885_v52 = vpop.f32.mrf.mxu0 }
 0x579   : > { %v5934_v26 = vpop.f32.mrf.mxu1 }
 0x57a   : > { %v13777_v31 = vadd.f32 %v5834_v35, %v13529_v21  ;;  %v5935_v61 = vadd.f32 %v5934_v26, %v5885_v52  ;;  %v9614_v21 = vld [vmem:[%s14757_s3 + $0x360] sm:$0xf]  ;;  %6708 = vmatpush.bf16.msrb.mxu2 %v9623_v38  ;;  %v14910_v35 = vld [vmem:[#allocation20_spill] sm:$0xff] }
 0x57b   : > { %6291 = vmatmul.bf16.gmra.mxu2 %v14908_v45  ;;  %6389 = vmatmul.bf16.gmra.mxu0 %v14908_v45 }
 0x57c   : > { %9520 = vmatmul.msk.bf16.gmra.mxu3 %vm3794_vm2, %v14909_v18  ;;  %v13783_v47 = vadd.f32 %v5935_v61, %v13533_v34  ;;  %9528 = vmatmul.msk.bf16.gmra.mxu1 %vm3794_vm2, %v14909_v18  ;;  %v9615_v34 = vor.u32 %v10121_v7, %v9614_v21  ;;  %v10105_v7 = vld [vmem:[#allocation2 + $0x34] sm:$0xf0] }
 0x57d   : > { %6806 = vmatpush.bf16.msrb.mxu0 %v9627_v54 }
 0x57e   : > { %v5787_v3 = vpop.f32.mrf.mxu2  ;;  %6709 = vmatpush.bf16.msrb.mxu2 %v9615_v34 }
 0x57f   : > { %v5836_v20 = vpop.f32.mrf.mxu3 }
 0x580   : > { %v5837_v36 = vadd.f32 %v5836_v20, %v5787_v3  ;;  %v5887_v14 = vpop.f32.mrf.mxu0  ;;  %v10104_v3 = vld [vmem:[#allocation2 + $0x34] sm:$0xf] }
 0x581   : > { %v5936_v23 = vpop.f32.mrf.mxu1  ;;  %6807 = vmatpush.bf16.msrb.mxu0 %v9619_v0 }
 0x582   : > { %v13801_v43 = vadd.f32 %v5837_v36, %v13549_v22  ;;  %v5937_v10 = vadd.f32 %v5936_v23, %v5887_v14  ;;  %v14911_v22 = vld [vmem:[#allocation21_spill] sm:$0xff]  ;;  %v9555_v14 = vor.u32 %v10104_v3, %v9552_v19 }
 0x584   : > { %v13804_v2 = vadd.f32 %v5937_v10, %v13554_v51 }
 0x586   : > { %v5789_v56 = vpop.f32.mrf.mxu2 }
 0x587   : > { %v5838_v41 = vpop.f32.mrf.mxu3 }
 0x588   : > { %v5839_v37 = vadd.f32 %v5838_v41, %v5789_v56  ;;  %v5890_v48 = vpop.f32.mrf.mxu0 }
 0x589   : > { %v5939_v16 = vpop.f32.mrf.mxu1 }
 0x58a   : > { %v13807_v62 = vadd.f32 %v5839_v37, %v13559_v9  ;;  %v5940_v4 = vadd.f32 %v5939_v16, %v5890_v48 }
 0x58b   : > { %6296 = vmatmul.bf16.gmra.mxu2 %v14910_v35  ;;  %6394 = vmatmul.bf16.gmra.mxu0 %v14910_v35 }
 0x58c   : > { %9521 = vmatmul.msk.bf16.gmra.mxu3 %vm3794_vm2, %v14911_v22  ;;  %v13813_v52 = vadd.f32 %v5940_v4, %v13563_v6  ;;  %9529 = vmatmul.msk.bf16.gmra.mxu1 %vm3794_vm2, %v14911_v22 }
 0x58e   : > { %v5792_v51 = vpop.f32.mrf.mxu2 }
 0x58f   : > { %v5841_v26 = vpop.f32.mrf.mxu3 }
 0x590   : > { %v5842_v9 = vadd.f32 %v5841_v26, %v5792_v51  ;;  %v5892_v54 = vpop.f32.mrf.mxu0  ;;  %v10107_v51 = vld [vmem:[#allocation2 + $0x4c] sm:$0xf0] }
 0x591   : > { %v5941_v61 = vpop.f32.mrf.mxu1 }
 0x592   : > { %v13819_v38 = vadd.f32 %v5842_v9, %v13567_v58  ;;  %v5942_v45 = vadd.f32 %v5941_v61, %v5892_v54  ;;  %v9551_v58 = vor.u32 %v10105_v7, %v9550_v15  ;;  %v9558_v9 = vld [vmem:[#allocation2 + $0x48] sm:$0xf]  ;;  %v10106_v54 = vld [vmem:[#allocation2 + $0x4c] sm:$0xf] }
 0x594   : > { %v13822_v18 = vadd.f32 %v5942_v45, %v13570_v42 }
 0x596   : > { %v5794_v21 = vpop.f32.mrf.mxu2 }
 0x597   : > { %v5843_v6 = vpop.f32.mrf.mxu3 }
 0x598   : > { %v5844_v34 = vadd.f32 %v5843_v6, %v5794_v21  ;;  %v6360_v0 = vpop.f32.mrf.mxu0 }
 0x599   : > { %v6409_v36 = vpop.f32.mrf.mxu1 }
 0x59a   : > { %v13825_v20 = vadd.f32 %v5844_v34, %v13573_v1  ;;  %v6410_v23 = vadd.f32 %v6409_v36, %v6360_v0 }
 0x59b   : > { %6710 = vmatmul.bf16.vlgmr.msrb.gmra.mxu2 %v9551_v58  ;;  %6808 = vmatmul.bf16.vlgmr.msrb.gmra.mxu0 %v9551_v58 }
 0x59c   : > { %9684 = vmatmul.msk.bf16.vlgmr.msrb.gmra.mxu3 %vm3794_vm2, %v9555_v14  ;;  %v13829_v42 = vadd.f32 %v6410_v23, %v13579_v29  ;;  %9692 = vmatmul.msk.bf16.vlgmr.msrb.gmra.mxu1 %vm3794_vm2, %v9555_v14  ;;  %v9560_v29 = vld [vmem:[#allocation2 + $0x50] sm:$0xf0] }
 0x59d   : > { %v9563_v6 = vor.u32 %v10106_v54, %v9560_v29 }
 0x59e   : > { %v6262_v10 = vpop.f32.mrf.mxu2 }
 0x59f   : > { %v6311_v56 = vpop.f32.mrf.mxu3 }
 0x5a0   : > { %v6312_v41 = vadd.f32 %v6311_v56, %v6262_v10  ;;  %v6362_v37 = vpop.f32.mrf.mxu0  ;;  %v10109_v10 = vld [vmem:[#allocation2 + $0x64] sm:$0xf0] }
 0x5a1   : > { %v6411_v48 = vpop.f32.mrf.mxu1 }
 0x5a2   : > { %v13833_v1 = vadd.f32 %v6312_v41, %v13585_v63  ;;  %v6412_v16 = vadd.f32 %v6411_v48, %v6362_v37  ;;  %v9559_v63 = vor.u32 %v10107_v51, %v9558_v9  ;;  %v9566_v41 = vld [vmem:[#allocation2 + $0x60] sm:$0xf]  ;;  %v10108_v37 = vld [vmem:[#allocation2 + $0x64] sm:$0xf] }
 0x5a4   : > { %v13836_v4 = vadd.f32 %v6412_v16, %v13588_v59 }
 0x5a6   : > { %v6264_v35 = vpop.f32.mrf.mxu2 }
 0x5a7   : > { %v6313_v22 = vpop.f32.mrf.mxu3 }
 0x5a8   : > { %v6314_v26 = vadd.f32 %v6313_v22, %v6264_v35  ;;  %v6365_v45 = vpop.f32.mrf.mxu0 }
 0x5a9   : > { %v6414_v21 = vpop.f32.mrf.mxu1 }
 0x5aa   : > { %v13839_v61 = vadd.f32 %v6314_v26, %v13591_v57  ;;  %v6415_v7 = vadd.f32 %v6414_v21, %v6365_v45 }
 0x5ab   : > { %6715 = vmatmul.bf16.gmra.mxu2 %v9559_v63  ;;  %6813 = vmatmul.bf16.gmra.mxu0 %v9559_v63 }
 0x5ac   : > { %9685 = vmatmul.msk.bf16.gmra.mxu3 %vm3794_vm2, %v9563_v6  ;;  %v13843_v59 = vadd.f32 %v6415_v7, %v13597_v30  ;;  %9693 = vmatmul.msk.bf16.gmra.mxu1 %vm3794_vm2, %v9563_v6  ;;  %v9568_v30 = vld [vmem:[#allocation2 + $0x68] sm:$0xf0] }
 0x5ad   : > { %v9571_v22 = vor.u32 %v10108_v37, %v9568_v30 }
 0x5ae   : > { %v6267_v19 = vpop.f32.mrf.mxu2 }
 0x5af   : > { %v6316_v34 = vpop.f32.mrf.mxu3 }
 0x5b0   : > { %v6317_v15 = vadd.f32 %v6316_v34, %v6267_v19  ;;  %v6367_v3 = vpop.f32.mrf.mxu0  ;;  %v10111_v19 = vld [vmem:[#allocation2 + $0x7c] sm:$0xf0] }
 0x5b1   : > { %v6416_v0 = vpop.f32.mrf.mxu1 }
 0x5b2   : > { %v13847_v57 = vadd.f32 %v6317_v15, %v13603_v53  ;;  %v6417_v36 = vadd.f32 %v6416_v0, %v6367_v3  ;;  %v9567_v53 = vor.u32 %v10109_v10, %v9566_v41  ;;  %v9574_v15 = vld [vmem:[#allocation2 + $0x78] sm:$0xf]  ;;  %v10110_v3 = vld [vmem:[#allocation2 + $0x7c] sm:$0xf] }
 0x5b4   : > { %v13850_v58 = vadd.f32 %v6417_v36, %v13606_v8 }
 0x5b6   : > { %v6269_v14 = vpop.f32.mrf.mxu2 }
 0x5b7   : > { %v6318_v23 = vpop.f32.mrf.mxu3 }
 0x5b8   : > { %v6319_v56 = vadd.f32 %v6318_v23, %v6269_v14  ;;  %v6370_v16 = vpop.f32.mrf.mxu0 }
 0x5b9   : > { %v6419_v35 = vpop.f32.mrf.mxu1 }
 0x5ba   : > { %v13853_v48 = vadd.f32 %v6319_v56, %v13609_v33  ;;  %v6420_v51 = vadd.f32 %v6419_v35, %v6370_v16 }
 0x5bb   : > { %6720 = vmatmul.bf16.gmra.mxu2 %v9567_v53  ;;  %6818 = vmatmul.bf16.gmra.mxu0 %v9567_v53 }
 0x5bc   : > { %9686 = vmatmul.msk.bf16.gmra.mxu3 %vm3794_vm2, %v9571_v22  ;;  %v13857_v8 = vadd.f32 %v6420_v51, %v13615_v5  ;;  %9694 = vmatmul.msk.bf16.gmra.mxu1 %vm3794_vm2, %v9571_v22  ;;  %v9576_v5 = vld [vmem:[#allocation2 + $0x80] sm:$0xf0] }
 0x5bd   : > { %v9579_v23 = vor.u32 %v10110_v3, %v9576_v5  ;;  %v9776_v5 = vld [vmem:[%s14757_s3 + $0x460] sm:$0xf]  ;;  %v10152_v3 = vld [vmem:[%s14757_s3 + $0x464] sm:$0xf] }
 0x5be   : > { %v6272_v29 = vpop.f32.mrf.mxu2 }
 0x5bf   : > { %v6321_v26 = vpop.f32.mrf.mxu3 }
 0x5c0   : > { %v6322_v9 = vadd.f32 %v6321_v26, %v6272_v29  ;;  %v6372_v54 = vpop.f32.mrf.mxu0  ;;  %v10113_v29 = vld [vmem:[#allocation2 + $0x94] sm:$0xf0] }
 0x5c1   : > { %v6421_v45 = vpop.f32.mrf.mxu1 }
 0x5c2   : > { %v13861_v33 = vadd.f32 %v6322_v9, %v13621_v55  ;;  %v6422_v21 = vadd.f32 %v6421_v45, %v6372_v54  ;;  %v9575_v55 = vor.u32 %v10111_v19, %v9574_v15  ;;  %v9582_v9 = vld [vmem:[#allocation2 + $0x90] sm:$0xf]  ;;  %v10112_v54 = vld [vmem:[#allocation2 + $0x94] sm:$0xf] }
 0x5c4   : > { %v13864_v63 = vadd.f32 %v6422_v21, %v13624_v13 }
 0x5c6   : > { %v6274_v6 = vpop.f32.mrf.mxu2 }
 0x5c7   : > { %v6323_v7 = vpop.f32.mrf.mxu3 }
 0x5c8   : > { %v6324_v34 = vadd.f32 %v6323_v7, %v6274_v6  ;;  %v6375_v36 = vpop.f32.mrf.mxu0 }
 0x5c9   : > { %v6424_v14 = vpop.f32.mrf.mxu1 }
 0x5ca   : > { %v13867_v0 = vadd.f32 %v6324_v34, %v13627_v11  ;;  %v6425_v10 = vadd.f32 %v6424_v14, %v6375_v36  ;;  %v9784_v34 = vld [vmem:[%s14757_s3 + $0x470] sm:$0xf]  ;;  %v9778_v36 = vld [vmem:[%s14757_s3 + $0x468] sm:$0xf0] }
 0x5cb   : > { %6725 = vmatmul.bf16.gmra.mxu2 %v9575_v55  ;;  %6823 = vmatmul.bf16.gmra.mxu0 %v9575_v55 }
 0x5cc   : > { %9687 = vmatmul.msk.bf16.gmra.mxu3 %vm3794_vm2, %v9579_v23  ;;  %v13871_v13 = vadd.f32 %v6425_v10, %v13633_v44  ;;  %9695 = vmatmul.msk.bf16.gmra.mxu1 %vm3794_vm2, %v9579_v23  ;;  %v9584_v44 = vld [vmem:[#allocation2 + $0x98] sm:$0xf0]  ;;  %v9781_v10 = vor.u32 %v10152_v3, %v9778_v36  ;;  %v10114_v36 = vld [vmem:[#allocation2 + $0xac] sm:$0xf] }
 0x5cd   : > { %v9587_v7 = vor.u32 %v10112_v54, %v9584_v44  ;;  %v10151_v44 = vld [vmem:[%s14757_s3 + $0x454] sm:$0xf0]  ;;  %v9786_v54 = vld [vmem:[%s14757_s3 + $0x478] sm:$0xf0] }
 0x5ce   : > { %v6277_v30 = vpop.f32.mrf.mxu2  ;;  %7433 = vmatpush.bf16.msra.mxu0 %v9781_v10 }
 0x5cf   : > { %v6326_v56 = vpop.f32.mrf.mxu3 }
 0x5d0   : > { %v6327_v41 = vadd.f32 %v6326_v56, %v6277_v30  ;;  %v6377_v37 = vpop.f32.mrf.mxu0 }
 0x5d1   : > { %v6426_v16 = vpop.f32.mrf.mxu1 }
 0x5d2   : > { %v13875_v11 = vadd.f32 %v6327_v41, %v13639_v32  ;;  %v6427_v35 = vadd.f32 %v6426_v16, %v6377_v37  ;;  %v9583_v32 = vor.u32 %v10113_v29, %v9582_v9  ;;  %v9768_v29 = vld [vmem:[%s14757_s3 + $0x450] sm:$0xf]  ;;  %v9770_v9 = vld [vmem:[%s14757_s3 + $0x458] sm:$0xf0] }
 0x5d4   : > { %v13878_v53 = vadd.f32 %v6427_v35, %v13642_v50  ;;  %v10115_v35 = vld [vmem:[#allocation2 + $0xac] sm:$0xf0] }
 0x5d6   : > { %v6279_v22 = vpop.f32.mrf.mxu2 }
 0x5d7   : > { %v6328_v51 = vpop.f32.mrf.mxu3 }
 0x5d8   : > { %v6329_v26 = vadd.f32 %v6328_v51, %v6279_v22  ;;  %v6380_v21 = vpop.f32.mrf.mxu0  ;;  %v9592_v51 = vld [vmem:[#allocation2 + $0xb0] sm:$0xf0] }
 0x5d9   : > { %v6429_v6 = vpop.f32.mrf.mxu1  ;;  %v9595_v10 = vor.u32 %v10114_v36, %v9592_v51  ;;  %v10146_v51 = vld [vmem:[%s14757_s3 + $0x434] sm:$0xf] }
 0x5da   : > { %v13881_v45 = vadd.f32 %v6329_v26, %v13645_v27  ;;  %v6430_v19 = vadd.f32 %v6429_v6, %v6380_v21  ;;  %v10153_v27 = vld [vmem:[%s14757_s3 + $0x464] sm:$0xf0]  ;;  %v9769_v26 = vor.u32 %v10151_v44, %v9768_v29  ;;  %v10142_v36 = vld [vmem:[%s14757_s3 + $0x414] sm:$0xf] }
 0x5db   : > { %6730 = vmatmul.bf16.gmra.mxu2 %v9583_v32  ;;  %6828 = vmatmul.bf16.gmra.mxu0 %v9583_v32  ;;  %v9777_v15 = vor.u32 %v10153_v27, %v9776_v5  ;;  %v10149_v5 = vld [vmem:[%s14757_s3 + $0x444] sm:$0xf0]  ;;  %v10148_v27 = vld [vmem:[%s14757_s3 + $0x444] sm:$0xf] }
 0x5dc   : > { %9688 = vmatmul.msk.bf16.gmra.mxu3 %vm3794_vm2, %v9587_v7  ;;  %v13885_v50 = vadd.f32 %v6430_v19, %v13651_v49  ;;  %9696 = vmatmul.msk.bf16.gmra.mxu1 %vm3794_vm2, %v9587_v7  ;;  %v10155_v49 = vld [vmem:[%s14757_s3 + $0x474] sm:$0xf0]  ;;  %v9760_v19 = vld [vmem:[%s14757_s3 + $0x440] sm:$0xf] }
 0x5dd   : > { %v9785_v23 = vor.u32 %v10155_v49, %v9784_v34  ;;  %7335 = vmatpush.bf16.msra.mxu2 %v9777_v15  ;;  %v9590_v15 = vld [vmem:[#allocation2 + $0xa8] sm:$0xf]  ;;  %v9762_v49 = vld [vmem:[%s14757_s3 + $0x448] sm:$0xf0] }
 0x5de   : > { %v6282_v14 = vpop.f32.mrf.mxu2  ;;  %v9591_v3 = vor.u32 %v10115_v35, %v9590_v15  ;;  %v10147_v35 = vld [vmem:[%s14757_s3 + $0x434] sm:$0xf0]  ;;  %v10117_v15 = vld [vmem:[#allocation2 + $0xc4] sm:$0xf0] }
 0x5df   : > { %v6331_v55 = vpop.f32.mrf.mxu3  ;;  %7391 = vmatpush.bf16.msra.mxu3 %v9785_v23 }
 0x5e0   : > { %v6332_v30 = vadd.f32 %v6331_v55, %v6282_v14  ;;  %v6382_v41 = vpop.f32.mrf.mxu0 }
 0x5e1   : > { %v6431_v37 = vpop.f32.mrf.mxu1  ;;  %7336 = vmatpush.bf16.msra.mxu2 %v9769_v26 }
 0x5e2   : > { %v13907_v56 = vadd.f32 %v6332_v30, %v13675_v39  ;;  %v6432_v16 = vadd.f32 %v6431_v37, %v6382_v41  ;;  %v10150_v39 = vld [vmem:[%s14757_s3 + $0x454] sm:$0xf]  ;;  %v9761_v30 = vor.u32 %v10149_v5, %v9760_v19  ;;  %v9765_v41 = vor.u32 %v10148_v27, %v9762_v49 }
 0x5e3   : > { %v9773_v32 = vor.u32 %v10150_v39, %v9770_v9  ;;  %v9744_v9 = vld [vmem:[%s14757_s3 + $0x420] sm:$0xf] }
 0x5e4   : > { %v13910_v22 = vadd.f32 %v6432_v16, %v13678_v17  ;;  %v10154_v17 = vld [vmem:[%s14757_s3 + $0x474] sm:$0xf] }
 0x5e5   : > { %v9789_v7 = vor.u32 %v10154_v17, %v9786_v54  ;;  %7434 = vmatpush.bf16.msra.mxu0 %v9773_v32  ;;  %7337 = vmatpush.bf16.msra.mxu2 %v9761_v30  ;;  %v10145_v54 = vld [vmem:[%s14757_s3 + $0x424] sm:$0xf0] }
 0x5e6   : > { %v6284_v21 = vpop.f32.mrf.mxu2  ;;  %v9745_v5 = vor.u32 %v10145_v54, %v9744_v9 }
 0x5e7   : > { %v6333_v6 = vpop.f32.mrf.mxu3  ;;  %7489 = vmatpush.bf16.msra.mxu1 %v9789_v7 }
 0x5e8   : > { %v6334_v34 = vadd.f32 %v6333_v6, %v6284_v21  ;;  %v6385_v55 = vpop.f32.mrf.mxu0  ;;  %v10144_v21 = vld [vmem:[%s14757_s3 + $0x424] sm:$0xf]  ;;  %v9746_v6 = vld [vmem:[%s14757_s3 + $0x428] sm:$0xf0] }
 0x5e9   : > { %v6434_v23 = vpop.f32.mrf.mxu1  ;;  %7435 = vmatpush.bf16.msra.mxu0 %v9765_v41  ;;  %v9749_v27 = vor.u32 %v10144_v21, %v9746_v6 }
 0x5ea   : > { %v13943_v14 = vadd.f32 %v6334_v34, %v13711_v25  ;;  %v6435_v37 = vadd.f32 %v6434_v23, %v6385_v55  ;;  %v9752_v25 = vld [vmem:[%s14757_s3 + $0x430] sm:$0xf]  ;;  %v9600_v55 = vld [vmem:[#allocation2 + $0xc8] sm:$0xf0] }
 0x5eb   : > { %6735 = vmatmul.bf16.gmra.mxu2 %v9591_v3  ;;  %6833 = vmatmul.bf16.gmra.mxu0 %v9591_v3  ;;  %v9753_v29 = vor.u32 %v10147_v35, %v9752_v25  ;;  %v9736_v3 = vld [vmem:[%s14757_s3 + $0x410] sm:$0xf]  ;;  %v10141_v25 = vld [vmem:[%s14757_s3 + $0x404] sm:$0xf0]  ;;  %v10140_v35 = vld [vmem:[%s14757_s3 + $0x404] sm:$0xf] }
 0x5ec   : > { %9689 = vmatmul.msk.bf16.gmra.mxu3 %vm3794_vm2, %v9595_v10  ;;  %v13947_v16 = vadd.f32 %v6435_v37, %v13717_v28  ;;  %9697 = vmatmul.msk.bf16.gmra.mxu1 %vm3794_vm2, %v9595_v10  ;;  %v9754_v28 = vld [vmem:[%s14757_s3 + $0x438] sm:$0xf0]  ;;  %v9728_v10 = vld [vmem:[%s14757_s3 + $0x400] sm:$0xf] }
 0x5ed   : > { %v9757_v26 = vor.u32 %v10146_v51, %v9754_v28  ;;  %7338 = vmatpush.bf16.msra.mxu2 %v9753_v29  ;;  %v9730_v51 = vld [vmem:[%s14757_s3 + $0x408] sm:$0xf0]  ;;  %v9598_v28 = vld [vmem:[#allocation2 + $0xc0] sm:$0xf]  ;;  %v9729_v21 = vor.u32 %v10141_v25, %v9728_v10 }
 0x5ee   : > { %v6287_v44 = vpop.f32.mrf.mxu2  ;;  %v9733_v6 = vor.u32 %v10140_v35, %v9730_v51  ;;  %v9606_v35 = vld [vmem:[#allocation2 + $0xd8] sm:$0xf] }
 0x5ef   : > { %v6336_v39 = vpop.f32.mrf.mxu3  ;;  %7436 = vmatpush.bf16.msra.mxu0 %v9757_v26 }
 0x5f0   : > { %v6337_v17 = vadd.f32 %v6336_v39, %v6287_v44  ;;  %v6387_v7 = vpop.f32.mrf.mxu0  ;;  %v10116_v44 = vld [vmem:[#allocation2 + $0xc4] sm:$0xf]  ;;  %v9599_v39 = vor.u32 %v10117_v15, %v9598_v28  ;;  %v10118_v28 = vld [vmem:[#allocation2 + $0xdc] sm:$0xf] }
 0x5f1   : > { %v6436_v19 = vpop.f32.mrf.mxu1  ;;  %7339 = vmatpush.bf16.msra.mxu2 %v9745_v5  ;;  %v9603_v26 = vor.u32 %v10116_v44, %v9600_v55  ;;  %v10139_v5 = vld [vmem:[%s14757_s3 + $0x3f4] sm:$0xf0]  ;;  %v9608_v44 = vld [vmem:[#allocation2 + $0xe0] sm:$0xf0] }
 0x5f2   : > { %v13975_v32 = vadd.f32 %v6337_v17, %v13747_v40  ;;  %v6437_v34 = vadd.f32 %v6436_v19, %v6387_v7  ;;  %v10143_v40 = vld [vmem:[%s14757_s3 + $0x414] sm:$0xf0] }
 0x5f3   : > { %7437 = vmatpush.bf16.msra.mxu0 %v9749_v27  ;;  %v9737_v23 = vor.u32 %v10143_v40, %v9736_v3  ;;  %v10138_v27 = vld [vmem:[%s14757_s3 + $0x3f4] sm:$0xf]  ;;  %v14024_v55 = vld [vmem:[#allocation2 + $0x38] sm:$0xff] }
 0x5f4   : > { %v13978_v49 = vadd.f32 %v6437_v34, %v13750_v46  ;;  %v9738_v46 = vld [vmem:[%s14757_s3 + $0x418] sm:$0xf0]  ;;  %v6968_v25 = vshrl.u32 %v14024_v55, 16 }
 0x5f5   : > { %v9741_v37 = vor.u32 %v10142_v36, %v9738_v46  ;;  %7340 = vmatpush.bf16.msra.mxu2 %v9737_v23 }
 0x5f6   : > { %v6289_v30 = vpop.f32.mrf.mxu2 }
 0x5f7   : > { %v6338_v41 = vpop.f32.mrf.mxu3  ;;  %7438 = vmatpush.bf16.msra.mxu0 %v9741_v37  ;;  %v6964_v37 = vshll.u32 %v14024_v55, 16 }
 0x5f8   : > { %v6339_v29 = vadd.f32 %v6338_v41, %v6289_v30  ;;  %v6390_v17 = vpop.f32.mrf.mxu0  ;;  %v6930_v41 = vld [vmem:[#allocation2 + $0x30] sm:$0xff] }
 0x5f9   : > { %v6439_v54 = vpop.f32.mrf.mxu1  ;;  %7341 = vmatpush.bf16.msra.mxu2 %v9729_v21  ;;  %v6970_v21 = vrot.slane %v6968_v25, 4  ;;  %v14045_v25 = vld [vmem:[#allocation2 + $0x50] sm:$0xff] }
 0x5fa   : > { %v14005_v9 = vadd.f32 %v6339_v29, %v13777_v31  ;;  %v6440_v7 = vadd.f32 %v6439_v54, %v6390_v17  ;;  %v9720_v31 = vld [vmem:[%s14757_s3 + $0x3f0] sm:$0xf]  ;;  %v10119_v29 = vld [vmem:[#allocation2 + $0xdc] sm:$0xf0]  ;;  %v6966_v54 = vrot.slane %v6964_v37, 5 }
 0x5fb   : > { %6740 = vmatmul.bf16.gmra.mxu2 %v9599_v39  ;;  %6838 = vmatmul.bf16.gmra.mxu0 %v9599_v39  ;;  %v9721_v34 = vor.u32 %v10139_v5, %v9720_v31  ;;  %v6955_v39 = vshrl.u32 %v6930_v41, 16  ;;  %v9611_v31 = vor.u32 %v10118_v28, %v9608_v44 }
 0x5fc   : > { %9690 = vmatmul.msk.bf16.gmra.mxu3 %vm3794_vm2, %v9603_v26  ;;  %v14009_v19 = vadd.f32 %v6440_v7, %v13783_v47  ;;  %9698 = vmatmul.msk.bf16.gmra.mxu1 %vm3794_vm2, %v9603_v26  ;;  %v9722_v47 = vld [vmem:[%s14757_s3 + $0x3f8] sm:$0xf0]  ;;  %v9607_v7 = vor.u32 %v10119_v29, %v9606_v35 }
 0x5fd   : > { %7439 = vmatpush.bf16.msra.mxu0 %v9733_v6  ;;  %v9725_v40 = vor.u32 %v10138_v27, %v9722_v47  ;;  %7342 = vmatpush.bf16.msra.mxu2 %v9721_v34  ;;  %v14037_v47 = vld [vmem:[#allocation2 + $0x40] sm:$0x11] }
 0x5fe   : > { %v6292_v15 = vpop.f32.mrf.mxu2 }
 0x5ff   : > { %v6341_v3 = vpop.f32.mrf.mxu3 }
 0x600   : > { %v6342_v36 = vadd.f32 %v6341_v3, %v6292_v15  ;;  %v6392_v46 = vpop.f32.mrf.mxu0 }
 0x601   : > { %v6441_v10 = vpop.f32.mrf.mxu1  ;;  %7440 = vmatpush.bf16.msra.mxu0 %v9725_v40  ;;  %v6971_v40 = vor.u32 %v6970_v21, %v6966_v54  ;;  %v6992_v21 = vshrl.u32 %v14045_v25, 16 }
 0x602   : > { %v14027_v23 = vadd.f32 %v6342_v36, %v13801_v43  ;;  %v6442_v30 = vadd.f32 %v6441_v10, %v6392_v46  ;;  %v6958_v43 = vshll.u32 %v6930_v41, 16 }
 0x603   : > { %v6972_v41 = vrot.slane %v6971_v40, 4  ;;  %v6994_v40 = vrot.slane %v6992_v21, 4 }
 0x604   : > { %v14032_v51 = vadd.f32 %v6442_v30, %v13804_v2  ;;  %v6957_v2 = vrot.slane %v6955_v39, 4  ;;  %v6960_v15 = vrot.slane %v6958_v43, 5  ;;  %v6933_v39 = vld [vmem:[#allocation2 + $0x48] sm:$0xff] }
 0x606   : > { %v6294_v26 = vpop.f32.mrf.mxu2  ;;  %v6961_v46 = vor.u32 %v6960_v15, %v6957_v2 }
 0x607   : > { %v6343_v17 = vpop.f32.mrf.mxu3 }
 0x608   : > { %v6344_v6 = vadd.f32 %v6343_v17, %v6294_v26  ;;  %v6395_v27 = vpop.f32.mrf.mxu0  ;;  %v6988_v17 = vshll.u32 %v14045_v25, 16 }
 0x609   : > { %v6444_v34 = vpop.f32.mrf.mxu1 }
 0x60a   : > { %v14035_v5 = vadd.f32 %v6344_v6, %v13807_v62  ;;  %v6445_v3 = vadd.f32 %v6444_v34, %v6395_v27  ;;  %v6974_v62 = vshll.u32 %v14037_v47, 16  ;;  %v6982_v34 = vshll.u32 %v6933_v39, 16 }
 0x60b   : > { %6745 = vmatmul.bf16.gmra.mxu2 %v9607_v7  ;;  %6843 = vmatmul.bf16.gmra.mxu0 %v9607_v7 }
 0x60c   : > { %9691 = vmatmul.msk.bf16.gmra.mxu3 %vm3794_vm2, %v9611_v31  ;;  %v14041_v36 = vadd.f32 %v6445_v3, %v13813_v52  ;;  %9699 = vmatmul.msk.bf16.gmra.mxu1 %vm3794_vm2, %v9611_v31  ;;  %v6976_v35 = vrot.slane %v6974_v62, 5  ;;  %v6962_v52 = vrot.slane %v6961_v46, 4  ;;  %v6990_v3 = vrot.slane %v6988_v17, 5 }
 0x60e   : > { %v6297_v10 = vpop.f32.mrf.mxu2  ;;  %v6977_v26 = vsel %vm10316_vm3, %v6972_v41, %v6976_v35  ;;  %v6967_v7 = vsel %vm10316_vm3, %v6962_v52, %v6966_v54  ;;  %v14062_v54 = vld [vmem:[#allocation2 + $0x58] sm:$0x11] }
 0x60f   : > { %v6346_v30 = vpop.f32.mrf.mxu3  ;;  %v7167_v31 = vunpack.c.l.b16 %v6977_v26  ;;  %v7168_v27 = vunpack.c.h.b16 %v6977_v26  ;;  %v7165_v46 = vunpack.c.l.b16 %v6967_v7 }
 0x610   : > { %v6347_v37 = vadd.f32 %v6346_v30, %v6297_v10  ;;  %v6397_v28 = vpop.f32.mrf.mxu0  ;;  %v7166_v10 = vunpack.c.h.b16 %v6967_v7 }
 0x611   : > { %v6446_v44 = vpop.f32.mrf.mxu1  ;;  %v7197_v35 = vpack.c.b16 %v7167_v31, %v7165_v46  ;;  %v14070_v31 = vld [vmem:[#allocation2 + $0x68] sm:$0xff] }
 0x612   : > { %v14048_v29 = vadd.f32 %v6347_v37, %v13819_v38  ;;  %v6447_v43 = vadd.f32 %v6446_v44, %v6397_v28  ;;  %v6979_v38 = vshrl.u32 %v6933_v39, 16  ;;  %v7198_v28 = vpack.c.b16 %v7168_v27, %v7166_v10 }
 0x613   : > { %v6984_v44 = vrot.slane %v6982_v34, 5  ;;  %v6995_v39 = vor.u32 %v6994_v40, %v6990_v3  ;;  %v6936_v40 = vld [vmem:[#allocation2 + $0x60] sm:$0xff]  ;;  %v7012_v10 = vshll.u32 %v14070_v31, 16 }
 0x614   : > { %v14055_v6 = vadd.f32 %v6447_v43, %v13822_v18  ;;  %v6981_v30 = vrot.slane %v6979_v38, 4 }
 0x615   : > { %v6996_v7 = vrot.slane %v6995_v39, 4 }
 0x616   : > { %v6299_v2 = vpop.f32.mrf.mxu2  ;;  %v6985_v26 = vor.u32 %v6984_v44, %v6981_v30  ;;  %v7016_v30 = vshrl.u32 %v14070_v31, 16  ;;  %v7006_v44 = vshll.u32 %v6936_v40, 16 }
 0x617   : > { %v6348_v15 = vpop.f32.mrf.mxu3 }
 0x618   : > { %v6349_v62 = vadd.f32 %v6348_v15, %v6299_v2  ;;  %v6809_v18 = vpop.f32.mrf.mxu0 }
 0x619   : > { %v6858_v37 = vpop.f32.mrf.mxu1 }
 0x61a   : > { %v14060_v41 = vadd.f32 %v6349_v62, %v13825_v20  ;;  %v6859_v52 = vadd.f32 %v6858_v37, %v6809_v18  ;;  %v6998_v20 = vshll.u32 %v14062_v54, 16 }
 0x61b   : > { %7343 = vmatmul.bf16.vlgmr.msra.gmra.mxu2 %v7197_v35  ;;  %7441 = vmatmul.bf16.vlgmr.msra.gmra.mxu0 %v7197_v35 }
 0x61c   : > { %9790 = vmatmul.msk.bf16.vlgmr.msra.gmra.mxu3 %vm3794_vm2, %v7198_v28  ;;  %v14066_v43 = vadd.f32 %v6859_v52, %v13829_v42  ;;  %9798 = vmatmul.msk.bf16.vlgmr.msra.gmra.mxu1 %vm3794_vm2, %v7198_v28  ;;  %v7000_v27 = vrot.slane %v6998_v20, 5  ;;  %v6986_v42 = vrot.slane %v6985_v26, 4  ;;  %v7014_v20 = vrot.slane %v7012_v10, 5 }
 0x61d   : > { %v7018_v26 = vrot.slane %v7016_v30, 4 }
 0x61e   : > { %v6711_v17 = vpop.f32.mrf.mxu2  ;;  %v7001_v46 = vsel %vm10316_vm3, %v6996_v7, %v7000_v27  ;;  %v6991_v37 = vsel %vm10316_vm3, %v6986_v42, %v6990_v3  ;;  %v14087_v3 = vld [vmem:[#allocation2 + $0x70] sm:$0x11]  ;;  %v7008_v42 = vrot.slane %v7006_v44, 5 }
 0x61f   : > { %v6760_v21 = vpop.f32.mrf.mxu3  ;;  %v7171_v35 = vunpack.c.l.b16 %v7001_v46  ;;  %v7172_v28 = vunpack.c.h.b16 %v7001_v46  ;;  %v7170_v7 = vunpack.c.h.b16 %v6991_v37 }
 0x620   : > { %v6761_v38 = vadd.f32 %v6760_v21, %v6711_v17  ;;  %v6811_v2 = vpop.f32.mrf.mxu0  ;;  %v7169_v21 = vunpack.c.l.b16 %v6991_v37 }
 0x621   : > { %v6860_v15 = vpop.f32.mrf.mxu1 }
 0x622   : > { %v14073_v34 = vadd.f32 %v6761_v38, %v13833_v1  ;;  %v6861_v62 = vadd.f32 %v6860_v15, %v6811_v2  ;;  %v7003_v1 = vshrl.u32 %v6936_v40, 16  ;;  %v7199_v15 = vpack.c.b16 %v7171_v35, %v7169_v21 }
 0x623   : > { %v7019_v40 = vor.u32 %v7018_v26, %v7014_v20 }
 0x624   : > { %v14080_v18 = vadd.f32 %v6861_v62, %v13836_v4  ;;  %v7005_v38 = vrot.slane %v7003_v1, 4  ;;  %v7200_v62 = vpack.c.b16 %v7172_v28, %v7170_v7 }
 0x625   : > { %v7020_v35 = vrot.slane %v7019_v40, 4 }
 0x626   : > { %v6713_v52 = vpop.f32.mrf.mxu2  ;;  %v7009_v30 = vor.u32 %v7008_v42, %v7005_v38 }
 0x627   : > { %v6762_v39 = vpop.f32.mrf.mxu3 }
 0x628   : > { %v6763_v17 = vadd.f32 %v6762_v39, %v6713_v52  ;;  %v6814_v4 = vpop.f32.mrf.mxu0  ;;  %v14095_v52 = vld [vmem:[#allocation2 + $0x80] sm:$0xff] }
 0x629   : > { %v6863_v2 = vpop.f32.mrf.mxu1  ;;  %14912 = vst [vmem:[#allocation7_spill] sm:$0xff] %v14095_v52  ;;  %v7040_v38 = vshrl.u32 %v14095_v52, 16 }
 0x62a   : > { %v14085_v27 = vadd.f32 %v6763_v17, %v13839_v61  ;;  %v6864_v46 = vadd.f32 %v6863_v2, %v6814_v4  ;;  %v7022_v61 = vshll.u32 %v14087_v3, 16  ;;  %v7036_v4 = vshll.u32 %v14095_v52, 16  ;;  %v6939_v2 = vld [vmem:[#allocation2 + $0x78] sm:$0xff]  ;;  %v14112_v52 = vld [vmem:[#allocation2 + $0x88] sm:$0x11] }
 0x62b   : > { %7348 = vmatmul.bf16.gmra.mxu2 %v7199_v15  ;;  %7446 = vmatmul.bf16.gmra.mxu0 %v7199_v15 }
 0x62c   : > { %9791 = vmatmul.msk.bf16.gmra.mxu3 %vm3794_vm2, %v7200_v62  ;;  %v14091_v10 = vadd.f32 %v6864_v46, %v13843_v59  ;;  %9799 = vmatmul.msk.bf16.gmra.mxu1 %vm3794_vm2, %v7200_v62  ;;  %v7024_v44 = vrot.slane %v7022_v61, 5  ;;  %v7010_v59 = vrot.slane %v7009_v30, 4  ;;  %v7027_v61 = vshrl.u32 %v6939_v2, 16 }
 0x62d   : > { %v7030_v30 = vshll.u32 %v6939_v2, 16 }
 0x62e   : > { %v6716_v37 = vpop.f32.mrf.mxu2  ;;  %v7025_v7 = vsel %vm10316_vm3, %v7020_v35, %v7024_v44  ;;  %v7015_v62 = vsel %vm10316_vm3, %v7010_v59, %v7014_v20  ;;  %v7029_v59 = vrot.slane %v7027_v61, 4 }
 0x62f   : > { %v6765_v1 = vpop.f32.mrf.mxu3  ;;  %v7176_v42 = vunpack.c.h.b16 %v7025_v7  ;;  %v7174_v44 = vunpack.c.h.b16 %v7015_v62 }
 0x630   : > { %v6766_v28 = vadd.f32 %v6765_v1, %v6716_v37  ;;  %v6816_v26 = vpop.f32.mrf.mxu0  ;;  %v7038_v37 = vrot.slane %v7036_v4, 5  ;;  %v7042_v1 = vrot.slane %v7040_v38, 4 }
 0x631   : > { %v6865_v17 = vpop.f32.mrf.mxu1  ;;  %v7202_v60 = vpack.c.b16 %v7176_v42, %v7174_v44 }
 0x632   : > { %v14098_v39 = vadd.f32 %v6766_v28, %v13847_v57  ;;  %v6866_v21 = vadd.f32 %v6865_v17, %v6816_v26  ;;  %v7175_v57 = vunpack.c.l.b16 %v7025_v7  ;;  %v7173_v28 = vunpack.c.l.b16 %v7015_v62 }
 0x633   : > { %v7032_v7 = vrot.slane %v7030_v30, 5 }
 0x634   : > { %v14105_v15 = vadd.f32 %v6866_v21, %v13850_v58  ;;  %v7201_v21 = vpack.c.b16 %v7175_v57, %v7173_v28 }
 0x635   : > { %v7033_v62 = vor.u32 %v7032_v7, %v7029_v59 }
 0x636   : > { %14913 = vst [vmem:[#allocation5_spill] sm:$0xff] %v14105_v15  ;;  %v6718_v46 = vpop.f32.mrf.mxu2  ;;  %v7043_v15 = vor.u32 %v7042_v1, %v7038_v37  ;;  %v6942_v1 = vld [vmem:[#allocation2 + $0x90] sm:$0xff] }
 0x637   : > { %v6767_v40 = vpop.f32.mrf.mxu3 }
 0x638   : > { %v6768_v35 = vadd.f32 %v6767_v40, %v6718_v46  ;;  %v6819_v17 = vpop.f32.mrf.mxu0  ;;  %v7044_v57 = vrot.slane %v7043_v15, 4 }
 0x639   : > { %v6868_v58 = vpop.f32.mrf.mxu1 }
 0x63a   : > { %v14110_v26 = vadd.f32 %v6768_v35, %v13853_v48  ;;  %v6869_v20 = vadd.f32 %v6868_v58, %v6819_v17  ;;  %v7046_v48 = vshll.u32 %v14112_v52, 16  ;;  %v10206_v35 = vld [vmem:[#allocation2 + $0x98] sm:$0xff]  ;;  %v7034_v17 = vrot.slane %v7033_v62, 4 }
 0x63b   : > { %7353 = vmatmul.bf16.gmra.mxu2 %v7201_v21  ;;  %7451 = vmatmul.bf16.gmra.mxu0 %v7201_v21  ;;  %v7064_v28 = vshrl.u32 %v10206_v35, 16  ;;  %v7051_v21 = vshrl.u32 %v6942_v1, 16 }
 0x63c   : > { %9792 = vmatmul.msk.bf16.gmra.mxu3 %vm3794_vm2, %v7202_v60  ;;  %v14116_v4 = vadd.f32 %v6869_v20, %v13857_v8  ;;  %9800 = vmatmul.msk.bf16.gmra.mxu1 %vm3794_vm2, %v7202_v60  ;;  %v7048_v46 = vrot.slane %v7046_v48, 5  ;;  %v7060_v8 = vshll.u32 %v10206_v35, 16  ;;  %v7039_v15 = vsel %vm10316_vm3, %v7034_v17, %v7038_v37 }
 0x63d   : > { %v7066_v48 = vrot.slane %v7064_v28, 4  ;;  %v7178_v62 = vunpack.c.h.b16 %v7039_v15 }
 0x63e   : > { %v6721_v38 = vpop.f32.mrf.mxu2  ;;  %v7049_v60 = vsel %vm10316_vm3, %v7044_v57, %v7048_v46  ;;  %v7062_v7 = vrot.slane %v7060_v8, 5  ;;  %v10207_v8 = vld [vmem:[#allocation2 + $0xa0] sm:$0x11] }
 0x63f   : > { %v6770_v2 = vpop.f32.mrf.mxu3  ;;  %v7179_v20 = vunpack.c.l.b16 %v7049_v60  ;;  %v7180_v59 = vunpack.c.h.b16 %v7049_v60  ;;  %v7070_v28 = vshll.u32 %v10207_v8, 16 }
 0x640   : > { %v6771_v42 = vadd.f32 %v6770_v2, %v6721_v38  ;;  %v6821_v61 = vpop.f32.mrf.mxu0  ;;  %v7067_v17 = vor.u32 %v7066_v48, %v7062_v7 }
 0x641   : > { %v6870_v30 = vpop.f32.mrf.mxu1  ;;  %v7204_v37 = vpack.c.b16 %v7180_v59, %v7178_v62  ;;  %v7072_v48 = vrot.slane %v7070_v28, 5 }
 0x642   : > { %v14121_v40 = vadd.f32 %v6771_v42, %v13861_v33  ;;  %v6871_v44 = vadd.f32 %v6870_v30, %v6821_v61  ;;  %v7054_v33 = vshll.u32 %v6942_v1, 16  ;;  %v7177_v61 = vunpack.c.l.b16 %v7039_v15  ;;  %v14138_v15 = vld [vmem:[#allocation2 + $0xb0] sm:$0xff] }
 0x643   : > { %v7053_v30 = vrot.slane %v7051_v21, 4  ;;  %14914 = vst [vmem:[#allocation22_spill] sm:$0xff] %v14138_v15  ;;  %v7068_v21 = vrot.slane %v7067_v17, 4 }
 0x644   : > { %v14126_v58 = vadd.f32 %v6871_v44, %v13864_v63  ;;  %v7056_v35 = vrot.slane %v7054_v33, 5  ;;  %v7203_v44 = vpack.c.b16 %v7179_v20, %v7177_v61 }
 0x646   : > { %v6723_v38 = vpop.f32.mrf.mxu2 }
 0x647   : > { %v6772_v2 = vpop.f32.mrf.mxu3 }
 0x648   : > { %v6773_v42 = vadd.f32 %v6772_v2, %v6723_v38  ;;  %v6824_v63 = vpop.f32.mrf.mxu0  ;;  %v7084_v38 = vshll.u32 %v14138_v15, 16  ;;  %v7088_v2 = vshrl.u32 %v14138_v15, 16 }
 0x649   : > { %v6873_v46 = vpop.f32.mrf.mxu1 }
 0x64a   : > { %v14131_v57 = vadd.f32 %v6773_v42, %v13867_v0  ;;  %v6874_v1 = vadd.f32 %v6873_v46, %v6824_v63  ;;  %v7057_v0 = vor.u32 %v7056_v35, %v7053_v30  ;;  %v7073_v63 = vsel %vm10316_vm3, %v7068_v21, %v7072_v48  ;;  %v6945_v30 = vld [vmem:[#allocation2 + $0xa8] sm:$0xff] }
 0x64b   : > { %7358 = vmatmul.bf16.gmra.mxu2 %v7203_v44  ;;  %7456 = vmatmul.bf16.gmra.mxu0 %v7203_v44  ;;  %v7086_v44 = vrot.slane %v7084_v38, 5  ;;  %v7184_v8 = vunpack.c.h.b16 %v7073_v63  ;;  %v7078_v28 = vshll.u32 %v6945_v30, 16 }
 0x64c   : > { %9793 = vmatmul.msk.bf16.gmra.mxu3 %vm3794_vm2, %v7204_v37  ;;  %v14135_v60 = vadd.f32 %v6874_v1, %v13871_v13  ;;  %9801 = vmatmul.msk.bf16.gmra.mxu1 %vm3794_vm2, %v7204_v37  ;;  %v7058_v62 = vrot.slane %v7057_v0, 4  ;;  %v7090_v37 = vrot.slane %v7088_v2, 4  ;;  %v7183_v1 = vunpack.c.l.b16 %v7073_v63 }
 0x64e   : > { %v6726_v33 = vpop.f32.mrf.mxu2  ;;  %v7063_v35 = vsel %vm10316_vm3, %v7058_v62, %v7062_v7  ;;  %v7091_v21 = vor.u32 %v7090_v37, %v7086_v44  ;;  %v7080_v62 = vrot.slane %v7078_v28, 5  ;;  %v10170_v28 = vld [vmem:[%s14757_s3 + $0x4f4] sm:$0xf] }
 0x64f   : > { %v6775_v20 = vpop.f32.mrf.mxu3  ;;  %v7181_v0 = vunpack.c.l.b16 %v7063_v35  ;;  %v7182_v15 = vunpack.c.h.b16 %v7063_v35  ;;  %v14159_v35 = vld [vmem:[#allocation2 + $0xc8] sm:$0xff] }
 0x650   : > { %v6776_v59 = vadd.f32 %v6775_v20, %v6726_v33  ;;  %v6826_v13 = vpop.f32.mrf.mxu0  ;;  %14917 = vst [vmem:[#allocation8_spill] sm:$0xff] %v14159_v35 }
 0x651   : > { %v6875_v61 = vpop.f32.mrf.mxu1  ;;  %v7205_v48 = vpack.c.b16 %v7183_v1, %v7181_v0  ;;  %v9898_v1 = vld [vmem:[%s14757_s3 + $0x500] sm:$0xf] }
 0x652   : > { %v14143_v42 = vadd.f32 %v6776_v59, %v13875_v11  ;;  %v6876_v46 = vadd.f32 %v6875_v61, %v6826_v13  ;;  %v7075_v11 = vshrl.u32 %v6945_v30, 16  ;;  %v14152_v13 = vld [vmem:[#allocation2 + $0xb8] sm:$0x11] }
 0x653   : > { %14915 = vst [vmem:[#allocation3_spill] sm:$0xff] %v14152_v13  ;;  %v7094_v30 = vshll.u32 %v14152_v13, 16 }
 0x654   : > { %v14150_v17 = vadd.f32 %v6876_v46, %v13878_v53  ;;  %v7206_v53 = vpack.c.b16 %v7184_v8, %v7182_v15  ;;  %v7077_v61 = vrot.slane %v7075_v11, 4  ;;  %v7092_v46 = vrot.slane %v7091_v21, 4  ;;  %v10171_v15 = vld [vmem:[%s14757_s3 + $0x4f4] sm:$0xf0] }
 0x656   : > { %v6728_v33 = vpop.f32.mrf.mxu2  ;;  %v7081_v8 = vor.u32 %v7080_v62, %v7077_v61  ;;  %v7112_v61 = vshrl.u32 %v14159_v35, 16 }
 0x657   : > { %v6777_v20 = vpop.f32.mrf.mxu3 }
 0x658   : > { %v6778_v59 = vadd.f32 %v6777_v20, %v6728_v33  ;;  %v6829_v38 = vpop.f32.mrf.mxu0  ;;  %v9892_v33 = vld [vmem:[%s14757_s3 + $0x4f8] sm:$0xf0] }
 0x659   : > { %v6878_v2 = vpop.f32.mrf.mxu1  ;;  %v9895_v21 = vor.u32 %v10170_v28, %v9892_v33 }
 0x65a   : > { %v14155_v7 = vadd.f32 %v6778_v59, %v13881_v45  ;;  %v6879_v63 = vadd.f32 %v6878_v2, %v6829_v38  ;;  %v9890_v45 = vld [vmem:[%s14757_s3 + $0x4f0] sm:$0xf]  ;;  %v7096_v38 = vrot.slane %v7094_v30, 5  ;;  %v6948_v2 = vld [vmem:[#allocation2 + $0xc0] sm:$0xff] }
 0x65b   : > { %7363 = vmatmul.bf16.gmra.mxu2 %v7205_v48  ;;  %7461 = vmatmul.bf16.gmra.mxu0 %v7205_v48  ;;  %v9891_v11 = vor.u32 %v10171_v15, %v9890_v45  ;;  %v7082_v15 = vrot.slane %v7081_v8, 4  ;;  %v7099_v28 = vshrl.u32 %v6948_v2, 16  ;;  %v7102_v33 = vshll.u32 %v6948_v2, 16  ;;  %v9882_v8 = vld [vmem:[%s14757_s3 + $0x4e0] sm:$0xf] }
 0x65c   : > { %14916 = vst [vmem:[#allocation6_spill] sm:$0xff] %v14155_v7  ;;  %9794 = vmatmul.msk.bf16.gmra.mxu3 %vm3794_vm2, %v7206_v53  ;;  %v14162_v37 = vadd.f32 %v6879_v63, %v13885_v50  ;;  %9802 = vmatmul.msk.bf16.gmra.mxu1 %vm3794_vm2, %v7206_v53  ;;  %v10173_v50 = vld [vmem:[%s14757_s3 + $0x504] sm:$0xf0]  ;;  %v7108_v53 = vshll.u32 %v14159_v35, 16 }
 0x65d   : > { %v9899_v59 = vor.u32 %v10173_v50, %v9898_v1  ;;  %7840 = vmatpush.bf16.msrb.mxu2 %v9891_v11  ;;  %7938 = vmatpush.bf16.msrb.mxu0 %v9895_v21  ;;  %v7097_v1 = vsel %vm10316_vm3, %v7092_v46, %v7096_v38  ;;  %v7087_v30 = vsel %vm10316_vm3, %v7082_v15, %v7086_v44  ;;  %v7114_v11 = vrot.slane %v7112_v61, 4  ;;  %v10169_v46 = vld [vmem:[%s14757_s3 + $0x4e4] sm:$0xf0]  ;;  %v10168_v44 = vld [vmem:[%s14757_s3 + $0x4e4] sm:$0xf] }
 0x65e   : > { %14918 = vst [vmem:[#allocation9_spill] sm:$0xff] %v14162_v37  ;;  %v6731_v20 = vpop.f32.mrf.mxu2  ;;  %v9883_v21 = vor.u32 %v10169_v46, %v9882_v8  ;;  %v9900_v38 = vld [vmem:[%s14757_s3 + $0x508] sm:$0xf0]  ;;  %v7185_v61 = vunpack.c.l.b16 %v7087_v30  ;;  %v9874_v15 = vld [vmem:[%s14757_s3 + $0x4d0] sm:$0xf]  ;;  %v7186_v46 = vunpack.c.h.b16 %v7087_v30 }
 0x65f   : > { %v6780_v0 = vpop.f32.mrf.mxu3  ;;  %7896 = vmatpush.bf16.msrb.mxu3 %v9899_v59  ;;  %v7188_v59 = vunpack.c.h.b16 %v7097_v1 }
 0x660   : > { %v6781_v48 = vadd.f32 %v6780_v0, %v6731_v20  ;;  %v6831_v63 = vpop.f32.mrf.mxu0  ;;  %v14192_v20 = vrot.slane %v7108_v53, 5 }
 0x661   : > { %v6880_v45 = vpop.f32.mrf.mxu1  ;;  %7841 = vmatpush.bf16.msrb.mxu2 %v9883_v21  ;;  %v7208_v30 = vpack.c.b16 %v7188_v59, %v7186_v46  ;;  %v9868_v59 = vld [vmem:[%s14757_s3 + $0x4c8] sm:$0xf0] }
 0x662   : > { %v14186_v62 = vadd.f32 %v6781_v48, %v13907_v56  ;;  %v6881_v50 = vadd.f32 %v6880_v45, %v6831_v63  ;;  %v7187_v56 = vunpack.c.l.b16 %v7097_v1  ;;  %v10172_v48 = vld [vmem:[%s14757_s3 + $0x504] sm:$0xf]  ;;  %v10167_v1 = vld [vmem:[%s14757_s3 + $0x4d4] sm:$0xf0]  ;;  %v7115_v35 = vor.u32 %v7114_v11, %v14192_v20 }
 0x663   : > { %v9903_v45 = vor.u32 %v10172_v48, %v9900_v38  ;;  %v7101_v48 = vrot.slane %v7099_v28, 4  ;;  %v7104_v38 = vrot.slane %v7102_v33, 5  ;;  %v10164_v11 = vld [vmem:[%s14757_s3 + $0x4c4] sm:$0xf] }
 0x664   : > { %14919 = vst [vmem:[#allocation10_spill] sm:$0xff] %v14186_v62  ;;  %v14195_v0 = vadd.f32 %v6881_v50, %v13910_v22  ;;  %v9884_v22 = vld [vmem:[%s14757_s3 + $0x4e8] sm:$0xf0]  ;;  %v10166_v50 = vld [vmem:[%s14757_s3 + $0x4d4] sm:$0xf] }
 0x665   : > { %v9887_v63 = vor.u32 %v10168_v44, %v9884_v22  ;;  %v14224_v62 = vld [vmem:[#allocation2 + $0xd0] sm:$0x11]  ;;  %v9876_v44 = vld [vmem:[%s14757_s3 + $0x4d8] sm:$0xf0]  ;;  %v7207_v22 = vpack.c.b16 %v7187_v56, %v7185_v61  ;;  %7994 = vmatpush.bf16.msrb.mxu1 %v9903_v45  ;;  %v7105_v33 = vor.u32 %v7104_v38, %v7101_v48  ;;  %v7116_v56 = vrot.slane %v7115_v35, 4 }
 0x666   : > { %14920 = vst [vmem:[#allocation12_spill] sm:$0xff] %v14195_v0  ;;  %v6733_v2 = vpop.f32.mrf.mxu2  ;;  %v9879_v37 = vor.u32 %v10166_v50, %v9876_v44  ;;  %v7118_v7 = vshll.u32 %v14224_v62, 16  ;;  %v6951_v61 = vld [vmem:[#allocation2 + $0xd8] sm:$0xff]  ;;  %v9871_v50 = vor.u32 %v10164_v11, %v9868_v59 }
 0x667   : > { %v6782_v53 = vpop.f32.mrf.mxu3  ;;  %7939 = vmatpush.bf16.msrb.mxu0 %v9887_v63  ;;  %v14251_v63 = vld [vmem:[#allocation2 + $0xe0] sm:$0xff]  ;;  %v7126_v46 = vshll.u32 %v6951_v61, 16  ;;  %v10163_v48 = vld [vmem:[%s14757_s3 + $0x4b4] sm:$0xf0]  ;;  %v7106_v38 = vrot.slane %v7105_v33, 4 }
 0x668   : > { %v6783_v8 = vadd.f32 %v6782_v53, %v6733_v2  ;;  %v6834_v13 = vpop.f32.mrf.mxu0  ;;  %v9875_v53 = vor.u32 %v10167_v1, %v9874_v15  ;;  %14922 = vst [vmem:[#allocation4_spill] sm:$0xff] %v14251_v63  ;;  %v7120_v1 = vrot.slane %v7118_v7, 5  ;;  %v7136_v35 = vshrl.u32 %v14251_v63, 16  ;;  %v10162_v7 = vld [vmem:[%s14757_s3 + $0x4b4] sm:$0xf] }
 0x669   : > { %v6883_v2 = vpop.f32.mrf.mxu1  ;;  %v7111_v11 = vsel %vm10316_vm3, %v7106_v38, %v14192_v20  ;;  %v10161_v20 = vld [vmem:[%s14757_s3 + $0x4a4] sm:$0xf0] }
 0x66a   : > { %v14231_v0 = vadd.f32 %v6783_v8, %v13943_v14  ;;  %v6884_v21 = vadd.f32 %v6883_v2, %v6834_v13  ;;  %v9866_v14 = vld [vmem:[%s14757_s3 + $0x4c0] sm:$0xf]  ;;  %v10165_v13 = vld [vmem:[%s14757_s3 + $0x4c4] sm:$0xf0]  ;;  %7842 = vmatpush.bf16.msrb.mxu2 %v9875_v53  ;;  %v7123_v8 = vshrl.u32 %v6951_v61, 16  ;;  %v7128_v61 = vrot.slane %v7126_v46, 5 }
 0x66b   : > { %7368 = vmatmul.bf16.gmra.mxu2 %v7207_v22  ;;  %7466 = vmatmul.bf16.gmra.mxu0 %v7207_v22  ;;  %v7132_v22 = vshll.u32 %v14251_v63, 16  ;;  %v9852_v46 = vld [vmem:[%s14757_s3 + $0x4a8] sm:$0xf0] }
 0x66c   : > { %14921 = vst [vmem:[#allocation13_spill] sm:$0xff] %v14231_v0  ;;  %9795 = vmatmul.msk.bf16.gmra.mxu3 %vm3794_vm2, %v7208_v30  ;;  %v14236_v28 = vadd.f32 %v6884_v21, %v13947_v16  ;;  %9803 = vmatmul.msk.bf16.gmra.mxu1 %vm3794_vm2, %v7208_v30  ;;  %v9867_v16 = vor.u32 %v10165_v13, %v9866_v14  ;;  %v9860_v13 = vld [vmem:[%s14757_s3 + $0x4b8] sm:$0xf0] }
 0x66d   : > { %7940 = vmatpush.bf16.msrb.mxu0 %v9879_v37  ;;  %v9858_v37 = vld [vmem:[%s14757_s3 + $0x4b0] sm:$0xf]  ;;  %v7121_v21 = vsel %vm10316_vm3, %v7116_v56, %v7120_v1  ;;  %v9863_v59 = vor.u32 %v10162_v7, %v9860_v13  ;;  %v14278_v1 = vld [vmem:[#allocation2 + $0xe8] sm:$0x11] }
 0x66e   : > { %v6736_v45 = vpop.f32.mrf.mxu2  ;;  %7843 = vmatpush.bf16.msrb.mxu2 %v9867_v16  ;;  %v9859_v14 = vor.u32 %v10163_v48, %v9858_v37  ;;  %v7191_v56 = vunpack.c.l.b16 %v7121_v21  ;;  %v7192_v16 = vunpack.c.h.b16 %v7121_v21  ;;  %v7189_v37 = vunpack.c.l.b16 %v7111_v11  ;;  %v9842_v7 = vld [vmem:[%s14757_s3 + $0x490] sm:$0xf] }
 0x66f   : > { %v6785_v15 = vpop.f32.mrf.mxu3  ;;  %v7190_v48 = vunpack.c.h.b16 %v7111_v11  ;;  %v9844_v11 = vld [vmem:[%s14757_s3 + $0x498] sm:$0xf0] }
 0x670   : > { %v6786_v44 = vadd.f32 %v6785_v15, %v6736_v45  ;;  %v6836_v30 = vpop.f32.mrf.mxu0  ;;  %v7134_v45 = vrot.slane %v7132_v22, 5  ;;  %v7138_v15 = vrot.slane %v7136_v35, 4 }
 0x671   : > { %v6885_v53 = vpop.f32.mrf.mxu1  ;;  %7941 = vmatpush.bf16.msrb.mxu0 %v9871_v50  ;;  %v9850_v50 = vld [vmem:[%s14757_s3 + $0x4a0] sm:$0xf] }
 0x672   : > { %v14265_v2 = vadd.f32 %v6786_v44, %v13975_v32  ;;  %v6886_v33 = vadd.f32 %v6885_v53, %v6836_v30  ;;  %v7125_v32 = vrot.slane %v7123_v8, 4  ;;  %7844 = vmatpush.bf16.msrb.mxu2 %v9859_v14  ;;  %v9851_v8 = vor.u32 %v10161_v20, %v9850_v50  ;;  %v10159_v30 = vld [vmem:[%s14757_s3 + $0x494] sm:$0xf0]  ;;  %v10158_v53 = vld [vmem:[%s14757_s3 + $0x494] sm:$0xf] }
 0x673   : > { %v7139_v13 = vor.u32 %v7138_v15, %v7134_v45  ;;  %v7210_v50 = vpack.c.b16 %v7192_v16, %v7190_v48  ;;  %v9843_v0 = vor.u32 %v10159_v30, %v9842_v7  ;;  %v9847_v63 = vor.u32 %v10158_v53, %v9844_v11  ;;  %v10156_v16 = vld [vmem:[%s14757_s3 + $0x484] sm:$0xf] }
 0x674   : > { %v14276_v44 = vadd.f32 %v6886_v33, %v13978_v49  ;;  %v10160_v49 = vld [vmem:[%s14757_s3 + $0x4a4] sm:$0xf]  ;;  %v7129_v14 = vor.u32 %v7128_v61, %v7125_v32  ;;  %v7142_v33 = vshll.u32 %v14278_v1, 16 }
 0x675   : > { %7942 = vmatpush.bf16.msrb.mxu0 %v9863_v59  ;;  %v9855_v38 = vor.u32 %v10160_v49, %v9852_v46  ;;  %v7209_v59 = vpack.c.b16 %v7191_v56, %v7189_v37  ;;  %v7140_v61 = vrot.slane %v7139_v13, 4  ;;  %v10157_v56 = vld [vmem:[%s14757_s3 + $0x484] sm:$0xf0] }
 0x676   : > { %v6738_v22 = vpop.f32.mrf.mxu2  ;;  %7845 = vmatpush.bf16.msrb.mxu2 %v9851_v8  ;;  %v7130_v32 = vrot.slane %v7129_v14, 4  ;;  %v7144_v15 = vrot.slane %v7142_v33, 5 }
 0x677   : > { %v6787_v35 = vpop.f32.mrf.mxu3 }
 0x678   : > { %v6788_v21 = vadd.f32 %v6787_v35, %v6738_v22  ;;  %v6839_v49 = vpop.f32.mrf.mxu0  ;;  %v7135_v30 = vsel %vm10316_vm3, %v7130_v32, %v7134_v45  ;;  %v7145_v53 = vsel %vm10316_vm3, %v7140_v61, %v7144_v15 }
 0x679   : > { %v6888_v46 = vpop.f32.mrf.mxu1  ;;  %7943 = vmatpush.bf16.msrb.mxu0 %v9855_v38  ;;  %v7193_v13 = vunpack.c.l.b16 %v7135_v30  ;;  %v7194_v33 = vunpack.c.h.b16 %v7135_v30  ;;  %v7195_v11 = vunpack.c.l.b16 %v7145_v53 }
 0x67a   : > { %v14306_v20 = vadd.f32 %v6788_v21, %v14005_v9  ;;  %v6889_v22 = vadd.f32 %v6888_v46, %v6839_v49  ;;  %v9834_v9 = vld [vmem:[%s14757_s3 + $0x480] sm:$0xf]  ;;  %7846 = vmatpush.bf16.msrb.mxu2 %v9843_v0 }
 0x67b   : > { %7373 = vmatmul.bf16.gmra.mxu2 %v7209_v59  ;;  %7471 = vmatmul.bf16.gmra.mxu0 %v7209_v59  ;;  %v9835_v8 = vor.u32 %v10157_v56, %v9834_v9  ;;  %v7196_v59 = vunpack.c.h.b16 %v7145_v53  ;;  %v7211_v12 = vpack.c.b16 %v7195_v11, %v7193_v13  ;;  %v7597_v9 = vrot.slane %v14024_v55, 5 }
 0x67c   : > { %9796 = vmatmul.msk.bf16.gmra.mxu3 %vm3794_vm2, %v7210_v50  ;;  %v14310_v35 = vadd.f32 %v6889_v22, %v14009_v19  ;;  %9804 = vmatmul.msk.bf16.gmra.mxu1 %vm3794_vm2, %v7210_v50  ;;  %v9836_v19 = vld [vmem:[%s14757_s3 + $0x488] sm:$0xf0] }
 0x67d   : > { %7944 = vmatpush.bf16.msrb.mxu0 %v9847_v63  ;;  %v9839_v38 = vor.u32 %v10156_v16, %v9836_v19  ;;  %v7212_v22 = vpack.c.b16 %v7196_v59, %v7194_v33 }
 0x67e   : > { %v6741_v37 = vpop.f32.mrf.mxu2  ;;  %7847 = vmatpush.bf16.msrb.mxu2 %v9835_v8  ;;  %v7599_v8 = vrot.slane %v7597_v9, 4 }
 0x67f   : > { %v6790_v48 = vpop.f32.mrf.mxu3 }
 0x680   : > { %v6791_v7 = vadd.f32 %v6790_v48, %v6741_v37  ;;  %v6841_v0 = vpop.f32.mrf.mxu0  ;;  %v7600_v37 = vrot.slane %v14037_v47, 5 }
 0x681   : > { %v6890_v63 = vpop.f32.mrf.mxu1  ;;  %7945 = vmatpush.bf16.msrb.mxu0 %v9839_v38 }
 0x682   : > { %v14330_v21 = vadd.f32 %v6791_v7, %v14027_v23  ;;  %v6891_v14 = vadd.f32 %v6890_v63, %v6841_v0 }
 0x684   : > { %v14333_v50 = vadd.f32 %v6891_v14, %v14032_v51 }
 0x686   : > { %v6743_v49 = vpop.f32.mrf.mxu2 }
 0x687   : > { %v6792_v45 = vpop.f32.mrf.mxu3 }
 0x688   : > { %v6793_v46 = vadd.f32 %v6792_v45, %v6743_v49  ;;  %v6844_v32 = vpop.f32.mrf.mxu0 }
 0x689   : > { %v6893_v61 = vpop.f32.mrf.mxu1 }
 0x68a   : > { %v14336_v23 = vadd.f32 %v6793_v46, %v14035_v5  ;;  %v6894_v15 = vadd.f32 %v6893_v61, %v6844_v32  ;;  %v7563_v5 = vld [vmem:[#allocation2 + $0x30] sm:$0xee] }
 0x68b   : > { %7378 = vmatmul.bf16.gmra.mxu2 %v7211_v12  ;;  %7476 = vmatmul.bf16.gmra.mxu0 %v7211_v12  ;;  %v9806_v30 = vrot.slane %v7563_v5, 9 }
 0x68c   : > { %9797 = vmatmul.msk.bf16.gmra.mxu3 %vm3794_vm2, %v7212_v22  ;;  %v14341_v56 = vadd.f32 %v6894_v15, %v14041_v36  ;;  %9805 = vmatmul.msk.bf16.gmra.mxu1 %vm3794_vm2, %v7212_v22  ;;  %v7601_v36 = vsel %vm10471_vm7, %v7599_v8, %v7600_v37 }
 0x68d   : > { %v7598_v0 = vsel %vm10471_vm7, %v9806_v30, %v7597_v9  ;;  %v7672_v63 = vunpack.c.l.b16 %v7601_v36  ;;  %v7673_v14 = vunpack.c.h.b16 %v7601_v36 }
 0x68e   : > { %v6746_v51 = vpop.f32.mrf.mxu2  ;;  %v7671_v11 = vunpack.c.h.b16 %v7598_v0 }
 0x68f   : > { %v6795_v16 = vpop.f32.mrf.mxu3 }
 0x690   : > { %v6796_v19 = vadd.f32 %v6795_v16, %v6746_v51  ;;  %v6846_v55 = vpop.f32.mrf.mxu0  ;;  %v7703_v12 = vpack.c.b16 %v7673_v14, %v7671_v11  ;;  %v7564_v51 = vld [vmem:[#allocation2 + $0x48] sm:$0xee]  ;;  %v7607_v16 = vrot.slane %v14062_v54, 5 }
 0x691   : > { %v6895_v38 = vpop.f32.mrf.mxu1  ;;  %v9807_v37 = vrot.slane %v7564_v51, 9  ;;  %v14923_v51 = vld [vmem:[#allocation5_spill] sm:$0xff] }
 0x692   : > { %v14346_v48 = vadd.f32 %v6796_v19, %v14048_v29  ;;  %v6896_v7 = vadd.f32 %v6895_v38, %v6846_v55  ;;  %v7670_v29 = vunpack.c.l.b16 %v7598_v0 }
 0x694   : > { %v14351_v53 = vadd.f32 %v6896_v7, %v14055_v6  ;;  %v7702_v46 = vpack.c.b16 %v7672_v63, %v7670_v29  ;;  %v7604_v6 = vrot.slane %v14045_v25, 5 }
 0x696   : > { %v6748_v13 = vpop.f32.mrf.mxu2  ;;  %v7605_v38 = vsel %vm10471_vm7, %v9807_v37, %v7604_v6 }
 0x697   : > { %v6797_v47 = vpop.f32.mrf.mxu3  ;;  %v7675_v63 = vunpack.c.h.b16 %v7605_v38 }
 0x698   : > { %v6798_v33 = vadd.f32 %v6797_v47, %v6748_v13  ;;  %v7442_v49 = vpop.f32.mrf.mxu0 }
 0x699   : > { %v7491_v45 = vpop.f32.mrf.mxu1 }
 0x69a   : > { %v14356_v59 = vadd.f32 %v6798_v33, %v14060_v41  ;;  %v7492_v22 = vadd.f32 %v7491_v45, %v7442_v49  ;;  %v7606_v41 = vrot.slane %v7604_v6, 4  ;;  %v7614_v6 = vrot.slane %v14087_v3, 5 }
 0x69b   : > { %7848 = vmatmul.bf16.vlgmr.msrb.gmra.mxu2 %v7702_v46  ;;  %7946 = vmatmul.bf16.vlgmr.msrb.gmra.mxu0 %v7702_v46 }
 0x69c   : > { %9904 = vmatmul.msk.bf16.vlgmr.msrb.gmra.mxu3 %vm3794_vm2, %v7703_v12  ;;  %v14361_v32 = vadd.f32 %v7492_v22, %v14066_v43  ;;  %9912 = vmatmul.msk.bf16.vlgmr.msrb.gmra.mxu1 %vm3794_vm2, %v7703_v12  ;;  %v7608_v43 = vsel %vm10471_vm7, %v7606_v41, %v7607_v16  ;;  %v7565_v22 = vld [vmem:[#allocation2 + $0x60] sm:$0xee] }
 0x69d   : > { %v7676_v7 = vunpack.c.l.b16 %v7608_v43  ;;  %v7677_v30 = vunpack.c.h.b16 %v7608_v43 }
 0x69e   : > { %v7344_v61 = vpop.f32.mrf.mxu2 }
 0x69f   : > { %v7393_v15 = vpop.f32.mrf.mxu3  ;;  %v7705_v29 = vpack.c.b16 %v7677_v30, %v7675_v63  ;;  %v14924_v63 = vld [vmem:[#allocation7_spill] sm:$0xff] }
 0x6a0   : > { %v7394_v9 = vadd.f32 %v7393_v15, %v7344_v61  ;;  %v7444_v25 = vpop.f32.mrf.mxu0 }
 0x6a1   : > { %v7493_v19 = vpop.f32.mrf.mxu1 }
 0x6a2   : > { %v14366_v8 = vadd.f32 %v7394_v9, %v14073_v34  ;;  %v7494_v5 = vadd.f32 %v7493_v19, %v7444_v25  ;;  %v7674_v34 = vunpack.c.l.b16 %v7605_v38  ;;  %v9808_v9 = vrot.slane %v7565_v22, 9 }
 0x6a4   : > { %v14371_v55 = vadd.f32 %v7494_v5, %v14080_v18  ;;  %v7704_v33 = vpack.c.b16 %v7676_v7, %v7674_v34  ;;  %v7611_v18 = vrot.slane %v14070_v31, 5 }
 0x6a6   : > { %v7346_v36 = vpop.f32.mrf.mxu2  ;;  %v7612_v25 = vsel %vm10471_vm7, %v9808_v9, %v7611_v18 }
 0x6a7   : > { %v7395_v54 = vpop.f32.mrf.mxu3  ;;  %v7679_v38 = vunpack.c.h.b16 %v7612_v25 }
 0x6a8   : > { %v7396_v0 = vadd.f32 %v7395_v54, %v7346_v36  ;;  %v7447_v13 = vpop.f32.mrf.mxu0 }
 0x6a9   : > { %v7496_v47 = vpop.f32.mrf.mxu1 }
 0x6aa   : > { %v14376_v14 = vadd.f32 %v7396_v0, %v14085_v27  ;;  %v7497_v11 = vadd.f32 %v7496_v47, %v7447_v13  ;;  %v7613_v27 = vrot.slane %v7611_v18, 4  ;;  %v7618_v13 = vrot.slane %v14924_v63, 5  ;;  %v7566_v18 = vld [vmem:[#allocation2 + $0x78] sm:$0xee] }
 0x6ab   : > { %7853 = vmatmul.bf16.gmra.mxu2 %v7704_v33  ;;  %7951 = vmatmul.bf16.gmra.mxu0 %v7704_v33 }
 0x6ac   : > { %9905 = vmatmul.msk.bf16.gmra.mxu3 %vm3794_vm2, %v7705_v29  ;;  %v14381_v49 = vadd.f32 %v7497_v11, %v14091_v10  ;;  %9913 = vmatmul.msk.bf16.gmra.mxu1 %vm3794_vm2, %v7705_v29  ;;  %v7615_v10 = vsel %vm10471_vm7, %v7613_v27, %v7614_v6  ;;  %v9809_v6 = vrot.slane %v7566_v18, 9 }
 0x6ad   : > { %v7680_v19 = vunpack.c.l.b16 %v7615_v10  ;;  %v7681_v5 = vunpack.c.h.b16 %v7615_v10 }
 0x6ae   : > { %v7349_v45 = vpop.f32.mrf.mxu2 }
 0x6af   : > { %v7398_v46 = vpop.f32.mrf.mxu3  ;;  %v7707_v0 = vpack.c.b16 %v7681_v5, %v7679_v38 }
 0x6b0   : > { %v7399_v12 = vadd.f32 %v7398_v46, %v7349_v45  ;;  %v7449_v31 = vpop.f32.mrf.mxu0  ;;  %v7621_v45 = vrot.slane %v14112_v52, 5 }
 0x6b1   : > { %v7498_v15 = vpop.f32.mrf.mxu1 }
 0x6b2   : > { %v14386_v61 = vadd.f32 %v7399_v12, %v14098_v39  ;;  %v7499_v41 = vadd.f32 %v7498_v15, %v7449_v31  ;;  %v7678_v39 = vunpack.c.l.b16 %v7612_v25  ;;  %v7619_v15 = vsel %vm10471_vm7, %v9809_v6, %v7618_v13  ;;  %v14929_v6 = vld [vmem:[#allocation9_spill] sm:$0xff] }
 0x6b3   : > { %v7683_v25 = vunpack.c.h.b16 %v7619_v15 }
 0x6b4   : > { %v14391_v16 = vadd.f32 %v7499_v41, %v14923_v51  ;;  %v7706_v54 = vpack.c.b16 %v7680_v19, %v7678_v39 }
 0x6b6   : > { %v7351_v37 = vpop.f32.mrf.mxu2 }
 0x6b7   : > { %v7400_v3 = vpop.f32.mrf.mxu3 }
 0x6b8   : > { %v7401_v43 = vadd.f32 %v7400_v3, %v7351_v37  ;;  %v7452_v30 = vpop.f32.mrf.mxu0 }
 0x6b9   : > { %v7501_v36 = vpop.f32.mrf.mxu1 }
 0x6ba   : > { %v14396_v7 = vadd.f32 %v7401_v43, %v14110_v26  ;;  %v7502_v34 = vadd.f32 %v7501_v36, %v7452_v30  ;;  %v7620_v26 = vrot.slane %v7618_v13, 4 }
 0x6bb   : > { %7858 = vmatmul.bf16.gmra.mxu2 %v7706_v54  ;;  %7956 = vmatmul.bf16.gmra.mxu0 %v7706_v54 }
 0x6bc   : > { %9906 = vmatmul.msk.bf16.gmra.mxu3 %vm3794_vm2, %v7707_v0  ;;  %v14401_v47 = vadd.f32 %v7502_v34, %v14116_v4  ;;  %9914 = vmatmul.msk.bf16.gmra.mxu1 %vm3794_vm2, %v7707_v0  ;;  %v7622_v4 = vsel %vm10471_vm7, %v7620_v26, %v7621_v45 }
 0x6bd   : > { %v7684_v41 = vunpack.c.l.b16 %v7622_v4  ;;  %v7685_v9 = vunpack.c.h.b16 %v7622_v4 }
 0x6be   : > { %v7354_v33 = vpop.f32.mrf.mxu2 }
 0x6bf   : > { %v7403_v29 = vpop.f32.mrf.mxu3  ;;  %v7709_v43 = vpack.c.b16 %v7685_v9, %v7683_v25  ;;  %v7568_v9 = vld [vmem:[#allocation2 + $0xa8] sm:$0xee] }
 0x6c0   : > { %v7404_v11 = vadd.f32 %v7403_v29, %v7354_v33  ;;  %v7454_v27 = vpop.f32.mrf.mxu0 }
 0x6c1   : > { %v7503_v12 = vpop.f32.mrf.mxu1 }
 0x6c2   : > { %v14406_v46 = vadd.f32 %v7404_v11, %v14121_v40  ;;  %v7504_v22 = vadd.f32 %v7503_v12, %v7454_v27  ;;  %v7682_v40 = vunpack.c.l.b16 %v7619_v15  ;;  %v14926_v27 = vld [vmem:[#allocation22_spill] sm:$0xff] }
 0x6c3   : > { %v7632_v12 = vrot.slane %v14926_v27, 5 }
 0x6c4   : > { %v14411_v31 = vadd.f32 %v7504_v22, %v14126_v58  ;;  %v7708_v3 = vpack.c.b16 %v7684_v41, %v7682_v40  ;;  %v14927_v22 = vld [vmem:[#allocation23_spill] sm:$0xff] }
 0x6c5   : > { %v7634_v41 = vrot.slane %v7632_v12, 4 }
 0x6c6   : > { %v7356_v10 = vpop.f32.mrf.mxu2 }
 0x6c7   : > { %v7405_v52 = vpop.f32.mrf.mxu3 }
 0x6c8   : > { %v7406_v51 = vadd.f32 %v7405_v52, %v7356_v10  ;;  %v7457_v5 = vpop.f32.mrf.mxu0  ;;  %v14930_v10 = vld [vmem:[#allocation3_spill] sm:$0xff] }
 0x6c9   : > { %v7506_v37 = vpop.f32.mrf.mxu1  ;;  %v7635_v52 = vrot.slane %v14930_v10, 5 }
 0x6ca   : > { %v14416_v19 = vadd.f32 %v7406_v51, %v14131_v57  ;;  %v7507_v39 = vadd.f32 %v7506_v37, %v7457_v5  ;;  %v9811_v5 = vrot.slane %v7568_v9, 9  ;;  %v7642_v9 = vrot.slane %v14224_v62, 5 }
 0x6cb   : > { %7863 = vmatmul.bf16.gmra.mxu2 %v7708_v3  ;;  %7961 = vmatmul.bf16.gmra.mxu0 %v7708_v3  ;;  %v7636_v37 = vsel %vm10471_vm7, %v7634_v41, %v7635_v52  ;;  %v14931_v3 = vld [vmem:[#allocation12_spill] sm:$0xff]  ;;  %v7569_v41 = vld [vmem:[#allocation2 + $0xc0] sm:$0xee] }
 0x6cc   : > { %9907 = vmatmul.msk.bf16.gmra.mxu3 %vm3794_vm2, %v7709_v43  ;;  %v14420_v58 = vadd.f32 %v7507_v39, %v14135_v60  ;;  %9915 = vmatmul.msk.bf16.gmra.mxu1 %vm3794_vm2, %v7709_v43  ;;  %v14925_v60 = vld [vmem:[#allocation6_spill] sm:$0xff]  ;;  %v7633_v39 = vsel %vm10471_vm7, %v9811_v5, %v7632_v12 }
 0x6ce   : > { %v7359_v38 = vpop.f32.mrf.mxu2 }
 0x6cf   : > { %v7408_v30 = vpop.f32.mrf.mxu3 }
 0x6d0   : > { %v7409_v36 = vadd.f32 %v7408_v30, %v7359_v38  ;;  %v7459_v54 = vpop.f32.mrf.mxu0  ;;  %v7692_v38 = vunpack.c.l.b16 %v7636_v37  ;;  %v7693_v30 = vunpack.c.h.b16 %v7636_v37 }
 0x6d1   : > { %v7508_v0 = vpop.f32.mrf.mxu1 }
 0x6d2   : > { %v14424_v57 = vadd.f32 %v7409_v36, %v14143_v42  ;;  %v7509_v34 = vadd.f32 %v7508_v0, %v7459_v54  ;;  %v14928_v42 = vld [vmem:[#allocation24_spill] sm:$0xff]  ;;  %v7690_v0 = vunpack.c.l.b16 %v7633_v39 }
 0x6d4   : > { %v14427_v63 = vadd.f32 %v7509_v34, %v14150_v17  ;;  %v7691_v34 = vunpack.c.h.b16 %v7633_v39 }
 0x6d6   : > { %v7361_v13 = vpop.f32.mrf.mxu2 }
 0x6d7   : > { %v7410_v33 = vpop.f32.mrf.mxu3 }
 0x6d8   : > { %v7411_v29 = vadd.f32 %v7410_v33, %v7361_v13  ;;  %v7462_v11 = vpop.f32.mrf.mxu0 }
 0x6d9   : > { %v7511_v18 = vpop.f32.mrf.mxu1 }
 0x6da   : > { %v14430_v26 = vadd.f32 %v7411_v29, %v14925_v60  ;;  %v7512_v45 = vadd.f32 %v7511_v18, %v7462_v11  ;;  %v7712_v29 = vpack.c.b16 %v7692_v38, %v7690_v0  ;;  %v7713_v60 = vpack.c.b16 %v7693_v30, %v7691_v34  ;;  %v14932_v18 = vld [vmem:[#allocation8_spill] sm:$0xff] }
 0x6db   : > { %7868 = vmatmul.bf16.gmra.mxu2 %v14927_v22  ;;  %7966 = vmatmul.bf16.gmra.mxu0 %v14927_v22  ;;  %v14933_v34 = vld [vmem:[#allocation4_spill] sm:$0xff] }
 0x6dc   : > { %9908 = vmatmul.msk.bf16.gmra.mxu3 %vm3794_vm2, %v14928_v42  ;;  %v14437_v4 = vadd.f32 %v7512_v45, %v14929_v6  ;;  %9916 = vmatmul.msk.bf16.gmra.mxu1 %vm3794_vm2, %v14928_v42  ;;  %v7639_v45 = vrot.slane %v14932_v18, 5  ;;  %v7570_v18 = vld [vmem:[#allocation2 + $0xd8] sm:$0xee] }
 0x6de   : > { %v14442_v17 = vpop.f32.mrf.mxu2  ;;  %v7641_v42 = vrot.slane %v7639_v45, 4 }
 0x6df   : > { %v14444_v15 = vpop.f32.mrf.mxu3 }
 0x6e0   : > { %v7464_v51 = vpop.f32.mrf.mxu0 }
 0x6e1   : > { %v7513_v40 = vpop.f32.mrf.mxu1 }
 0x6e2   : > { %v7514_v25 = vadd.f32 %v7513_v40, %v7464_v51 }
 0x6e4   : > { %v14450_v43 = vadd.f32 %v7514_v25, %v14931_v3  ;;  %v9812_v25 = vrot.slane %v7569_v41, 9 }
 0x6e6   : > { %v14454_v36 = vpop.f32.mrf.mxu2  ;;  %v7640_v37 = vsel %vm10471_vm7, %v9812_v25, %v7639_v45 }
 0x6e7   : > { %v14456_v54 = vpop.f32.mrf.mxu3  ;;  %v7695_v0 = vunpack.c.h.b16 %v7640_v37 }
 0x6e8   : > { %v7467_v13 = vpop.f32.mrf.mxu0 }
 0x6e9   : > { %v7516_v33 = vpop.f32.mrf.mxu1 }
 0x6ea   : > { %v7517_v11 = vadd.f32 %v7516_v33, %v7467_v13  ;;  %v7646_v13 = vrot.slane %v14933_v34, 5 }
 0x6eb   : > { %7873 = vmatmul.bf16.gmra.mxu2 %v7712_v29  ;;  %7971 = vmatmul.bf16.gmra.mxu0 %v7712_v29 }
 0x6ec   : > { %9909 = vmatmul.msk.bf16.gmra.mxu3 %vm3794_vm2, %v7713_v60  ;;  %v14461_v27 = vadd.f32 %v7517_v11, %v14236_v28  ;;  %9917 = vmatmul.msk.bf16.gmra.mxu1 %vm3794_vm2, %v7713_v60  ;;  %v7643_v28 = vsel %vm10471_vm7, %v7641_v42, %v7642_v9  ;;  %v7648_v42 = vrot.slane %v7646_v13, 4 }
 0x6ed   : > { %v7696_v3 = vunpack.c.l.b16 %v7643_v28  ;;  %v7697_v39 = vunpack.c.h.b16 %v7643_v28 }
 0x6ee   : > { %v7369_v12 = vpop.f32.mrf.mxu2 }
 0x6ef   : > { %v7418_v22 = vpop.f32.mrf.mxu3 }
 0x6f0   : > { %v7419_v6 = vadd.f32 %v7418_v22, %v7369_v12  ;;  %v7469_v52 = vpop.f32.mrf.mxu0  ;;  %v9813_v22 = vrot.slane %v7570_v18, 9 }
 0x6f1   : > { %v7518_v51 = vpop.f32.mrf.mxu1 }
 0x6f2   : > { %v14466_v10 = vadd.f32 %v7419_v6, %v14265_v2  ;;  %v7519_v40 = vadd.f32 %v7518_v51, %v7469_v52  ;;  %v7694_v2 = vunpack.c.l.b16 %v7640_v37  ;;  %v7647_v52 = vsel %vm10471_vm7, %v9813_v22, %v7646_v13 }
 0x6f3   : > { %v7698_v37 = vunpack.c.l.b16 %v7647_v52 }
 0x6f4   : > { %v14471_v5 = vadd.f32 %v7519_v40, %v14276_v44  ;;  %v7714_v11 = vpack.c.b16 %v7696_v3, %v7694_v2  ;;  %v7715_v44 = vpack.c.b16 %v7697_v39, %v7695_v0  ;;  %v7699_v3 = vunpack.c.h.b16 %v7647_v52 }
 0x6f6   : > { %v7371_v38 = vpop.f32.mrf.mxu2 }
 0x6f7   : > { %v7420_v62 = vpop.f32.mrf.mxu3 }
 0x6f8   : > { %v7421_v30 = vadd.f32 %v7420_v62, %v7371_v38  ;;  %v7472_v29 = vpop.f32.mrf.mxu0 }
 0x6f9   : > { %v7521_v60 = vpop.f32.mrf.mxu1 }
 0x6fa   : > { %v14477_v33 = vadd.f32 %v7421_v30, %v14306_v20  ;;  %v7522_v12 = vadd.f32 %v7521_v60, %v7472_v29  ;;  %v7649_v20 = vrot.slane %v14278_v1, 5 }
 0x6fb   : > { %7878 = vmatmul.bf16.gmra.mxu2 %v7714_v11  ;;  %7976 = vmatmul.bf16.gmra.mxu0 %v7714_v11 }
 0x6fc   : > { %9910 = vmatmul.msk.bf16.gmra.mxu3 %vm3794_vm2, %v7715_v44  ;;  %v14481_v45 = vadd.f32 %v7522_v12, %v14310_v35  ;;  %9918 = vmatmul.msk.bf16.gmra.mxu1 %vm3794_vm2, %v7715_v44  ;;  %v7650_v51 = vsel %vm10471_vm7, %v7648_v42, %v7649_v20 }
 0x6fd   : > { %v7700_v39 = vunpack.c.l.b16 %v7650_v51  ;;  %v7701_v38 = vunpack.c.h.b16 %v7650_v51 }
 0x6fe   : > { %v7374_v6 = vpop.f32.mrf.mxu2 }
 0x6ff   : > { %v7423_v41 = vpop.f32.mrf.mxu3  ;;  %v7716_v0 = vpack.c.b16 %v7700_v39, %v7698_v37  ;;  %v7717_v34 = vpack.c.b16 %v7701_v38, %v7699_v3 }
 0x700   : > { %v7424_v9 = vadd.f32 %v7423_v41, %v7374_v6  ;;  %v7474_v35 = vpop.f32.mrf.mxu0 }
 0x701   : > { %v7523_v25 = vpop.f32.mrf.mxu1 }
 0x702   : > { %v14490_v40 = vadd.f32 %v7424_v9, %v14330_v21  ;;  %v7524_v28 = vadd.f32 %v7523_v25, %v7474_v35 }
 0x704   : > { %v14493_v1 = vadd.f32 %v7524_v28, %v14333_v50 }
 0x706   : > { %v7376_v62 = vpop.f32.mrf.mxu2 }
 0x707   : > { %v7425_v30 = vpop.f32.mrf.mxu3 }
 0x708   : > { %v7426_v2 = vadd.f32 %v7425_v30, %v7376_v62  ;;  %v7477_v21 = vpop.f32.mrf.mxu0 }
 0x709   : > { %v7526_v13 = vpop.f32.mrf.mxu1 }
 0x70a   : > { %v14496_v24 = vadd.f32 %v7426_v2, %v14336_v23  ;;  %v7527_v29 = vadd.f32 %v7526_v13, %v7477_v21 }
 0x70b   : > { %7883 = vmatmul.bf16.gmra.mxu2 %v7716_v0  ;;  %7981 = vmatmul.bf16.gmra.mxu0 %v7716_v0 }
 0x70c   : > { %9911 = vmatmul.msk.bf16.gmra.mxu3 %vm3794_vm2, %v7717_v34  ;;  %v14500_v60 = vadd.f32 %v7527_v29, %v14341_v56  ;;  %9919 = vmatmul.msk.bf16.gmra.mxu1 %vm3794_vm2, %v7717_v34 }
 0x70e   : > { %v7379_v50 = vpop.f32.mrf.mxu2 }
 0x70f   : > { %v7428_v11 = vpop.f32.mrf.mxu3 }
 0x710   : > { %v7429_v44 = vadd.f32 %v7428_v11, %v7379_v50  ;;  %v7479_v23 = vpop.f32.mrf.mxu0 }
 0x711   : > { %v7528_v12 = vpop.f32.mrf.mxu1 }
 0x712   : > { %v14504_v18 = vadd.f32 %v7429_v44, %v14346_v48  ;;  %v7529_v22 = vadd.f32 %v7528_v12, %v7479_v23 }
 0x714   : > { %v14507_v42 = vadd.f32 %v7529_v22, %v14351_v53 }
 0x716   : > { %v7381_v20 = vpop.f32.mrf.mxu2 }
 0x717   : > { %v7430_v6 = vpop.f32.mrf.mxu3 }
 0x718   : > { %v7431_v41 = vadd.f32 %v7430_v6, %v7381_v20  ;;  %v7947_v9 = vpop.f32.mrf.mxu0 }
 0x719   : > { %v7996_v52 = vpop.f32.mrf.mxu1 }
 0x71a   : > { %v14510_v56 = vadd.f32 %v7431_v41, %v14356_v59  ;;  %v7997_v51 = vadd.f32 %v7996_v52, %v7947_v9 }
 0x71c   : > { %v14513_v35 = vadd.f32 %v7997_v51, %v14361_v32 }
 0x71e   : > { %14934 = vst [vmem:[#allocation11_spill] sm:$0xff] %v14513_v35  ;;  %v7849_v48 = vpop.f32.mrf.mxu2 }
 0x71f   : > { %v7898_v25 = vpop.f32.mrf.mxu3 }
 0x720   : > { %v7899_v28 = vadd.f32 %v7898_v25, %v7849_v48  ;;  %v7949_v53 = vpop.f32.mrf.mxu0 }
 0x721   : > { %v7998_v3 = vpop.f32.mrf.mxu1 }
 0x722   : > { %v14516_v37 = vadd.f32 %v7899_v28, %v14366_v8  ;;  %v7999_v39 = vadd.f32 %v7998_v3, %v7949_v53 }
 0x724   : > { %14935 = vst [vmem:[#allocation14_spill] sm:$0xff] %v14516_v37  ;;  %v14519_v38 = vadd.f32 %v7999_v39, %v14371_v55 }
 0x726   : > { %14936 = vst [vmem:[#allocation15_spill] sm:$0xff] %v14519_v38  ;;  %v7851_v59 = vpop.f32.mrf.mxu2 }
 0x727   : > { %v7900_v62 = vpop.f32.mrf.mxu3 }
 0x728   : > { %v7901_v30 = vadd.f32 %v7900_v62, %v7851_v59  ;;  %v7952_v32 = vpop.f32.mrf.mxu0 }
 0x729   : > { %v8001_v0 = vpop.f32.mrf.mxu1 }
 0x72a   : > { %v14522_v2 = vadd.f32 %v7901_v30, %v14376_v14  ;;  %v8002_v34 = vadd.f32 %v8001_v0, %v7952_v32 }
 0x72c   : > { %14937 = vst [vmem:[#allocation16_spill] sm:$0xff] %v14522_v2  ;;  %v14525_v21 = vadd.f32 %v8002_v34, %v14381_v49 }
 0x72e   : > { %14938 = vst [vmem:[#allocation17_spill] sm:$0xff] %v14525_v21  ;;  %v7854_v8 = vpop.f32.mrf.mxu2 }
 0x72f   : > { %v7903_v13 = vpop.f32.mrf.mxu3 }
 0x730   : > { %v7904_v29 = vadd.f32 %v7903_v13, %v7854_v8  ;;  %v7954_v55 = vpop.f32.mrf.mxu0 }
 0x731   : > { %v8003_v11 = vpop.f32.mrf.mxu1 }
 0x732   : > { %v14528_v50 = vadd.f32 %v7904_v29, %v14386_v61  ;;  %v8004_v44 = vadd.f32 %v8003_v11, %v7954_v55 }
 0x734   : > { %14939 = vst [vmem:[#allocation18_spill] sm:$0xff] %v14528_v50  ;;  %v14531_v23 = vadd.f32 %v8004_v44, %v14391_v16 }
 0x736   : > { %v7856_v14 = vpop.f32.mrf.mxu2 }
 0x737   : > { %v7905_v12 = vpop.f32.mrf.mxu3 }
 0x738   : > { %v7906_v22 = vadd.f32 %v7905_v12, %v7856_v14  ;;  %v7957_v49 = vpop.f32.mrf.mxu0 }
 0x739   : > { %v8006_v6 = vpop.f32.mrf.mxu1 }
 0x73a   : > { %v14534_v20 = vadd.f32 %v7906_v22, %v14396_v7  ;;  %v8007_v41 = vadd.f32 %v8006_v6, %v7957_v49  ;;  %v7414_v49 = vadd.f32 %v14444_v15, %v14442_v17 }
 0x73c   : > { %14940 = vst [vmem:[#allocation19_spill] sm:$0xff] %v14534_v20  ;;  %v14537_v9 = vadd.f32 %v8007_v41, %v14401_v47 }
 0x73e   : > { %v7859_v61 = vpop.f32.mrf.mxu2 }
 0x73f   : > { %v7908_v52 = vpop.f32.mrf.mxu3 }
 0x740   : > { %v7909_v51 = vadd.f32 %v7908_v52, %v7859_v61  ;;  %v7959_v16 = vpop.f32.mrf.mxu0  ;;  %v14942_v61 = vld [vmem:[#allocation10_spill] sm:$0xff] }
 0x741   : > { %v8008_v25 = vpop.f32.mrf.mxu1 }
 0x742   : > { %v14540_v48 = vadd.f32 %v7909_v51, %v14406_v46  ;;  %v8009_v28 = vadd.f32 %v8008_v25, %v7959_v16 }
 0x744   : > { %14941 = vst [vmem:[#allocation20_spill] sm:$0xff] %v14540_v48  ;;  %v14543_v53 = vadd.f32 %v8009_v28, %v14411_v31 }
 0x746   : > { %v7861_v7 = vpop.f32.mrf.mxu2 }
 0x747   : > { %v7910_v3 = vpop.f32.mrf.mxu3 }
 0x748   : > { %v7911_v39 = vadd.f32 %v7910_v3, %v7861_v7  ;;  %v7962_v47 = vpop.f32.mrf.mxu0 }
 0x749   : > { %v8011_v62 = vpop.f32.mrf.mxu1 }
 0x74a   : > { %v14546_v59 = vadd.f32 %v7911_v39, %v14416_v19  ;;  %v8012_v30 = vadd.f32 %v8011_v62, %v7962_v47 }
 0x74c   : > { %v14549_v32 = vadd.f32 %v8012_v30, %v14420_v58 }
 0x74e   : > { %v7864_v46 = vpop.f32.mrf.mxu2 }
 0x74f   : > { %v7913_v0 = vpop.f32.mrf.mxu3 }
 0x750   : > { %v7914_v34 = vadd.f32 %v7913_v0, %v7864_v46  ;;  %v7964_v31 = vpop.f32.mrf.mxu0 }
 0x751   : > { %v8013_v13 = vpop.f32.mrf.mxu1 }
 0x752   : > { %v14552_v8 = vadd.f32 %v7914_v34, %v14424_v57  ;;  %v8014_v29 = vadd.f32 %v8013_v13, %v7964_v31 }
 0x754   : > { %v14555_v55 = vadd.f32 %v8014_v29, %v14427_v63  ;;  %v7547_v63 = vadd.f32 %v7414_v49, %v14942_v61  ;;  %v8068_v61 = vld [vmem:[%s14758_s4] sm:$0x3] }
 0x756   : > { %v7866_v19 = vpop.f32.mrf.mxu2 }
 0x757   : > { %v7915_v11 = vpop.f32.mrf.mxu3 }
 0x758   : > { %v7916_v44 = vadd.f32 %v7915_v11, %v7866_v19  ;;  %v7967_v58 = vpop.f32.mrf.mxu0 }
 0x759   : > { %v8016_v12 = vpop.f32.mrf.mxu1 }
 0x75a   : > { %v14558_v14 = vadd.f32 %v7916_v44, %v14430_v26  ;;  %v8017_v22 = vadd.f32 %v8016_v12, %v7967_v58 }
 0x75c   : > { %v14563_v57 = vadd.f32 %v8017_v22, %v14437_v4 }
 0x75e   : > { %v7869_v6 = vpop.f32.mrf.mxu2 }
 0x75f   : > { %v7918_v41 = vpop.f32.mrf.mxu3 }
 0x760   : > { %v7919_v52 = vadd.f32 %v7918_v41, %v7869_v6  ;;  %v7969_v16 = vpop.f32.mrf.mxu0 }
 0x761   : > { %v8018_v25 = vpop.f32.mrf.mxu1 }
 0x762   : > { %v14566_v51 = vadd.f32 %v7919_v52, %v7547_v63 }
 0x766   : > { %v14568_v26 = vpop.f32.mrf.mxu2 }
 0x767   : > { %v14570_v28 = vpop.f32.mrf.mxu3 }
 0x768   : > { %v7972_v7 = vpop.f32.mrf.mxu0 }
 0x769   : > { %v8021_v3 = vpop.f32.mrf.mxu1 }
 0x76e   : > { %v7874_v39 = vpop.f32.mrf.mxu2 }
 0x76f   : > { %v7923_v17 = vpop.f32.mrf.mxu3 }
 0x770   : > { %v7974_v15 = vpop.f32.mrf.mxu0 }
 0x771   : > { %v8023_v4 = vpop.f32.mrf.mxu1 }
 0x772   : > { %v8024_v50 = vadd.f32 %v8023_v4, %v7974_v15  ;;  %v8019_v4 = vadd.f32 %v8018_v25, %v7969_v16  ;;  %v14943_v25 = vld [vmem:[#allocation13_spill] sm:$0xff] }
 0x776   : > { %v7876_v47 = vpop.f32.mrf.mxu2 }
 0x777   : > { %v7925_v62 = vpop.f32.mrf.mxu3 }
 0x778   : > { %v7977_v30 = vpop.f32.mrf.mxu0 }
 0x779   : > { %v8026_v46 = vpop.f32.mrf.mxu1 }
 0x77a   : > { %v8027_v63 = vadd.f32 %v8026_v46, %v7977_v30 }
 0x77e   : > { %v7879_v0 = vpop.f32.mrf.mxu2 }
 0x77f   : > { %v7928_v34 = vpop.f32.mrf.mxu3 }
 0x780   : > { %v7979_v31 = vpop.f32.mrf.mxu0 }
 0x781   : > { %v8028_v13 = vpop.f32.mrf.mxu1 }
 0x782   : > { %v8029_v49 = vadd.f32 %v8028_v13, %v7979_v31  ;;  %v8022_v31 = vadd.f32 %v8021_v3, %v7972_v7  ;;  %v8061_v13 = vadd.f32 %v8027_v63, %v14481_v45  ;;  %v7416_v3 = vadd.f32 %v14456_v54, %v14454_v36 }
 0x783   : > { %v7921_v36 = vadd.f32 %v14570_v28, %v14568_v26 }
 0x784   : > { %v8063_v35 = vadd.f32 %v8029_v49, %v14493_v1  ;;  %v8059_v1 = vadd.f32 %v8024_v50, %v14471_v5  ;;  %v7924_v5 = vadd.f32 %v7923_v17, %v7874_v39  ;;  %v7549_v39 = vadd.f32 %v7416_v3, %v14943_v25  ;;  %v14947_v3 = vld [vmem:[#allocation19_spill] sm:$0xff] }
 0x785   : > { %v8209_v25 = vld [vmem:[%s14760_s6 + $0xf0] sm:$0xff] }
 0x786   : > { %v7881_v29 = vpop.f32.mrf.mxu2 }
 0x787   : > { %v7930_v19 = vpop.f32.mrf.mxu3 }
 0x788   : > { %v7982_v11 = vpop.f32.mrf.mxu0 }
 0x789   : > { %v8031_v44 = vpop.f32.mrf.mxu1 }
 0x78a   : > { %v8032_v58 = vadd.f32 %v8031_v44, %v7982_v11  ;;  %v14578_v11 = vperm.slane %v8068_v61, 1  ;;  %v7931_v44 = vadd.f32 %v7930_v19, %v7881_v29  ;;  %v7926_v29 = vadd.f32 %v7925_v62, %v7876_v47 }
 0x78c   : > { %v8065_v52 = vadd.f32 %v8032_v58, %v14500_v60  ;;  %v7929_v60 = vadd.f32 %v7928_v34, %v7879_v0  ;;  %v8062_v7 = vadd.f32 %v7931_v44, %v14496_v24  ;;  %v8057_v0 = vadd.f32 %v8022_v31, %v14461_v27 }
 0x78d   : > { %v8097_v50 = vadd.f32 %v14578_v11, %v8059_v1  ;;  %v8058_v54 = vadd.f32 %v7926_v29, %v14477_v33  ;;  %v8054_v33 = vadd.f32 %v7921_v36, %v7549_v39  ;;  %v8091_v58 = vadd.f32 %v14578_v11, %v14563_v57  ;;  %v14944_v1 = vld [vmem:[#allocation17_spill] sm:$0xff] }
 0x78e   : > { %v7884_v12 = vpop.f32.mrf.mxu2  ;;  %v8103_v30 = vadd.f32 %v14578_v11, %v8065_v52  ;;  %v8095_v16 = vadd.f32 %v14578_v11, %v8057_v0  ;;  %v8089_v49 = vadd.f32 %v14578_v11, %v14555_v55  ;;  %v8087_v63 = vadd.f32 %v14578_v11, %v14549_v32 }
 0x78f   : > { %v7933_v22 = vpop.f32.mrf.mxu3  ;;  %v8129_v62 = vmax.f32 %v8097_v50, 0.0  ;;  %v8085_v31 = vadd.f32 %v14578_v11, %v14543_v53  ;;  %v8083_v32 = vadd.f32 %v14578_v11, %v14537_v9  ;;  %v8081_v53 = vadd.f32 %v14578_v11, %v14531_v23 }
 0x790   : > { %v7984_v6 = vpop.f32.mrf.mxu0  ;;  %v7934_v2 = vadd.f32 %v7933_v22, %v7884_v12  ;;  %v8127_v19 = vmax.f32 %v8095_v16, 0.0  ;;  %v8121_v44 = vmax.f32 %v8089_v49, 0.0  ;;  %v8079_v9 = vadd.f32 %v14578_v11, %v14944_v1  ;;  %v8201_v49 = vld [vmem:[%s14760_s6 + $0xb0] sm:$0xff] }
 0x791   : > { %v8033_v41 = vpop.f32.mrf.mxu1  ;;  %v8113_v29 = vmax.f32 %v8081_v53, 0.0 }
 0x792   : > { %v8034_v37 = vadd.f32 %v8033_v41, %v7984_v6  ;;  %v8064_v46 = vadd.f32 %v7934_v2, %v14504_v18  ;;  %v8135_v18 = vmax.f32 %v8103_v30, 0.0  ;;  %v8099_v2 = vadd.f32 %v14578_v11, %v8061_v13 }
 0x793   : > { %v8119_v30 = vmax.f32 %v8087_v63, 0.0  ;;  %v8111_v0 = vmax.f32 %v8079_v9, 0.0  ;;  %v8199_v63 = vld [vmem:[%s14760_s6 + $0xa0] sm:$0xff] }
 0x794   : > { %v8067_v20 = vadd.f32 %v8034_v37, %v14507_v42  ;;  %v8101_v37 = vadd.f32 %v14578_v11, %v8063_v35 }
 0x796   : > { %v8105_v38 = vadd.f32 %v14578_v11, %v8067_v20  ;;  %v7886_v48 = vpop.f32.mrf.mxu2  ;;  %v14588_v20 = vperm.slane %v8068_v61, 0  ;;  %v8123_v61 = vmax.f32 %v8091_v58, 0.0  ;;  %v8203_v58 = vld [vmem:[%s14760_s6 + $0xc0] sm:$0xff] }
 0x797   : > { %v7935_v21 = vpop.f32.mrf.mxu3 }
 0x798   : > { %v7936_v15 = vadd.f32 %v7935_v21, %v7886_v48  ;;  %v8137_v42 = vmax.f32 %v8105_v38, 0.0  ;;  %v8060_v38 = vadd.f32 %v7929_v60, %v14490_v40  ;;  %v8102_v24 = vadd.f32 %v14588_v20, %v8064_v46 }
 0x799   : > { %v8133_v21 = vmax.f32 %v8101_v37, 0.0  ;;  %v8100_v48 = vadd.f32 %v14588_v20, %v8062_v7  ;;  %v8131_v40 = vmax.f32 %v8099_v2, 0.0  ;;  %v8096_v34 = vadd.f32 %v14588_v20, %v8058_v54  ;;  %v14945_v37 = vld [vmem:[#allocation20_spill] sm:$0xff]  ;;  %v14946_v7 = vld [vmem:[#allocation15_spill] sm:$0xff]  ;;  %v8138_v54 = vld [vmem:[%s14759_s5] sm:$0xff] }
 0x79a   : > { %v8066_v45 = vadd.f32 %v7936_v15, %v14510_v56  ;;  %8159 = vmatpush.msra.mxu3 %v8137_v42  ;;  %v8055_v56 = vadd.f32 %v8019_v4, %v14450_v43  ;;  %v8056_v43 = vadd.f32 %v7924_v5, %v14466_v10  ;;  %v8134_v17 = vmax.f32 %v8102_v24, 0.0 }
 0x79b   : > { %v8098_v47 = vadd.f32 %v14588_v20, %v8060_v38  ;;  %v8132_v28 = vmax.f32 %v8100_v48, 0.0  ;;  %v8128_v6 = vmax.f32 %v8096_v34, 0.0  ;;  %v8092_v41 = vadd.f32 %v14588_v20, %v8054_v33  ;;  %v14949_v38 = vld [vmem:[#allocation18_spill] sm:$0xff]  ;;  %v8205_v33 = vld [vmem:[%s14760_s6 + $0xd0] sm:$0xff] }
 0x79c   : > { %v8104_v35 = vadd.f32 %v14588_v20, %v8066_v45  ;;  %8160 = vmatpush.msra.mxu3 %v8135_v18  ;;  %v8093_v26 = vadd.f32 %v14578_v11, %v8055_v56  ;;  %v8094_v12 = vadd.f32 %v14588_v20, %v8056_v43  ;;  %v8090_v52 = vadd.f32 %v14588_v20, %v14566_v51  ;;  %v14948_v18 = vld [vmem:[#allocation11_spill] sm:$0xff]  ;;  %v8208_v43 = vld [vmem:[%s14760_s6 + $0xe8] sm:$0xff] }
 0x79d   : > { %v8130_v10 = vmax.f32 %v8098_v47, 0.0  ;;  %v8124_v55 = vmax.f32 %v8092_v41, 0.0  ;;  %v8088_v13 = vadd.f32 %v14588_v20, %v14558_v14  ;;  %v8086_v51 = vadd.f32 %v14588_v20, %v14552_v8  ;;  %v8193_v47 = vld [vmem:[%s14760_s6 + $0x70] sm:$0xff]  ;;  %v8204_v34 = vld [vmem:[%s14760_s6 + $0xc8] sm:$0xff] }
 0x79e   : > { %v8136_v27 = vmax.f32 %v8104_v35, 0.0  ;;  %8161 = vmatpush.msra.mxu3 %v8133_v21  ;;  %v8125_v22 = vmax.f32 %v8093_v26, 0.0  ;;  %v8126_v57 = vmax.f32 %v8094_v12, 0.0  ;;  %v8122_v60 = vmax.f32 %v8090_v52, 0.0  ;;  %v14950_v21 = vld [vmem:[#allocation16_spill] sm:$0xff]  ;;  %v8192_v26 = vld [vmem:[%s14760_s6 + $0x68] sm:$0xff] }
 0x79f   : > { %v8117_v46 = vmax.f32 %v8085_v31, 0.0  ;;  %v8120_v15 = vmax.f32 %v8088_v13, 0.0  ;;  %v8084_v14 = vadd.f32 %v14588_v20, %v14546_v59  ;;  %v8115_v4 = vmax.f32 %v8083_v32, 0.0  ;;  %v8202_v12 = vld [vmem:[%s14760_s6 + $0xb8] sm:$0xff]  ;;  %v8200_v41 = vld [vmem:[%s14760_s6 + $0xa8] sm:$0xff]  ;;  %v8197_v31 = vld [vmem:[%s14760_s6 + $0x90] sm:$0xff] }
 0x7a0   : > { %8139 = vmatpush.msra.mxu2 %v8136_v27  ;;  %8162 = vmatpush.msra.mxu3 %v8131_v40  ;;  %v8118_v42 = vmax.f32 %v8086_v51, 0.0  ;;  %v8082_v8 = vadd.f32 %v14588_v20, %v14945_v37  ;;  %v8077_v23 = vadd.f32 %v14578_v11, %v14946_v7  ;;  %v8080_v59 = vadd.f32 %v14588_v20, %v14947_v3  ;;  %v14951_v27 = vld [vmem:[#allocation14_spill] sm:$0xff]  ;;  %v8210_v40 = vld [vmem:[%s14760_s6 + $0xf8] sm:$0xff]  ;;  %v8181_v32 = vld [vmem:[%s14760_s6 + $0x10] sm:$0xff] }
 0x7a1   : > { %v8116_v45 = vmax.f32 %v8084_v14, 0.0  ;;  %v8075_v2 = vadd.f32 %v14578_v11, %v14948_v18  ;;  %v8078_v35 = vadd.f32 %v14588_v20, %v14949_v38  ;;  %v8076_v50 = vadd.f32 %v14588_v20, %v14950_v21  ;;  %v8198_v52 = vld [vmem:[%s14760_s6 + $0x98] sm:$0xff]  ;;  %v8196_v13 = vld [vmem:[%s14760_s6 + $0x88] sm:$0xff]  ;;  %v8179_v51 = vld [vmem:[%s14760_s6] sm:$0xff] }
 0x7a2   : > { %8140 = vmatpush.msra.mxu2 %v8134_v17  ;;  %8163 = vmatpush.msra.mxu3 %v8129_v62  ;;  %v8114_v5 = vmax.f32 %v8082_v8, 0.0  ;;  %v8109_v24 = vmax.f32 %v8077_v23, 0.0  ;;  %v8112_v56 = vmax.f32 %v8080_v59, 0.0  ;;  %v8074_v48 = vadd.f32 %v14588_v20, %v14951_v27  ;;  %v8194_v20 = vld [vmem:[%s14760_s6 + $0x78] sm:$0xff]  ;;  %v8207_v17 = vld [vmem:[%s14760_s6 + $0xe0] sm:$0xff] }
 0x7a3   : > { %v8107_v36 = vmax.f32 %v8075_v2, 0.0  ;;  %v8110_v11 = vmax.f32 %v8078_v35, 0.0  ;;  %v8108_v16 = vmax.f32 %v8076_v50, 0.0  ;;  %v8206_v62 = vld [vmem:[%s14760_s6 + $0xd8] sm:$0xff] }
 0x7a4   : > { %8141 = vmatpush.msra.mxu2 %v8132_v28  ;;  %8164 = vmatpush.msra.mxu3 %v8127_v19  ;;  %v8106_v39 = vmax.f32 %v8074_v48, 0.0  ;;  %v8191_v28 = vld [vmem:[%s14760_s6 + $0x60] sm:$0xff]  ;;  %v8190_v19 = vld [vmem:[%s14760_s6 + $0x58] sm:$0xff] }
 0x7a6   : > { %8142 = vmatpush.msra.mxu2 %v8130_v10  ;;  %8165 = vmatpush.msra.mxu3 %v8125_v22  ;;  %v8189_v10 = vld [vmem:[%s14760_s6 + $0x50] sm:$0xff]  ;;  %v8188_v22 = vld [vmem:[%s14760_s6 + $0x48] sm:$0xff] }
 0x7a8   : > { %8143 = vmatpush.msra.mxu2 %v8128_v6  ;;  %8166 = vmatpush.msra.mxu3 %v8123_v61  ;;  %v8187_v6 = vld [vmem:[%s14760_s6 + $0x40] sm:$0xff]  ;;  %v8186_v61 = vld [vmem:[%s14760_s6 + $0x38] sm:$0xff] }
 0x7aa   : > { %8144 = vmatpush.msra.mxu2 %v8126_v57  ;;  %8167 = vmatpush.msra.mxu3 %v8121_v44  ;;  %v8185_v57 = vld [vmem:[%s14760_s6 + $0x30] sm:$0xff]  ;;  %v8184_v44 = vld [vmem:[%s14760_s6 + $0x28] sm:$0xff] }
 0x7ac   : > { %8145 = vmatpush.msra.mxu2 %v8124_v55  ;;  %8168 = vmatpush.msra.mxu3 %v8119_v30  ;;  %v8183_v55 = vld [vmem:[%s14760_s6 + $0x20] sm:$0xff]  ;;  %v8182_v30 = vld [vmem:[%s14760_s6 + $0x18] sm:$0xff] }
 0x7ae   : > { %8146 = vmatpush.msra.mxu2 %v8122_v60  ;;  %8169 = vmatpush.msra.mxu3 %v8117_v46  ;;  %v8180_v60 = vld [vmem:[%s14760_s6 + $0x8] sm:$0xff]  ;;  %v8195_v46 = vld [vmem:[%s14760_s6 + $0x80] sm:$0xff] }
 0x7b0   : > { %8147 = vmatpush.msra.mxu2 %v8120_v15  ;;  %8170 = vmatpush.msra.mxu3 %v8115_v4 }
 0x7b2   : > { %8148 = vmatpush.msra.mxu2 %v8118_v42  ;;  %8171 = vmatpush.msra.mxu3 %v8113_v29 }
 0x7b4   : > { %8149 = vmatpush.msra.mxu2 %v8116_v45  ;;  %8172 = vmatpush.msra.mxu3 %v8111_v0 }
 0x7b6   : > { %8150 = vmatpush.msra.mxu2 %v8114_v5  ;;  %8173 = vmatpush.msra.mxu3 %v8109_v24 }
 0x7b8   : > { %8151 = vmatpush.msra.mxu2 %v8112_v56  ;;  %8174 = vmatpush.msra.mxu3 %v8107_v36 }
 0x7b9   : > { %8175 = vmatmul.f32.vlgmr.msra.gmra.mxu3 %v8138_v54 }
 0x7ba   : > { %8152 = vmatpush.msra.mxu2 %v8110_v11  ;;  %8231 = vmatpush.msrb.mxu3 %v8210_v40 }
 0x7bc   : > { %8153 = vmatpush.msra.mxu2 %v8108_v16  ;;  %8232 = vmatpush.msrb.mxu3 %v8209_v25 }
 0x7be   : > { %8154 = vmatpush.msra.mxu2 %v8106_v39  ;;  %8233 = vmatpush.msrb.mxu3 %v8208_v43 }
 0x7bf   : > { %8155 = vmatmul.f32.vlgmr.msra.gmra.mxu2 %v8138_v54 }
 0x7c0   : > { %8211 = vmatpush.msrb.mxu2 %v8194_v20  ;;  %8234 = vmatpush.msrb.mxu3 %v8207_v17 }
 0x7c2   : > { %8212 = vmatpush.msrb.mxu2 %v8193_v47  ;;  %8235 = vmatpush.msrb.mxu3 %v8206_v62 }
 0x7c4   : > { %8213 = vmatpush.msrb.mxu2 %v8192_v26  ;;  %8236 = vmatpush.msrb.mxu3 %v8205_v33 }
 0x7c6   : > { %8214 = vmatpush.msrb.mxu2 %v8191_v28  ;;  %8237 = vmatpush.msrb.mxu3 %v8204_v34 }
 0x7c8   : > { %8215 = vmatpush.msrb.mxu2 %v8190_v19  ;;  %8238 = vmatpush.msrb.mxu3 %v8203_v58 }
 0x7ca   : > { %8216 = vmatpush.msrb.mxu2 %v8189_v10  ;;  %8239 = vmatpush.msrb.mxu3 %v8202_v12 }
 0x7cc   : > { %8217 = vmatpush.msrb.mxu2 %v8188_v22  ;;  %8240 = vmatpush.msrb.mxu3 %v8201_v49 }
 0x7ce   : > { %8218 = vmatpush.msrb.mxu2 %v8187_v6  ;;  %8241 = vmatpush.msrb.mxu3 %v8200_v41 }
 0x7d0   : > { %8219 = vmatpush.msrb.mxu2 %v8186_v61  ;;  %8242 = vmatpush.msrb.mxu3 %v8199_v63 }
 0x7d2   : > { %8220 = vmatpush.msrb.mxu2 %v8185_v57  ;;  %8243 = vmatpush.msrb.mxu3 %v8198_v52 }
 0x7d4   : > { %8221 = vmatpush.msrb.mxu2 %v8184_v44  ;;  %8244 = vmatpush.msrb.mxu3 %v8197_v31 }
 0x7d6   : > { %8222 = vmatpush.msrb.mxu2 %v8183_v55  ;;  %8245 = vmatpush.msrb.mxu3 %v8196_v13 }
 0x7d8   : > { %8223 = vmatpush.msrb.mxu2 %v8182_v30  ;;  %8246 = vmatpush.msrb.mxu3 %v8195_v46 }
 0x7da   : > { %8224 = vmatpush.msrb.mxu2 %v8181_v32 }
 0x7dc   : > { %8225 = vmatpush.msrb.mxu2 %v8180_v60 }
 0x7de   : > { %8226 = vmatpush.msrb.mxu2 %v8179_v51 }
 0x83c   : > { %v8176_v53 = vpop.f32.mrf.mxu3 }
 0x83d   : > { %8247 = vmatmul.f32.vlgmr.msrb.gmra.mxu3 %v8176_v53 }
 0x842   : > { %v8156_v15 = vpop.f32.mrf.mxu2 }
 0x843   : > { %8227 = vmatmul.f32.vlgmr.msrb.gmra.mxu2 %v8156_v15 }
 0x8c0   : > { %v8248_v14 = vpop.f32.mrf.mxu3 }
 0x8c6   : > { %v8228_v4 = vpop.f32.mrf.mxu2 }
 0x8c7   : > { %v8249_v1 = vadd.f32 %v8248_v14, %v8228_v4 }
 0x8c9   : > { %8251 = vst.msk [vmem:[%s276_s26] sm:$0xff] %vm3794_vm2, %v8249_v1 }
 0x8ca PF: > { %s17_s24 = sadd.s32 1, %s10214_s24  }
 0x8cb   : > { %p14_p4 = scmp.ge.s32.totalorder %s17_s24, 4  }
 0x8cd   :  { %16 = sbr.rel (!%p14_p4) target bundleno = 1 (0x1), region = 104 }

</bundles_post_ra>
